<compile_context>
chip_gen: v7x
topology: tpu7x:2x2x1
jax: 0.10.0
libtpu: 0.0.40
codegen_flags: <defaults>
</compile_context>

<pallas_src>
import functools

import jax
import jax.numpy as jnp
from jax.experimental import pallas as pl
from jax.experimental.pallas import tpu as pltpu

LN_EPS = 1e-5                    # PyTorch nn.LayerNorm default
COMPUTE_DTYPE = jnp.bfloat16     # MXU operand dtype (accumulation stays f32)


# ----------------------------- in-kernel helpers -----------------------------

def _ln_f32(x, w, b):
    mean = jnp.mean(x, axis=-1, keepdims=True)
    xc = x - mean
    var = jnp.mean(xc * xc, axis=-1, keepdims=True)
    return xc * jax.lax.rsqrt(var + LN_EPS) * w + b


def _gelu_tanh(x):
    # TODO(synk): nn.GELU default is erf-exact; tanh approx used for robust Mosaic lowering.
    return 0.5 * x * (1.0 + jnp.tanh(0.7978845608028654 * (x + 0.044715 * x * x * x)))


# ----------------------------- fused per-level kernel -----------------------------

def _level_kernel(v_ref, a_ref, pv_ref, pa_ref,
                  lvw_ref, lvb_ref, law_ref, lab_ref,
                  n1w_ref, n1b_ref, wqkv_ref, bqkv_ref,
                  wo_ref, bo_ref, n2w_ref, n2b_ref,
                  w1_ref, b1_ref, w2_ref, b2_ref,
                  nw_ref, nb_ref, gv_ref, ga_ref,
                  vout_ref, aout_ref,
                  x_scr,
                  *, num_heads, n_layers, sv):
    """Whole OneStreamAttention level for one batch row, fully resident in VMEM."""
    f32 = jnp.float32
    D = vout_ref.shape[-1]
    dh = D // num_heads

    # ---- prelude: per-stream LayerNorm, +pos, concat (via direct slice stores) ----
    v_ln = _ln_f32(v_ref[0].astype(f32), lvw_ref[...].astype(f32), lvb_ref[...].astype(f32))
    a_ln = _ln_f32(a_ref[0].astype(f32), law_ref[...].astype(f32), lab_ref[...].astype(f32))
    x_scr[:sv, :] = v_ln + pv_ref[0].astype(f32)
    x_scr[sv:, :] = a_ln + pa_ref[0].astype(f32)
    x = x_scr[...]                                                        # [S, D] f32

    # ---- n_layers pre-norm ViT blocks (static unroll; weights indexed on layer axis) ----
    for l in range(n_layers):
        # attention sub-block
        h1 = _ln_f32(x, n1w_ref[l].astype(f32), n1b_ref[l].astype(f32)).astype(COMPUTE_DTYPE)
        # one lane-dense QKV matmul; attention scale is pre-folded into the Q columns
        qkv = (jnp.dot(h1, wqkv_ref[l], preferred_element_type=f32)
               + bqkv_ref[l].astype(f32))                                 # [S, 3D]
        o_heads = []
        for h in range(num_heads):        # static head loop, static lane slices of qkv
            q = qkv[:, h * dh:(h + 1) * dh].astype(COMPUTE_DTYPE)
            k = qkv[:, D + h * dh:D + (h + 1) * dh].astype(COMPUTE_DTYPE)
            vv = qkv[:, 2 * D + h * dh:2 * D + (h + 1) * dh].astype(COMPUTE_DTYPE)
            s = jax.lax.dot_general(q, k, (((1,), (1,)), ((), ())),
                                    preferred_element_type=f32)           # [S, S]
            m = jnp.max(s, axis=-1, keepdims=True)
            p = jnp.exp(s - m)
            p = p * pl.reciprocal(jnp.sum(p, axis=-1, keepdims=True), approx=True)
            o_heads.append(jnp.dot(p.astype(COMPUTE_DTYPE), vv,
                                   preferred_element_type=f32))           # [S, dh]
        # lane-concat all heads -> ONE full-depth output projection matmul
        o_cat = jnp.concatenate(o_heads, axis=-1).astype(COMPUTE_DTYPE)   # [S, D]
        attn = (jnp.dot(o_cat, wo_ref[l], preferred_element_type=f32)
                + bo_ref[l].astype(f32))
        x = x + attn

        # MLP sub-block (fc1 activation never leaves VMEM)
        h2 = _ln_f32(x, n2w_ref[l].astype(f32), n2b_ref[l].astype(f32)).astype(COMPUTE_DTYPE)
        f1 = jnp.dot(h2, w1_ref[l], preferred_element_type=f32) + b1_ref[l].astype(f32)
        g = _gelu_tanh(f1).astype(COMPUTE_DTYPE)
        f2 = jnp.dot(g, w2_ref[l], preferred_element_type=f32) + b2_ref[l].astype(f32)
        x = x + f2

    # ---- epilogue: final LN, split, gamma-scaled residual onto the LN'd inputs ----
    xf = _ln_f32(x, nw_ref[...].astype(f32), nb_ref[...].astype(f32))
    vout_ref[0] = (v_ln + gv_ref[...].astype(f32) * xf[:sv, :]).astype(vout_ref.dtype)
    aout_ref[0] = (a_ln + ga_ref[...].astype(f32) * xf[sv:, :]).astype(aout_ref.dtype)


# ----------------------------- pallas_call wrapper -----------------------------

def _row_spec(s, d):
    return pl.BlockSpec((1, s, d), lambda b: (b, 0, 0))


def _full_spec(arr):
    nd = arr.ndim
    return pl.BlockSpec(arr.shape, lambda b, _nd=nd: (0,) * _nd)


def fused_level(v, a, pos_v, pos_a, lp, gamma_a, num_heads):
    """One launch for a whole level: prelude + n_layers blocks + epilogue."""
    B, Sv, D = v.shape
    Sa = a.shape[1]
    S = Sv + Sa
    L = lp["wqkv"].shape[0]

    weights = [lp["ln_v_w"], lp["ln_v_b"], lp["ln_a_w"], lp["ln_a_b"],
               lp["n1w"], lp["n1b"], lp["wqkv"], lp["bqkv"],
               lp["wo"], lp["bo"], lp["n2w"], lp["n2b"],
               lp["w1"], lp["b1"], lp["w2"], lp["b2"],
               lp["norm_w"], lp["norm_b"], lp["gamma_v"], gamma_a]

    kernel = functools.partial(_level_kernel, num_heads=num_heads, n_layers=L, sv=Sv)
    return pl.pallas_call(
        kernel,
        out_shape=(jax.ShapeDtypeStruct((B, Sv, D), v.dtype),
                   jax.ShapeDtypeStruct((B, Sa, D), a.dtype)),
        grid=(B,),
        in_specs=[_row_spec(Sv, D), _row_spec(Sa, D),
                  _row_spec(Sv, D), _row_spec(Sa, D)]
                 + [_full_spec(w) for w in weights],
        out_specs=(_row_spec(Sv, D), _row_spec(Sa, D)),
        scratch_shapes=[pltpu.VMEM((S, D), jnp.float32)],
        compiler_params=pltpu.CompilerParams(dimension_semantics=("parallel",)),
    )(v, a, pos_v, pos_a, *weights)


# ----------------------------- host-side weight prep (outside jit) -----------------------------

def prepare_params(params, num_heads, compute_dtype=COMPUTE_DTYPE):
    """Re-layout PyTorch-style parameters into the kernel layout. Called ONCE, outside jit."""
    f32 = jnp.float32
    D = params["levels"][0]["attn"]["blocks"][0]["n1w"].shape[0]
    dh = D // num_heads
    scale = dh ** (-0.5)

    def stack(blocks, fn):
        return jnp.stack([fn(b) for b in blocks], axis=0)

    prepped_levels = []
    for lvl in params["levels"]:
        blocks = lvl["attn"]["blocks"]
        hidden = blocks[0]["wfc1"].shape[1]
        prepped_levels.append(dict(
            ln_v_w=lvl["ln_v_w"].reshape(1, -1).astype(f32),
            ln_v_b=lvl["ln_v_b"].reshape(1, -1).astype(f32),
            ln_a_w=lvl["ln_a_w"].reshape(1, -1).astype(f32),
            ln_a_b=lvl["ln_a_b"].reshape(1, -1).astype(f32),
            gamma_v=lvl["gamma_v"].reshape(1, -1).astype(f32),
            n1w=stack(blocks, lambda b: b["n1w"].reshape(1, D).astype(f32)),
            n1b=stack(blocks, lambda b: b["n1b"].reshape(1, D).astype(f32)),
            # fold the attention scale into the Q columns of the fused QKV weight / bias
            wqkv=stack(blocks, lambda b: jnp.concatenate(
                [b["wqkv"][:, :D] * scale, b["wqkv"][:, D:]], axis=1).astype(compute_dtype)),
            bqkv=stack(blocks, lambda b: jnp.concatenate(
                [b["bqkv"][:D] * scale, b["bqkv"][D:]]).reshape(1, 3 * D).astype(f32)),
            wo=stack(blocks, lambda b: b["wproj"].astype(compute_dtype)),
            bo=stack(blocks, lambda b: b["bproj"].reshape(1, D).astype(f32)),
            n2w=stack(blocks, lambda b: b["n2w"].reshape(1, D).astype(f32)),
            n2b=stack(blocks, lambda b: b["n2b"].reshape(1, D).astype(f32)),
            w1=stack(blocks, lambda b: b["wfc1"].astype(compute_dtype)),
            b1=stack(blocks, lambda b: b["bfc1"].reshape(1, hidden).astype(f32)),
            w2=stack(blocks, lambda b: b["wfc2"].astype(compute_dtype)),
            b2=stack(blocks, lambda b: b["bfc2"].reshape(1, D).astype(f32)),
            norm_w=lvl["attn"]["norm_w"].reshape(1, D).astype(f32),
            norm_b=lvl["attn"]["norm_b"].reshape(1, D).astype(f32),
        ))
    return {"levels": prepped_levels,
            "gamma_a": params["gamma_a"].reshape(1, -1).astype(f32)}


# ----------------------------- model (glue) -----------------------------

def one_stream_attention_block_forward(visual_features, audio_feature, prepped,
                                       visual_features_names, num_heads,
                                       pos_a=None, pos_v=None):
    size_per_level = []
    new_v_list, new_a_list = [], []
    bs = None
    if pos_a is None:
        pos_a = jnp.zeros_like(audio_feature)
    for num_level, feature_name in enumerate(visual_features_names):
        feat = visual_features[feature_name]                       # NCHW
        bs, c, h, w = feat.shape
        size_per_level.append((h, w))
        # permute_and_flatten: NCHW -> [N, H*W, C]
        v_flat = jnp.transpose(feat, (0, 2, 3, 1)).reshape(bs, h * w, c)
        pv = pos_v if pos_v is not None else jnp.zeros_like(v_flat)
        new_v, new_a = fused_level(v_flat, audio_feature, pv, pos_a,
                                   prepped["levels"][num_level], prepped["gamma_a"],
                                   num_heads)
        new_v_list.append(jnp.transpose(new_v, (0, 2, 1)))          # [N, C, H*W]
        new_a_list.append(new_a)
    audio_out = jnp.mean(jnp.stack(new_a_list, axis=1), axis=1)
    out_features = dict(visual_features)
    for num_level, (h, w) in enumerate(size_per_level):
        out_features[visual_features_names[num_level]] = \
            new_v_list[num_level].reshape(bs, -1, h, w)
    return out_features, audio_out


# ----------------------------- parameter init -----------------------------

def init_params(key, vision_dim_list, audio_dim, embed_dim,
                init_values=1e-4, n_layers=3, mlp_ratio=4):
    keys = iter(jax.random.split(key, 256))

    def lin(din, dout):
        w = 0.02 * jax.random.normal(next(keys), (din, dout), jnp.float32)
        return w, jnp.zeros((dout,), jnp.float32)

    params = {"levels": [],
              "gamma_a": init_values * jnp.ones((audio_dim,), jnp.float32)}
    for vdim in vision_dim_list:
        blocks = []
        for _ in range(n_layers):
            wqkv, bqkv = lin(embed_dim, 3 * embed_dim)
            wproj, bproj = lin(embed_dim, embed_dim)
            wfc1, bfc1 = lin(embed_dim, mlp_ratio * embed_dim)
            wfc2, bfc2 = lin(mlp_ratio * embed_dim, embed_dim)
            blocks.append(dict(
                n1w=jnp.ones((embed_dim,), jnp.float32), n1b=jnp.zeros((embed_dim,), jnp.float32),
                wqkv=wqkv, bqkv=bqkv, wproj=wproj, bproj=bproj,
                n2w=jnp.ones((embed_dim,), jnp.float32), n2b=jnp.zeros((embed_dim,), jnp.float32),
                wfc1=wfc1, bfc1=bfc1, wfc2=wfc2, bfc2=bfc2))
        params["levels"].append(dict(
            ln_v_w=jnp.ones((vdim,), jnp.float32), ln_v_b=jnp.zeros((vdim,), jnp.float32),
            ln_a_w=jnp.ones((audio_dim,), jnp.float32), ln_a_b=jnp.zeros((audio_dim,), jnp.float32),
            gamma_v=init_values * jnp.ones((vdim,), jnp.float32),
            attn=dict(blocks=blocks,
                      norm_w=jnp.ones((embed_dim,), jnp.float32),
                      norm_b=jnp.zeros((embed_dim,), jnp.float32))))
    return params


# ----------------------------- main -----------------------------

if __name__ == "__main__":
    visual_features_names = ["p3", "p4"]
    embed_dim = 32
    num_heads = 4
    vision_dim_list = [embed_dim, embed_dim]   # must equal embed_dim for the concat
    audio_dim = embed_dim
    bs, h, w = 2, 4, 4                         # vis_len = 16 per level
    aud_len = 8

    key = jax.random.PRNGKey(0)
    k_p3, k_p4, k_aud, k_pv, k_pa, k_params = jax.random.split(key, 6)

    visual_features = {
        "p3": jax.random.normal(k_p3, (bs, embed_dim, h, w), jnp.float32),
        "p4": jax.random.normal(k_p4, (bs, embed_dim, h, w), jnp.float32),
    }
    audio_feature = jax.random.normal(k_aud, (bs, aud_len, audio_dim), jnp.float32)
    pos_v = jax.random.normal(k_pv, (bs, h * w, embed_dim), jnp.float32)
    pos_a = jax.random.normal(k_pa, (bs, aud_len, audio_dim), jnp.float32)

    params = init_params(k_params, vision_dim_list, audio_dim, embed_dim)
    prepped = prepare_params(params, num_heads)   # host-side re-layout, ONCE, outside jit

    fwd = jax.jit(functools.partial(one_stream_attention_block_forward,
                                    visual_features_names=visual_features_names,
                                    num_heads=num_heads))
    out_visual, out_audio = fwd(visual_features, audio_feature, prepped,
                                pos_a=pos_a, pos_v=pos_v)

    jax.block_until_ready((out_visual, out_audio))
    assert out_visual["p3"].shape == (bs, embed_dim, h, w)
    assert out_visual["p4"].shape == (bs, embed_dim, h, w)
    assert out_audio.shape == (bs, aud_len, audio_dim)
    print("KERNEL_OK")
</pallas_src>

<mosaic_0001>
module attributes {stable_mosaic.version = 11 : i64} {
  func.func @_level_kernel(%arg0: i32, %arg1: memref<1x16x32xf32, #tpu.memory_space<vmem>>, %arg2: memref<1x8x32xf32, #tpu.memory_space<vmem>>, %arg3: memref<1x16x32xf32, #tpu.memory_space<vmem>>, %arg4: memref<1x8x32xf32, #tpu.memory_space<vmem>>, %arg5: memref<1x32xf32, #tpu.memory_space<vmem>>, %arg6: memref<1x32xf32, #tpu.memory_space<vmem>>, %arg7: memref<1x32xf32, #tpu.memory_space<vmem>>, %arg8: memref<1x32xf32, #tpu.memory_space<vmem>>, %arg9: memref<3x1x32xf32, #tpu.memory_space<vmem>>, %arg10: memref<3x1x32xf32, #tpu.memory_space<vmem>>, %arg11: memref<3x32x96xbf16, #tpu.memory_space<vmem>>, %arg12: memref<3x1x96xf32, #tpu.memory_space<vmem>>, %arg13: memref<3x32x32xbf16, #tpu.memory_space<vmem>>, %arg14: memref<3x1x32xf32, #tpu.memory_space<vmem>>, %arg15: memref<3x1x32xf32, #tpu.memory_space<vmem>>, %arg16: memref<3x1x32xf32, #tpu.memory_space<vmem>>, %arg17: memref<3x32x128xbf16, #tpu.memory_space<vmem>>, %arg18: memref<3x1x128xf32, #tpu.memory_space<vmem>>, %arg19: memref<3x128x32xbf16, #tpu.memory_space<vmem>>, %arg20: memref<3x1x32xf32, #tpu.memory_space<vmem>>, %arg21: memref<1x32xf32, #tpu.memory_space<vmem>>, %arg22: memref<1x32xf32, #tpu.memory_space<vmem>>, %arg23: memref<1x32xf32, #tpu.memory_space<vmem>>, %arg24: memref<1x32xf32, #tpu.memory_space<vmem>>, %arg25: memref<1x16x32xf32, #tpu.memory_space<vmem>>, %arg26: memref<1x8x32xf32, #tpu.memory_space<vmem>>, %arg27: memref<24x32xf32, #tpu.memory_space<vmem>>) attributes {dimension_semantics = [#tpu.dimension_semantics<parallel>], iteration_bounds = array<i64: 2>, scalar_prefetch = 0 : i64, scratch_operands = 1 : i64, tpu.core_type = #tpu.core_type<tc>, window_params = [{transform_indices = @transform_0, window_bounds = array<i64: 1, 16, 32>}, {transform_indices = @transform_1, window_bounds = array<i64: 1, 8, 32>}, {transform_indices = @transform_2, window_bounds = array<i64: 1, 16, 32>}, {transform_indices = @transform_3, window_bounds = array<i64: 1, 8, 32>}, {pipeline_mode = #tpu.pipeline_mode<synchronous>, transform_indices = @transform_4, window_bounds = array<i64: 1, 32>}, {pipeline_mode = #tpu.pipeline_mode<synchronous>, transform_indices = @transform_5, window_bounds = array<i64: 1, 32>}, {pipeline_mode = #tpu.pipeline_mode<synchronous>, transform_indices = @transform_6, window_bounds = array<i64: 1, 32>}, {pipeline_mode = #tpu.pipeline_mode<synchronous>, transform_indices = @transform_7, window_bounds = array<i64: 1, 32>}, {pipeline_mode = #tpu.pipeline_mode<synchronous>, transform_indices = @transform_8, window_bounds = array<i64: 3, 1, 32>}, {pipeline_mode = #tpu.pipeline_mode<synchronous>, transform_indices = @transform_9, window_bounds = array<i64: 3, 1, 32>}, {pipeline_mode = #tpu.pipeline_mode<synchronous>, transform_indices = @transform_10, window_bounds = array<i64: 3, 32, 96>}, {pipeline_mode = #tpu.pipeline_mode<synchronous>, transform_indices = @transform_11, window_bounds = array<i64: 3, 1, 96>}, {pipeline_mode = #tpu.pipeline_mode<synchronous>, transform_indices = @transform_12, window_bounds = array<i64: 3, 32, 32>}, {pipeline_mode = #tpu.pipeline_mode<synchronous>, transform_indices = @transform_13, window_bounds = array<i64: 3, 1, 32>}, {pipeline_mode = #tpu.pipeline_mode<synchronous>, transform_indices = @transform_14, window_bounds = array<i64: 3, 1, 32>}, {pipeline_mode = #tpu.pipeline_mode<synchronous>, transform_indices = @transform_15, window_bounds = array<i64: 3, 1, 32>}, {pipeline_mode = #tpu.pipeline_mode<synchronous>, transform_indices = @transform_16, window_bounds = array<i64: 3, 32, 128>}, {pipeline_mode = #tpu.pipeline_mode<synchronous>, transform_indices = @transform_17, window_bounds = array<i64: 3, 1, 128>}, {pipeline_mode = #tpu.pipeline_mode<synchronous>, transform_indices = @transform_18, window_bounds = array<i64: 3, 128, 32>}, {pipeline_mode = #tpu.pipeline_mode<synchronous>, transform_indices = @transform_19, window_bounds = array<i64: 3, 1, 32>}, {pipeline_mode = #tpu.pipeline_mode<synchronous>, transform_indices = @transform_20, window_bounds = array<i64: 1, 32>}, {pipeline_mode = #tpu.pipeline_mode<synchronous>, transform_indices = @transform_21, window_bounds = array<i64: 1, 32>}, {pipeline_mode = #tpu.pipeline_mode<synchronous>, transform_indices = @transform_22, window_bounds = array<i64: 1, 32>}, {pipeline_mode = #tpu.pipeline_mode<synchronous>, transform_indices = @transform_23, window_bounds = array<i64: 1, 32>}, {transform_indices = @transform_24, window_bounds = array<i64: 1, 16, 32>}, {transform_indices = @transform_25, window_bounds = array<i64: 1, 8, 32>}]} {
    %c0 = arith.constant 0 : index
    %c0_0 = arith.constant 0 : index
    %c0_1 = arith.constant 0 : index
    %0 = vector.load %arg1[%c0, %c0_0, %c0_1] : memref<1x16x32xf32, #tpu.memory_space<vmem>>, vector<1x16x32xf32>
    %1 = vector.shape_cast %0 : vector<1x16x32xf32> to vector<16x32xf32>
    %c0_2 = arith.constant 0 : index
    %c0_3 = arith.constant 0 : index
    %2 = vector.load %arg5[%c0_2, %c0_3] : memref<1x32xf32, #tpu.memory_space<vmem>>, vector<1x32xf32>
    %c0_4 = arith.constant 0 : index
    %c0_5 = arith.constant 0 : index
    %3 = vector.load %arg6[%c0_4, %c0_5] : memref<1x32xf32, #tpu.memory_space<vmem>>, vector<1x32xf32>
    %cst = arith.constant dense<0.000000e+00> : vector<16xf32>
    %4 = vector.multi_reduction <add>, %1, %cst [1] : vector<16x32xf32> to vector<16xf32>
    %5 = vector.shape_cast %4 : vector<16xf32> to vector<16x1xf32>
    %cst_6 = arith.constant 3.200000e+01 : f32
    %6 = vector.broadcast %cst_6 : f32 to vector<16x1xf32>
    %7 = arith.divf %5, %6 : vector<16x1xf32>
    %8 = vector.broadcast %7 : vector<16x1xf32> to vector<16x32xf32>
    %9 = arith.subf %1, %8 : vector<16x32xf32>
    %10 = arith.mulf %9, %9 : vector<16x32xf32>
    %cst_7 = arith.constant dense<0.000000e+00> : vector<16xf32>
    %11 = vector.multi_reduction <add>, %10, %cst_7 [1] : vector<16x32xf32> to vector<16xf32>
    %12 = vector.shape_cast %11 : vector<16xf32> to vector<16x1xf32>
    %cst_8 = arith.constant 3.200000e+01 : f32
    %13 = vector.broadcast %cst_8 : f32 to vector<16x1xf32>
    %14 = arith.divf %12, %13 : vector<16x1xf32>
    %cst_9 = arith.constant 9.99999974E-6 : f32
    %15 = vector.broadcast %cst_9 : f32 to vector<16x1xf32>
    %16 = arith.addf %14, %15 : vector<16x1xf32>
    %17 = math.rsqrt %16 : vector<16x1xf32>
    %18 = vector.broadcast %17 : vector<16x1xf32> to vector<16x32xf32>
    %19 = arith.mulf %9, %18 : vector<16x32xf32>
    %20 = vector.broadcast %2 : vector<1x32xf32> to vector<16x32xf32>
    %21 = arith.mulf %19, %20 : vector<16x32xf32>
    %22 = vector.broadcast %3 : vector<1x32xf32> to vector<16x32xf32>
    %23 = arith.addf %21, %22 : vector<16x32xf32>
    %c0_10 = arith.constant 0 : index
    %c0_11 = arith.constant 0 : index
    %c0_12 = arith.constant 0 : index
    %24 = vector.load %arg2[%c0_10, %c0_11, %c0_12] : memref<1x8x32xf32, #tpu.memory_space<vmem>>, vector<1x8x32xf32>
    %25 = vector.shape_cast %24 : vector<1x8x32xf32> to vector<8x32xf32>
    %c0_13 = arith.constant 0 : index
    %c0_14 = arith.constant 0 : index
    %26 = vector.load %arg7[%c0_13, %c0_14] : memref<1x32xf32, #tpu.memory_space<vmem>>, vector<1x32xf32>
    %c0_15 = arith.constant 0 : index
    %c0_16 = arith.constant 0 : index
    %27 = vector.load %arg8[%c0_15, %c0_16] : memref<1x32xf32, #tpu.memory_space<vmem>>, vector<1x32xf32>
    %cst_17 = arith.constant dense<0.000000e+00> : vector<8xf32>
    %28 = vector.multi_reduction <add>, %25, %cst_17 [1] : vector<8x32xf32> to vector<8xf32>
    %29 = vector.shape_cast %28 : vector<8xf32> to vector<8x1xf32>
    %cst_18 = arith.constant 3.200000e+01 : f32
    %30 = vector.broadcast %cst_18 : f32 to vector<8x1xf32>
    %31 = arith.divf %29, %30 : vector<8x1xf32>
    %32 = vector.broadcast %31 : vector<8x1xf32> to vector<8x32xf32>
    %33 = arith.subf %25, %32 : vector<8x32xf32>
    %34 = arith.mulf %33, %33 : vector<8x32xf32>
    %cst_19 = arith.constant dense<0.000000e+00> : vector<8xf32>
    %35 = vector.multi_reduction <add>, %34, %cst_19 [1] : vector<8x32xf32> to vector<8xf32>
    %36 = vector.shape_cast %35 : vector<8xf32> to vector<8x1xf32>
    %cst_20 = arith.constant 3.200000e+01 : f32
    %37 = vector.broadcast %cst_20 : f32 to vector<8x1xf32>
    %38 = arith.divf %36, %37 : vector<8x1xf32>
    %cst_21 = arith.constant 9.99999974E-6 : f32
    %39 = vector.broadcast %cst_21 : f32 to vector<8x1xf32>
    %40 = arith.addf %38, %39 : vector<8x1xf32>
    %41 = math.rsqrt %40 : vector<8x1xf32>
    %42 = vector.broadcast %41 : vector<8x1xf32> to vector<8x32xf32>
    %43 = arith.mulf %33, %42 : vector<8x32xf32>
    %44 = vector.broadcast %26 : vector<1x32xf32> to vector<8x32xf32>
    %45 = arith.mulf %43, %44 : vector<8x32xf32>
    %46 = vector.broadcast %27 : vector<1x32xf32> to vector<8x32xf32>
    %47 = arith.addf %45, %46 : vector<8x32xf32>
    %c0_22 = arith.constant 0 : index
    %c0_23 = arith.constant 0 : index
    %c0_24 = arith.constant 0 : index
    %48 = vector.load %arg3[%c0_22, %c0_23, %c0_24] : memref<1x16x32xf32, #tpu.memory_space<vmem>>, vector<1x16x32xf32>
    %49 = vector.shape_cast %48 : vector<1x16x32xf32> to vector<16x32xf32>
    %50 = arith.addf %23, %49 : vector<16x32xf32>
    %c0_25 = arith.constant 0 : index
    %c0_26 = arith.constant 0 : index
    %51 = vector.load %arg27[%c0_25, %c0_26] : memref<24x32xf32, #tpu.memory_space<vmem>>, vector<16x32xf32>
    tpu.vector_store %arg27[%c0_25, %c0_26], %50 {strides = array<i32>} : memref<24x32xf32, #tpu.memory_space<vmem>>, vector<16x32xf32>,
    %c0_27 = arith.constant 0 : index
    %c0_28 = arith.constant 0 : index
    %c0_29 = arith.constant 0 : index
    %52 = vector.load %arg4[%c0_27, %c0_28, %c0_29] : memref<1x8x32xf32, #tpu.memory_space<vmem>>, vector<1x8x32xf32>
    %53 = vector.shape_cast %52 : vector<1x8x32xf32> to vector<8x32xf32>
    %54 = arith.addf %47, %53 : vector<8x32xf32>
    %c16 = arith.constant 16 : index
    %c0_30 = arith.constant 0 : index
    %55 = vector.load %arg27[%c16, %c0_30] : memref<24x32xf32, #tpu.memory_space<vmem>>, vector<8x32xf32>
    tpu.vector_store %arg27[%c16, %c0_30], %54 {strides = array<i32>} : memref<24x32xf32, #tpu.memory_space<vmem>>, vector<8x32xf32>,
    %c0_31 = arith.constant 0 : index
    %c0_32 = arith.constant 0 : index
    %56 = vector.load %arg27[%c0_31, %c0_32] : memref<24x32xf32, #tpu.memory_space<vmem>>, vector<24x32xf32>
    %c0_33 = arith.constant 0 : index
    %c0_34 = arith.constant 0 : index
    %c0_35 = arith.constant 0 : index
    %57 = vector.load %arg9[%c0_33, %c0_34, %c0_35] : memref<3x1x32xf32, #tpu.memory_space<vmem>>, vector<1x1x32xf32>
    %58 = vector.shape_cast %57 : vector<1x1x32xf32> to vector<1x32xf32>
    %c0_36 = arith.constant 0 : index
    %c0_37 = arith.constant 0 : index
    %c0_38 = arith.constant 0 : index
    %59 = vector.load %arg10[%c0_36, %c0_37, %c0_38] : memref<3x1x32xf32, #tpu.memory_space<vmem>>, vector<1x1x32xf32>
    %60 = vector.shape_cast %59 : vector<1x1x32xf32> to vector<1x32xf32>
    %cst_39 = arith.constant dense<0.000000e+00> : vector<24xf32>
    %61 = vector.multi_reduction <add>, %56, %cst_39 [1] : vector<24x32xf32> to vector<24xf32>
    %62 = vector.shape_cast %61 : vector<24xf32> to vector<24x1xf32>
    %cst_40 = arith.constant 3.200000e+01 : f32
    %63 = vector.broadcast %cst_40 : f32 to vector<24x1xf32>
    %64 = arith.divf %62, %63 : vector<24x1xf32>
    %65 = vector.broadcast %64 : vector<24x1xf32> to vector<24x32xf32>
    %66 = arith.subf %56, %65 : vector<24x32xf32>
    %67 = arith.mulf %66, %66 : vector<24x32xf32>
    %cst_41 = arith.constant dense<0.000000e+00> : vector<24xf32>
    %68 = vector.multi_reduction <add>, %67, %cst_41 [1] : vector<24x32xf32> to vector<24xf32>
    %69 = vector.shape_cast %68 : vector<24xf32> to vector<24x1xf32>
    %cst_42 = arith.constant 3.200000e+01 : f32
    %70 = vector.broadcast %cst_42 : f32 to vector<24x1xf32>
    %71 = arith.divf %69, %70 : vector<24x1xf32>
    %cst_43 = arith.constant 9.99999974E-6 : f32
    %72 = vector.broadcast %cst_43 : f32 to vector<24x1xf32>
    %73 = arith.addf %71, %72 : vector<24x1xf32>
    %74 = math.rsqrt %73 : vector<24x1xf32>
    %75 = vector.broadcast %74 : vector<24x1xf32> to vector<24x32xf32>
    %76 = arith.mulf %66, %75 : vector<24x32xf32>
    %77 = vector.broadcast %58 : vector<1x32xf32> to vector<24x32xf32>
    %78 = arith.mulf %76, %77 : vector<24x32xf32>
    %79 = vector.broadcast %60 : vector<1x32xf32> to vector<24x32xf32>
    %80 = arith.addf %78, %79 : vector<24x32xf32>
    %81 = arith.truncf %80 : vector<24x32xf32> to vector<24x32xbf16>
    %c0_44 = arith.constant 0 : index
    %c0_45 = arith.constant 0 : index
    %c0_46 = arith.constant 0 : index
    %82 = vector.load %arg11[%c0_44, %c0_45, %c0_46] : memref<3x32x96xbf16, #tpu.memory_space<vmem>>, vector<1x32x96xbf16>
    %83 = vector.shape_cast %82 : vector<1x32x96xbf16> to vector<32x96xbf16>
    %cst_47 = arith.constant dense<0.000000e+00> : vector<24x96xf32>
    %84 = tpu.matmul %81, %83, %cst_47 {dimension_numbers = #tpu.dot_dimension_numbers<[1], [0], [0], [1], [0, 0, 1, 1], [], []>} : vector<24x32xbf16>, vector<32x96xbf16>, vector<24x96xf32> -> vector<24x96xf32>
    %c0_48 = arith.constant 0 : index
    %c0_49 = arith.constant 0 : index
    %c0_50 = arith.constant 0 : index
    %85 = vector.load %arg12[%c0_48, %c0_49, %c0_50] : memref<3x1x96xf32, #tpu.memory_space<vmem>>, vector<1x1x96xf32>
    %86 = vector.shape_cast %85 : vector<1x1x96xf32> to vector<1x96xf32>
    %87 = vector.broadcast %86 : vector<1x96xf32> to vector<24x96xf32>
    %88 = arith.addf %84, %87 : vector<24x96xf32>
    %89 = vector.extract_strided_slice %88 {offsets = [0, 0], sizes = [24, 8], strides = [1, 1]} : vector<24x96xf32> to vector<24x8xf32>
    %90 = arith.truncf %89 : vector<24x8xf32> to vector<24x8xbf16>
    %91 = vector.extract_strided_slice %88 {offsets = [0, 32], sizes = [24, 8], strides = [1, 1]} : vector<24x96xf32> to vector<24x8xf32>
    %92 = arith.truncf %91 : vector<24x8xf32> to vector<24x8xbf16>
    %93 = vector.extract_strided_slice %88 {offsets = [0, 64], sizes = [24, 8], strides = [1, 1]} : vector<24x96xf32> to vector<24x8xf32>
    %94 = arith.truncf %93 : vector<24x8xf32> to vector<24x8xbf16>
    %cst_51 = arith.constant dense<0.000000e+00> : vector<24x24xf32>
    %95 = tpu.matmul %90, %92, %cst_51 {dimension_numbers = #tpu.dot_dimension_numbers<[1], [1], [0], [0], [0, 0, 1, 0], [], []>} : vector<24x8xbf16>, vector<24x8xbf16>, vector<24x24xf32> -> vector<24x24xf32>
    %cst_52 = arith.constant dense<0xFF800000> : vector<24xf32>
    %96 = vector.multi_reduction <maximumf>, %95, %cst_52 [1] : vector<24x24xf32> to vector<24xf32>
    %97 = vector.shape_cast %96 : vector<24xf32> to vector<24x1xf32>
    %98 = vector.broadcast %97 : vector<24x1xf32> to vector<24x24xf32>
    %99 = arith.subf %95, %98 : vector<24x24xf32>
    %100 = math.exp %99 : vector<24x24xf32>
    %cst_53 = arith.constant dense<0.000000e+00> : vector<24xf32>
    %101 = vector.multi_reduction <add>, %100, %cst_53 [1] : vector<24x24xf32> to vector<24xf32>
    %102 = vector.shape_cast %101 : vector<24xf32> to vector<24x1xf32>
    %103 = tpu.reciprocal %102 {approx = true} : vector<24x1xf32> -> vector<24x1xf32>
    %104 = vector.broadcast %103 : vector<24x1xf32> to vector<24x24xf32>
    %105 = arith.mulf %100, %104 : vector<24x24xf32>
    %106 = arith.truncf %105 : vector<24x24xf32> to vector<24x24xbf16>
    %cst_54 = arith.constant dense<0.000000e+00> : vector<24x8xf32>
    %107 = tpu.matmul %106, %94, %cst_54 {dimension_numbers = #tpu.dot_dimension_numbers<[1], [0], [0], [1], [0, 0, 1, 1], [], []>} : vector<24x24xbf16>, vector<24x8xbf16>, vector<24x8xf32> -> vector<24x8xf32>
    %108 = vector.extract_strided_slice %88 {offsets = [0, 8], sizes = [24, 8], strides = [1, 1]} : vector<24x96xf32> to vector<24x8xf32>
    %109 = arith.truncf %108 : vector<24x8xf32> to vector<24x8xbf16>
    %110 = vector.extract_strided_slice %88 {offsets = [0, 40], sizes = [24, 8], strides = [1, 1]} : vector<24x96xf32> to vector<24x8xf32>
    %111 = arith.truncf %110 : vector<24x8xf32> to vector<24x8xbf16>
    %112 = vector.extract_strided_slice %88 {offsets = [0, 72], sizes = [24, 8], strides = [1, 1]} : vector<24x96xf32> to vector<24x8xf32>
    %113 = arith.truncf %112 : vector<24x8xf32> to vector<24x8xbf16>
    %cst_55 = arith.constant dense<0.000000e+00> : vector<24x24xf32>
    %114 = tpu.matmul %109, %111, %cst_55 {dimension_numbers = #tpu.dot_dimension_numbers<[1], [1], [0], [0], [0, 0, 1, 0], [], []>} : vector<24x8xbf16>, vector<24x8xbf16>, vector<24x24xf32> -> vector<24x24xf32>
    %cst_56 = arith.constant dense<0xFF800000> : vector<24xf32>
    %115 = vector.multi_reduction <maximumf>, %114, %cst_56 [1] : vector<24x24xf32> to vector<24xf32>
    %116 = vector.shape_cast %115 : vector<24xf32> to vector<24x1xf32>
    %117 = vector.broadcast %116 : vector<24x1xf32> to vector<24x24xf32>
    %118 = arith.subf %114, %117 : vector<24x24xf32>
    %119 = math.exp %118 : vector<24x24xf32>
    %cst_57 = arith.constant dense<0.000000e+00> : vector<24xf32>
    %120 = vector.multi_reduction <add>, %119, %cst_57 [1] : vector<24x24xf32> to vector<24xf32>
    %121 = vector.shape_cast %120 : vector<24xf32> to vector<24x1xf32>
    %122 = tpu.reciprocal %121 {approx = true} : vector<24x1xf32> -> vector<24x1xf32>
    %123 = vector.broadcast %122 : vector<24x1xf32> to vector<24x24xf32>
    %124 = arith.mulf %119, %123 : vector<24x24xf32>
    %125 = arith.truncf %124 : vector<24x24xf32> to vector<24x24xbf16>
    %cst_58 = arith.constant dense<0.000000e+00> : vector<24x8xf32>
    %126 = tpu.matmul %125, %113, %cst_58 {dimension_numbers = #tpu.dot_dimension_numbers<[1], [0], [0], [1], [0, 0, 1, 1], [], []>} : vector<24x24xbf16>, vector<24x8xbf16>, vector<24x8xf32> -> vector<24x8xf32>
    %127 = vector.extract_strided_slice %88 {offsets = [0, 16], sizes = [24, 8], strides = [1, 1]} : vector<24x96xf32> to vector<24x8xf32>
    %128 = arith.truncf %127 : vector<24x8xf32> to vector<24x8xbf16>
    %129 = vector.extract_strided_slice %88 {offsets = [0, 48], sizes = [24, 8], strides = [1, 1]} : vector<24x96xf32> to vector<24x8xf32>
    %130 = arith.truncf %129 : vector<24x8xf32> to vector<24x8xbf16>
    %131 = vector.extract_strided_slice %88 {offsets = [0, 80], sizes = [24, 8], strides = [1, 1]} : vector<24x96xf32> to vector<24x8xf32>
    %132 = arith.truncf %131 : vector<24x8xf32> to vector<24x8xbf16>
    %cst_59 = arith.constant dense<0.000000e+00> : vector<24x24xf32>
    %133 = tpu.matmul %128, %130, %cst_59 {dimension_numbers = #tpu.dot_dimension_numbers<[1], [1], [0], [0], [0, 0, 1, 0], [], []>} : vector<24x8xbf16>, vector<24x8xbf16>, vector<24x24xf32> -> vector<24x24xf32>
    %cst_60 = arith.constant dense<0xFF800000> : vector<24xf32>
    %134 = vector.multi_reduction <maximumf>, %133, %cst_60 [1] : vector<24x24xf32> to vector<24xf32>
    %135 = vector.shape_cast %134 : vector<24xf32> to vector<24x1xf32>
    %136 = vector.broadcast %135 : vector<24x1xf32> to vector<24x24xf32>
    %137 = arith.subf %133, %136 : vector<24x24xf32>
    %138 = math.exp %137 : vector<24x24xf32>
    %cst_61 = arith.constant dense<0.000000e+00> : vector<24xf32>
    %139 = vector.multi_reduction <add>, %138, %cst_61 [1] : vector<24x24xf32> to vector<24xf32>
    %140 = vector.shape_cast %139 : vector<24xf32> to vector<24x1xf32>
    %141 = tpu.reciprocal %140 {approx = true} : vector<24x1xf32> -> vector<24x1xf32>
    %142 = vector.broadcast %141 : vector<24x1xf32> to vector<24x24xf32>
    %143 = arith.mulf %138, %142 : vector<24x24xf32>
    %144 = arith.truncf %143 : vector<24x24xf32> to vector<24x24xbf16>
    %cst_62 = arith.constant dense<0.000000e+00> : vector<24x8xf32>
    %145 = tpu.matmul %144, %132, %cst_62 {dimension_numbers = #tpu.dot_dimension_numbers<[1], [0], [0], [1], [0, 0, 1, 1], [], []>} : vector<24x24xbf16>, vector<24x8xbf16>, vector<24x8xf32> -> vector<24x8xf32>
    %146 = vector.extract_strided_slice %88 {offsets = [0, 24], sizes = [24, 8], strides = [1, 1]} : vector<24x96xf32> to vector<24x8xf32>
    %147 = arith.truncf %146 : vector<24x8xf32> to vector<24x8xbf16>
    %148 = vector.extract_strided_slice %88 {offsets = [0, 56], sizes = [24, 8], strides = [1, 1]} : vector<24x96xf32> to vector<24x8xf32>
    %149 = arith.truncf %148 : vector<24x8xf32> to vector<24x8xbf16>
    %150 = vector.extract_strided_slice %88 {offsets = [0, 88], sizes = [24, 8], strides = [1, 1]} : vector<24x96xf32> to vector<24x8xf32>
    %151 = arith.truncf %150 : vector<24x8xf32> to vector<24x8xbf16>
    %cst_63 = arith.constant dense<0.000000e+00> : vector<24x24xf32>
    %152 = tpu.matmul %147, %149, %cst_63 {dimension_numbers = #tpu.dot_dimension_numbers<[1], [1], [0], [0], [0, 0, 1, 0], [], []>} : vector<24x8xbf16>, vector<24x8xbf16>, vector<24x24xf32> -> vector<24x24xf32>
    %cst_64 = arith.constant dense<0xFF800000> : vector<24xf32>
    %153 = vector.multi_reduction <maximumf>, %152, %cst_64 [1] : vector<24x24xf32> to vector<24xf32>
    %154 = vector.shape_cast %153 : vector<24xf32> to vector<24x1xf32>
    %155 = vector.broadcast %154 : vector<24x1xf32> to vector<24x24xf32>
    %156 = arith.subf %152, %155 : vector<24x24xf32>
    %157 = math.exp %156 : vector<24x24xf32>
    %cst_65 = arith.constant dense<0.000000e+00> : vector<24xf32>
    %158 = vector.multi_reduction <add>, %157, %cst_65 [1] : vector<24x24xf32> to vector<24xf32>
    %159 = vector.shape_cast %158 : vector<24xf32> to vector<24x1xf32>
    %160 = tpu.reciprocal %159 {approx = true} : vector<24x1xf32> -> vector<24x1xf32>
    %161 = vector.broadcast %160 : vector<24x1xf32> to vector<24x24xf32>
    %162 = arith.mulf %157, %161 : vector<24x24xf32>
    %163 = arith.truncf %162 : vector<24x24xf32> to vector<24x24xbf16>
    %cst_66 = arith.constant dense<0.000000e+00> : vector<24x8xf32>
    %164 = tpu.matmul %163, %151, %cst_66 {dimension_numbers = #tpu.dot_dimension_numbers<[1], [0], [0], [1], [0, 0, 1, 1], [], []>} : vector<24x24xbf16>, vector<24x8xbf16>, vector<24x8xf32> -> vector<24x8xf32>
    %165 = tpu.concatenate %107, %126, %145, %164 in 1 : vector<24x8xf32>, vector<24x8xf32>, vector<24x8xf32>, vector<24x8xf32> -> vector<24x32xf32>
    %166 = arith.truncf %165 : vector<24x32xf32> to vector<24x32xbf16>
    %c0_67 = arith.constant 0 : index
    %c0_68 = arith.constant 0 : index
    %c0_69 = arith.constant 0 : index
    %167 = vector.load %arg13[%c0_67, %c0_68, %c0_69] : memref<3x32x32xbf16, #tpu.memory_space<vmem>>, vector<1x32x32xbf16>
    %168 = vector.shape_cast %167 : vector<1x32x32xbf16> to vector<32x32xbf16>
    %cst_70 = arith.constant dense<0.000000e+00> : vector<24x32xf32>
    %169 = tpu.matmul %166, %168, %cst_70 {dimension_numbers = #tpu.dot_dimension_numbers<[1], [0], [0], [1], [0, 0, 1, 1], [], []>} : vector<24x32xbf16>, vector<32x32xbf16>, vector<24x32xf32> -> vector<24x32xf32>
    %c0_71 = arith.constant 0 : index
    %c0_72 = arith.constant 0 : index
    %c0_73 = arith.constant 0 : index
    %170 = vector.load %arg14[%c0_71, %c0_72, %c0_73] : memref<3x1x32xf32, #tpu.memory_space<vmem>>, vector<1x1x32xf32>
    %171 = vector.shape_cast %170 : vector<1x1x32xf32> to vector<1x32xf32>
    %172 = vector.broadcast %171 : vector<1x32xf32> to vector<24x32xf32>
    %173 = arith.addf %169, %172 : vector<24x32xf32>
    %174 = arith.addf %56, %173 : vector<24x32xf32>
    %c0_74 = arith.constant 0 : index
    %c0_75 = arith.constant 0 : index
    %c0_76 = arith.constant 0 : index
    %175 = vector.load %arg15[%c0_74, %c0_75, %c0_76] : memref<3x1x32xf32, #tpu.memory_space<vmem>>, vector<1x1x32xf32>
    %176 = vector.shape_cast %175 : vector<1x1x32xf32> to vector<1x32xf32>
    %c0_77 = arith.constant 0 : index
    %c0_78 = arith.constant 0 : index
    %c0_79 = arith.constant 0 : index
    %177 = vector.load %arg16[%c0_77, %c0_78, %c0_79] : memref<3x1x32xf32, #tpu.memory_space<vmem>>, vector<1x1x32xf32>
    %178 = vector.shape_cast %177 : vector<1x1x32xf32> to vector<1x32xf32>
    %cst_80 = arith.constant dense<0.000000e+00> : vector<24xf32>
    %179 = vector.multi_reduction <add>, %174, %cst_80 [1] : vector<24x32xf32> to vector<24xf32>
    %180 = vector.shape_cast %179 : vector<24xf32> to vector<24x1xf32>
    %cst_81 = arith.constant 3.200000e+01 : f32
    %181 = vector.broadcast %cst_81 : f32 to vector<24x1xf32>
    %182 = arith.divf %180, %181 : vector<24x1xf32>
    %183 = vector.broadcast %182 : vector<24x1xf32> to vector<24x32xf32>
    %184 = arith.subf %174, %183 : vector<24x32xf32>
    %185 = arith.mulf %184, %184 : vector<24x32xf32>
    %cst_82 = arith.constant dense<0.000000e+00> : vector<24xf32>
    %186 = vector.multi_reduction <add>, %185, %cst_82 [1] : vector<24x32xf32> to vector<24xf32>
    %187 = vector.shape_cast %186 : vector<24xf32> to vector<24x1xf32>
    %cst_83 = arith.constant 3.200000e+01 : f32
    %188 = vector.broadcast %cst_83 : f32 to vector<24x1xf32>
    %189 = arith.divf %187, %188 : vector<24x1xf32>
    %cst_84 = arith.constant 9.99999974E-6 : f32
    %190 = vector.broadcast %cst_84 : f32 to vector<24x1xf32>
    %191 = arith.addf %189, %190 : vector<24x1xf32>
    %192 = math.rsqrt %191 : vector<24x1xf32>
    %193 = vector.broadcast %192 : vector<24x1xf32> to vector<24x32xf32>
    %194 = arith.mulf %184, %193 : vector<24x32xf32>
    %195 = vector.broadcast %176 : vector<1x32xf32> to vector<24x32xf32>
    %196 = arith.mulf %194, %195 : vector<24x32xf32>
    %197 = vector.broadcast %178 : vector<1x32xf32> to vector<24x32xf32>
    %198 = arith.addf %196, %197 : vector<24x32xf32>
    %199 = arith.truncf %198 : vector<24x32xf32> to vector<24x32xbf16>
    %c0_85 = arith.constant 0 : index
    %c0_86 = arith.constant 0 : index
    %c0_87 = arith.constant 0 : index
    %200 = vector.load %arg17[%c0_85, %c0_86, %c0_87] : memref<3x32x128xbf16, #tpu.memory_space<vmem>>, vector<1x32x128xbf16>
    %201 = vector.shape_cast %200 : vector<1x32x128xbf16> to vector<32x128xbf16>
    %cst_88 = arith.constant dense<0.000000e+00> : vector<24x128xf32>
    %202 = tpu.matmul %199, %201, %cst_88 {dimension_numbers = #tpu.dot_dimension_numbers<[1], [0], [0], [1], [0, 0, 1, 1], [], []>} : vector<24x32xbf16>, vector<32x128xbf16>, vector<24x128xf32> -> vector<24x128xf32>
    %c0_89 = arith.constant 0 : index
    %c0_90 = arith.constant 0 : index
    %c0_91 = arith.constant 0 : index
    %203 = vector.load %arg18[%c0_89, %c0_90, %c0_91] : memref<3x1x128xf32, #tpu.memory_space<vmem>>, vector<1x1x128xf32>
    %204 = vector.shape_cast %203 : vector<1x1x128xf32> to vector<1x128xf32>
    %205 = vector.broadcast %204 : vector<1x128xf32> to vector<24x128xf32>
    %206 = arith.addf %202, %205 : vector<24x128xf32>
    %cst_92 = arith.constant 5.000000e-01 : f32
    %207 = vector.broadcast %cst_92 : f32 to vector<24x128xf32>
    %208 = arith.mulf %207, %206 : vector<24x128xf32>
    %cst_93 = arith.constant 4.471500e-02 : f32
    %209 = vector.broadcast %cst_93 : f32 to vector<24x128xf32>
    %210 = arith.mulf %209, %206 : vector<24x128xf32>
    %211 = arith.mulf %210, %206 : vector<24x128xf32>
    %212 = arith.mulf %211, %206 : vector<24x128xf32>
    %213 = arith.addf %206, %212 : vector<24x128xf32>
    %cst_94 = arith.constant 0.797884583 : f32
    %214 = vector.broadcast %cst_94 : f32 to vector<24x128xf32>
    %215 = arith.mulf %214, %213 : vector<24x128xf32>
    %216 = math.tanh %215 : vector<24x128xf32>
    %cst_95 = arith.constant 1.000000e+00 : f32
    %217 = vector.broadcast %cst_95 : f32 to vector<24x128xf32>
    %218 = arith.addf %217, %216 : vector<24x128xf32>
    %219 = arith.mulf %208, %218 : vector<24x128xf32>
    %220 = arith.truncf %219 : vector<24x128xf32> to vector<24x128xbf16>
    %c0_96 = arith.constant 0 : index
    %c0_97 = arith.constant 0 : index
    %c0_98 = arith.constant 0 : index
    %221 = vector.load %arg19[%c0_96, %c0_97, %c0_98] : memref<3x128x32xbf16, #tpu.memory_space<vmem>>, vector<1x128x32xbf16>
    %222 = vector.shape_cast %221 : vector<1x128x32xbf16> to vector<128x32xbf16>
    %cst_99 = arith.constant dense<0.000000e+00> : vector<24x32xf32>
    %223 = tpu.matmul %220, %222, %cst_99 {dimension_numbers = #tpu.dot_dimension_numbers<[1], [0], [0], [1], [0, 0, 1, 1], [], []>} : vector<24x128xbf16>, vector<128x32xbf16>, vector<24x32xf32> -> vector<24x32xf32>
    %c0_100 = arith.constant 0 : index
    %c0_101 = arith.constant 0 : index
    %c0_102 = arith.constant 0 : index
    %224 = vector.load %arg20[%c0_100, %c0_101, %c0_102] : memref<3x1x32xf32, #tpu.memory_space<vmem>>, vector<1x1x32xf32>
    %225 = vector.shape_cast %224 : vector<1x1x32xf32> to vector<1x32xf32>
    %226 = vector.broadcast %225 : vector<1x32xf32> to vector<24x32xf32>
    %227 = arith.addf %223, %226 : vector<24x32xf32>
    %228 = arith.addf %174, %227 : vector<24x32xf32>
    %c1 = arith.constant 1 : index
    %c0_103 = arith.constant 0 : index
    %c0_104 = arith.constant 0 : index
    %229 = vector.load %arg9[%c1, %c0_103, %c0_104] : memref<3x1x32xf32, #tpu.memory_space<vmem>>, vector<1x1x32xf32>
    %230 = vector.shape_cast %229 : vector<1x1x32xf32> to vector<1x32xf32>
    %c1_105 = arith.constant 1 : index
    %c0_106 = arith.constant 0 : index
    %c0_107 = arith.constant 0 : index
    %231 = vector.load %arg10[%c1_105, %c0_106, %c0_107] : memref<3x1x32xf32, #tpu.memory_space<vmem>>, vector<1x1x32xf32>
    %232 = vector.shape_cast %231 : vector<1x1x32xf32> to vector<1x32xf32>
    %cst_108 = arith.constant dense<0.000000e+00> : vector<24xf32>
    %233 = vector.multi_reduction <add>, %228, %cst_108 [1] : vector<24x32xf32> to vector<24xf32>
    %234 = vector.shape_cast %233 : vector<24xf32> to vector<24x1xf32>
    %cst_109 = arith.constant 3.200000e+01 : f32
    %235 = vector.broadcast %cst_109 : f32 to vector<24x1xf32>
    %236 = arith.divf %234, %235 : vector<24x1xf32>
    %237 = vector.broadcast %236 : vector<24x1xf32> to vector<24x32xf32>
    %238 = arith.subf %228, %237 : vector<24x32xf32>
    %239 = arith.mulf %238, %238 : vector<24x32xf32>
    %cst_110 = arith.constant dense<0.000000e+00> : vector<24xf32>
    %240 = vector.multi_reduction <add>, %239, %cst_110 [1] : vector<24x32xf32> to vector<24xf32>
    %241 = vector.shape_cast %240 : vector<24xf32> to vector<24x1xf32>
    %cst_111 = arith.constant 3.200000e+01 : f32
    %242 = vector.broadcast %cst_111 : f32 to vector<24x1xf32>
    %243 = arith.divf %241, %242 : vector<24x1xf32>
    %cst_112 = arith.constant 9.99999974E-6 : f32
    %244 = vector.broadcast %cst_112 : f32 to vector<24x1xf32>
    %245 = arith.addf %243, %244 : vector<24x1xf32>
    %246 = math.rsqrt %245 : vector<24x1xf32>
    %247 = vector.broadcast %246 : vector<24x1xf32> to vector<24x32xf32>
    %248 = arith.mulf %238, %247 : vector<24x32xf32>
    %249 = vector.broadcast %230 : vector<1x32xf32> to vector<24x32xf32>
    %250 = arith.mulf %248, %249 : vector<24x32xf32>
    %251 = vector.broadcast %232 : vector<1x32xf32> to vector<24x32xf32>
    %252 = arith.addf %250, %251 : vector<24x32xf32>
    %253 = arith.truncf %252 : vector<24x32xf32> to vector<24x32xbf16>
    %c1_113 = arith.constant 1 : index
    %c0_114 = arith.constant 0 : index
    %c0_115 = arith.constant 0 : index
    %254 = vector.load %arg11[%c1_113, %c0_114, %c0_115] : memref<3x32x96xbf16, #tpu.memory_space<vmem>>, vector<1x32x96xbf16>
    %255 = vector.shape_cast %254 : vector<1x32x96xbf16> to vector<32x96xbf16>
    %cst_116 = arith.constant dense<0.000000e+00> : vector<24x96xf32>
    %256 = tpu.matmul %253, %255, %cst_116 {dimension_numbers = #tpu.dot_dimension_numbers<[1], [0], [0], [1], [0, 0, 1, 1], [], []>} : vector<24x32xbf16>, vector<32x96xbf16>, vector<24x96xf32> -> vector<24x96xf32>
    %c1_117 = arith.constant 1 : index
    %c0_118 = arith.constant 0 : index
    %c0_119 = arith.constant 0 : index
    %257 = vector.load %arg12[%c1_117, %c0_118, %c0_119] : memref<3x1x96xf32, #tpu.memory_space<vmem>>, vector<1x1x96xf32>
    %258 = vector.shape_cast %257 : vector<1x1x96xf32> to vector<1x96xf32>
    %259 = vector.broadcast %258 : vector<1x96xf32> to vector<24x96xf32>
    %260 = arith.addf %256, %259 : vector<24x96xf32>
    %261 = vector.extract_strided_slice %260 {offsets = [0, 0], sizes = [24, 8], strides = [1, 1]} : vector<24x96xf32> to vector<24x8xf32>
    %262 = arith.truncf %261 : vector<24x8xf32> to vector<24x8xbf16>
    %263 = vector.extract_strided_slice %260 {offsets = [0, 32], sizes = [24, 8], strides = [1, 1]} : vector<24x96xf32> to vector<24x8xf32>
    %264 = arith.truncf %263 : vector<24x8xf32> to vector<24x8xbf16>
    %265 = vector.extract_strided_slice %260 {offsets = [0, 64], sizes = [24, 8], strides = [1, 1]} : vector<24x96xf32> to vector<24x8xf32>
    %266 = arith.truncf %265 : vector<24x8xf32> to vector<24x8xbf16>
    %cst_120 = arith.constant dense<0.000000e+00> : vector<24x24xf32>
    %267 = tpu.matmul %262, %264, %cst_120 {dimension_numbers = #tpu.dot_dimension_numbers<[1], [1], [0], [0], [0, 0, 1, 0], [], []>} : vector<24x8xbf16>, vector<24x8xbf16>, vector<24x24xf32> -> vector<24x24xf32>
    %cst_121 = arith.constant dense<0xFF800000> : vector<24xf32>
    %268 = vector.multi_reduction <maximumf>, %267, %cst_121 [1] : vector<24x24xf32> to vector<24xf32>
    %269 = vector.shape_cast %268 : vector<24xf32> to vector<24x1xf32>
    %270 = vector.broadcast %269 : vector<24x1xf32> to vector<24x24xf32>
    %271 = arith.subf %267, %270 : vector<24x24xf32>
    %272 = math.exp %271 : vector<24x24xf32>
    %cst_122 = arith.constant dense<0.000000e+00> : vector<24xf32>
    %273 = vector.multi_reduction <add>, %272, %cst_122 [1] : vector<24x24xf32> to vector<24xf32>
    %274 = vector.shape_cast %273 : vector<24xf32> to vector<24x1xf32>
    %275 = tpu.reciprocal %274 {approx = true} : vector<24x1xf32> -> vector<24x1xf32>
    %276 = vector.broadcast %275 : vector<24x1xf32> to vector<24x24xf32>
    %277 = arith.mulf %272, %276 : vector<24x24xf32>
    %278 = arith.truncf %277 : vector<24x24xf32> to vector<24x24xbf16>
    %cst_123 = arith.constant dense<0.000000e+00> : vector<24x8xf32>
    %279 = tpu.matmul %278, %266, %cst_123 {dimension_numbers = #tpu.dot_dimension_numbers<[1], [0], [0], [1], [0, 0, 1, 1], [], []>} : vector<24x24xbf16>, vector<24x8xbf16>, vector<24x8xf32> -> vector<24x8xf32>
    %280 = vector.extract_strided_slice %260 {offsets = [0, 8], sizes = [24, 8], strides = [1, 1]} : vector<24x96xf32> to vector<24x8xf32>
    %281 = arith.truncf %280 : vector<24x8xf32> to vector<24x8xbf16>
    %282 = vector.extract_strided_slice %260 {offsets = [0, 40], sizes = [24, 8], strides = [1, 1]} : vector<24x96xf32> to vector<24x8xf32>
    %283 = arith.truncf %282 : vector<24x8xf32> to vector<24x8xbf16>
    %284 = vector.extract_strided_slice %260 {offsets = [0, 72], sizes = [24, 8], strides = [1, 1]} : vector<24x96xf32> to vector<24x8xf32>
    %285 = arith.truncf %284 : vector<24x8xf32> to vector<24x8xbf16>
    %cst_124 = arith.constant dense<0.000000e+00> : vector<24x24xf32>
    %286 = tpu.matmul %281, %283, %cst_124 {dimension_numbers = #tpu.dot_dimension_numbers<[1], [1], [0], [0], [0, 0, 1, 0], [], []>} : vector<24x8xbf16>, vector<24x8xbf16>, vector<24x24xf32> -> vector<24x24xf32>
    %cst_125 = arith.constant dense<0xFF800000> : vector<24xf32>
    %287 = vector.multi_reduction <maximumf>, %286, %cst_125 [1] : vector<24x24xf32> to vector<24xf32>
    %288 = vector.shape_cast %287 : vector<24xf32> to vector<24x1xf32>
    %289 = vector.broadcast %288 : vector<24x1xf32> to vector<24x24xf32>
    %290 = arith.subf %286, %289 : vector<24x24xf32>
    %291 = math.exp %290 : vector<24x24xf32>
    %cst_126 = arith.constant dense<0.000000e+00> : vector<24xf32>
    %292 = vector.multi_reduction <add>, %291, %cst_126 [1] : vector<24x24xf32> to vector<24xf32>
    %293 = vector.shape_cast %292 : vector<24xf32> to vector<24x1xf32>
    %294 = tpu.reciprocal %293 {approx = true} : vector<24x1xf32> -> vector<24x1xf32>
    %295 = vector.broadcast %294 : vector<24x1xf32> to vector<24x24xf32>
    %296 = arith.mulf %291, %295 : vector<24x24xf32>
    %297 = arith.truncf %296 : vector<24x24xf32> to vector<24x24xbf16>
    %cst_127 = arith.constant dense<0.000000e+00> : vector<24x8xf32>
    %298 = tpu.matmul %297, %285, %cst_127 {dimension_numbers = #tpu.dot_dimension_numbers<[1], [0], [0], [1], [0, 0, 1, 1], [], []>} : vector<24x24xbf16>, vector<24x8xbf16>, vector<24x8xf32> -> vector<24x8xf32>
    %299 = vector.extract_strided_slice %260 {offsets = [0, 16], sizes = [24, 8], strides = [1, 1]} : vector<24x96xf32> to vector<24x8xf32>
    %300 = arith.truncf %299 : vector<24x8xf32> to vector<24x8xbf16>
    %301 = vector.extract_strided_slice %260 {offsets = [0, 48], sizes = [24, 8], strides = [1, 1]} : vector<24x96xf32> to vector<24x8xf32>
    %302 = arith.truncf %301 : vector<24x8xf32> to vector<24x8xbf16>
    %303 = vector.extract_strided_slice %260 {offsets = [0, 80], sizes = [24, 8], strides = [1, 1]} : vector<24x96xf32> to vector<24x8xf32>
    %304 = arith.truncf %303 : vector<24x8xf32> to vector<24x8xbf16>
    %cst_128 = arith.constant dense<0.000000e+00> : vector<24x24xf32>
    %305 = tpu.matmul %300, %302, %cst_128 {dimension_numbers = #tpu.dot_dimension_numbers<[1], [1], [0], [0], [0, 0, 1, 0], [], []>} : vector<24x8xbf16>, vector<24x8xbf16>, vector<24x24xf32> -> vector<24x24xf32>
    %cst_129 = arith.constant dense<0xFF800000> : vector<24xf32>
    %306 = vector.multi_reduction <maximumf>, %305, %cst_129 [1] : vector<24x24xf32> to vector<24xf32>
    %307 = vector.shape_cast %306 : vector<24xf32> to vector<24x1xf32>
    %308 = vector.broadcast %307 : vector<24x1xf32> to vector<24x24xf32>
    %309 = arith.subf %305, %308 : vector<24x24xf32>
    %310 = math.exp %309 : vector<24x24xf32>
    %cst_130 = arith.constant dense<0.000000e+00> : vector<24xf32>
    %311 = vector.multi_reduction <add>, %310, %cst_130 [1] : vector<24x24xf32> to vector<24xf32>
    %312 = vector.shape_cast %311 : vector<24xf32> to vector<24x1xf32>
    %313 = tpu.reciprocal %312 {approx = true} : vector<24x1xf32> -> vector<24x1xf32>
    %314 = vector.broadcast %313 : vector<24x1xf32> to vector<24x24xf32>
    %315 = arith.mulf %310, %314 : vector<24x24xf32>
    %316 = arith.truncf %315 : vector<24x24xf32> to vector<24x24xbf16>
    %cst_131 = arith.constant dense<0.000000e+00> : vector<24x8xf32>
    %317 = tpu.matmul %316, %304, %cst_131 {dimension_numbers = #tpu.dot_dimension_numbers<[1], [0], [0], [1], [0, 0, 1, 1], [], []>} : vector<24x24xbf16>, vector<24x8xbf16>, vector<24x8xf32> -> vector<24x8xf32>
    %318 = vector.extract_strided_slice %260 {offsets = [0, 24], sizes = [24, 8], strides = [1, 1]} : vector<24x96xf32> to vector<24x8xf32>
    %319 = arith.truncf %318 : vector<24x8xf32> to vector<24x8xbf16>
    %320 = vector.extract_strided_slice %260 {offsets = [0, 56], sizes = [24, 8], strides = [1, 1]} : vector<24x96xf32> to vector<24x8xf32>
    %321 = arith.truncf %320 : vector<24x8xf32> to vector<24x8xbf16>
    %322 = vector.extract_strided_slice %260 {offsets = [0, 88], sizes = [24, 8], strides = [1, 1]} : vector<24x96xf32> to vector<24x8xf32>
    %323 = arith.truncf %322 : vector<24x8xf32> to vector<24x8xbf16>
    %cst_132 = arith.constant dense<0.000000e+00> : vector<24x24xf32>
    %324 = tpu.matmul %319, %321, %cst_132 {dimension_numbers = #tpu.dot_dimension_numbers<[1], [1], [0], [0], [0, 0, 1, 0], [], []>} : vector<24x8xbf16>, vector<24x8xbf16>, vector<24x24xf32> -> vector<24x24xf32>
    %cst_133 = arith.constant dense<0xFF800000> : vector<24xf32>
    %325 = vector.multi_reduction <maximumf>, %324, %cst_133 [1] : vector<24x24xf32> to vector<24xf32>
    %326 = vector.shape_cast %325 : vector<24xf32> to vector<24x1xf32>
    %327 = vector.broadcast %326 : vector<24x1xf32> to vector<24x24xf32>
    %328 = arith.subf %324, %327 : vector<24x24xf32>
    %329 = math.exp %328 : vector<24x24xf32>
    %cst_134 = arith.constant dense<0.000000e+00> : vector<24xf32>
    %330 = vector.multi_reduction <add>, %329, %cst_134 [1] : vector<24x24xf32> to vector<24xf32>
    %331 = vector.shape_cast %330 : vector<24xf32> to vector<24x1xf32>
    %332 = tpu.reciprocal %331 {approx = true} : vector<24x1xf32> -> vector<24x1xf32>
    %333 = vector.broadcast %332 : vector<24x1xf32> to vector<24x24xf32>
    %334 = arith.mulf %329, %333 : vector<24x24xf32>
    %335 = arith.truncf %334 : vector<24x24xf32> to vector<24x24xbf16>
    %cst_135 = arith.constant dense<0.000000e+00> : vector<24x8xf32>
    %336 = tpu.matmul %335, %323, %cst_135 {dimension_numbers = #tpu.dot_dimension_numbers<[1], [0], [0], [1], [0, 0, 1, 1], [], []>} : vector<24x24xbf16>, vector<24x8xbf16>, vector<24x8xf32> -> vector<24x8xf32>
    %337 = tpu.concatenate %279, %298, %317, %336 in 1 : vector<24x8xf32>, vector<24x8xf32>, vector<24x8xf32>, vector<24x8xf32> -> vector<24x32xf32>
    %338 = arith.truncf %337 : vector<24x32xf32> to vector<24x32xbf16>
    %c1_136 = arith.constant 1 : index
    %c0_137 = arith.constant 0 : index
    %c0_138 = arith.constant 0 : index
    %339 = vector.load %arg13[%c1_136, %c0_137, %c0_138] : memref<3x32x32xbf16, #tpu.memory_space<vmem>>, vector<1x32x32xbf16>
    %340 = vector.shape_cast %339 : vector<1x32x32xbf16> to vector<32x32xbf16>
    %cst_139 = arith.constant dense<0.000000e+00> : vector<24x32xf32>
    %341 = tpu.matmul %338, %340, %cst_139 {dimension_numbers = #tpu.dot_dimension_numbers<[1], [0], [0], [1], [0, 0, 1, 1], [], []>} : vector<24x32xbf16>, vector<32x32xbf16>, vector<24x32xf32> -> vector<24x32xf32>
    %c1_140 = arith.constant 1 : index
    %c0_141 = arith.constant 0 : index
    %c0_142 = arith.constant 0 : index
    %342 = vector.load %arg14[%c1_140, %c0_141, %c0_142] : memref<3x1x32xf32, #tpu.memory_space<vmem>>, vector<1x1x32xf32>
    %343 = vector.shape_cast %342 : vector<1x1x32xf32> to vector<1x32xf32>
    %344 = vector.broadcast %343 : vector<1x32xf32> to vector<24x32xf32>
    %345 = arith.addf %341, %344 : vector<24x32xf32>
    %346 = arith.addf %228, %345 : vector<24x32xf32>
    %c1_143 = arith.constant 1 : index
    %c0_144 = arith.constant 0 : index
    %c0_145 = arith.constant 0 : index
    %347 = vector.load %arg15[%c1_143, %c0_144, %c0_145] : memref<3x1x32xf32, #tpu.memory_space<vmem>>, vector<1x1x32xf32>
    %348 = vector.shape_cast %347 : vector<1x1x32xf32> to vector<1x32xf32>
    %c1_146 = arith.constant 1 : index
    %c0_147 = arith.constant 0 : index
    %c0_148 = arith.constant 0 : index
    %349 = vector.load %arg16[%c1_146, %c0_147, %c0_148] : memref<3x1x32xf32, #tpu.memory_space<vmem>>, vector<1x1x32xf32>
    %350 = vector.shape_cast %349 : vector<1x1x32xf32> to vector<1x32xf32>
    %cst_149 = arith.constant dense<0.000000e+00> : vector<24xf32>
    %351 = vector.multi_reduction <add>, %346, %cst_149 [1] : vector<24x32xf32> to vector<24xf32>
    %352 = vector.shape_cast %351 : vector<24xf32> to vector<24x1xf32>
    %cst_150 = arith.constant 3.200000e+01 : f32
    %353 = vector.broadcast %cst_150 : f32 to vector<24x1xf32>
    %354 = arith.divf %352, %353 : vector<24x1xf32>
    %355 = vector.broadcast %354 : vector<24x1xf32> to vector<24x32xf32>
    %356 = arith.subf %346, %355 : vector<24x32xf32>
    %357 = arith.mulf %356, %356 : vector<24x32xf32>
    %cst_151 = arith.constant dense<0.000000e+00> : vector<24xf32>
    %358 = vector.multi_reduction <add>, %357, %cst_151 [1] : vector<24x32xf32> to vector<24xf32>
    %359 = vector.shape_cast %358 : vector<24xf32> to vector<24x1xf32>
    %cst_152 = arith.constant 3.200000e+01 : f32
    %360 = vector.broadcast %cst_152 : f32 to vector<24x1xf32>
    %361 = arith.divf %359, %360 : vector<24x1xf32>
    %cst_153 = arith.constant 9.99999974E-6 : f32
    %362 = vector.broadcast %cst_153 : f32 to vector<24x1xf32>
    %363 = arith.addf %361, %362 : vector<24x1xf32>
    %364 = math.rsqrt %363 : vector<24x1xf32>
    %365 = vector.broadcast %364 : vector<24x1xf32> to vector<24x32xf32>
    %366 = arith.mulf %356, %365 : vector<24x32xf32>
    %367 = vector.broadcast %348 : vector<1x32xf32> to vector<24x32xf32>
    %368 = arith.mulf %366, %367 : vector<24x32xf32>
    %369 = vector.broadcast %350 : vector<1x32xf32> to vector<24x32xf32>
    %370 = arith.addf %368, %369 : vector<24x32xf32>
    %371 = arith.truncf %370 : vector<24x32xf32> to vector<24x32xbf16>
    %c1_154 = arith.constant 1 : index
    %c0_155 = arith.constant 0 : index
    %c0_156 = arith.constant 0 : index
    %372 = vector.load %arg17[%c1_154, %c0_155, %c0_156] : memref<3x32x128xbf16, #tpu.memory_space<vmem>>, vector<1x32x128xbf16>
    %373 = vector.shape_cast %372 : vector<1x32x128xbf16> to vector<32x128xbf16>
    %cst_157 = arith.constant dense<0.000000e+00> : vector<24x128xf32>
    %374 = tpu.matmul %371, %373, %cst_157 {dimension_numbers = #tpu.dot_dimension_numbers<[1], [0], [0], [1], [0, 0, 1, 1], [], []>} : vector<24x32xbf16>, vector<32x128xbf16>, vector<24x128xf32> -> vector<24x128xf32>
    %c1_158 = arith.constant 1 : index
    %c0_159 = arith.constant 0 : index
    %c0_160 = arith.constant 0 : index
    %375 = vector.load %arg18[%c1_158, %c0_159, %c0_160] : memref<3x1x128xf32, #tpu.memory_space<vmem>>, vector<1x1x128xf32>
    %376 = vector.shape_cast %375 : vector<1x1x128xf32> to vector<1x128xf32>
    %377 = vector.broadcast %376 : vector<1x128xf32> to vector<24x128xf32>
    %378 = arith.addf %374, %377 : vector<24x128xf32>
    %cst_161 = arith.constant 5.000000e-01 : f32
    %379 = vector.broadcast %cst_161 : f32 to vector<24x128xf32>
    %380 = arith.mulf %379, %378 : vector<24x128xf32>
    %cst_162 = arith.constant 4.471500e-02 : f32
    %381 = vector.broadcast %cst_162 : f32 to vector<24x128xf32>
    %382 = arith.mulf %381, %378 : vector<24x128xf32>
    %383 = arith.mulf %382, %378 : vector<24x128xf32>
    %384 = arith.mulf %383, %378 : vector<24x128xf32>
    %385 = arith.addf %378, %384 : vector<24x128xf32>
    %cst_163 = arith.constant 0.797884583 : f32
    %386 = vector.broadcast %cst_163 : f32 to vector<24x128xf32>
    %387 = arith.mulf %386, %385 : vector<24x128xf32>
    %388 = math.tanh %387 : vector<24x128xf32>
    %cst_164 = arith.constant 1.000000e+00 : f32
    %389 = vector.broadcast %cst_164 : f32 to vector<24x128xf32>
    %390 = arith.addf %389, %388 : vector<24x128xf32>
    %391 = arith.mulf %380, %390 : vector<24x128xf32>
    %392 = arith.truncf %391 : vector<24x128xf32> to vector<24x128xbf16>
    %c1_165 = arith.constant 1 : index
    %c0_166 = arith.constant 0 : index
    %c0_167 = arith.constant 0 : index
    %393 = vector.load %arg19[%c1_165, %c0_166, %c0_167] : memref<3x128x32xbf16, #tpu.memory_space<vmem>>, vector<1x128x32xbf16>
    %394 = vector.shape_cast %393 : vector<1x128x32xbf16> to vector<128x32xbf16>
    %cst_168 = arith.constant dense<0.000000e+00> : vector<24x32xf32>
    %395 = tpu.matmul %392, %394, %cst_168 {dimension_numbers = #tpu.dot_dimension_numbers<[1], [0], [0], [1], [0, 0, 1, 1], [], []>} : vector<24x128xbf16>, vector<128x32xbf16>, vector<24x32xf32> -> vector<24x32xf32>
    %c1_169 = arith.constant 1 : index
    %c0_170 = arith.constant 0 : index
    %c0_171 = arith.constant 0 : index
    %396 = vector.load %arg20[%c1_169, %c0_170, %c0_171] : memref<3x1x32xf32, #tpu.memory_space<vmem>>, vector<1x1x32xf32>
    %397 = vector.shape_cast %396 : vector<1x1x32xf32> to vector<1x32xf32>
    %398 = vector.broadcast %397 : vector<1x32xf32> to vector<24x32xf32>
    %399 = arith.addf %395, %398 : vector<24x32xf32>
    %400 = arith.addf %346, %399 : vector<24x32xf32>
    %c2 = arith.constant 2 : index
    %c0_172 = arith.constant 0 : index
    %c0_173 = arith.constant 0 : index
    %401 = vector.load %arg9[%c2, %c0_172, %c0_173] : memref<3x1x32xf32, #tpu.memory_space<vmem>>, vector<1x1x32xf32>
    %402 = vector.shape_cast %401 : vector<1x1x32xf32> to vector<1x32xf32>
    %c2_174 = arith.constant 2 : index
    %c0_175 = arith.constant 0 : index
    %c0_176 = arith.constant 0 : index
    %403 = vector.load %arg10[%c2_174, %c0_175, %c0_176] : memref<3x1x32xf32, #tpu.memory_space<vmem>>, vector<1x1x32xf32>
    %404 = vector.shape_cast %403 : vector<1x1x32xf32> to vector<1x32xf32>
    %cst_177 = arith.constant dense<0.000000e+00> : vector<24xf32>
    %405 = vector.multi_reduction <add>, %400, %cst_177 [1] : vector<24x32xf32> to vector<24xf32>
    %406 = vector.shape_cast %405 : vector<24xf32> to vector<24x1xf32>
    %cst_178 = arith.constant 3.200000e+01 : f32
    %407 = vector.broadcast %cst_178 : f32 to vector<24x1xf32>
    %408 = arith.divf %406, %407 : vector<24x1xf32>
    %409 = vector.broadcast %408 : vector<24x1xf32> to vector<24x32xf32>
    %410 = arith.subf %400, %409 : vector<24x32xf32>
    %411 = arith.mulf %410, %410 : vector<24x32xf32>
    %cst_179 = arith.constant dense<0.000000e+00> : vector<24xf32>
    %412 = vector.multi_reduction <add>, %411, %cst_179 [1] : vector<24x32xf32> to vector<24xf32>
    %413 = vector.shape_cast %412 : vector<24xf32> to vector<24x1xf32>
    %cst_180 = arith.constant 3.200000e+01 : f32
    %414 = vector.broadcast %cst_180 : f32 to vector<24x1xf32>
    %415 = arith.divf %413, %414 : vector<24x1xf32>
    %cst_181 = arith.constant 9.99999974E-6 : f32
    %416 = vector.broadcast %cst_181 : f32 to vector<24x1xf32>
    %417 = arith.addf %415, %416 : vector<24x1xf32>
    %418 = math.rsqrt %417 : vector<24x1xf32>
    %419 = vector.broadcast %418 : vector<24x1xf32> to vector<24x32xf32>
    %420 = arith.mulf %410, %419 : vector<24x32xf32>
    %421 = vector.broadcast %402 : vector<1x32xf32> to vector<24x32xf32>
    %422 = arith.mulf %420, %421 : vector<24x32xf32>
    %423 = vector.broadcast %404 : vector<1x32xf32> to vector<24x32xf32>
    %424 = arith.addf %422, %423 : vector<24x32xf32>
    %425 = arith.truncf %424 : vector<24x32xf32> to vector<24x32xbf16>
    %c2_182 = arith.constant 2 : index
    %c0_183 = arith.constant 0 : index
    %c0_184 = arith.constant 0 : index
    %426 = vector.load %arg11[%c2_182, %c0_183, %c0_184] : memref<3x32x96xbf16, #tpu.memory_space<vmem>>, vector<1x32x96xbf16>
    %427 = vector.shape_cast %426 : vector<1x32x96xbf16> to vector<32x96xbf16>
    %cst_185 = arith.constant dense<0.000000e+00> : vector<24x96xf32>
    %428 = tpu.matmul %425, %427, %cst_185 {dimension_numbers = #tpu.dot_dimension_numbers<[1], [0], [0], [1], [0, 0, 1, 1], [], []>} : vector<24x32xbf16>, vector<32x96xbf16>, vector<24x96xf32> -> vector<24x96xf32>
    %c2_186 = arith.constant 2 : index
    %c0_187 = arith.constant 0 : index
    %c0_188 = arith.constant 0 : index
    %429 = vector.load %arg12[%c2_186, %c0_187, %c0_188] : memref<3x1x96xf32, #tpu.memory_space<vmem>>, vector<1x1x96xf32>
    %430 = vector.shape_cast %429 : vector<1x1x96xf32> to vector<1x96xf32>
    %431 = vector.broadcast %430 : vector<1x96xf32> to vector<24x96xf32>
    %432 = arith.addf %428, %431 : vector<24x96xf32>
    %433 = vector.extract_strided_slice %432 {offsets = [0, 0], sizes = [24, 8], strides = [1, 1]} : vector<24x96xf32> to vector<24x8xf32>
    %434 = arith.truncf %433 : vector<24x8xf32> to vector<24x8xbf16>
    %435 = vector.extract_strided_slice %432 {offsets = [0, 32], sizes = [24, 8], strides = [1, 1]} : vector<24x96xf32> to vector<24x8xf32>
    %436 = arith.truncf %435 : vector<24x8xf32> to vector<24x8xbf16>
    %437 = vector.extract_strided_slice %432 {offsets = [0, 64], sizes = [24, 8], strides = [1, 1]} : vector<24x96xf32> to vector<24x8xf32>
    %438 = arith.truncf %437 : vector<24x8xf32> to vector<24x8xbf16>
    %cst_189 = arith.constant dense<0.000000e+00> : vector<24x24xf32>
    %439 = tpu.matmul %434, %436, %cst_189 {dimension_numbers = #tpu.dot_dimension_numbers<[1], [1], [0], [0], [0, 0, 1, 0], [], []>} : vector<24x8xbf16>, vector<24x8xbf16>, vector<24x24xf32> -> vector<24x24xf32>
    %cst_190 = arith.constant dense<0xFF800000> : vector<24xf32>
    %440 = vector.multi_reduction <maximumf>, %439, %cst_190 [1] : vector<24x24xf32> to vector<24xf32>
    %441 = vector.shape_cast %440 : vector<24xf32> to vector<24x1xf32>
    %442 = vector.broadcast %441 : vector<24x1xf32> to vector<24x24xf32>
    %443 = arith.subf %439, %442 : vector<24x24xf32>
    %444 = math.exp %443 : vector<24x24xf32>
    %cst_191 = arith.constant dense<0.000000e+00> : vector<24xf32>
    %445 = vector.multi_reduction <add>, %444, %cst_191 [1] : vector<24x24xf32> to vector<24xf32>
    %446 = vector.shape_cast %445 : vector<24xf32> to vector<24x1xf32>
    %447 = tpu.reciprocal %446 {approx = true} : vector<24x1xf32> -> vector<24x1xf32>
    %448 = vector.broadcast %447 : vector<24x1xf32> to vector<24x24xf32>
    %449 = arith.mulf %444, %448 : vector<24x24xf32>
    %450 = arith.truncf %449 : vector<24x24xf32> to vector<24x24xbf16>
    %cst_192 = arith.constant dense<0.000000e+00> : vector<24x8xf32>
    %451 = tpu.matmul %450, %438, %cst_192 {dimension_numbers = #tpu.dot_dimension_numbers<[1], [0], [0], [1], [0, 0, 1, 1], [], []>} : vector<24x24xbf16>, vector<24x8xbf16>, vector<24x8xf32> -> vector<24x8xf32>
    %452 = vector.extract_strided_slice %432 {offsets = [0, 8], sizes = [24, 8], strides = [1, 1]} : vector<24x96xf32> to vector<24x8xf32>
    %453 = arith.truncf %452 : vector<24x8xf32> to vector<24x8xbf16>
    %454 = vector.extract_strided_slice %432 {offsets = [0, 40], sizes = [24, 8], strides = [1, 1]} : vector<24x96xf32> to vector<24x8xf32>
    %455 = arith.truncf %454 : vector<24x8xf32> to vector<24x8xbf16>
    %456 = vector.extract_strided_slice %432 {offsets = [0, 72], sizes = [24, 8], strides = [1, 1]} : vector<24x96xf32> to vector<24x8xf32>
    %457 = arith.truncf %456 : vector<24x8xf32> to vector<24x8xbf16>
    %cst_193 = arith.constant dense<0.000000e+00> : vector<24x24xf32>
    %458 = tpu.matmul %453, %455, %cst_193 {dimension_numbers = #tpu.dot_dimension_numbers<[1], [1], [0], [0], [0, 0, 1, 0], [], []>} : vector<24x8xbf16>, vector<24x8xbf16>, vector<24x24xf32> -> vector<24x24xf32>
    %cst_194 = arith.constant dense<0xFF800000> : vector<24xf32>
    %459 = vector.multi_reduction <maximumf>, %458, %cst_194 [1] : vector<24x24xf32> to vector<24xf32>
    %460 = vector.shape_cast %459 : vector<24xf32> to vector<24x1xf32>
    %461 = vector.broadcast %460 : vector<24x1xf32> to vector<24x24xf32>
    %462 = arith.subf %458, %461 : vector<24x24xf32>
    %463 = math.exp %462 : vector<24x24xf32>
    %cst_195 = arith.constant dense<0.000000e+00> : vector<24xf32>
    %464 = vector.multi_reduction <add>, %463, %cst_195 [1] : vector<24x24xf32> to vector<24xf32>
    %465 = vector.shape_cast %464 : vector<24xf32> to vector<24x1xf32>
    %466 = tpu.reciprocal %465 {approx = true} : vector<24x1xf32> -> vector<24x1xf32>
    %467 = vector.broadcast %466 : vector<24x1xf32> to vector<24x24xf32>
    %468 = arith.mulf %463, %467 : vector<24x24xf32>
    %469 = arith.truncf %468 : vector<24x24xf32> to vector<24x24xbf16>
    %cst_196 = arith.constant dense<0.000000e+00> : vector<24x8xf32>
    %470 = tpu.matmul %469, %457, %cst_196 {dimension_numbers = #tpu.dot_dimension_numbers<[1], [0], [0], [1], [0, 0, 1, 1], [], []>} : vector<24x24xbf16>, vector<24x8xbf16>, vector<24x8xf32> -> vector<24x8xf32>
    %471 = vector.extract_strided_slice %432 {offsets = [0, 16], sizes = [24, 8], strides = [1, 1]} : vector<24x96xf32> to vector<24x8xf32>
    %472 = arith.truncf %471 : vector<24x8xf32> to vector<24x8xbf16>
    %473 = vector.extract_strided_slice %432 {offsets = [0, 48], sizes = [24, 8], strides = [1, 1]} : vector<24x96xf32> to vector<24x8xf32>
    %474 = arith.truncf %473 : vector<24x8xf32> to vector<24x8xbf16>
    %475 = vector.extract_strided_slice %432 {offsets = [0, 80], sizes = [24, 8], strides = [1, 1]} : vector<24x96xf32> to vector<24x8xf32>
    %476 = arith.truncf %475 : vector<24x8xf32> to vector<24x8xbf16>
    %cst_197 = arith.constant dense<0.000000e+00> : vector<24x24xf32>
    %477 = tpu.matmul %472, %474, %cst_197 {dimension_numbers = #tpu.dot_dimension_numbers<[1], [1], [0], [0], [0, 0, 1, 0], [], []>} : vector<24x8xbf16>, vector<24x8xbf16>, vector<24x24xf32> -> vector<24x24xf32>
    %cst_198 = arith.constant dense<0xFF800000> : vector<24xf32>
    %478 = vector.multi_reduction <maximumf>, %477, %cst_198 [1] : vector<24x24xf32> to vector<24xf32>
    %479 = vector.shape_cast %478 : vector<24xf32> to vector<24x1xf32>
    %480 = vector.broadcast %479 : vector<24x1xf32> to vector<24x24xf32>
    %481 = arith.subf %477, %480 : vector<24x24xf32>
    %482 = math.exp %481 : vector<24x24xf32>
    %cst_199 = arith.constant dense<0.000000e+00> : vector<24xf32>
    %483 = vector.multi_reduction <add>, %482, %cst_199 [1] : vector<24x24xf32> to vector<24xf32>
    %484 = vector.shape_cast %483 : vector<24xf32> to vector<24x1xf32>
    %485 = tpu.reciprocal %484 {approx = true} : vector<24x1xf32> -> vector<24x1xf32>
    %486 = vector.broadcast %485 : vector<24x1xf32> to vector<24x24xf32>
    %487 = arith.mulf %482, %486 : vector<24x24xf32>
    %488 = arith.truncf %487 : vector<24x24xf32> to vector<24x24xbf16>
    %cst_200 = arith.constant dense<0.000000e+00> : vector<24x8xf32>
    %489 = tpu.matmul %488, %476, %cst_200 {dimension_numbers = #tpu.dot_dimension_numbers<[1], [0], [0], [1], [0, 0, 1, 1], [], []>} : vector<24x24xbf16>, vector<24x8xbf16>, vector<24x8xf32> -> vector<24x8xf32>
    %490 = vector.extract_strided_slice %432 {offsets = [0, 24], sizes = [24, 8], strides = [1, 1]} : vector<24x96xf32> to vector<24x8xf32>
    %491 = arith.truncf %490 : vector<24x8xf32> to vector<24x8xbf16>
    %492 = vector.extract_strided_slice %432 {offsets = [0, 56], sizes = [24, 8], strides = [1, 1]} : vector<24x96xf32> to vector<24x8xf32>
    %493 = arith.truncf %492 : vector<24x8xf32> to vector<24x8xbf16>
    %494 = vector.extract_strided_slice %432 {offsets = [0, 88], sizes = [24, 8], strides = [1, 1]} : vector<24x96xf32> to vector<24x8xf32>
    %495 = arith.truncf %494 : vector<24x8xf32> to vector<24x8xbf16>
    %cst_201 = arith.constant dense<0.000000e+00> : vector<24x24xf32>
    %496 = tpu.matmul %491, %493, %cst_201 {dimension_numbers = #tpu.dot_dimension_numbers<[1], [1], [0], [0], [0, 0, 1, 0], [], []>} : vector<24x8xbf16>, vector<24x8xbf16>, vector<24x24xf32> -> vector<24x24xf32>
    %cst_202 = arith.constant dense<0xFF800000> : vector<24xf32>
    %497 = vector.multi_reduction <maximumf>, %496, %cst_202 [1] : vector<24x24xf32> to vector<24xf32>
    %498 = vector.shape_cast %497 : vector<24xf32> to vector<24x1xf32>
    %499 = vector.broadcast %498 : vector<24x1xf32> to vector<24x24xf32>
    %500 = arith.subf %496, %499 : vector<24x24xf32>
    %501 = math.exp %500 : vector<24x24xf32>
    %cst_203 = arith.constant dense<0.000000e+00> : vector<24xf32>
    %502 = vector.multi_reduction <add>, %501, %cst_203 [1] : vector<24x24xf32> to vector<24xf32>
    %503 = vector.shape_cast %502 : vector<24xf32> to vector<24x1xf32>
    %504 = tpu.reciprocal %503 {approx = true} : vector<24x1xf32> -> vector<24x1xf32>
    %505 = vector.broadcast %504 : vector<24x1xf32> to vector<24x24xf32>
    %506 = arith.mulf %501, %505 : vector<24x24xf32>
    %507 = arith.truncf %506 : vector<24x24xf32> to vector<24x24xbf16>
    %cst_204 = arith.constant dense<0.000000e+00> : vector<24x8xf32>
    %508 = tpu.matmul %507, %495, %cst_204 {dimension_numbers = #tpu.dot_dimension_numbers<[1], [0], [0], [1], [0, 0, 1, 1], [], []>} : vector<24x24xbf16>, vector<24x8xbf16>, vector<24x8xf32> -> vector<24x8xf32>
    %509 = tpu.concatenate %451, %470, %489, %508 in 1 : vector<24x8xf32>, vector<24x8xf32>, vector<24x8xf32>, vector<24x8xf32> -> vector<24x32xf32>
    %510 = arith.truncf %509 : vector<24x32xf32> to vector<24x32xbf16>
    %c2_205 = arith.constant 2 : index
    %c0_206 = arith.constant 0 : index
    %c0_207 = arith.constant 0 : index
    %511 = vector.load %arg13[%c2_205, %c0_206, %c0_207] : memref<3x32x32xbf16, #tpu.memory_space<vmem>>, vector<1x32x32xbf16>
    %512 = vector.shape_cast %511 : vector<1x32x32xbf16> to vector<32x32xbf16>
    %cst_208 = arith.constant dense<0.000000e+00> : vector<24x32xf32>
    %513 = tpu.matmul %510, %512, %cst_208 {dimension_numbers = #tpu.dot_dimension_numbers<[1], [0], [0], [1], [0, 0, 1, 1], [], []>} : vector<24x32xbf16>, vector<32x32xbf16>, vector<24x32xf32> -> vector<24x32xf32>
    %c2_209 = arith.constant 2 : index
    %c0_210 = arith.constant 0 : index
    %c0_211 = arith.constant 0 : index
    %514 = vector.load %arg14[%c2_209, %c0_210, %c0_211] : memref<3x1x32xf32, #tpu.memory_space<vmem>>, vector<1x1x32xf32>
    %515 = vector.shape_cast %514 : vector<1x1x32xf32> to vector<1x32xf32>
    %516 = vector.broadcast %515 : vector<1x32xf32> to vector<24x32xf32>
    %517 = arith.addf %513, %516 : vector<24x32xf32>
    %518 = arith.addf %400, %517 : vector<24x32xf32>
    %c2_212 = arith.constant 2 : index
    %c0_213 = arith.constant 0 : index
    %c0_214 = arith.constant 0 : index
    %519 = vector.load %arg15[%c2_212, %c0_213, %c0_214] : memref<3x1x32xf32, #tpu.memory_space<vmem>>, vector<1x1x32xf32>
    %520 = vector.shape_cast %519 : vector<1x1x32xf32> to vector<1x32xf32>
    %c2_215 = arith.constant 2 : index
    %c0_216 = arith.constant 0 : index
    %c0_217 = arith.constant 0 : index
    %521 = vector.load %arg16[%c2_215, %c0_216, %c0_217] : memref<3x1x32xf32, #tpu.memory_space<vmem>>, vector<1x1x32xf32>
    %522 = vector.shape_cast %521 : vector<1x1x32xf32> to vector<1x32xf32>
    %cst_218 = arith.constant dense<0.000000e+00> : vector<24xf32>
    %523 = vector.multi_reduction <add>, %518, %cst_218 [1] : vector<24x32xf32> to vector<24xf32>
    %524 = vector.shape_cast %523 : vector<24xf32> to vector<24x1xf32>
    %cst_219 = arith.constant 3.200000e+01 : f32
    %525 = vector.broadcast %cst_219 : f32 to vector<24x1xf32>
    %526 = arith.divf %524, %525 : vector<24x1xf32>
    %527 = vector.broadcast %526 : vector<24x1xf32> to vector<24x32xf32>
    %528 = arith.subf %518, %527 : vector<24x32xf32>
    %529 = arith.mulf %528, %528 : vector<24x32xf32>
    %cst_220 = arith.constant dense<0.000000e+00> : vector<24xf32>
    %530 = vector.multi_reduction <add>, %529, %cst_220 [1] : vector<24x32xf32> to vector<24xf32>
    %531 = vector.shape_cast %530 : vector<24xf32> to vector<24x1xf32>
    %cst_221 = arith.constant 3.200000e+01 : f32
    %532 = vector.broadcast %cst_221 : f32 to vector<24x1xf32>
    %533 = arith.divf %531, %532 : vector<24x1xf32>
    %cst_222 = arith.constant 9.99999974E-6 : f32
    %534 = vector.broadcast %cst_222 : f32 to vector<24x1xf32>
    %535 = arith.addf %533, %534 : vector<24x1xf32>
    %536 = math.rsqrt %535 : vector<24x1xf32>
    %537 = vector.broadcast %536 : vector<24x1xf32> to vector<24x32xf32>
    %538 = arith.mulf %528, %537 : vector<24x32xf32>
    %539 = vector.broadcast %520 : vector<1x32xf32> to vector<24x32xf32>
    %540 = arith.mulf %538, %539 : vector<24x32xf32>
    %541 = vector.broadcast %522 : vector<1x32xf32> to vector<24x32xf32>
    %542 = arith.addf %540, %541 : vector<24x32xf32>
    %543 = arith.truncf %542 : vector<24x32xf32> to vector<24x32xbf16>
    %c2_223 = arith.constant 2 : index
    %c0_224 = arith.constant 0 : index
    %c0_225 = arith.constant 0 : index
    %544 = vector.load %arg17[%c2_223, %c0_224, %c0_225] : memref<3x32x128xbf16, #tpu.memory_space<vmem>>, vector<1x32x128xbf16>
    %545 = vector.shape_cast %544 : vector<1x32x128xbf16> to vector<32x128xbf16>
    %cst_226 = arith.constant dense<0.000000e+00> : vector<24x128xf32>
    %546 = tpu.matmul %543, %545, %cst_226 {dimension_numbers = #tpu.dot_dimension_numbers<[1], [0], [0], [1], [0, 0, 1, 1], [], []>} : vector<24x32xbf16>, vector<32x128xbf16>, vector<24x128xf32> -> vector<24x128xf32>
    %c2_227 = arith.constant 2 : index
    %c0_228 = arith.constant 0 : index
    %c0_229 = arith.constant 0 : index
    %547 = vector.load %arg18[%c2_227, %c0_228, %c0_229] : memref<3x1x128xf32, #tpu.memory_space<vmem>>, vector<1x1x128xf32>
    %548 = vector.shape_cast %547 : vector<1x1x128xf32> to vector<1x128xf32>
    %549 = vector.broadcast %548 : vector<1x128xf32> to vector<24x128xf32>
    %550 = arith.addf %546, %549 : vector<24x128xf32>
    %cst_230 = arith.constant 5.000000e-01 : f32
    %551 = vector.broadcast %cst_230 : f32 to vector<24x128xf32>
    %552 = arith.mulf %551, %550 : vector<24x128xf32>
    %cst_231 = arith.constant 4.471500e-02 : f32
    %553 = vector.broadcast %cst_231 : f32 to vector<24x128xf32>
    %554 = arith.mulf %553, %550 : vector<24x128xf32>
    %555 = arith.mulf %554, %550 : vector<24x128xf32>
    %556 = arith.mulf %555, %550 : vector<24x128xf32>
    %557 = arith.addf %550, %556 : vector<24x128xf32>
    %cst_232 = arith.constant 0.797884583 : f32
    %558 = vector.broadcast %cst_232 : f32 to vector<24x128xf32>
    %559 = arith.mulf %558, %557 : vector<24x128xf32>
    %560 = math.tanh %559 : vector<24x128xf32>
    %cst_233 = arith.constant 1.000000e+00 : f32
    %561 = vector.broadcast %cst_233 : f32 to vector<24x128xf32>
    %562 = arith.addf %561, %560 : vector<24x128xf32>
    %563 = arith.mulf %552, %562 : vector<24x128xf32>
    %564 = arith.truncf %563 : vector<24x128xf32> to vector<24x128xbf16>
    %c2_234 = arith.constant 2 : index
    %c0_235 = arith.constant 0 : index
    %c0_236 = arith.constant 0 : index
    %565 = vector.load %arg19[%c2_234, %c0_235, %c0_236] : memref<3x128x32xbf16, #tpu.memory_space<vmem>>, vector<1x128x32xbf16>
    %566 = vector.shape_cast %565 : vector<1x128x32xbf16> to vector<128x32xbf16>
    %cst_237 = arith.constant dense<0.000000e+00> : vector<24x32xf32>
    %567 = tpu.matmul %564, %566, %cst_237 {dimension_numbers = #tpu.dot_dimension_numbers<[1], [0], [0], [1], [0, 0, 1, 1], [], []>} : vector<24x128xbf16>, vector<128x32xbf16>, vector<24x32xf32> -> vector<24x32xf32>
    %c2_238 = arith.constant 2 : index
    %c0_239 = arith.constant 0 : index
    %c0_240 = arith.constant 0 : index
    %568 = vector.load %arg20[%c2_238, %c0_239, %c0_240] : memref<3x1x32xf32, #tpu.memory_space<vmem>>, vector<1x1x32xf32>
    %569 = vector.shape_cast %568 : vector<1x1x32xf32> to vector<1x32xf32>
    %570 = vector.broadcast %569 : vector<1x32xf32> to vector<24x32xf32>
    %571 = arith.addf %567, %570 : vector<24x32xf32>
    %572 = arith.addf %518, %571 : vector<24x32xf32>
    %c0_241 = arith.constant 0 : index
    %c0_242 = arith.constant 0 : index
    %573 = vector.load %arg21[%c0_241, %c0_242] : memref<1x32xf32, #tpu.memory_space<vmem>>, vector<1x32xf32>
    %c0_243 = arith.constant 0 : index
    %c0_244 = arith.constant 0 : index
    %574 = vector.load %arg22[%c0_243, %c0_244] : memref<1x32xf32, #tpu.memory_space<vmem>>, vector<1x32xf32>
    %cst_245 = arith.constant dense<0.000000e+00> : vector<24xf32>
    %575 = vector.multi_reduction <add>, %572, %cst_245 [1] : vector<24x32xf32> to vector<24xf32>
    %576 = vector.shape_cast %575 : vector<24xf32> to vector<24x1xf32>
    %cst_246 = arith.constant 3.200000e+01 : f32
    %577 = vector.broadcast %cst_246 : f32 to vector<24x1xf32>
    %578 = arith.divf %576, %577 : vector<24x1xf32>
    %579 = vector.broadcast %578 : vector<24x1xf32> to vector<24x32xf32>
    %580 = arith.subf %572, %579 : vector<24x32xf32>
    %581 = arith.mulf %580, %580 : vector<24x32xf32>
    %cst_247 = arith.constant dense<0.000000e+00> : vector<24xf32>
    %582 = vector.multi_reduction <add>, %581, %cst_247 [1] : vector<24x32xf32> to vector<24xf32>
    %583 = vector.shape_cast %582 : vector<24xf32> to vector<24x1xf32>
    %cst_248 = arith.constant 3.200000e+01 : f32
    %584 = vector.broadcast %cst_248 : f32 to vector<24x1xf32>
    %585 = arith.divf %583, %584 : vector<24x1xf32>
    %cst_249 = arith.constant 9.99999974E-6 : f32
    %586 = vector.broadcast %cst_249 : f32 to vector<24x1xf32>
    %587 = arith.addf %585, %586 : vector<24x1xf32>
    %588 = math.rsqrt %587 : vector<24x1xf32>
    %589 = vector.broadcast %588 : vector<24x1xf32> to vector<24x32xf32>
    %590 = arith.mulf %580, %589 : vector<24x32xf32>
    %591 = vector.broadcast %573 : vector<1x32xf32> to vector<24x32xf32>
    %592 = arith.mulf %590, %591 : vector<24x32xf32>
    %593 = vector.broadcast %574 : vector<1x32xf32> to vector<24x32xf32>
    %594 = arith.addf %592, %593 : vector<24x32xf32>
    %c0_250 = arith.constant 0 : index
    %c0_251 = arith.constant 0 : index
    %595 = vector.load %arg23[%c0_250, %c0_251] : memref<1x32xf32, #tpu.memory_space<vmem>>, vector<1x32xf32>
    %596 = vector.extract_strided_slice %594 {offsets = [0, 0], sizes = [16, 32], strides = [1, 1]} : vector<24x32xf32> to vector<16x32xf32>
    %597 = vector.broadcast %595 : vector<1x32xf32> to vector<16x32xf32>
    %598 = arith.mulf %597, %596 : vector<16x32xf32>
    %599 = arith.addf %23, %598 : vector<16x32xf32>
    %c0_252 = arith.constant 0 : index
    %c0_253 = arith.constant 0 : index
    %c0_254 = arith.constant 0 : index
    %600 = vector.load %arg25[%c0_252, %c0_253, %c0_254] : memref<1x16x32xf32, #tpu.memory_space<vmem>>, vector<1x16x32xf32>
    %601 = vector.shape_cast %600 : vector<1x16x32xf32> to vector<16x32xf32>
    %602 = vector.shape_cast %599 : vector<16x32xf32> to vector<1x16x32xf32>
    tpu.vector_store %arg25[%c0_252, %c0_253, %c0_254], %602 {strides = array<i32>} : memref<1x16x32xf32, #tpu.memory_space<vmem>>, vector<1x16x32xf32>,
    %c0_255 = arith.constant 0 : index
    %c0_256 = arith.constant 0 : index
    %603 = vector.load %arg24[%c0_255, %c0_256] : memref<1x32xf32, #tpu.memory_space<vmem>>, vector<1x32xf32>
    %604 = vector.extract_strided_slice %594 {offsets = [16, 0], sizes = [8, 32], strides = [1, 1]} : vector<24x32xf32> to vector<8x32xf32>
    %605 = vector.broadcast %603 : vector<1x32xf32> to vector<8x32xf32>
    %606 = arith.mulf %605, %604 : vector<8x32xf32>
    %607 = arith.addf %47, %606 : vector<8x32xf32>
    %c0_257 = arith.constant 0 : index
    %c0_258 = arith.constant 0 : index
    %c0_259 = arith.constant 0 : index
    %608 = vector.load %arg26[%c0_257, %c0_258, %c0_259] : memref<1x8x32xf32, #tpu.memory_space<vmem>>, vector<1x8x32xf32>
    %609 = vector.shape_cast %608 : vector<1x8x32xf32> to vector<8x32xf32>
    %610 = vector.shape_cast %607 : vector<8x32xf32> to vector<1x8x32xf32>
    tpu.vector_store %arg26[%c0_257, %c0_258, %c0_259], %610 {strides = array<i32>} : memref<1x8x32xf32, #tpu.memory_space<vmem>>, vector<1x8x32xf32>,
    return
  }
  func.func @transform_0(%arg0: i32) -> (i32, i32, i32) {
    %c0_i32 = arith.constant 0 : i32
    %c0_i32_0 = arith.constant 0 : i32
    %c0_i32_1 = arith.constant 0 : i32
    return %arg0, %c0_i32, %c0_i32_0 : i32, i32, i32
  }
  func.func @transform_1(%arg0: i32) -> (i32, i32, i32) {
    %c0_i32 = arith.constant 0 : i32
    %c0_i32_0 = arith.constant 0 : i32
    %c0_i32_1 = arith.constant 0 : i32
    return %arg0, %c0_i32, %c0_i32_0 : i32, i32, i32
  }
  func.func @transform_2(%arg0: i32) -> (i32, i32, i32) {
    %c0_i32 = arith.constant 0 : i32
    %c0_i32_0 = arith.constant 0 : i32
    %c0_i32_1 = arith.constant 0 : i32
    return %arg0, %c0_i32, %c0_i32_0 : i32, i32, i32
  }
  func.func @transform_3(%arg0: i32) -> (i32, i32, i32) {
    %c0_i32 = arith.constant 0 : i32
    %c0_i32_0 = arith.constant 0 : i32
    %c0_i32_1 = arith.constant 0 : i32
    return %arg0, %c0_i32, %c0_i32_0 : i32, i32, i32
  }
  func.func @transform_4(%arg0: i32) -> (i32, i32) {
    %c0_i32 = arith.constant 0 : i32
    %c0_i32_0 = arith.constant 0 : i32
    %c0_i32_1 = arith.constant 0 : i32
    return %c0_i32, %c0_i32_0 : i32, i32
  }
  func.func @transform_5(%arg0: i32) -> (i32, i32) {
    %c0_i32 = arith.constant 0 : i32
    %c0_i32_0 = arith.constant 0 : i32
    %c0_i32_1 = arith.constant 0 : i32
    return %c0_i32, %c0_i32_0 : i32, i32
  }
  func.func @transform_6(%arg0: i32) -> (i32, i32) {
    %c0_i32 = arith.constant 0 : i32
    %c0_i32_0 = arith.constant 0 : i32
    %c0_i32_1 = arith.constant 0 : i32
    return %c0_i32, %c0_i32_0 : i32, i32
  }
  func.func @transform_7(%arg0: i32) -> (i32, i32) {
    %c0_i32 = arith.constant 0 : i32
    %c0_i32_0 = arith.constant 0 : i32
    %c0_i32_1 = arith.constant 0 : i32
    return %c0_i32, %c0_i32_0 : i32, i32
  }
  func.func @transform_8(%arg0: i32) -> (i32, i32, i32) {
    %c0_i32 = arith.constant 0 : i32
    %c0_i32_0 = arith.constant 0 : i32
    %c0_i32_1 = arith.constant 0 : i32
    %c0_i32_2 = arith.constant 0 : i32
    return %c0_i32, %c0_i32_0, %c0_i32_1 : i32, i32, i32
  }
  func.func @transform_9(%arg0: i32) -> (i32, i32, i32) {
    %c0_i32 = arith.constant 0 : i32
    %c0_i32_0 = arith.constant 0 : i32
    %c0_i32_1 = arith.constant 0 : i32
    %c0_i32_2 = arith.constant 0 : i32
    return %c0_i32, %c0_i32_0, %c0_i32_1 : i32, i32, i32
  }
  func.func @transform_10(%arg0: i32) -> (i32, i32, i32) {
    %c0_i32 = arith.constant 0 : i32
    %c0_i32_0 = arith.constant 0 : i32
    %c0_i32_1 = arith.constant 0 : i32
    %c0_i32_2 = arith.constant 0 : i32
    return %c0_i32, %c0_i32_0, %c0_i32_1 : i32, i32, i32
  }
  func.func @transform_11(%arg0: i32) -> (i32, i32, i32) {
    %c0_i32 = arith.constant 0 : i32
    %c0_i32_0 = arith.constant 0 : i32
    %c0_i32_1 = arith.constant 0 : i32
    %c0_i32_2 = arith.constant 0 : i32
    return %c0_i32, %c0_i32_0, %c0_i32_1 : i32, i32, i32
  }
  func.func @transform_12(%arg0: i32) -> (i32, i32, i32) {
    %c0_i32 = arith.constant 0 : i32
    %c0_i32_0 = arith.constant 0 : i32
    %c0_i32_1 = arith.constant 0 : i32
    %c0_i32_2 = arith.constant 0 : i32
    return %c0_i32, %c0_i32_0, %c0_i32_1 : i32, i32, i32
  }
  func.func @transform_13(%arg0: i32) -> (i32, i32, i32) {
    %c0_i32 = arith.constant 0 : i32
    %c0_i32_0 = arith.constant 0 : i32
    %c0_i32_1 = arith.constant 0 : i32
    %c0_i32_2 = arith.constant 0 : i32
    return %c0_i32, %c0_i32_0, %c0_i32_1 : i32, i32, i32
  }
  func.func @transform_14(%arg0: i32) -> (i32, i32, i32) {
    %c0_i32 = arith.constant 0 : i32
    %c0_i32_0 = arith.constant 0 : i32
    %c0_i32_1 = arith.constant 0 : i32
    %c0_i32_2 = arith.constant 0 : i32
    return %c0_i32, %c0_i32_0, %c0_i32_1 : i32, i32, i32
  }
  func.func @transform_15(%arg0: i32) -> (i32, i32, i32) {
    %c0_i32 = arith.constant 0 : i32
    %c0_i32_0 = arith.constant 0 : i32
    %c0_i32_1 = arith.constant 0 : i32
    %c0_i32_2 = arith.constant 0 : i32
    return %c0_i32, %c0_i32_0, %c0_i32_1 : i32, i32, i32
  }
  func.func @transform_16(%arg0: i32) -> (i32, i32, i32) {
    %c0_i32 = arith.constant 0 : i32
    %c0_i32_0 = arith.constant 0 : i32
    %c0_i32_1 = arith.constant 0 : i32
    %c0_i32_2 = arith.constant 0 : i32
    return %c0_i32, %c0_i32_0, %c0_i32_1 : i32, i32, i32
  }
  func.func @transform_17(%arg0: i32) -> (i32, i32, i32) {
    %c0_i32 = arith.constant 0 : i32
    %c0_i32_0 = arith.constant 0 : i32
    %c0_i32_1 = arith.constant 0 : i32
    %c0_i32_2 = arith.constant 0 : i32
    return %c0_i32, %c0_i32_0, %c0_i32_1 : i32, i32, i32
  }
  func.func @transform_18(%arg0: i32) -> (i32, i32, i32) {
    %c0_i32 = arith.constant 0 : i32
    %c0_i32_0 = arith.constant 0 : i32
    %c0_i32_1 = arith.constant 0 : i32
    %c0_i32_2 = arith.constant 0 : i32
    return %c0_i32, %c0_i32_0, %c0_i32_1 : i32, i32, i32
  }
  func.func @transform_19(%arg0: i32) -> (i32, i32, i32) {
    %c0_i32 = arith.constant 0 : i32
    %c0_i32_0 = arith.constant 0 : i32
    %c0_i32_1 = arith.constant 0 : i32
    %c0_i32_2 = arith.constant 0 : i32
    return %c0_i32, %c0_i32_0, %c0_i32_1 : i32, i32, i32
  }
  func.func @transform_20(%arg0: i32) -> (i32, i32) {
    %c0_i32 = arith.constant 0 : i32
    %c0_i32_0 = arith.constant 0 : i32
    %c0_i32_1 = arith.constant 0 : i32
    return %c0_i32, %c0_i32_0 : i32, i32
  }
  func.func @transform_21(%arg0: i32) -> (i32, i32) {
    %c0_i32 = arith.constant 0 : i32
    %c0_i32_0 = arith.constant 0 : i32
    %c0_i32_1 = arith.constant 0 : i32
    return %c0_i32, %c0_i32_0 : i32, i32
  }
  func.func @transform_22(%arg0: i32) -> (i32, i32) {
    %c0_i32 = arith.constant 0 : i32
    %c0_i32_0 = arith.constant 0 : i32
    %c0_i32_1 = arith.constant 0 : i32
    return %c0_i32, %c0_i32_0 : i32, i32
  }
  func.func @transform_23(%arg0: i32) -> (i32, i32) {
    %c0_i32 = arith.constant 0 : i32
    %c0_i32_0 = arith.constant 0 : i32
    %c0_i32_1 = arith.constant 0 : i32
    return %c0_i32, %c0_i32_0 : i32, i32
  }
  func.func @transform_24(%arg0: i32) -> (i32, i32, i32) {
    %c0_i32 = arith.constant 0 : i32
    %c0_i32_0 = arith.constant 0 : i32
    %c0_i32_1 = arith.constant 0 : i32
    return %arg0, %c0_i32, %c0_i32_0 : i32, i32, i32
  }
  func.func @transform_25(%arg0: i32) -> (i32, i32, i32) {
    %c0_i32 = arith.constant 0 : i32
    %c0_i32_0 = arith.constant 0 : i32
    %c0_i32_1 = arith.constant 0 : i32
    return %arg0, %c0_i32, %c0_i32_0 : i32, i32, i32
  }
}

module attributes {stable_mosaic.version = 11 : i64} {
  func.func @_level_kernel(%arg0: i32, %arg1: memref<1x16x32xf32, #tpu.memory_space<vmem>>, %arg2: memref<1x8x32xf32, #tpu.memory_space<vmem>>, %arg3: memref<1x16x32xf32, #tpu.memory_space<vmem>>, %arg4: memref<1x8x32xf32, #tpu.memory_space<vmem>>, %arg5: memref<1x32xf32, #tpu.memory_space<vmem>>, %arg6: memref<1x32xf32, #tpu.memory_space<vmem>>, %arg7: memref<1x32xf32, #tpu.memory_space<vmem>>, %arg8: memref<1x32xf32, #tpu.memory_space<vmem>>, %arg9: memref<3x1x32xf32, #tpu.memory_space<vmem>>, %arg10: memref<3x1x32xf32, #tpu.memory_space<vmem>>, %arg11: memref<3x32x96xbf16, #tpu.memory_space<vmem>>, %arg12: memref<3x1x96xf32, #tpu.memory_space<vmem>>, %arg13: memref<3x32x32xbf16, #tpu.memory_space<vmem>>, %arg14: memref<3x1x32xf32, #tpu.memory_space<vmem>>, %arg15: memref<3x1x32xf32, #tpu.memory_space<vmem>>, %arg16: memref<3x1x32xf32, #tpu.memory_space<vmem>>, %arg17: memref<3x32x128xbf16, #tpu.memory_space<vmem>>, %arg18: memref<3x1x128xf32, #tpu.memory_space<vmem>>, %arg19: memref<3x128x32xbf16, #tpu.memory_space<vmem>>, %arg20: memref<3x1x32xf32, #tpu.memory_space<vmem>>, %arg21: memref<1x32xf32, #tpu.memory_space<vmem>>, %arg22: memref<1x32xf32, #tpu.memory_space<vmem>>, %arg23: memref<1x32xf32, #tpu.memory_space<vmem>>, %arg24: memref<1x32xf32, #tpu.memory_space<vmem>>, %arg25: memref<1x16x32xf32, #tpu.memory_space<vmem>>, %arg26: memref<1x8x32xf32, #tpu.memory_space<vmem>>, %arg27: memref<24x32xf32, #tpu.memory_space<vmem>>) attributes {dimension_semantics = [#tpu.dimension_semantics<parallel>], iteration_bounds = array<i64: 2>, scalar_prefetch = 0 : i64, scratch_operands = 1 : i64, tpu.core_type = #tpu.core_type<tc>, window_params = [{transform_indices = @transform_0, window_bounds = array<i64: 1, 16, 32>}, {transform_indices = @transform_1, window_bounds = array<i64: 1, 8, 32>}, {transform_indices = @transform_2, window_bounds = array<i64: 1, 16, 32>}, {transform_indices = @transform_3, window_bounds = array<i64: 1, 8, 32>}, {pipeline_mode = #tpu.pipeline_mode<synchronous>, transform_indices = @transform_4, window_bounds = array<i64: 1, 32>}, {pipeline_mode = #tpu.pipeline_mode<synchronous>, transform_indices = @transform_5, window_bounds = array<i64: 1, 32>}, {pipeline_mode = #tpu.pipeline_mode<synchronous>, transform_indices = @transform_6, window_bounds = array<i64: 1, 32>}, {pipeline_mode = #tpu.pipeline_mode<synchronous>, transform_indices = @transform_7, window_bounds = array<i64: 1, 32>}, {pipeline_mode = #tpu.pipeline_mode<synchronous>, transform_indices = @transform_8, window_bounds = array<i64: 3, 1, 32>}, {pipeline_mode = #tpu.pipeline_mode<synchronous>, transform_indices = @transform_9, window_bounds = array<i64: 3, 1, 32>}, {pipeline_mode = #tpu.pipeline_mode<synchronous>, transform_indices = @transform_10, window_bounds = array<i64: 3, 32, 96>}, {pipeline_mode = #tpu.pipeline_mode<synchronous>, transform_indices = @transform_11, window_bounds = array<i64: 3, 1, 96>}, {pipeline_mode = #tpu.pipeline_mode<synchronous>, transform_indices = @transform_12, window_bounds = array<i64: 3, 32, 32>}, {pipeline_mode = #tpu.pipeline_mode<synchronous>, transform_indices = @transform_13, window_bounds = array<i64: 3, 1, 32>}, {pipeline_mode = #tpu.pipeline_mode<synchronous>, transform_indices = @transform_14, window_bounds = array<i64: 3, 1, 32>}, {pipeline_mode = #tpu.pipeline_mode<synchronous>, transform_indices = @transform_15, window_bounds = array<i64: 3, 1, 32>}, {pipeline_mode = #tpu.pipeline_mode<synchronous>, transform_indices = @transform_16, window_bounds = array<i64: 3, 32, 128>}, {pipeline_mode = #tpu.pipeline_mode<synchronous>, transform_indices = @transform_17, window_bounds = array<i64: 3, 1, 128>}, {pipeline_mode = #tpu.pipeline_mode<synchronous>, transform_indices = @transform_18, window_bounds = array<i64: 3, 128, 32>}, {pipeline_mode = #tpu.pipeline_mode<synchronous>, transform_indices = @transform_19, window_bounds = array<i64: 3, 1, 32>}, {pipeline_mode = #tpu.pipeline_mode<synchronous>, transform_indices = @transform_20, window_bounds = array<i64: 1, 32>}, {pipeline_mode = #tpu.pipeline_mode<synchronous>, transform_indices = @transform_21, window_bounds = array<i64: 1, 32>}, {pipeline_mode = #tpu.pipeline_mode<synchronous>, transform_indices = @transform_22, window_bounds = array<i64: 1, 32>}, {pipeline_mode = #tpu.pipeline_mode<synchronous>, transform_indices = @transform_23, window_bounds = array<i64: 1, 32>}, {transform_indices = @transform_24, window_bounds = array<i64: 1, 16, 32>}, {transform_indices = @transform_25, window_bounds = array<i64: 1, 8, 32>}]} {
    %c0 = arith.constant 0 : index
    %c0_0 = arith.constant 0 : index
    %c0_1 = arith.constant 0 : index
    %0 = vector.load %arg1[%c0, %c0_0, %c0_1] : memref<1x16x32xf32, #tpu.memory_space<vmem>>, vector<1x16x32xf32>
    %1 = vector.shape_cast %0 : vector<1x16x32xf32> to vector<16x32xf32>
    %c0_2 = arith.constant 0 : index
    %c0_3 = arith.constant 0 : index
    %2 = vector.load %arg5[%c0_2, %c0_3] : memref<1x32xf32, #tpu.memory_space<vmem>>, vector<1x32xf32>
    %c0_4 = arith.constant 0 : index
    %c0_5 = arith.constant 0 : index
    %3 = vector.load %arg6[%c0_4, %c0_5] : memref<1x32xf32, #tpu.memory_space<vmem>>, vector<1x32xf32>
    %cst = arith.constant dense<0.000000e+00> : vector<16xf32>
    %4 = vector.multi_reduction <add>, %1, %cst [1] : vector<16x32xf32> to vector<16xf32>
    %5 = vector.shape_cast %4 : vector<16xf32> to vector<16x1xf32>
    %cst_6 = arith.constant 3.200000e+01 : f32
    %6 = vector.broadcast %cst_6 : f32 to vector<16x1xf32>
    %7 = arith.divf %5, %6 : vector<16x1xf32>
    %8 = vector.broadcast %7 : vector<16x1xf32> to vector<16x32xf32>
    %9 = arith.subf %1, %8 : vector<16x32xf32>
    %10 = arith.mulf %9, %9 : vector<16x32xf32>
    %cst_7 = arith.constant dense<0.000000e+00> : vector<16xf32>
    %11 = vector.multi_reduction <add>, %10, %cst_7 [1] : vector<16x32xf32> to vector<16xf32>
    %12 = vector.shape_cast %11 : vector<16xf32> to vector<16x1xf32>
    %cst_8 = arith.constant 3.200000e+01 : f32
    %13 = vector.broadcast %cst_8 : f32 to vector<16x1xf32>
    %14 = arith.divf %12, %13 : vector<16x1xf32>
    %cst_9 = arith.constant 9.99999974E-6 : f32
    %15 = vector.broadcast %cst_9 : f32 to vector<16x1xf32>
    %16 = arith.addf %14, %15 : vector<16x1xf32>
    %17 = math.rsqrt %16 : vector<16x1xf32>
    %18 = vector.broadcast %17 : vector<16x1xf32> to vector<16x32xf32>
    %19 = arith.mulf %9, %18 : vector<16x32xf32>
    %20 = vector.broadcast %2 : vector<1x32xf32> to vector<16x32xf32>
    %21 = arith.mulf %19, %20 : vector<16x32xf32>
    %22 = vector.broadcast %3 : vector<1x32xf32> to vector<16x32xf32>
    %23 = arith.addf %21, %22 : vector<16x32xf32>
    %c0_10 = arith.constant 0 : index
    %c0_11 = arith.constant 0 : index
    %c0_12 = arith.constant 0 : index
    %24 = vector.load %arg2[%c0_10, %c0_11, %c0_12] : memref<1x8x32xf32, #tpu.memory_space<vmem>>, vector<1x8x32xf32>
    %25 = vector.shape_cast %24 : vector<1x8x32xf32> to vector<8x32xf32>
    %c0_13 = arith.constant 0 : index
    %c0_14 = arith.constant 0 : index
    %26 = vector.load %arg7[%c0_13, %c0_14] : memref<1x32xf32, #tpu.memory_space<vmem>>, vector<1x32xf32>
    %c0_15 = arith.constant 0 : index
    %c0_16 = arith.constant 0 : index
    %27 = vector.load %arg8[%c0_15, %c0_16] : memref<1x32xf32, #tpu.memory_space<vmem>>, vector<1x32xf32>
    %cst_17 = arith.constant dense<0.000000e+00> : vector<8xf32>
    %28 = vector.multi_reduction <add>, %25, %cst_17 [1] : vector<8x32xf32> to vector<8xf32>
    %29 = vector.shape_cast %28 : vector<8xf32> to vector<8x1xf32>
    %cst_18 = arith.constant 3.200000e+01 : f32
    %30 = vector.broadcast %cst_18 : f32 to vector<8x1xf32>
    %31 = arith.divf %29, %30 : vector<8x1xf32>
    %32 = vector.broadcast %31 : vector<8x1xf32> to vector<8x32xf32>
    %33 = arith.subf %25, %32 : vector<8x32xf32>
    %34 = arith.mulf %33, %33 : vector<8x32xf32>
    %cst_19 = arith.constant dense<0.000000e+00> : vector<8xf32>
    %35 = vector.multi_reduction <add>, %34, %cst_19 [1] : vector<8x32xf32> to vector<8xf32>
    %36 = vector.shape_cast %35 : vector<8xf32> to vector<8x1xf32>
    %cst_20 = arith.constant 3.200000e+01 : f32
    %37 = vector.broadcast %cst_20 : f32 to vector<8x1xf32>
    %38 = arith.divf %36, %37 : vector<8x1xf32>
    %cst_21 = arith.constant 9.99999974E-6 : f32
    %39 = vector.broadcast %cst_21 : f32 to vector<8x1xf32>
    %40 = arith.addf %38, %39 : vector<8x1xf32>
    %41 = math.rsqrt %40 : vector<8x1xf32>
    %42 = vector.broadcast %41 : vector<8x1xf32> to vector<8x32xf32>
    %43 = arith.mulf %33, %42 : vector<8x32xf32>
    %44 = vector.broadcast %26 : vector<1x32xf32> to vector<8x32xf32>
    %45 = arith.mulf %43, %44 : vector<8x32xf32>
    %46 = vector.broadcast %27 : vector<1x32xf32> to vector<8x32xf32>
    %47 = arith.addf %45, %46 : vector<8x32xf32>
    %c0_22 = arith.constant 0 : index
    %c0_23 = arith.constant 0 : index
    %c0_24 = arith.constant 0 : index
    %48 = vector.load %arg3[%c0_22, %c0_23, %c0_24] : memref<1x16x32xf32, #tpu.memory_space<vmem>>, vector<1x16x32xf32>
    %49 = vector.shape_cast %48 : vector<1x16x32xf32> to vector<16x32xf32>
    %50 = arith.addf %23, %49 : vector<16x32xf32>
    %c0_25 = arith.constant 0 : index
    %c0_26 = arith.constant 0 : index
    %51 = vector.load %arg27[%c0_25, %c0_26] : memref<24x32xf32, #tpu.memory_space<vmem>>, vector<16x32xf32>
    tpu.vector_store %arg27[%c0_25, %c0_26], %50 {strides = array<i32>} : memref<24x32xf32, #tpu.memory_space<vmem>>, vector<16x32xf32>,
    %c0_27 = arith.constant 0 : index
    %c0_28 = arith.constant 0 : index
    %c0_29 = arith.constant 0 : index
    %52 = vector.load %arg4[%c0_27, %c0_28, %c0_29] : memref<1x8x32xf32, #tpu.memory_space<vmem>>, vector<1x8x32xf32>
    %53 = vector.shape_cast %52 : vector<1x8x32xf32> to vector<8x32xf32>
    %54 = arith.addf %47, %53 : vector<8x32xf32>
    %c16 = arith.constant 16 : index
    %c0_30 = arith.constant 0 : index
    %55 = vector.load %arg27[%c16, %c0_30] : memref<24x32xf32, #tpu.memory_space<vmem>>, vector<8x32xf32>
    tpu.vector_store %arg27[%c16, %c0_30], %54 {strides = array<i32>} : memref<24x32xf32, #tpu.memory_space<vmem>>, vector<8x32xf32>,
    %c0_31 = arith.constant 0 : index
    %c0_32 = arith.constant 0 : index
    %56 = vector.load %arg27[%c0_31, %c0_32] : memref<24x32xf32, #tpu.memory_space<vmem>>, vector<24x32xf32>
    %c0_33 = arith.constant 0 : index
    %c0_34 = arith.constant 0 : index
    %c0_35 = arith.constant 0 : index
    %57 = vector.load %arg9[%c0_33, %c0_34, %c0_35] : memref<3x1x32xf32, #tpu.memory_space<vmem>>, vector<1x1x32xf32>
    %58 = vector.shape_cast %57 : vector<1x1x32xf32> to vector<1x32xf32>
    %c0_36 = arith.constant 0 : index
    %c0_37 = arith.constant 0 : index
    %c0_38 = arith.constant 0 : index
    %59 = vector.load %arg10[%c0_36, %c0_37, %c0_38] : memref<3x1x32xf32, #tpu.memory_space<vmem>>, vector<1x1x32xf32>
    %60 = vector.shape_cast %59 : vector<1x1x32xf32> to vector<1x32xf32>
    %cst_39 = arith.constant dense<0.000000e+00> : vector<24xf32>
    %61 = vector.multi_reduction <add>, %56, %cst_39 [1] : vector<24x32xf32> to vector<24xf32>
    %62 = vector.shape_cast %61 : vector<24xf32> to vector<24x1xf32>
    %cst_40 = arith.constant 3.200000e+01 : f32
    %63 = vector.broadcast %cst_40 : f32 to vector<24x1xf32>
    %64 = arith.divf %62, %63 : vector<24x1xf32>
    %65 = vector.broadcast %64 : vector<24x1xf32> to vector<24x32xf32>
    %66 = arith.subf %56, %65 : vector<24x32xf32>
    %67 = arith.mulf %66, %66 : vector<24x32xf32>
    %cst_41 = arith.constant dense<0.000000e+00> : vector<24xf32>
    %68 = vector.multi_reduction <add>, %67, %cst_41 [1] : vector<24x32xf32> to vector<24xf32>
    %69 = vector.shape_cast %68 : vector<24xf32> to vector<24x1xf32>
    %cst_42 = arith.constant 3.200000e+01 : f32
    %70 = vector.broadcast %cst_42 : f32 to vector<24x1xf32>
    %71 = arith.divf %69, %70 : vector<24x1xf32>
    %cst_43 = arith.constant 9.99999974E-6 : f32
    %72 = vector.broadcast %cst_43 : f32 to vector<24x1xf32>
    %73 = arith.addf %71, %72 : vector<24x1xf32>
    %74 = math.rsqrt %73 : vector<24x1xf32>
    %75 = vector.broadcast %74 : vector<24x1xf32> to vector<24x32xf32>
    %76 = arith.mulf %66, %75 : vector<24x32xf32>
    %77 = vector.broadcast %58 : vector<1x32xf32> to vector<24x32xf32>
    %78 = arith.mulf %76, %77 : vector<24x32xf32>
    %79 = vector.broadcast %60 : vector<1x32xf32> to vector<24x32xf32>
    %80 = arith.addf %78, %79 : vector<24x32xf32>
    %81 = arith.truncf %80 : vector<24x32xf32> to vector<24x32xbf16>
    %c0_44 = arith.constant 0 : index
    %c0_45 = arith.constant 0 : index
    %c0_46 = arith.constant 0 : index
    %82 = vector.load %arg11[%c0_44, %c0_45, %c0_46] : memref<3x32x96xbf16, #tpu.memory_space<vmem>>, vector<1x32x96xbf16>
    %83 = vector.shape_cast %82 : vector<1x32x96xbf16> to vector<32x96xbf16>
    %cst_47 = arith.constant dense<0.000000e+00> : vector<24x96xf32>
    %84 = tpu.matmul %81, %83, %cst_47 {dimension_numbers = #tpu.dot_dimension_numbers<[1], [0], [0], [1], [0, 0, 1, 1], [], []>} : vector<24x32xbf16>, vector<32x96xbf16>, vector<24x96xf32> -> vector<24x96xf32>
    %c0_48 = arith.constant 0 : index
    %c0_49 = arith.constant 0 : index
    %c0_50 = arith.constant 0 : index
    %85 = vector.load %arg12[%c0_48, %c0_49, %c0_50] : memref<3x1x96xf32, #tpu.memory_space<vmem>>, vector<1x1x96xf32>
    %86 = vector.shape_cast %85 : vector<1x1x96xf32> to vector<1x96xf32>
    %87 = vector.broadcast %86 : vector<1x96xf32> to vector<24x96xf32>
    %88 = arith.addf %84, %87 : vector<24x96xf32>
    %89 = vector.extract_strided_slice %88 {offsets = [0, 0], sizes = [24, 8], strides = [1, 1]} : vector<24x96xf32> to vector<24x8xf32>
    %90 = arith.truncf %89 : vector<24x8xf32> to vector<24x8xbf16>
    %91 = vector.extract_strided_slice %88 {offsets = [0, 32], sizes = [24, 8], strides = [1, 1]} : vector<24x96xf32> to vector<24x8xf32>
    %92 = arith.truncf %91 : vector<24x8xf32> to vector<24x8xbf16>
    %93 = vector.extract_strided_slice %88 {offsets = [0, 64], sizes = [24, 8], strides = [1, 1]} : vector<24x96xf32> to vector<24x8xf32>
    %94 = arith.truncf %93 : vector<24x8xf32> to vector<24x8xbf16>
    %cst_51 = arith.constant dense<0.000000e+00> : vector<24x24xf32>
    %95 = tpu.matmul %90, %92, %cst_51 {dimension_numbers = #tpu.dot_dimension_numbers<[1], [1], [0], [0], [0, 0, 1, 0], [], []>} : vector<24x8xbf16>, vector<24x8xbf16>, vector<24x24xf32> -> vector<24x24xf32>
    %cst_52 = arith.constant dense<0xFF800000> : vector<24xf32>
    %96 = vector.multi_reduction <maximumf>, %95, %cst_52 [1] : vector<24x24xf32> to vector<24xf32>
    %97 = vector.shape_cast %96 : vector<24xf32> to vector<24x1xf32>
    %98 = vector.broadcast %97 : vector<24x1xf32> to vector<24x24xf32>
    %99 = arith.subf %95, %98 : vector<24x24xf32>
    %100 = math.exp %99 : vector<24x24xf32>
    %cst_53 = arith.constant dense<0.000000e+00> : vector<24xf32>
    %101 = vector.multi_reduction <add>, %100, %cst_53 [1] : vector<24x24xf32> to vector<24xf32>
    %102 = vector.shape_cast %101 : vector<24xf32> to vector<24x1xf32>
    %103 = tpu.reciprocal %102 {approx = true} : vector<24x1xf32> -> vector<24x1xf32>
    %104 = vector.broadcast %103 : vector<24x1xf32> to vector<24x24xf32>
    %105 = arith.mulf %100, %104 : vector<24x24xf32>
    %106 = arith.truncf %105 : vector<24x24xf32> to vector<24x24xbf16>
    %cst_54 = arith.constant dense<0.000000e+00> : vector<24x8xf32>
    %107 = tpu.matmul %106, %94, %cst_54 {dimension_numbers = #tpu.dot_dimension_numbers<[1], [0], [0], [1], [0, 0, 1, 1], [], []>} : vector<24x24xbf16>, vector<24x8xbf16>, vector<24x8xf32> -> vector<24x8xf32>
    %108 = vector.extract_strided_slice %88 {offsets = [0, 8], sizes = [24, 8], strides = [1, 1]} : vector<24x96xf32> to vector<24x8xf32>
    %109 = arith.truncf %108 : vector<24x8xf32> to vector<24x8xbf16>
    %110 = vector.extract_strided_slice %88 {offsets = [0, 40], sizes = [24, 8], strides = [1, 1]} : vector<24x96xf32> to vector<24x8xf32>
    %111 = arith.truncf %110 : vector<24x8xf32> to vector<24x8xbf16>
    %112 = vector.extract_strided_slice %88 {offsets = [0, 72], sizes = [24, 8], strides = [1, 1]} : vector<24x96xf32> to vector<24x8xf32>
    %113 = arith.truncf %112 : vector<24x8xf32> to vector<24x8xbf16>
    %cst_55 = arith.constant dense<0.000000e+00> : vector<24x24xf32>
    %114 = tpu.matmul %109, %111, %cst_55 {dimension_numbers = #tpu.dot_dimension_numbers<[1], [1], [0], [0], [0, 0, 1, 0], [], []>} : vector<24x8xbf16>, vector<24x8xbf16>, vector<24x24xf32> -> vector<24x24xf32>
    %cst_56 = arith.constant dense<0xFF800000> : vector<24xf32>
    %115 = vector.multi_reduction <maximumf>, %114, %cst_56 [1] : vector<24x24xf32> to vector<24xf32>
    %116 = vector.shape_cast %115 : vector<24xf32> to vector<24x1xf32>
    %117 = vector.broadcast %116 : vector<24x1xf32> to vector<24x24xf32>
    %118 = arith.subf %114, %117 : vector<24x24xf32>
    %119 = math.exp %118 : vector<24x24xf32>
    %cst_57 = arith.constant dense<0.000000e+00> : vector<24xf32>
    %120 = vector.multi_reduction <add>, %119, %cst_57 [1] : vector<24x24xf32> to vector<24xf32>
    %121 = vector.shape_cast %120 : vector<24xf32> to vector<24x1xf32>
    %122 = tpu.reciprocal %121 {approx = true} : vector<24x1xf32> -> vector<24x1xf32>
    %123 = vector.broadcast %122 : vector<24x1xf32> to vector<24x24xf32>
    %124 = arith.mulf %119, %123 : vector<24x24xf32>
    %125 = arith.truncf %124 : vector<24x24xf32> to vector<24x24xbf16>
    %cst_58 = arith.constant dense<0.000000e+00> : vector<24x8xf32>
    %126 = tpu.matmul %125, %113, %cst_58 {dimension_numbers = #tpu.dot_dimension_numbers<[1], [0], [0], [1], [0, 0, 1, 1], [], []>} : vector<24x24xbf16>, vector<24x8xbf16>, vector<24x8xf32> -> vector<24x8xf32>
    %127 = vector.extract_strided_slice %88 {offsets = [0, 16], sizes = [24, 8], strides = [1, 1]} : vector<24x96xf32> to vector<24x8xf32>
    %128 = arith.truncf %127 : vector<24x8xf32> to vector<24x8xbf16>
    %129 = vector.extract_strided_slice %88 {offsets = [0, 48], sizes = [24, 8], strides = [1, 1]} : vector<24x96xf32> to vector<24x8xf32>
    %130 = arith.truncf %129 : vector<24x8xf32> to vector<24x8xbf16>
    %131 = vector.extract_strided_slice %88 {offsets = [0, 80], sizes = [24, 8], strides = [1, 1]} : vector<24x96xf32> to vector<24x8xf32>
    %132 = arith.truncf %131 : vector<24x8xf32> to vector<24x8xbf16>
    %cst_59 = arith.constant dense<0.000000e+00> : vector<24x24xf32>
    %133 = tpu.matmul %128, %130, %cst_59 {dimension_numbers = #tpu.dot_dimension_numbers<[1], [1], [0], [0], [0, 0, 1, 0], [], []>} : vector<24x8xbf16>, vector<24x8xbf16>, vector<24x24xf32> -> vector<24x24xf32>
    %cst_60 = arith.constant dense<0xFF800000> : vector<24xf32>
    %134 = vector.multi_reduction <maximumf>, %133, %cst_60 [1] : vector<24x24xf32> to vector<24xf32>
    %135 = vector.shape_cast %134 : vector<24xf32> to vector<24x1xf32>
    %136 = vector.broadcast %135 : vector<24x1xf32> to vector<24x24xf32>
    %137 = arith.subf %133, %136 : vector<24x24xf32>
    %138 = math.exp %137 : vector<24x24xf32>
    %cst_61 = arith.constant dense<0.000000e+00> : vector<24xf32>
    %139 = vector.multi_reduction <add>, %138, %cst_61 [1] : vector<24x24xf32> to vector<24xf32>
    %140 = vector.shape_cast %139 : vector<24xf32> to vector<24x1xf32>
    %141 = tpu.reciprocal %140 {approx = true} : vector<24x1xf32> -> vector<24x1xf32>
    %142 = vector.broadcast %141 : vector<24x1xf32> to vector<24x24xf32>
    %143 = arith.mulf %138, %142 : vector<24x24xf32>
    %144 = arith.truncf %143 : vector<24x24xf32> to vector<24x24xbf16>
    %cst_62 = arith.constant dense<0.000000e+00> : vector<24x8xf32>
    %145 = tpu.matmul %144, %132, %cst_62 {dimension_numbers = #tpu.dot_dimension_numbers<[1], [0], [0], [1], [0, 0, 1, 1], [], []>} : vector<24x24xbf16>, vector<24x8xbf16>, vector<24x8xf32> -> vector<24x8xf32>
    %146 = vector.extract_strided_slice %88 {offsets = [0, 24], sizes = [24, 8], strides = [1, 1]} : vector<24x96xf32> to vector<24x8xf32>
    %147 = arith.truncf %146 : vector<24x8xf32> to vector<24x8xbf16>
    %148 = vector.extract_strided_slice %88 {offsets = [0, 56], sizes = [24, 8], strides = [1, 1]} : vector<24x96xf32> to vector<24x8xf32>
    %149 = arith.truncf %148 : vector<24x8xf32> to vector<24x8xbf16>
    %150 = vector.extract_strided_slice %88 {offsets = [0, 88], sizes = [24, 8], strides = [1, 1]} : vector<24x96xf32> to vector<24x8xf32>
    %151 = arith.truncf %150 : vector<24x8xf32> to vector<24x8xbf16>
    %cst_63 = arith.constant dense<0.000000e+00> : vector<24x24xf32>
    %152 = tpu.matmul %147, %149, %cst_63 {dimension_numbers = #tpu.dot_dimension_numbers<[1], [1], [0], [0], [0, 0, 1, 0], [], []>} : vector<24x8xbf16>, vector<24x8xbf16>, vector<24x24xf32> -> vector<24x24xf32>
    %cst_64 = arith.constant dense<0xFF800000> : vector<24xf32>
    %153 = vector.multi_reduction <maximumf>, %152, %cst_64 [1] : vector<24x24xf32> to vector<24xf32>
    %154 = vector.shape_cast %153 : vector<24xf32> to vector<24x1xf32>
    %155 = vector.broadcast %154 : vector<24x1xf32> to vector<24x24xf32>
    %156 = arith.subf %152, %155 : vector<24x24xf32>
    %157 = math.exp %156 : vector<24x24xf32>
    %cst_65 = arith.constant dense<0.000000e+00> : vector<24xf32>
    %158 = vector.multi_reduction <add>, %157, %cst_65 [1] : vector<24x24xf32> to vector<24xf32>
    %159 = vector.shape_cast %158 : vector<24xf32> to vector<24x1xf32>
    %160 = tpu.reciprocal %159 {approx = true} : vector<24x1xf32> -> vector<24x1xf32>
    %161 = vector.broadcast %160 : vector<24x1xf32> to vector<24x24xf32>
    %162 = arith.mulf %157, %161 : vector<24x24xf32>
    %163 = arith.truncf %162 : vector<24x24xf32> to vector<24x24xbf16>
    %cst_66 = arith.constant dense<0.000000e+00> : vector<24x8xf32>
    %164 = tpu.matmul %163, %151, %cst_66 {dimension_numbers = #tpu.dot_dimension_numbers<[1], [0], [0], [1], [0, 0, 1, 1], [], []>} : vector<24x24xbf16>, vector<24x8xbf16>, vector<24x8xf32> -> vector<24x8xf32>
    %165 = tpu.concatenate %107, %126, %145, %164 in 1 : vector<24x8xf32>, vector<24x8xf32>, vector<24x8xf32>, vector<24x8xf32> -> vector<24x32xf32>
    %166 = arith.truncf %165 : vector<24x32xf32> to vector<24x32xbf16>
    %c0_67 = arith.constant 0 : index
    %c0_68 = arith.constant 0 : index
    %c0_69 = arith.constant 0 : index
    %167 = vector.load %arg13[%c0_67, %c0_68, %c0_69] : memref<3x32x32xbf16, #tpu.memory_space<vmem>>, vector<1x32x32xbf16>
    %168 = vector.shape_cast %167 : vector<1x32x32xbf16> to vector<32x32xbf16>
    %cst_70 = arith.constant dense<0.000000e+00> : vector<24x32xf32>
    %169 = tpu.matmul %166, %168, %cst_70 {dimension_numbers = #tpu.dot_dimension_numbers<[1], [0], [0], [1], [0, 0, 1, 1], [], []>} : vector<24x32xbf16>, vector<32x32xbf16>, vector<24x32xf32> -> vector<24x32xf32>
    %c0_71 = arith.constant 0 : index
    %c0_72 = arith.constant 0 : index
    %c0_73 = arith.constant 0 : index
    %170 = vector.load %arg14[%c0_71, %c0_72, %c0_73] : memref<3x1x32xf32, #tpu.memory_space<vmem>>, vector<1x1x32xf32>
    %171 = vector.shape_cast %170 : vector<1x1x32xf32> to vector<1x32xf32>
    %172 = vector.broadcast %171 : vector<1x32xf32> to vector<24x32xf32>
    %173 = arith.addf %169, %172 : vector<24x32xf32>
    %174 = arith.addf %56, %173 : vector<24x32xf32>
    %c0_74 = arith.constant 0 : index
    %c0_75 = arith.constant 0 : index
    %c0_76 = arith.constant 0 : index
    %175 = vector.load %arg15[%c0_74, %c0_75, %c0_76] : memref<3x1x32xf32, #tpu.memory_space<vmem>>, vector<1x1x32xf32>
    %176 = vector.shape_cast %175 : vector<1x1x32xf32> to vector<1x32xf32>
    %c0_77 = arith.constant 0 : index
    %c0_78 = arith.constant 0 : index
    %c0_79 = arith.constant 0 : index
    %177 = vector.load %arg16[%c0_77, %c0_78, %c0_79] : memref<3x1x32xf32, #tpu.memory_space<vmem>>, vector<1x1x32xf32>
    %178 = vector.shape_cast %177 : vector<1x1x32xf32> to vector<1x32xf32>
    %cst_80 = arith.constant dense<0.000000e+00> : vector<24xf32>
    %179 = vector.multi_reduction <add>, %174, %cst_80 [1] : vector<24x32xf32> to vector<24xf32>
    %180 = vector.shape_cast %179 : vector<24xf32> to vector<24x1xf32>
    %cst_81 = arith.constant 3.200000e+01 : f32
    %181 = vector.broadcast %cst_81 : f32 to vector<24x1xf32>
    %182 = arith.divf %180, %181 : vector<24x1xf32>
    %183 = vector.broadcast %182 : vector<24x1xf32> to vector<24x32xf32>
    %184 = arith.subf %174, %183 : vector<24x32xf32>
    %185 = arith.mulf %184, %184 : vector<24x32xf32>
    %cst_82 = arith.constant dense<0.000000e+00> : vector<24xf32>
    %186 = vector.multi_reduction <add>, %185, %cst_82 [1] : vector<24x32xf32> to vector<24xf32>
    %187 = vector.shape_cast %186 : vector<24xf32> to vector<24x1xf32>
    %cst_83 = arith.constant 3.200000e+01 : f32
    %188 = vector.broadcast %cst_83 : f32 to vector<24x1xf32>
    %189 = arith.divf %187, %188 : vector<24x1xf32>
    %cst_84 = arith.constant 9.99999974E-6 : f32
    %190 = vector.broadcast %cst_84 : f32 to vector<24x1xf32>
    %191 = arith.addf %189, %190 : vector<24x1xf32>
    %192 = math.rsqrt %191 : vector<24x1xf32>
    %193 = vector.broadcast %192 : vector<24x1xf32> to vector<24x32xf32>
    %194 = arith.mulf %184, %193 : vector<24x32xf32>
    %195 = vector.broadcast %176 : vector<1x32xf32> to vector<24x32xf32>
    %196 = arith.mulf %194, %195 : vector<24x32xf32>
    %197 = vector.broadcast %178 : vector<1x32xf32> to vector<24x32xf32>
    %198 = arith.addf %196, %197 : vector<24x32xf32>
    %199 = arith.truncf %198 : vector<24x32xf32> to vector<24x32xbf16>
    %c0_85 = arith.constant 0 : index
    %c0_86 = arith.constant 0 : index
    %c0_87 = arith.constant 0 : index
    %200 = vector.load %arg17[%c0_85, %c0_86, %c0_87] : memref<3x32x128xbf16, #tpu.memory_space<vmem>>, vector<1x32x128xbf16>
    %201 = vector.shape_cast %200 : vector<1x32x128xbf16> to vector<32x128xbf16>
    %cst_88 = arith.constant dense<0.000000e+00> : vector<24x128xf32>
    %202 = tpu.matmul %199, %201, %cst_88 {dimension_numbers = #tpu.dot_dimension_numbers<[1], [0], [0], [1], [0, 0, 1, 1], [], []>} : vector<24x32xbf16>, vector<32x128xbf16>, vector<24x128xf32> -> vector<24x128xf32>
    %c0_89 = arith.constant 0 : index
    %c0_90 = arith.constant 0 : index
    %c0_91 = arith.constant 0 : index
    %203 = vector.load %arg18[%c0_89, %c0_90, %c0_91] : memref<3x1x128xf32, #tpu.memory_space<vmem>>, vector<1x1x128xf32>
    %204 = vector.shape_cast %203 : vector<1x1x128xf32> to vector<1x128xf32>
    %205 = vector.broadcast %204 : vector<1x128xf32> to vector<24x128xf32>
    %206 = arith.addf %202, %205 : vector<24x128xf32>
    %cst_92 = arith.constant 5.000000e-01 : f32
    %207 = vector.broadcast %cst_92 : f32 to vector<24x128xf32>
    %208 = arith.mulf %207, %206 : vector<24x128xf32>
    %cst_93 = arith.constant 4.471500e-02 : f32
    %209 = vector.broadcast %cst_93 : f32 to vector<24x128xf32>
    %210 = arith.mulf %209, %206 : vector<24x128xf32>
    %211 = arith.mulf %210, %206 : vector<24x128xf32>
    %212 = arith.mulf %211, %206 : vector<24x128xf32>
    %213 = arith.addf %206, %212 : vector<24x128xf32>
    %cst_94 = arith.constant 0.797884583 : f32
    %214 = vector.broadcast %cst_94 : f32 to vector<24x128xf32>
    %215 = arith.mulf %214, %213 : vector<24x128xf32>
    %216 = math.tanh %215 : vector<24x128xf32>
    %cst_95 = arith.constant 1.000000e+00 : f32
    %217 = vector.broadcast %cst_95 : f32 to vector<24x128xf32>
    %218 = arith.addf %217, %216 : vector<24x128xf32>
    %219 = arith.mulf %208, %218 : vector<24x128xf32>
    %220 = arith.truncf %219 : vector<24x128xf32> to vector<24x128xbf16>
    %c0_96 = arith.constant 0 : index
    %c0_97 = arith.constant 0 : index
    %c0_98 = arith.constant 0 : index
    %221 = vector.load %arg19[%c0_96, %c0_97, %c0_98] : memref<3x128x32xbf16, #tpu.memory_space<vmem>>, vector<1x128x32xbf16>
    %222 = vector.shape_cast %221 : vector<1x128x32xbf16> to vector<128x32xbf16>
    %cst_99 = arith.constant dense<0.000000e+00> : vector<24x32xf32>
    %223 = tpu.matmul %220, %222, %cst_99 {dimension_numbers = #tpu.dot_dimension_numbers<[1], [0], [0], [1], [0, 0, 1, 1], [], []>} : vector<24x128xbf16>, vector<128x32xbf16>, vector<24x32xf32> -> vector<24x32xf32>
    %c0_100 = arith.constant 0 : index
    %c0_101 = arith.constant 0 : index
    %c0_102 = arith.constant 0 : index
    %224 = vector.load %arg20[%c0_100, %c0_101, %c0_102] : memref<3x1x32xf32, #tpu.memory_space<vmem>>, vector<1x1x32xf32>
    %225 = vector.shape_cast %224 : vector<1x1x32xf32> to vector<1x32xf32>
    %226 = vector.broadcast %225 : vector<1x32xf32> to vector<24x32xf32>
    %227 = arith.addf %223, %226 : vector<24x32xf32>
    %228 = arith.addf %174, %227 : vector<24x32xf32>
    %c1 = arith.constant 1 : index
    %c0_103 = arith.constant 0 : index
    %c0_104 = arith.constant 0 : index
    %229 = vector.load %arg9[%c1, %c0_103, %c0_104] : memref<3x1x32xf32, #tpu.memory_space<vmem>>, vector<1x1x32xf32>
    %230 = vector.shape_cast %229 : vector<1x1x32xf32> to vector<1x32xf32>
    %c1_105 = arith.constant 1 : index
    %c0_106 = arith.constant 0 : index
    %c0_107 = arith.constant 0 : index
    %231 = vector.load %arg10[%c1_105, %c0_106, %c0_107] : memref<3x1x32xf32, #tpu.memory_space<vmem>>, vector<1x1x32xf32>
    %232 = vector.shape_cast %231 : vector<1x1x32xf32> to vector<1x32xf32>
    %cst_108 = arith.constant dense<0.000000e+00> : vector<24xf32>
    %233 = vector.multi_reduction <add>, %228, %cst_108 [1] : vector<24x32xf32> to vector<24xf32>
    %234 = vector.shape_cast %233 : vector<24xf32> to vector<24x1xf32>
    %cst_109 = arith.constant 3.200000e+01 : f32
    %235 = vector.broadcast %cst_109 : f32 to vector<24x1xf32>
    %236 = arith.divf %234, %235 : vector<24x1xf32>
    %237 = vector.broadcast %236 : vector<24x1xf32> to vector<24x32xf32>
    %238 = arith.subf %228, %237 : vector<24x32xf32>
    %239 = arith.mulf %238, %238 : vector<24x32xf32>
    %cst_110 = arith.constant dense<0.000000e+00> : vector<24xf32>
    %240 = vector.multi_reduction <add>, %239, %cst_110 [1] : vector<24x32xf32> to vector<24xf32>
    %241 = vector.shape_cast %240 : vector<24xf32> to vector<24x1xf32>
    %cst_111 = arith.constant 3.200000e+01 : f32
    %242 = vector.broadcast %cst_111 : f32 to vector<24x1xf32>
    %243 = arith.divf %241, %242 : vector<24x1xf32>
    %cst_112 = arith.constant 9.99999974E-6 : f32
    %244 = vector.broadcast %cst_112 : f32 to vector<24x1xf32>
    %245 = arith.addf %243, %244 : vector<24x1xf32>
    %246 = math.rsqrt %245 : vector<24x1xf32>
    %247 = vector.broadcast %246 : vector<24x1xf32> to vector<24x32xf32>
    %248 = arith.mulf %238, %247 : vector<24x32xf32>
    %249 = vector.broadcast %230 : vector<1x32xf32> to vector<24x32xf32>
    %250 = arith.mulf %248, %249 : vector<24x32xf32>
    %251 = vector.broadcast %232 : vector<1x32xf32> to vector<24x32xf32>
    %252 = arith.addf %250, %251 : vector<24x32xf32>
    %253 = arith.truncf %252 : vector<24x32xf32> to vector<24x32xbf16>
    %c1_113 = arith.constant 1 : index
    %c0_114 = arith.constant 0 : index
    %c0_115 = arith.constant 0 : index
    %254 = vector.load %arg11[%c1_113, %c0_114, %c0_115] : memref<3x32x96xbf16, #tpu.memory_space<vmem>>, vector<1x32x96xbf16>
    %255 = vector.shape_cast %254 : vector<1x32x96xbf16> to vector<32x96xbf16>
    %cst_116 = arith.constant dense<0.000000e+00> : vector<24x96xf32>
    %256 = tpu.matmul %253, %255, %cst_116 {dimension_numbers = #tpu.dot_dimension_numbers<[1], [0], [0], [1], [0, 0, 1, 1], [], []>} : vector<24x32xbf16>, vector<32x96xbf16>, vector<24x96xf32> -> vector<24x96xf32>
    %c1_117 = arith.constant 1 : index
    %c0_118 = arith.constant 0 : index
    %c0_119 = arith.constant 0 : index
    %257 = vector.load %arg12[%c1_117, %c0_118, %c0_119] : memref<3x1x96xf32, #tpu.memory_space<vmem>>, vector<1x1x96xf32>
    %258 = vector.shape_cast %257 : vector<1x1x96xf32> to vector<1x96xf32>
    %259 = vector.broadcast %258 : vector<1x96xf32> to vector<24x96xf32>
    %260 = arith.addf %256, %259 : vector<24x96xf32>
    %261 = vector.extract_strided_slice %260 {offsets = [0, 0], sizes = [24, 8], strides = [1, 1]} : vector<24x96xf32> to vector<24x8xf32>
    %262 = arith.truncf %261 : vector<24x8xf32> to vector<24x8xbf16>
    %263 = vector.extract_strided_slice %260 {offsets = [0, 32], sizes = [24, 8], strides = [1, 1]} : vector<24x96xf32> to vector<24x8xf32>
    %264 = arith.truncf %263 : vector<24x8xf32> to vector<24x8xbf16>
    %265 = vector.extract_strided_slice %260 {offsets = [0, 64], sizes = [24, 8], strides = [1, 1]} : vector<24x96xf32> to vector<24x8xf32>
    %266 = arith.truncf %265 : vector<24x8xf32> to vector<24x8xbf16>
    %cst_120 = arith.constant dense<0.000000e+00> : vector<24x24xf32>
    %267 = tpu.matmul %262, %264, %cst_120 {dimension_numbers = #tpu.dot_dimension_numbers<[1], [1], [0], [0], [0, 0, 1, 0], [], []>} : vector<24x8xbf16>, vector<24x8xbf16>, vector<24x24xf32> -> vector<24x24xf32>
    %cst_121 = arith.constant dense<0xFF800000> : vector<24xf32>
    %268 = vector.multi_reduction <maximumf>, %267, %cst_121 [1] : vector<24x24xf32> to vector<24xf32>
    %269 = vector.shape_cast %268 : vector<24xf32> to vector<24x1xf32>
    %270 = vector.broadcast %269 : vector<24x1xf32> to vector<24x24xf32>
    %271 = arith.subf %267, %270 : vector<24x24xf32>
    %272 = math.exp %271 : vector<24x24xf32>
    %cst_122 = arith.constant dense<0.000000e+00> : vector<24xf32>
    %273 = vector.multi_reduction <add>, %272, %cst_122 [1] : vector<24x24xf32> to vector<24xf32>
    %274 = vector.shape_cast %273 : vector<24xf32> to vector<24x1xf32>
    %275 = tpu.reciprocal %274 {approx = true} : vector<24x1xf32> -> vector<24x1xf32>
    %276 = vector.broadcast %275 : vector<24x1xf32> to vector<24x24xf32>
    %277 = arith.mulf %272, %276 : vector<24x24xf32>
    %278 = arith.truncf %277 : vector<24x24xf32> to vector<24x24xbf16>
    %cst_123 = arith.constant dense<0.000000e+00> : vector<24x8xf32>
    %279 = tpu.matmul %278, %266, %cst_123 {dimension_numbers = #tpu.dot_dimension_numbers<[1], [0], [0], [1], [0, 0, 1, 1], [], []>} : vector<24x24xbf16>, vector<24x8xbf16>, vector<24x8xf32> -> vector<24x8xf32>
    %280 = vector.extract_strided_slice %260 {offsets = [0, 8], sizes = [24, 8], strides = [1, 1]} : vector<24x96xf32> to vector<24x8xf32>
    %281 = arith.truncf %280 : vector<24x8xf32> to vector<24x8xbf16>
    %282 = vector.extract_strided_slice %260 {offsets = [0, 40], sizes = [24, 8], strides = [1, 1]} : vector<24x96xf32> to vector<24x8xf32>
    %283 = arith.truncf %282 : vector<24x8xf32> to vector<24x8xbf16>
    %284 = vector.extract_strided_slice %260 {offsets = [0, 72], sizes = [24, 8], strides = [1, 1]} : vector<24x96xf32> to vector<24x8xf32>
    %285 = arith.truncf %284 : vector<24x8xf32> to vector<24x8xbf16>
    %cst_124 = arith.constant dense<0.000000e+00> : vector<24x24xf32>
    %286 = tpu.matmul %281, %283, %cst_124 {dimension_numbers = #tpu.dot_dimension_numbers<[1], [1], [0], [0], [0, 0, 1, 0], [], []>} : vector<24x8xbf16>, vector<24x8xbf16>, vector<24x24xf32> -> vector<24x24xf32>
    %cst_125 = arith.constant dense<0xFF800000> : vector<24xf32>
    %287 = vector.multi_reduction <maximumf>, %286, %cst_125 [1] : vector<24x24xf32> to vector<24xf32>
    %288 = vector.shape_cast %287 : vector<24xf32> to vector<24x1xf32>
    %289 = vector.broadcast %288 : vector<24x1xf32> to vector<24x24xf32>
    %290 = arith.subf %286, %289 : vector<24x24xf32>
    %291 = math.exp %290 : vector<24x24xf32>
    %cst_126 = arith.constant dense<0.000000e+00> : vector<24xf32>
    %292 = vector.multi_reduction <add>, %291, %cst_126 [1] : vector<24x24xf32> to vector<24xf32>
    %293 = vector.shape_cast %292 : vector<24xf32> to vector<24x1xf32>
    %294 = tpu.reciprocal %293 {approx = true} : vector<24x1xf32> -> vector<24x1xf32>
    %295 = vector.broadcast %294 : vector<24x1xf32> to vector<24x24xf32>
    %296 = arith.mulf %291, %295 : vector<24x24xf32>
    %297 = arith.truncf %296 : vector<24x24xf32> to vector<24x24xbf16>
    %cst_127 = arith.constant dense<0.000000e+00> : vector<24x8xf32>
    %298 = tpu.matmul %297, %285, %cst_127 {dimension_numbers = #tpu.dot_dimension_numbers<[1], [0], [0], [1], [0, 0, 1, 1], [], []>} : vector<24x24xbf16>, vector<24x8xbf16>, vector<24x8xf32> -> vector<24x8xf32>
    %299 = vector.extract_strided_slice %260 {offsets = [0, 16], sizes = [24, 8], strides = [1, 1]} : vector<24x96xf32> to vector<24x8xf32>
    %300 = arith.truncf %299 : vector<24x8xf32> to vector<24x8xbf16>
    %301 = vector.extract_strided_slice %260 {offsets = [0, 48], sizes = [24, 8], strides = [1, 1]} : vector<24x96xf32> to vector<24x8xf32>
    %302 = arith.truncf %301 : vector<24x8xf32> to vector<24x8xbf16>
    %303 = vector.extract_strided_slice %260 {offsets = [0, 80], sizes = [24, 8], strides = [1, 1]} : vector<24x96xf32> to vector<24x8xf32>
    %304 = arith.truncf %303 : vector<24x8xf32> to vector<24x8xbf16>
    %cst_128 = arith.constant dense<0.000000e+00> : vector<24x24xf32>
    %305 = tpu.matmul %300, %302, %cst_128 {dimension_numbers = #tpu.dot_dimension_numbers<[1], [1], [0], [0], [0, 0, 1, 0], [], []>} : vector<24x8xbf16>, vector<24x8xbf16>, vector<24x24xf32> -> vector<24x24xf32>
    %cst_129 = arith.constant dense<0xFF800000> : vector<24xf32>
    %306 = vector.multi_reduction <maximumf>, %305, %cst_129 [1] : vector<24x24xf32> to vector<24xf32>
    %307 = vector.shape_cast %306 : vector<24xf32> to vector<24x1xf32>
    %308 = vector.broadcast %307 : vector<24x1xf32> to vector<24x24xf32>
    %309 = arith.subf %305, %308 : vector<24x24xf32>
    %310 = math.exp %309 : vector<24x24xf32>
    %cst_130 = arith.constant dense<0.000000e+00> : vector<24xf32>
    %311 = vector.multi_reduction <add>, %310, %cst_130 [1] : vector<24x24xf32> to vector<24xf32>
    %312 = vector.shape_cast %311 : vector<24xf32> to vector<24x1xf32>
    %313 = tpu.reciprocal %312 {approx = true} : vector<24x1xf32> -> vector<24x1xf32>
    %314 = vector.broadcast %313 : vector<24x1xf32> to vector<24x24xf32>
    %315 = arith.mulf %310, %314 : vector<24x24xf32>
    %316 = arith.truncf %315 : vector<24x24xf32> to vector<24x24xbf16>
    %cst_131 = arith.constant dense<0.000000e+00> : vector<24x8xf32>
    %317 = tpu.matmul %316, %304, %cst_131 {dimension_numbers = #tpu.dot_dimension_numbers<[1], [0], [0], [1], [0, 0, 1, 1], [], []>} : vector<24x24xbf16>, vector<24x8xbf16>, vector<24x8xf32> -> vector<24x8xf32>
    %318 = vector.extract_strided_slice %260 {offsets = [0, 24], sizes = [24, 8], strides = [1, 1]} : vector<24x96xf32> to vector<24x8xf32>
    %319 = arith.truncf %318 : vector<24x8xf32> to vector<24x8xbf16>
    %320 = vector.extract_strided_slice %260 {offsets = [0, 56], sizes = [24, 8], strides = [1, 1]} : vector<24x96xf32> to vector<24x8xf32>
    %321 = arith.truncf %320 : vector<24x8xf32> to vector<24x8xbf16>
    %322 = vector.extract_strided_slice %260 {offsets = [0, 88], sizes = [24, 8], strides = [1, 1]} : vector<24x96xf32> to vector<24x8xf32>
    %323 = arith.truncf %322 : vector<24x8xf32> to vector<24x8xbf16>
    %cst_132 = arith.constant dense<0.000000e+00> : vector<24x24xf32>
    %324 = tpu.matmul %319, %321, %cst_132 {dimension_numbers = #tpu.dot_dimension_numbers<[1], [1], [0], [0], [0, 0, 1, 0], [], []>} : vector<24x8xbf16>, vector<24x8xbf16>, vector<24x24xf32> -> vector<24x24xf32>
    %cst_133 = arith.constant dense<0xFF800000> : vector<24xf32>
    %325 = vector.multi_reduction <maximumf>, %324, %cst_133 [1] : vector<24x24xf32> to vector<24xf32>
    %326 = vector.shape_cast %325 : vector<24xf32> to vector<24x1xf32>
    %327 = vector.broadcast %326 : vector<24x1xf32> to vector<24x24xf32>
    %328 = arith.subf %324, %327 : vector<24x24xf32>
    %329 = math.exp %328 : vector<24x24xf32>
    %cst_134 = arith.constant dense<0.000000e+00> : vector<24xf32>
    %330 = vector.multi_reduction <add>, %329, %cst_134 [1] : vector<24x24xf32> to vector<24xf32>
    %331 = vector.shape_cast %330 : vector<24xf32> to vector<24x1xf32>
    %332 = tpu.reciprocal %331 {approx = true} : vector<24x1xf32> -> vector<24x1xf32>
    %333 = vector.broadcast %332 : vector<24x1xf32> to vector<24x24xf32>
    %334 = arith.mulf %329, %333 : vector<24x24xf32>
    %335 = arith.truncf %334 : vector<24x24xf32> to vector<24x24xbf16>
    %cst_135 = arith.constant dense<0.000000e+00> : vector<24x8xf32>
    %336 = tpu.matmul %335, %323, %cst_135 {dimension_numbers = #tpu.dot_dimension_numbers<[1], [0], [0], [1], [0, 0, 1, 1], [], []>} : vector<24x24xbf16>, vector<24x8xbf16>, vector<24x8xf32> -> vector<24x8xf32>
    %337 = tpu.concatenate %279, %298, %317, %336 in 1 : vector<24x8xf32>, vector<24x8xf32>, vector<24x8xf32>, vector<24x8xf32> -> vector<24x32xf32>
    %338 = arith.truncf %337 : vector<24x32xf32> to vector<24x32xbf16>
    %c1_136 = arith.constant 1 : index
    %c0_137 = arith.constant 0 : index
    %c0_138 = arith.constant 0 : index
    %339 = vector.load %arg13[%c1_136, %c0_137, %c0_138] : memref<3x32x32xbf16, #tpu.memory_space<vmem>>, vector<1x32x32xbf16>
    %340 = vector.shape_cast %339 : vector<1x32x32xbf16> to vector<32x32xbf16>
    %cst_139 = arith.constant dense<0.000000e+00> : vector<24x32xf32>
    %341 = tpu.matmul %338, %340, %cst_139 {dimension_numbers = #tpu.dot_dimension_numbers<[1], [0], [0], [1], [0, 0, 1, 1], [], []>} : vector<24x32xbf16>, vector<32x32xbf16>, vector<24x32xf32> -> vector<24x32xf32>
    %c1_140 = arith.constant 1 : index
    %c0_141 = arith.constant 0 : index
    %c0_142 = arith.constant 0 : index
    %342 = vector.load %arg14[%c1_140, %c0_141, %c0_142] : memref<3x1x32xf32, #tpu.memory_space<vmem>>, vector<1x1x32xf32>
    %343 = vector.shape_cast %342 : vector<1x1x32xf32> to vector<1x32xf32>
    %344 = vector.broadcast %343 : vector<1x32xf32> to vector<24x32xf32>
    %345 = arith.addf %341, %344 : vector<24x32xf32>
    %346 = arith.addf %228, %345 : vector<24x32xf32>
    %c1_143 = arith.constant 1 : index
    %c0_144 = arith.constant 0 : index
    %c0_145 = arith.constant 0 : index
    %347 = vector.load %arg15[%c1_143, %c0_144, %c0_145] : memref<3x1x32xf32, #tpu.memory_space<vmem>>, vector<1x1x32xf32>
    %348 = vector.shape_cast %347 : vector<1x1x32xf32> to vector<1x32xf32>
    %c1_146 = arith.constant 1 : index
    %c0_147 = arith.constant 0 : index
    %c0_148 = arith.constant 0 : index
    %349 = vector.load %arg16[%c1_146, %c0_147, %c0_148] : memref<3x1x32xf32, #tpu.memory_space<vmem>>, vector<1x1x32xf32>
    %350 = vector.shape_cast %349 : vector<1x1x32xf32> to vector<1x32xf32>
    %cst_149 = arith.constant dense<0.000000e+00> : vector<24xf32>
    %351 = vector.multi_reduction <add>, %346, %cst_149 [1] : vector<24x32xf32> to vector<24xf32>
    %352 = vector.shape_cast %351 : vector<24xf32> to vector<24x1xf32>
    %cst_150 = arith.constant 3.200000e+01 : f32
    %353 = vector.broadcast %cst_150 : f32 to vector<24x1xf32>
    %354 = arith.divf %352, %353 : vector<24x1xf32>
    %355 = vector.broadcast %354 : vector<24x1xf32> to vector<24x32xf32>
    %356 = arith.subf %346, %355 : vector<24x32xf32>
    %357 = arith.mulf %356, %356 : vector<24x32xf32>
    %cst_151 = arith.constant dense<0.000000e+00> : vector<24xf32>
    %358 = vector.multi_reduction <add>, %357, %cst_151 [1] : vector<24x32xf32> to vector<24xf32>
    %359 = vector.shape_cast %358 : vector<24xf32> to vector<24x1xf32>
    %cst_152 = arith.constant 3.200000e+01 : f32
    %360 = vector.broadcast %cst_152 : f32 to vector<24x1xf32>
    %361 = arith.divf %359, %360 : vector<24x1xf32>
    %cst_153 = arith.constant 9.99999974E-6 : f32
    %362 = vector.broadcast %cst_153 : f32 to vector<24x1xf32>
    %363 = arith.addf %361, %362 : vector<24x1xf32>
    %364 = math.rsqrt %363 : vector<24x1xf32>
    %365 = vector.broadcast %364 : vector<24x1xf32> to vector<24x32xf32>
    %366 = arith.mulf %356, %365 : vector<24x32xf32>
    %367 = vector.broadcast %348 : vector<1x32xf32> to vector<24x32xf32>
    %368 = arith.mulf %366, %367 : vector<24x32xf32>
    %369 = vector.broadcast %350 : vector<1x32xf32> to vector<24x32xf32>
    %370 = arith.addf %368, %369 : vector<24x32xf32>
    %371 = arith.truncf %370 : vector<24x32xf32> to vector<24x32xbf16>
    %c1_154 = arith.constant 1 : index
    %c0_155 = arith.constant 0 : index
    %c0_156 = arith.constant 0 : index
    %372 = vector.load %arg17[%c1_154, %c0_155, %c0_156] : memref<3x32x128xbf16, #tpu.memory_space<vmem>>, vector<1x32x128xbf16>
    %373 = vector.shape_cast %372 : vector<1x32x128xbf16> to vector<32x128xbf16>
    %cst_157 = arith.constant dense<0.000000e+00> : vector<24x128xf32>
    %374 = tpu.matmul %371, %373, %cst_157 {dimension_numbers = #tpu.dot_dimension_numbers<[1], [0], [0], [1], [0, 0, 1, 1], [], []>} : vector<24x32xbf16>, vector<32x128xbf16>, vector<24x128xf32> -> vector<24x128xf32>
    %c1_158 = arith.constant 1 : index
    %c0_159 = arith.constant 0 : index
    %c0_160 = arith.constant 0 : index
    %375 = vector.load %arg18[%c1_158, %c0_159, %c0_160] : memref<3x1x128xf32, #tpu.memory_space<vmem>>, vector<1x1x128xf32>
    %376 = vector.shape_cast %375 : vector<1x1x128xf32> to vector<1x128xf32>
    %377 = vector.broadcast %376 : vector<1x128xf32> to vector<24x128xf32>
    %378 = arith.addf %374, %377 : vector<24x128xf32>
    %cst_161 = arith.constant 5.000000e-01 : f32
    %379 = vector.broadcast %cst_161 : f32 to vector<24x128xf32>
    %380 = arith.mulf %379, %378 : vector<24x128xf32>
    %cst_162 = arith.constant 4.471500e-02 : f32
    %381 = vector.broadcast %cst_162 : f32 to vector<24x128xf32>
    %382 = arith.mulf %381, %378 : vector<24x128xf32>
    %383 = arith.mulf %382, %378 : vector<24x128xf32>
    %384 = arith.mulf %383, %378 : vector<24x128xf32>
    %385 = arith.addf %378, %384 : vector<24x128xf32>
    %cst_163 = arith.constant 0.797884583 : f32
    %386 = vector.broadcast %cst_163 : f32 to vector<24x128xf32>
    %387 = arith.mulf %386, %385 : vector<24x128xf32>
    %388 = math.tanh %387 : vector<24x128xf32>
    %cst_164 = arith.constant 1.000000e+00 : f32
    %389 = vector.broadcast %cst_164 : f32 to vector<24x128xf32>
    %390 = arith.addf %389, %388 : vector<24x128xf32>
    %391 = arith.mulf %380, %390 : vector<24x128xf32>
    %392 = arith.truncf %391 : vector<24x128xf32> to vector<24x128xbf16>
    %c1_165 = arith.constant 1 : index
    %c0_166 = arith.constant 0 : index
    %c0_167 = arith.constant 0 : index
    %393 = vector.load %arg19[%c1_165, %c0_166, %c0_167] : memref<3x128x32xbf16, #tpu.memory_space<vmem>>, vector<1x128x32xbf16>
    %394 = vector.shape_cast %393 : vector<1x128x32xbf16> to vector<128x32xbf16>
    %cst_168 = arith.constant dense<0.000000e+00> : vector<24x32xf32>
    %395 = tpu.matmul %392, %394, %cst_168 {dimension_numbers = #tpu.dot_dimension_numbers<[1], [0], [0], [1], [0, 0, 1, 1], [], []>} : vector<24x128xbf16>, vector<128x32xbf16>, vector<24x32xf32> -> vector<24x32xf32>
    %c1_169 = arith.constant 1 : index
    %c0_170 = arith.constant 0 : index
    %c0_171 = arith.constant 0 : index
    %396 = vector.load %arg20[%c1_169, %c0_170, %c0_171] : memref<3x1x32xf32, #tpu.memory_space<vmem>>, vector<1x1x32xf32>
    %397 = vector.shape_cast %396 : vector<1x1x32xf32> to vector<1x32xf32>
    %398 = vector.broadcast %397 : vector<1x32xf32> to vector<24x32xf32>
    %399 = arith.addf %395, %398 : vector<24x32xf32>
    %400 = arith.addf %346, %399 : vector<24x32xf32>
    %c2 = arith.constant 2 : index
    %c0_172 = arith.constant 0 : index
    %c0_173 = arith.constant 0 : index
    %401 = vector.load %arg9[%c2, %c0_172, %c0_173] : memref<3x1x32xf32, #tpu.memory_space<vmem>>, vector<1x1x32xf32>
    %402 = vector.shape_cast %401 : vector<1x1x32xf32> to vector<1x32xf32>
    %c2_174 = arith.constant 2 : index
    %c0_175 = arith.constant 0 : index
    %c0_176 = arith.constant 0 : index
    %403 = vector.load %arg10[%c2_174, %c0_175, %c0_176] : memref<3x1x32xf32, #tpu.memory_space<vmem>>, vector<1x1x32xf32>
    %404 = vector.shape_cast %403 : vector<1x1x32xf32> to vector<1x32xf32>
    %cst_177 = arith.constant dense<0.000000e+00> : vector<24xf32>
    %405 = vector.multi_reduction <add>, %400, %cst_177 [1] : vector<24x32xf32> to vector<24xf32>
    %406 = vector.shape_cast %405 : vector<24xf32> to vector<24x1xf32>
    %cst_178 = arith.constant 3.200000e+01 : f32
    %407 = vector.broadcast %cst_178 : f32 to vector<24x1xf32>
    %408 = arith.divf %406, %407 : vector<24x1xf32>
    %409 = vector.broadcast %408 : vector<24x1xf32> to vector<24x32xf32>
    %410 = arith.subf %400, %409 : vector<24x32xf32>
    %411 = arith.mulf %410, %410 : vector<24x32xf32>
    %cst_179 = arith.constant dense<0.000000e+00> : vector<24xf32>
    %412 = vector.multi_reduction <add>, %411, %cst_179 [1] : vector<24x32xf32> to vector<24xf32>
    %413 = vector.shape_cast %412 : vector<24xf32> to vector<24x1xf32>
    %cst_180 = arith.constant 3.200000e+01 : f32
    %414 = vector.broadcast %cst_180 : f32 to vector<24x1xf32>
    %415 = arith.divf %413, %414 : vector<24x1xf32>
    %cst_181 = arith.constant 9.99999974E-6 : f32
    %416 = vector.broadcast %cst_181 : f32 to vector<24x1xf32>
    %417 = arith.addf %415, %416 : vector<24x1xf32>
    %418 = math.rsqrt %417 : vector<24x1xf32>
    %419 = vector.broadcast %418 : vector<24x1xf32> to vector<24x32xf32>
    %420 = arith.mulf %410, %419 : vector<24x32xf32>
    %421 = vector.broadcast %402 : vector<1x32xf32> to vector<24x32xf32>
    %422 = arith.mulf %420, %421 : vector<24x32xf32>
    %423 = vector.broadcast %404 : vector<1x32xf32> to vector<24x32xf32>
    %424 = arith.addf %422, %423 : vector<24x32xf32>
    %425 = arith.truncf %424 : vector<24x32xf32> to vector<24x32xbf16>
    %c2_182 = arith.constant 2 : index
    %c0_183 = arith.constant 0 : index
    %c0_184 = arith.constant 0 : index
    %426 = vector.load %arg11[%c2_182, %c0_183, %c0_184] : memref<3x32x96xbf16, #tpu.memory_space<vmem>>, vector<1x32x96xbf16>
    %427 = vector.shape_cast %426 : vector<1x32x96xbf16> to vector<32x96xbf16>
    %cst_185 = arith.constant dense<0.000000e+00> : vector<24x96xf32>
    %428 = tpu.matmul %425, %427, %cst_185 {dimension_numbers = #tpu.dot_dimension_numbers<[1], [0], [0], [1], [0, 0, 1, 1], [], []>} : vector<24x32xbf16>, vector<32x96xbf16>, vector<24x96xf32> -> vector<24x96xf32>
    %c2_186 = arith.constant 2 : index
    %c0_187 = arith.constant 0 : index
    %c0_188 = arith.constant 0 : index
    %429 = vector.load %arg12[%c2_186, %c0_187, %c0_188] : memref<3x1x96xf32, #tpu.memory_space<vmem>>, vector<1x1x96xf32>
    %430 = vector.shape_cast %429 : vector<1x1x96xf32> to vector<1x96xf32>
    %431 = vector.broadcast %430 : vector<1x96xf32> to vector<24x96xf32>
    %432 = arith.addf %428, %431 : vector<24x96xf32>
    %433 = vector.extract_strided_slice %432 {offsets = [0, 0], sizes = [24, 8], strides = [1, 1]} : vector<24x96xf32> to vector<24x8xf32>
    %434 = arith.truncf %433 : vector<24x8xf32> to vector<24x8xbf16>
    %435 = vector.extract_strided_slice %432 {offsets = [0, 32], sizes = [24, 8], strides = [1, 1]} : vector<24x96xf32> to vector<24x8xf32>
    %436 = arith.truncf %435 : vector<24x8xf32> to vector<24x8xbf16>
    %437 = vector.extract_strided_slice %432 {offsets = [0, 64], sizes = [24, 8], strides = [1, 1]} : vector<24x96xf32> to vector<24x8xf32>
    %438 = arith.truncf %437 : vector<24x8xf32> to vector<24x8xbf16>
    %cst_189 = arith.constant dense<0.000000e+00> : vector<24x24xf32>
    %439 = tpu.matmul %434, %436, %cst_189 {dimension_numbers = #tpu.dot_dimension_numbers<[1], [1], [0], [0], [0, 0, 1, 0], [], []>} : vector<24x8xbf16>, vector<24x8xbf16>, vector<24x24xf32> -> vector<24x24xf32>
    %cst_190 = arith.constant dense<0xFF800000> : vector<24xf32>
    %440 = vector.multi_reduction <maximumf>, %439, %cst_190 [1] : vector<24x24xf32> to vector<24xf32>
    %441 = vector.shape_cast %440 : vector<24xf32> to vector<24x1xf32>
    %442 = vector.broadcast %441 : vector<24x1xf32> to vector<24x24xf32>
    %443 = arith.subf %439, %442 : vector<24x24xf32>
    %444 = math.exp %443 : vector<24x24xf32>
    %cst_191 = arith.constant dense<0.000000e+00> : vector<24xf32>
    %445 = vector.multi_reduction <add>, %444, %cst_191 [1] : vector<24x24xf32> to vector<24xf32>
    %446 = vector.shape_cast %445 : vector<24xf32> to vector<24x1xf32>
    %447 = tpu.reciprocal %446 {approx = true} : vector<24x1xf32> -> vector<24x1xf32>
    %448 = vector.broadcast %447 : vector<24x1xf32> to vector<24x24xf32>
    %449 = arith.mulf %444, %448 : vector<24x24xf32>
    %450 = arith.truncf %449 : vector<24x24xf32> to vector<24x24xbf16>
    %cst_192 = arith.constant dense<0.000000e+00> : vector<24x8xf32>
    %451 = tpu.matmul %450, %438, %cst_192 {dimension_numbers = #tpu.dot_dimension_numbers<[1], [0], [0], [1], [0, 0, 1, 1], [], []>} : vector<24x24xbf16>, vector<24x8xbf16>, vector<24x8xf32> -> vector<24x8xf32>
    %452 = vector.extract_strided_slice %432 {offsets = [0, 8], sizes = [24, 8], strides = [1, 1]} : vector<24x96xf32> to vector<24x8xf32>
    %453 = arith.truncf %452 : vector<24x8xf32> to vector<24x8xbf16>
    %454 = vector.extract_strided_slice %432 {offsets = [0, 40], sizes = [24, 8], strides = [1, 1]} : vector<24x96xf32> to vector<24x8xf32>
    %455 = arith.truncf %454 : vector<24x8xf32> to vector<24x8xbf16>
    %456 = vector.extract_strided_slice %432 {offsets = [0, 72], sizes = [24, 8], strides = [1, 1]} : vector<24x96xf32> to vector<24x8xf32>
    %457 = arith.truncf %456 : vector<24x8xf32> to vector<24x8xbf16>
    %cst_193 = arith.constant dense<0.000000e+00> : vector<24x24xf32>
    %458 = tpu.matmul %453, %455, %cst_193 {dimension_numbers = #tpu.dot_dimension_numbers<[1], [1], [0], [0], [0, 0, 1, 0], [], []>} : vector<24x8xbf16>, vector<24x8xbf16>, vector<24x24xf32> -> vector<24x24xf32>
    %cst_194 = arith.constant dense<0xFF800000> : vector<24xf32>
    %459 = vector.multi_reduction <maximumf>, %458, %cst_194 [1] : vector<24x24xf32> to vector<24xf32>
    %460 = vector.shape_cast %459 : vector<24xf32> to vector<24x1xf32>
    %461 = vector.broadcast %460 : vector<24x1xf32> to vector<24x24xf32>
    %462 = arith.subf %458, %461 : vector<24x24xf32>
    %463 = math.exp %462 : vector<24x24xf32>
    %cst_195 = arith.constant dense<0.000000e+00> : vector<24xf32>
    %464 = vector.multi_reduction <add>, %463, %cst_195 [1] : vector<24x24xf32> to vector<24xf32>
    %465 = vector.shape_cast %464 : vector<24xf32> to vector<24x1xf32>
    %466 = tpu.reciprocal %465 {approx = true} : vector<24x1xf32> -> vector<24x1xf32>
    %467 = vector.broadcast %466 : vector<24x1xf32> to vector<24x24xf32>
    %468 = arith.mulf %463, %467 : vector<24x24xf32>
    %469 = arith.truncf %468 : vector<24x24xf32> to vector<24x24xbf16>
    %cst_196 = arith.constant dense<0.000000e+00> : vector<24x8xf32>
    %470 = tpu.matmul %469, %457, %cst_196 {dimension_numbers = #tpu.dot_dimension_numbers<[1], [0], [0], [1], [0, 0, 1, 1], [], []>} : vector<24x24xbf16>, vector<24x8xbf16>, vector<24x8xf32> -> vector<24x8xf32>
    %471 = vector.extract_strided_slice %432 {offsets = [0, 16], sizes = [24, 8], strides = [1, 1]} : vector<24x96xf32> to vector<24x8xf32>
    %472 = arith.truncf %471 : vector<24x8xf32> to vector<24x8xbf16>
    %473 = vector.extract_strided_slice %432 {offsets = [0, 48], sizes = [24, 8], strides = [1, 1]} : vector<24x96xf32> to vector<24x8xf32>
    %474 = arith.truncf %473 : vector<24x8xf32> to vector<24x8xbf16>
    %475 = vector.extract_strided_slice %432 {offsets = [0, 80], sizes = [24, 8], strides = [1, 1]} : vector<24x96xf32> to vector<24x8xf32>
    %476 = arith.truncf %475 : vector<24x8xf32> to vector<24x8xbf16>
    %cst_197 = arith.constant dense<0.000000e+00> : vector<24x24xf32>
    %477 = tpu.matmul %472, %474, %cst_197 {dimension_numbers = #tpu.dot_dimension_numbers<[1], [1], [0], [0], [0, 0, 1, 0], [], []>} : vector<24x8xbf16>, vector<24x8xbf16>, vector<24x24xf32> -> vector<24x24xf32>
    %cst_198 = arith.constant dense<0xFF800000> : vector<24xf32>
    %478 = vector.multi_reduction <maximumf>, %477, %cst_198 [1] : vector<24x24xf32> to vector<24xf32>
    %479 = vector.shape_cast %478 : vector<24xf32> to vector<24x1xf32>
    %480 = vector.broadcast %479 : vector<24x1xf32> to vector<24x24xf32>
    %481 = arith.subf %477, %480 : vector<24x24xf32>
    %482 = math.exp %481 : vector<24x24xf32>
    %cst_199 = arith.constant dense<0.000000e+00> : vector<24xf32>
    %483 = vector.multi_reduction <add>, %482, %cst_199 [1] : vector<24x24xf32> to vector<24xf32>
    %484 = vector.shape_cast %483 : vector<24xf32> to vector<24x1xf32>
    %485 = tpu.reciprocal %484 {approx = true} : vector<24x1xf32> -> vector<24x1xf32>
    %486 = vector.broadcast %485 : vector<24x1xf32> to vector<24x24xf32>
    %487 = arith.mulf %482, %486 : vector<24x24xf32>
    %488 = arith.truncf %487 : vector<24x24xf32> to vector<24x24xbf16>
    %cst_200 = arith.constant dense<0.000000e+00> : vector<24x8xf32>
    %489 = tpu.matmul %488, %476, %cst_200 {dimension_numbers = #tpu.dot_dimension_numbers<[1], [0], [0], [1], [0, 0, 1, 1], [], []>} : vector<24x24xbf16>, vector<24x8xbf16>, vector<24x8xf32> -> vector<24x8xf32>
    %490 = vector.extract_strided_slice %432 {offsets = [0, 24], sizes = [24, 8], strides = [1, 1]} : vector<24x96xf32> to vector<24x8xf32>
    %491 = arith.truncf %490 : vector<24x8xf32> to vector<24x8xbf16>
    %492 = vector.extract_strided_slice %432 {offsets = [0, 56], sizes = [24, 8], strides = [1, 1]} : vector<24x96xf32> to vector<24x8xf32>
    %493 = arith.truncf %492 : vector<24x8xf32> to vector<24x8xbf16>
    %494 = vector.extract_strided_slice %432 {offsets = [0, 88], sizes = [24, 8], strides = [1, 1]} : vector<24x96xf32> to vector<24x8xf32>
    %495 = arith.truncf %494 : vector<24x8xf32> to vector<24x8xbf16>
    %cst_201 = arith.constant dense<0.000000e+00> : vector<24x24xf32>
    %496 = tpu.matmul %491, %493, %cst_201 {dimension_numbers = #tpu.dot_dimension_numbers<[1], [1], [0], [0], [0, 0, 1, 0], [], []>} : vector<24x8xbf16>, vector<24x8xbf16>, vector<24x24xf32> -> vector<24x24xf32>
    %cst_202 = arith.constant dense<0xFF800000> : vector<24xf32>
    %497 = vector.multi_reduction <maximumf>, %496, %cst_202 [1] : vector<24x24xf32> to vector<24xf32>
    %498 = vector.shape_cast %497 : vector<24xf32> to vector<24x1xf32>
    %499 = vector.broadcast %498 : vector<24x1xf32> to vector<24x24xf32>
    %500 = arith.subf %496, %499 : vector<24x24xf32>
    %501 = math.exp %500 : vector<24x24xf32>
    %cst_203 = arith.constant dense<0.000000e+00> : vector<24xf32>
    %502 = vector.multi_reduction <add>, %501, %cst_203 [1] : vector<24x24xf32> to vector<24xf32>
    %503 = vector.shape_cast %502 : vector<24xf32> to vector<24x1xf32>
    %504 = tpu.reciprocal %503 {approx = true} : vector<24x1xf32> -> vector<24x1xf32>
    %505 = vector.broadcast %504 : vector<24x1xf32> to vector<24x24xf32>
    %506 = arith.mulf %501, %505 : vector<24x24xf32>
    %507 = arith.truncf %506 : vector<24x24xf32> to vector<24x24xbf16>
    %cst_204 = arith.constant dense<0.000000e+00> : vector<24x8xf32>
    %508 = tpu.matmul %507, %495, %cst_204 {dimension_numbers = #tpu.dot_dimension_numbers<[1], [0], [0], [1], [0, 0, 1, 1], [], []>} : vector<24x24xbf16>, vector<24x8xbf16>, vector<24x8xf32> -> vector<24x8xf32>
    %509 = tpu.concatenate %451, %470, %489, %508 in 1 : vector<24x8xf32>, vector<24x8xf32>, vector<24x8xf32>, vector<24x8xf32> -> vector<24x32xf32>
    %510 = arith.truncf %509 : vector<24x32xf32> to vector<24x32xbf16>
    %c2_205 = arith.constant 2 : index
    %c0_206 = arith.constant 0 : index
    %c0_207 = arith.constant 0 : index
    %511 = vector.load %arg13[%c2_205, %c0_206, %c0_207] : memref<3x32x32xbf16, #tpu.memory_space<vmem>>, vector<1x32x32xbf16>
    %512 = vector.shape_cast %511 : vector<1x32x32xbf16> to vector<32x32xbf16>
    %cst_208 = arith.constant dense<0.000000e+00> : vector<24x32xf32>
    %513 = tpu.matmul %510, %512, %cst_208 {dimension_numbers = #tpu.dot_dimension_numbers<[1], [0], [0], [1], [0, 0, 1, 1], [], []>} : vector<24x32xbf16>, vector<32x32xbf16>, vector<24x32xf32> -> vector<24x32xf32>
    %c2_209 = arith.constant 2 : index
    %c0_210 = arith.constant 0 : index
    %c0_211 = arith.constant 0 : index
    %514 = vector.load %arg14[%c2_209, %c0_210, %c0_211] : memref<3x1x32xf32, #tpu.memory_space<vmem>>, vector<1x1x32xf32>
    %515 = vector.shape_cast %514 : vector<1x1x32xf32> to vector<1x32xf32>
    %516 = vector.broadcast %515 : vector<1x32xf32> to vector<24x32xf32>
    %517 = arith.addf %513, %516 : vector<24x32xf32>
    %518 = arith.addf %400, %517 : vector<24x32xf32>
    %c2_212 = arith.constant 2 : index
    %c0_213 = arith.constant 0 : index
    %c0_214 = arith.constant 0 : index
    %519 = vector.load %arg15[%c2_212, %c0_213, %c0_214] : memref<3x1x32xf32, #tpu.memory_space<vmem>>, vector<1x1x32xf32>
    %520 = vector.shape_cast %519 : vector<1x1x32xf32> to vector<1x32xf32>
    %c2_215 = arith.constant 2 : index
    %c0_216 = arith.constant 0 : index
    %c0_217 = arith.constant 0 : index
    %521 = vector.load %arg16[%c2_215, %c0_216, %c0_217] : memref<3x1x32xf32, #tpu.memory_space<vmem>>, vector<1x1x32xf32>
    %522 = vector.shape_cast %521 : vector<1x1x32xf32> to vector<1x32xf32>
    %cst_218 = arith.constant dense<0.000000e+00> : vector<24xf32>
    %523 = vector.multi_reduction <add>, %518, %cst_218 [1] : vector<24x32xf32> to vector<24xf32>
    %524 = vector.shape_cast %523 : vector<24xf32> to vector<24x1xf32>
    %cst_219 = arith.constant 3.200000e+01 : f32
    %525 = vector.broadcast %cst_219 : f32 to vector<24x1xf32>
    %526 = arith.divf %524, %525 : vector<24x1xf32>
    %527 = vector.broadcast %526 : vector<24x1xf32> to vector<24x32xf32>
    %528 = arith.subf %518, %527 : vector<24x32xf32>
    %529 = arith.mulf %528, %528 : vector<24x32xf32>
    %cst_220 = arith.constant dense<0.000000e+00> : vector<24xf32>
    %530 = vector.multi_reduction <add>, %529, %cst_220 [1] : vector<24x32xf32> to vector<24xf32>
    %531 = vector.shape_cast %530 : vector<24xf32> to vector<24x1xf32>
    %cst_221 = arith.constant 3.200000e+01 : f32
    %532 = vector.broadcast %cst_221 : f32 to vector<24x1xf32>
    %533 = arith.divf %531, %532 : vector<24x1xf32>
    %cst_222 = arith.constant 9.99999974E-6 : f32
    %534 = vector.broadcast %cst_222 : f32 to vector<24x1xf32>
    %535 = arith.addf %533, %534 : vector<24x1xf32>
    %536 = math.rsqrt %535 : vector<24x1xf32>
    %537 = vector.broadcast %536 : vector<24x1xf32> to vector<24x32xf32>
    %538 = arith.mulf %528, %537 : vector<24x32xf32>
    %539 = vector.broadcast %520 : vector<1x32xf32> to vector<24x32xf32>
    %540 = arith.mulf %538, %539 : vector<24x32xf32>
    %541 = vector.broadcast %522 : vector<1x32xf32> to vector<24x32xf32>
    %542 = arith.addf %540, %541 : vector<24x32xf32>
    %543 = arith.truncf %542 : vector<24x32xf32> to vector<24x32xbf16>
    %c2_223 = arith.constant 2 : index
    %c0_224 = arith.constant 0 : index
    %c0_225 = arith.constant 0 : index
    %544 = vector.load %arg17[%c2_223, %c0_224, %c0_225] : memref<3x32x128xbf16, #tpu.memory_space<vmem>>, vector<1x32x128xbf16>
    %545 = vector.shape_cast %544 : vector<1x32x128xbf16> to vector<32x128xbf16>
    %cst_226 = arith.constant dense<0.000000e+00> : vector<24x128xf32>
    %546 = tpu.matmul %543, %545, %cst_226 {dimension_numbers = #tpu.dot_dimension_numbers<[1], [0], [0], [1], [0, 0, 1, 1], [], []>} : vector<24x32xbf16>, vector<32x128xbf16>, vector<24x128xf32> -> vector<24x128xf32>
    %c2_227 = arith.constant 2 : index
    %c0_228 = arith.constant 0 : index
    %c0_229 = arith.constant 0 : index
    %547 = vector.load %arg18[%c2_227, %c0_228, %c0_229] : memref<3x1x128xf32, #tpu.memory_space<vmem>>, vector<1x1x128xf32>
    %548 = vector.shape_cast %547 : vector<1x1x128xf32> to vector<1x128xf32>
    %549 = vector.broadcast %548 : vector<1x128xf32> to vector<24x128xf32>
    %550 = arith.addf %546, %549 : vector<24x128xf32>
    %cst_230 = arith.constant 5.000000e-01 : f32
    %551 = vector.broadcast %cst_230 : f32 to vector<24x128xf32>
    %552 = arith.mulf %551, %550 : vector<24x128xf32>
    %cst_231 = arith.constant 4.471500e-02 : f32
    %553 = vector.broadcast %cst_231 : f32 to vector<24x128xf32>
    %554 = arith.mulf %553, %550 : vector<24x128xf32>
    %555 = arith.mulf %554, %550 : vector<24x128xf32>
    %556 = arith.mulf %555, %550 : vector<24x128xf32>
    %557 = arith.addf %550, %556 : vector<24x128xf32>
    %cst_232 = arith.constant 0.797884583 : f32
    %558 = vector.broadcast %cst_232 : f32 to vector<24x128xf32>
    %559 = arith.mulf %558, %557 : vector<24x128xf32>
    %560 = math.tanh %559 : vector<24x128xf32>
    %cst_233 = arith.constant 1.000000e+00 : f32
    %561 = vector.broadcast %cst_233 : f32 to vector<24x128xf32>
    %562 = arith.addf %561, %560 : vector<24x128xf32>
    %563 = arith.mulf %552, %562 : vector<24x128xf32>
    %564 = arith.truncf %563 : vector<24x128xf32> to vector<24x128xbf16>
    %c2_234 = arith.constant 2 : index
    %c0_235 = arith.constant 0 : index
    %c0_236 = arith.constant 0 : index
    %565 = vector.load %arg19[%c2_234, %c0_235, %c0_236] : memref<3x128x32xbf16, #tpu.memory_space<vmem>>, vector<1x128x32xbf16>
    %566 = vector.shape_cast %565 : vector<1x128x32xbf16> to vector<128x32xbf16>
    %cst_237 = arith.constant dense<0.000000e+00> : vector<24x32xf32>
    %567 = tpu.matmul %564, %566, %cst_237 {dimension_numbers = #tpu.dot_dimension_numbers<[1], [0], [0], [1], [0, 0, 1, 1], [], []>} : vector<24x128xbf16>, vector<128x32xbf16>, vector<24x32xf32> -> vector<24x32xf32>
    %c2_238 = arith.constant 2 : index
    %c0_239 = arith.constant 0 : index
    %c0_240 = arith.constant 0 : index
    %568 = vector.load %arg20[%c2_238, %c0_239, %c0_240] : memref<3x1x32xf32, #tpu.memory_space<vmem>>, vector<1x1x32xf32>
    %569 = vector.shape_cast %568 : vector<1x1x32xf32> to vector<1x32xf32>
    %570 = vector.broadcast %569 : vector<1x32xf32> to vector<24x32xf32>
    %571 = arith.addf %567, %570 : vector<24x32xf32>
    %572 = arith.addf %518, %571 : vector<24x32xf32>
    %c0_241 = arith.constant 0 : index
    %c0_242 = arith.constant 0 : index
    %573 = vector.load %arg21[%c0_241, %c0_242] : memref<1x32xf32, #tpu.memory_space<vmem>>, vector<1x32xf32>
    %c0_243 = arith.constant 0 : index
    %c0_244 = arith.constant 0 : index
    %574 = vector.load %arg22[%c0_243, %c0_244] : memref<1x32xf32, #tpu.memory_space<vmem>>, vector<1x32xf32>
    %cst_245 = arith.constant dense<0.000000e+00> : vector<24xf32>
    %575 = vector.multi_reduction <add>, %572, %cst_245 [1] : vector<24x32xf32> to vector<24xf32>
    %576 = vector.shape_cast %575 : vector<24xf32> to vector<24x1xf32>
    %cst_246 = arith.constant 3.200000e+01 : f32
    %577 = vector.broadcast %cst_246 : f32 to vector<24x1xf32>
    %578 = arith.divf %576, %577 : vector<24x1xf32>
    %579 = vector.broadcast %578 : vector<24x1xf32> to vector<24x32xf32>
    %580 = arith.subf %572, %579 : vector<24x32xf32>
    %581 = arith.mulf %580, %580 : vector<24x32xf32>
    %cst_247 = arith.constant dense<0.000000e+00> : vector<24xf32>
    %582 = vector.multi_reduction <add>, %581, %cst_247 [1] : vector<24x32xf32> to vector<24xf32>
    %583 = vector.shape_cast %582 : vector<24xf32> to vector<24x1xf32>
    %cst_248 = arith.constant 3.200000e+01 : f32
    %584 = vector.broadcast %cst_248 : f32 to vector<24x1xf32>
    %585 = arith.divf %583, %584 : vector<24x1xf32>
    %cst_249 = arith.constant 9.99999974E-6 : f32
    %586 = vector.broadcast %cst_249 : f32 to vector<24x1xf32>
    %587 = arith.addf %585, %586 : vector<24x1xf32>
    %588 = math.rsqrt %587 : vector<24x1xf32>
    %589 = vector.broadcast %588 : vector<24x1xf32> to vector<24x32xf32>
    %590 = arith.mulf %580, %589 : vector<24x32xf32>
    %591 = vector.broadcast %573 : vector<1x32xf32> to vector<24x32xf32>
    %592 = arith.mulf %590, %591 : vector<24x32xf32>
    %593 = vector.broadcast %574 : vector<1x32xf32> to vector<24x32xf32>
    %594 = arith.addf %592, %593 : vector<24x32xf32>
    %c0_250 = arith.constant 0 : index
    %c0_251 = arith.constant 0 : index
    %595 = vector.load %arg23[%c0_250, %c0_251] : memref<1x32xf32, #tpu.memory_space<vmem>>, vector<1x32xf32>
    %596 = vector.extract_strided_slice %594 {offsets = [0, 0], sizes = [16, 32], strides = [1, 1]} : vector<24x32xf32> to vector<16x32xf32>
    %597 = vector.broadcast %595 : vector<1x32xf32> to vector<16x32xf32>
    %598 = arith.mulf %597, %596 : vector<16x32xf32>
    %599 = arith.addf %23, %598 : vector<16x32xf32>
    %c0_252 = arith.constant 0 : index
    %c0_253 = arith.constant 0 : index
    %c0_254 = arith.constant 0 : index
    %600 = vector.load %arg25[%c0_252, %c0_253, %c0_254] : memref<1x16x32xf32, #tpu.memory_space<vmem>>, vector<1x16x32xf32>
    %601 = vector.shape_cast %600 : vector<1x16x32xf32> to vector<16x32xf32>
    %602 = vector.shape_cast %599 : vector<16x32xf32> to vector<1x16x32xf32>
    tpu.vector_store %arg25[%c0_252, %c0_253, %c0_254], %602 {strides = array<i32>} : memref<1x16x32xf32, #tpu.memory_space<vmem>>, vector<1x16x32xf32>,
    %c0_255 = arith.constant 0 : index
    %c0_256 = arith.constant 0 : index
    %603 = vector.load %arg24[%c0_255, %c0_256] : memref<1x32xf32, #tpu.memory_space<vmem>>, vector<1x32xf32>
    %604 = vector.extract_strided_slice %594 {offsets = [16, 0], sizes = [8, 32], strides = [1, 1]} : vector<24x32xf32> to vector<8x32xf32>
    %605 = vector.broadcast %603 : vector<1x32xf32> to vector<8x32xf32>
    %606 = arith.mulf %605, %604 : vector<8x32xf32>
    %607 = arith.addf %47, %606 : vector<8x32xf32>
    %c0_257 = arith.constant 0 : index
    %c0_258 = arith.constant 0 : index
    %c0_259 = arith.constant 0 : index
    %608 = vector.load %arg26[%c0_257, %c0_258, %c0_259] : memref<1x8x32xf32, #tpu.memory_space<vmem>>, vector<1x8x32xf32>
    %609 = vector.shape_cast %608 : vector<1x8x32xf32> to vector<8x32xf32>
    %610 = vector.shape_cast %607 : vector<8x32xf32> to vector<1x8x32xf32>
    tpu.vector_store %arg26[%c0_257, %c0_258, %c0_259], %610 {strides = array<i32>} : memref<1x8x32xf32, #tpu.memory_space<vmem>>, vector<1x8x32xf32>,
    return
  }
  func.func @transform_0(%arg0: i32) -> (i32, i32, i32) {
    %c0_i32 = arith.constant 0 : i32
    %c0_i32_0 = arith.constant 0 : i32
    %c0_i32_1 = arith.constant 0 : i32
    return %arg0, %c0_i32, %c0_i32_0 : i32, i32, i32
  }
  func.func @transform_1(%arg0: i32) -> (i32, i32, i32) {
    %c0_i32 = arith.constant 0 : i32
    %c0_i32_0 = arith.constant 0 : i32
    %c0_i32_1 = arith.constant 0 : i32
    return %arg0, %c0_i32, %c0_i32_0 : i32, i32, i32
  }
  func.func @transform_2(%arg0: i32) -> (i32, i32, i32) {
    %c0_i32 = arith.constant 0 : i32
    %c0_i32_0 = arith.constant 0 : i32
    %c0_i32_1 = arith.constant 0 : i32
    return %arg0, %c0_i32, %c0_i32_0 : i32, i32, i32
  }
  func.func @transform_3(%arg0: i32) -> (i32, i32, i32) {
    %c0_i32 = arith.constant 0 : i32
    %c0_i32_0 = arith.constant 0 : i32
    %c0_i32_1 = arith.constant 0 : i32
    return %arg0, %c0_i32, %c0_i32_0 : i32, i32, i32
  }
  func.func @transform_4(%arg0: i32) -> (i32, i32) {
    %c0_i32 = arith.constant 0 : i32
    %c0_i32_0 = arith.constant 0 : i32
    %c0_i32_1 = arith.constant 0 : i32
    return %c0_i32, %c0_i32_0 : i32, i32
  }
  func.func @transform_5(%arg0: i32) -> (i32, i32) {
    %c0_i32 = arith.constant 0 : i32
    %c0_i32_0 = arith.constant 0 : i32
    %c0_i32_1 = arith.constant 0 : i32
    return %c0_i32, %c0_i32_0 : i32, i32
  }
  func.func @transform_6(%arg0: i32) -> (i32, i32) {
    %c0_i32 = arith.constant 0 : i32
    %c0_i32_0 = arith.constant 0 : i32
    %c0_i32_1 = arith.constant 0 : i32
    return %c0_i32, %c0_i32_0 : i32, i32
  }
  func.func @transform_7(%arg0: i32) -> (i32, i32) {
    %c0_i32 = arith.constant 0 : i32
    %c0_i32_0 = arith.constant 0 : i32
    %c0_i32_1 = arith.constant 0 : i32
    return %c0_i32, %c0_i32_0 : i32, i32
  }
  func.func @transform_8(%arg0: i32) -> (i32, i32, i32) {
    %c0_i32 = arith.constant 0 : i32
    %c0_i32_0 = arith.constant 0 : i32
    %c0_i32_1 = arith.constant 0 : i32
    %c0_i32_2 = arith.constant 0 : i32
    return %c0_i32, %c0_i32_0, %c0_i32_1 : i32, i32, i32
  }
  func.func @transform_9(%arg0: i32) -> (i32, i32, i32) {
    %c0_i32 = arith.constant 0 : i32
    %c0_i32_0 = arith.constant 0 : i32
    %c0_i32_1 = arith.constant 0 : i32
    %c0_i32_2 = arith.constant 0 : i32
    return %c0_i32, %c0_i32_0, %c0_i32_1 : i32, i32, i32
  }
  func.func @transform_10(%arg0: i32) -> (i32, i32, i32) {
    %c0_i32 = arith.constant 0 : i32
    %c0_i32_0 = arith.constant 0 : i32
    %c0_i32_1 = arith.constant 0 : i32
    %c0_i32_2 = arith.constant 0 : i32
    return %c0_i32, %c0_i32_0, %c0_i32_1 : i32, i32, i32
  }
  func.func @transform_11(%arg0: i32) -> (i32, i32, i32) {
    %c0_i32 = arith.constant 0 : i32
    %c0_i32_0 = arith.constant 0 : i32
    %c0_i32_1 = arith.constant 0 : i32
    %c0_i32_2 = arith.constant 0 : i32
    return %c0_i32, %c0_i32_0, %c0_i32_1 : i32, i32, i32
  }
  func.func @transform_12(%arg0: i32) -> (i32, i32, i32) {
    %c0_i32 = arith.constant 0 : i32
    %c0_i32_0 = arith.constant 0 : i32
    %c0_i32_1 = arith.constant 0 : i32
    %c0_i32_2 = arith.constant 0 : i32
    return %c0_i32, %c0_i32_0, %c0_i32_1 : i32, i32, i32
  }
  func.func @transform_13(%arg0: i32) -> (i32, i32, i32) {
    %c0_i32 = arith.constant 0 : i32
    %c0_i32_0 = arith.constant 0 : i32
    %c0_i32_1 = arith.constant 0 : i32
    %c0_i32_2 = arith.constant 0 : i32
    return %c0_i32, %c0_i32_0, %c0_i32_1 : i32, i32, i32
  }
  func.func @transform_14(%arg0: i32) -> (i32, i32, i32) {
    %c0_i32 = arith.constant 0 : i32
    %c0_i32_0 = arith.constant 0 : i32
    %c0_i32_1 = arith.constant 0 : i32
    %c0_i32_2 = arith.constant 0 : i32
    return %c0_i32, %c0_i32_0, %c0_i32_1 : i32, i32, i32
  }
  func.func @transform_15(%arg0: i32) -> (i32, i32, i32) {
    %c0_i32 = arith.constant 0 : i32
    %c0_i32_0 = arith.constant 0 : i32
    %c0_i32_1 = arith.constant 0 : i32
    %c0_i32_2 = arith.constant 0 : i32
    return %c0_i32, %c0_i32_0, %c0_i32_1 : i32, i32, i32
  }
  func.func @transform_16(%arg0: i32) -> (i32, i32, i32) {
    %c0_i32 = arith.constant 0 : i32
    %c0_i32_0 = arith.constant 0 : i32
    %c0_i32_1 = arith.constant 0 : i32
    %c0_i32_2 = arith.constant 0 : i32
    return %c0_i32, %c0_i32_0, %c0_i32_1 : i32, i32, i32
  }
  func.func @transform_17(%arg0: i32) -> (i32, i32, i32) {
    %c0_i32 = arith.constant 0 : i32
    %c0_i32_0 = arith.constant 0 : i32
    %c0_i32_1 = arith.constant 0 : i32
    %c0_i32_2 = arith.constant 0 : i32
    return %c0_i32, %c0_i32_0, %c0_i32_1 : i32, i32, i32
  }
  func.func @transform_18(%arg0: i32) -> (i32, i32, i32) {
    %c0_i32 = arith.constant 0 : i32
    %c0_i32_0 = arith.constant 0 : i32
    %c0_i32_1 = arith.constant 0 : i32
    %c0_i32_2 = arith.constant 0 : i32
    return %c0_i32, %c0_i32_0, %c0_i32_1 : i32, i32, i32
  }
  func.func @transform_19(%arg0: i32) -> (i32, i32, i32) {
    %c0_i32 = arith.constant 0 : i32
    %c0_i32_0 = arith.constant 0 : i32
    %c0_i32_1 = arith.constant 0 : i32
    %c0_i32_2 = arith.constant 0 : i32
    return %c0_i32, %c0_i32_0, %c0_i32_1 : i32, i32, i32
  }
  func.func @transform_20(%arg0: i32) -> (i32, i32) {
    %c0_i32 = arith.constant 0 : i32
    %c0_i32_0 = arith.constant 0 : i32
    %c0_i32_1 = arith.constant 0 : i32
    return %c0_i32, %c0_i32_0 : i32, i32
  }
  func.func @transform_21(%arg0: i32) -> (i32, i32) {
    %c0_i32 = arith.constant 0 : i32
    %c0_i32_0 = arith.constant 0 : i32
    %c0_i32_1 = arith.constant 0 : i32
    return %c0_i32, %c0_i32_0 : i32, i32
  }
  func.func @transform_22(%arg0: i32) -> (i32, i32) {
    %c0_i32 = arith.constant 0 : i32
    %c0_i32_0 = arith.constant 0 : i32
    %c0_i32_1 = arith.constant 0 : i32
    return %c0_i32, %c0_i32_0 : i32, i32
  }
  func.func @transform_23(%arg0: i32) -> (i32, i32) {
    %c0_i32 = arith.constant 0 : i32
    %c0_i32_0 = arith.constant 0 : i32
    %c0_i32_1 = arith.constant 0 : i32
    return %c0_i32, %c0_i32_0 : i32, i32
  }
  func.func @transform_24(%arg0: i32) -> (i32, i32, i32) {
    %c0_i32 = arith.constant 0 : i32
    %c0_i32_0 = arith.constant 0 : i32
    %c0_i32_1 = arith.constant 0 : i32
    return %arg0, %c0_i32, %c0_i32_0 : i32, i32, i32
  }
  func.func @transform_25(%arg0: i32) -> (i32, i32, i32) {
    %c0_i32 = arith.constant 0 : i32
    %c0_i32_0 = arith.constant 0 : i32
    %c0_i32_1 = arith.constant 0 : i32
    return %arg0, %c0_i32, %c0_i32_0 : i32, i32, i32
  }
}

</mosaic_0001>

<bundles_post_ra>
// kernel: one_stream_attention_block_forward.3
= control target key start
LH: loop header
LB: loop body
LE: loop exit
PB: predicated region body
PF: predicated region fallthrough
CT: control target
= control target key end

     0   :  { %s7125_s0 = inlined_call_operand.vmem [shape: f32[2,16,32], index: 0, kind: input, shape index: {}]   ;;  %s7126_s1 = inlined_call_operand.vmem [shape: f32[2,8,32], index: 1, kind: input, shape index: {}]   ;;  %s7127_s2 = inlined_call_operand.vmem [shape: f32[2,16,32], index: 2, kind: input, shape index: {}]   ;;  %s7128_s3 = inlined_call_operand.vmem [shape: f32[2,8,32], index: 3, kind: input, shape index: {}]   ;;  %s7129_s4 = inlined_call_operand.vmem [shape: f32[1,32], index: 4, kind: input, shape index: {}]   ;;  %s7130_s5 = inlined_call_operand.vmem [shape: f32[1,32], index: 5, kind: input, shape index: {}]   ;;  %s7131_s6 = inlined_call_operand.vmem [shape: f32[1,32], index: 6, kind: input, shape index: {}]   ;;  %s7132_s7 = inlined_call_operand.vmem [shape: f32[1,32], index: 7, kind: input, shape index: {}]   ;;  %s7133_s8 = inlined_call_operand.vmem [shape: f32[3,1,32], index: 8, kind: input, shape index: {}]   ;;  %s7134_s9 = inlined_call_operand.vmem [shape: f32[3,1,32], index: 9, kind: input, shape index: {}]   ;;  %s7135_s10 = inlined_call_operand.vmem [shape: bf16[3,32,96], index: 10, kind: input, shape index: {}]   ;;  %s7136_s11 = inlined_call_operand.vmem [shape: f32[3,1,96], index: 11, kind: input, shape index: {}]   ;;  %s7137_s12 = inlined_call_operand.vmem [shape: bf16[3,32,32], index: 12, kind: input, shape index: {}]   ;;  %s7138_s13 = inlined_call_operand.vmem [shape: f32[3,1,32], index: 13, kind: input, shape index: {}]   ;;  %s7139_s14 = inlined_call_operand.vmem [shape: f32[3,1,32], index: 14, kind: input, shape index: {}]   ;;  %s7140_s15 = inlined_call_operand.vmem [shape: f32[3,1,32], index: 15, kind: input, shape index: {}]   ;;  %s7141_s16 = inlined_call_operand.vmem [shape: bf16[3,32,128], index: 16, kind: input, shape index: {}]   ;;  %s7142_s17 = inlined_call_operand.vmem [shape: f32[3,1,128], index: 17, kind: input, shape index: {}]   ;;  %s7143_s18 = inlined_call_operand.vmem [shape: bf16[3,128,32], index: 18, kind: input, shape index: {}]   ;;  %s7144_s19 = inlined_call_operand.vmem [shape: f32[3,1,32], index: 19, kind: input, shape index: {}]   ;;  %s7145_s20 = inlined_call_operand.vmem [shape: f32[1,32], index: 20, kind: input, shape index: {}]   ;;  %s7146_s21 = inlined_call_operand.vmem [shape: f32[1,32], index: 21, kind: input, shape index: {}]   ;;  %s7147_s22 = inlined_call_operand.vmem [shape: f32[1,32], index: 22, kind: input, shape index: {}]   ;;  %s7148_s23 = inlined_call_operand.vmem [shape: f32[1,32], index: 23, kind: input, shape index: {}]   ;;  %s7149_s24 = inlined_call_operand.hbm [shape: f32[2,16,32], index: 24, kind: output, shape index: {0}]   ;;  %s7150_s25 = inlined_call_operand.vmem [shape: f32[2,8,32], index: 25, kind: output, shape index: {1}]  }
   0x1   :  { %7194 = sst [smem:[#allocation15_spill]] %s7125_s0 }
   0x2   :  { %7195 = sst [smem:[#allocation16_spill]] %s7126_s1 }
   0x3   :  { %7196 = sst [smem:[#allocation17_spill]] %s7127_s2 }
   0x4   :  { %7197 = sst [smem:[#allocation18_spill]] %s7128_s3 }
   0x5   :  { %7198 = sst [smem:[#allocation19_spill]] %s7129_s4 }
   0x6   :  { %7199 = sst [smem:[#allocation20_spill]] %s7130_s5 }
   0x7   :  { %7200 = sst [smem:[#allocation21_spill]] %s7131_s6 }
   0x8   :  { %7201 = sst [smem:[#allocation22_spill]] %s7132_s7 }
   0x9   :  { %7202 = sst [smem:[#allocation23_spill]] %s7133_s8 }
   0xa   :  { %7203 = sst [smem:[#allocation24_spill]] %s7134_s9 }
   0xb   :  { %7204 = sst [smem:[#allocation25_spill]] %s7146_s21 }
   0xc   :  { %7205 = sst [smem:[#allocation26_spill]] %s7147_s22 }
   0xd   :  { %7206 = sst [smem:[#allocation27_spill]] %s7148_s23 }
   0xe   :  { %7207 = sst [smem:[#allocation28_spill]] %s7149_s24 }
   0xf   :  { %7208 = sst [smem:[#allocation29_spill]] %s7150_s25 }
  0x10   :  { %31 = vsyncpa [#allocation4], 0 }
  0x11   :  { %33 = vsyncpa [#allocation4 + $0x1], 0  ;;  %s6129_s29 = smov 0   ;;  %s6131_s2 = smov 0  }
  0x12   :  { %s6133_s6 = smov 0   ;;  %s6135_s30 = smov 0  }
  0x13 LB: > { %7209 = sst [smem:[#allocation6_spill]] %s5969_s29  ;;  %s6150_s7 = sadd.s32 4294967295, %s5981_s30   ;;  %s5981_s30 = sphi %s6135_s30, %s7256_s30   ;;  %s5977_s6 = sphi %s6133_s6, %s7258_s6   ;;  %s5973_s2 = sphi %s6131_s2, %s7260_s2   ;;  %s5969_s29 = sphi %s6129_s29, %s7259_s29  }
  0x14   : > { %7210 = sst [smem:[#allocation7_spill]] %s5977_s6  ;;  %s4814_s3 = sadd.s32 4294967294, %s5981_s30  }
  0x15   : > { %7211 = sst [smem:[#allocation8_spill]] %s5981_s30  ;;  %s6154_s26 = sadd.s32 1, %s5981_s30  }
  0x16   : > { %7212 = sst [smem:[#allocation9_spill]] %s6150_s7  ;;  %s570_s1 = sadd.s32 1, %s5977_s6 }
  0x17   : > { %7213 = sst [smem:[#allocation10_spill]] %s6154_s26  ;;  %s567_s8 = ssub.s32 %s5981_s30, %s6154_s26 }
  0x18   : > { %p580_p0 = scmp.ne.s32.totalorder %s5977_s6, %s5973_s2  ;;  %p568_p1 = scmp.eq.s32.totalorder %s567_s8, 0 }
  0x19   : > { %p581_p2 = scmp.eq.s32.totalorder %s6150_s7, 1  ;;  %p586_p3 = scmp.ne.s32.totalorder %s5973_s2, %s5969_s29 }
  0x1a   : > { %p587_p4 = scmp.eq.s32.totalorder %s4814_s3, 1  ;;  %p4817_p7 = scmp.ge.s32.totalorder %s5981_s30, 1 }
  0x1b   : > { %s6165_s27 = scalar_select %p568_p1, %s5977_s6, %s570_s1  }
  0x1c   : > { %p6167_p5 = por %p581_p2, %p580_p0  ;;  %p6171_p6 = por %p587_p4, %p586_p3 }
  0x1d   : > { %7214 = sst [smem:[#allocation11_spill]] %s6165_s27  ;;  %p721_p8 = scmp.lt.s32.totalorder %s5981_s30, 3 }
  0x1e   : > { %s7215_s4 = scalar_select %p6167_p5, 1, 0 }
  0x1f   : > { %s7217_s28 = scalar_select %p6171_p6, 1, 0 }
  0x20   : > { %7216 = sst [smem:[#allocation12_spill]] %s7215_s4  ;;  %p722_p9 = pnand %p4817_p7, %p721_p8 }
  0x21   : > { %7218 = sst [smem:[#allocation13_spill]] %s7217_s28 }
  0x22   : > { %725 = sbr.rel (%p722_p9) target bundleno = 12343 (0x3037), region = 116 }
  0x29   : > { %p806_p10 = scmp.lt.s32.totalorder %s6150_s7, 1  ;;  %vm833_vm0 = vcmask 261120   ;;  %s7220_s8 = sld [smem:[#allocation15_spill]]  ;;  %vm1065_vm1 = vcmask 64512   ;;  %vm1126_vm2 = vcmask 195584   ;;  %vm1173_vm3 = vcmask 1043456  }
  0x2a   : > { %s7221_s28 = sld [smem:[#allocation16_spill]]  ;;  %s7222_s26 = sld [smem:[#allocation19_spill]]  ;;  %vm1759_vm4 = vcmask 130048  }
  0x2b   : > { %s6179_s9 = scalar_select %p806_p10, %s6150_s7, 1 }
  0x2c   : > { %s7223_s3 = sld [smem:[#allocation17_spill]]  ;;  %s7224_s25 = sld [smem:[#allocation20_spill]] }
  0x2d   : > { %s5043_s5 = sshll.u32 %s6179_s9, 4  ;;  %s6183_s0 = sshll.u32 %s6179_s9, 3 }
  0x2e   : > { %7219 = sst [smem:[#allocation14_spill]] %s6183_s0  ;;  %s7225_s23 = sld [smem:[#allocation21_spill]] }
  0x2f   : > { %s810_s27 = scalar_lea.vmem %s7220_s8, %s5043_s5  ;;  %s7226_s9 = sld [smem:[#allocation18_spill]] }
  0x30   : > { %v829_v0 = vld [vmem:[%s810_s27] sm:$0xff]  ;;  %s814_s29 = scalar_lea.vmem %s7221_s28, %s6183_s0  ;;  %v830_v3 = vld [vmem:[%s810_s27 + $0x8] sm:$0xff]  ;;  %s7227_s28 = sld [smem:[#allocation22_spill]] }
  0x31   : > { %v834_v1 = vsel %vm833_vm0, %v829_v0, 0.0  ;;  %v877_v2 = vld [vmem:[%s814_s29] sm:$0xff]  ;;  %v837_v5 = vsel %vm833_vm0, %v830_v3, 0.0  ;;  %s7229_s6 = sld [smem:[#allocation24_spill]]  ;;  %s7189_s27 = smov 96  }
  0x32   : > { %835 = vadd.xlane.f32.xlu0 %v834_v1  ;;  %v880_v4 = vsel %vm833_vm0, %v877_v2, 0.0  ;;  %v4826_v31 = vld [vmem:[%s7222_s26] ss:$0 sm:$0xff]  ;;  %s819_s1 = scalar_lea.vmem %s7223_s3, %s5043_s5  ;;  %s7187_s24 = smov 88  }
  0x33   : > { %881 = vadd.xlane.f32.xlu1 %v880_v4  ;;  %v4827_v33 = vld [vmem:[%s7224_s25] ss:$0 sm:$0xff]  ;;  %v908_v47 = vld [vmem:[%s819_s1 + $0x8] sm:$0xff]  ;;  %s7181_s25 = smov 56   ;;  %s7179_s30 = smov 80  }
  0x34   : > { %v907_v36 = vld [vmem:[%s819_s1] sm:$0xff]  ;;  %s7228_s1 = sld [smem:[#allocation23_spill]]  ;;  %s7177_s4 = smov 112  }
  0x35   : > { %v4828_v37 = vld [vmem:[%s7225_s23] ss:$0 sm:$0xff]  ;;  %s823_s26 = scalar_lea.vmem %s7226_s9, %s6183_s0  ;;  %s7185_s23 = smov 120  }
  0x36   : > { %838 = vadd.xlane.f32.xlu0 %v837_v5  ;;  %v4829_v41 = vld [vmem:[%s7227_s28] ss:$0 sm:$0xff]  ;;  %s7183_s28 = smov 64   ;;  %s7175_s3 = smov 48  }
  0x37   : > { %v913_v45 = vld [vmem:[%s823_s26] sm:$0xff]  ;;  %s7230_s9 = smov %s7229_s6  ;;  %s7171_s8 = smov 72  }
  0x38   : > { %s7169_s29 = smov 104   ;;  %s7165_s26 = smov 8  }
  0x39   : > { %s7163_s5 = smov 16   ;;  %s7240_s21 = smov 96  }
  0x3a   : > { %s7241_s7 = smov 88   ;;  %s7244_s0 = smov 56  }
  0x3b   : > { %s7251_s22 = sld [smem:[#allocation28_spill]] }
  0xbf   : > { %v836_v6 = vpop.xlane.xlu0 %835 }
  0xc0   : > { %v841_v7 = vmul.f32 0.03125, %v836_v6  ;;  %v882_v8 = vpop.xlane.xlu1 %881 }
  0xc1   : > { %v883_v9 = vmul.f32 0.03125, %v882_v8 }
  0xc2   : > { %v843_v10 = vsub.f32 %v829_v0, %v841_v7 }
  0xc3   : > { %v884_v11 = vsub.f32 %v877_v2, %v883_v9  ;;  %v839_v12 = vpop.xlane.xlu0 %838  ;;  %v5667_v9 = vld [vmem:[%s7135_s10] sm:$0xff]  }
  0xc4   : > { %v842_v13 = vmul.f32 0.03125, %v839_v12  ;;  %v845_v14 = vmul.f32 %v843_v10, %v843_v10  ;;  %5208 = vmatprep.subr.bf16.mxu0 %v5667_v9 }
  0xc5   : > { %v885_v15 = vmul.f32 %v884_v11, %v884_v11  ;;  %5209 = vmatpush3.bf16.msra.mxu0 %v5667_v9 }
  0xc6   : > { %v844_v16 = vsub.f32 %v830_v3, %v842_v13  ;;  %v847_v17 = vsel %vm833_vm0, %v845_v14, 0.0 }
  0xc7   : > { %848 = vadd.xlane.f32.xlu1 %v847_v17  ;;  %v886_v18 = vsel %vm833_vm0, %v885_v15, 0.0 }
  0xc8   : > { %v846_v19 = vmul.f32 %v844_v16, %v844_v16 }
  0xca   : > { %v850_v20 = vsel %vm833_vm0, %v846_v19, 0.0 }
  0xcb   : > { %887 = vadd.xlane.f32.xlu1 %v886_v18  ;;  %851 = vadd.xlane.f32.xlu0 %v850_v20 }
 0x154   : > { %v849_v21 = vpop.xlane.xlu1 %848 }
 0x155   : > { %v853_v22 = vmul.f32 0.03125, %v849_v21 }
 0x157   : > { %v855_v23 = vadd.f32 1e-05, %v853_v22  ;;  %v4830_v22 = vld [vmem:[%s7228_s1] ss:$0 sm:$0xff] }
 0x158   : > { %v888_v24 = vpop.xlane.xlu1 %887  ;;  %v852_v25 = vpop.xlane.xlu0 %851 }
 0x159   : > { %5709 = vrsqrt.f32 %v855_v23  ;;  %v889_v26 = vmul.f32 0.03125, %v888_v24  ;;  %v854_v27 = vmul.f32 0.03125, %v852_v25 }
 0x15b   : > { %v890_v28 = vadd.f32 1e-05, %v889_v26  ;;  %v856_v29 = vadd.f32 1e-05, %v854_v27 }
 0x15d   : > { %5711 = vrsqrt.f32 %v890_v28  ;;  %v4831_v28 = vld [vmem:[%s7229_s6] ss:$0 sm:$0xff]  ;;  %s7167_s6 = smov 40  }
 0x15e   : > { %5713 = vrsqrt.f32 %v856_v29 }
 0x163   : > { %v5710_v30 = vpop.eup %5709 }
 0x164   : > { %v859_v32 = vmul.f32 %v5710_v30, %v843_v10  ;;  %v5668_v10 = vld [vmem:[%s7135_s10 + $0x8] sm:$0xff]  }
 0x165   : > { %5210 = vmatprep.subr.bf16.mxu0 %v5668_v10 }
 0x166   : > { %v867_v34 = vmul.f32 %v4826_v31, %v859_v32  ;;  %5211 = vmatpush3.bf16.msra.mxu0 %v5668_v10 }
 0x167   : > { %v5712_v35 = vpop.eup %5711 }
 0x168   : > { %v5714_v38 = vpop.eup %5713  ;;  %v6218_v39 = vadd.f32 %v4827_v33, %v867_v34  ;;  %v892_v40 = vmul.f32 %v5712_v35, %v884_v11 }
 0x169   : > { %v860_v42 = vmul.f32 %v5714_v38, %v844_v16 }
 0x16a   : > { %v909_v43 = vadd.f32 %v907_v36, %v6218_v39  ;;  %v899_v44 = vmul.f32 %v4828_v37, %v892_v40  ;;  %v4832_v36 = vld [vmem:[%s7136_s11] ss:$0 sm:$0xff] }
 0x16b   : > { %v868_v46 = vmul.f32 %v4826_v31, %v860_v42 }
 0x16c   : > { %911 = vst.msk [vmem:[#allocation2] sm:$0xff] %vm833_vm0, %v909_v43  ;;  %v6225_v48 = vadd.f32 %v4829_v41, %v899_v44 }
 0x16d   : > { %v6227_v49 = vadd.f32 %v4827_v33, %v868_v46 }
 0x16e   : > { %v914_v50 = vadd.f32 %v913_v45, %v6225_v48 }
 0x16f   : > { %v910_v51 = vadd.f32 %v908_v47, %v6227_v49 }
 0x170   : > { %915 = vst.msk [vmem:[#allocation2 + $0x10] sm:$0xff] %vm833_vm0, %v914_v50 }
 0x171   : > { %912 = vst.msk [vmem:[#allocation2 + $0x8] sm:$0xff] %vm833_vm0, %v910_v51 }
 0x173   : > { %v6233_v52 = vld [vmem:[#allocation2] sm:$0xff] }
 0x174   : > { %v921_v53 = vsel %vm833_vm0, %v6233_v52, 0.0 }
 0x175   : > { %922 = vadd.xlane.f32.xlu0 %v921_v53 }
 0x177   : > { %v6237_v54 = vld [vmem:[#allocation2 + $0x10] sm:$0xff] }
 0x178   : > { %v927_v55 = vsel %vm833_vm0, %v6237_v54, 0.0  ;;  %v6241_v56 = vld [vmem:[#allocation2 + $0x8] sm:$0xff] }
 0x179   : > { %928 = vadd.xlane.f32.xlu0 %v927_v55  ;;  %v924_v57 = vsel %vm833_vm0, %v6241_v56, 0.0 }
 0x17a   : > { %925 = vadd.xlane.f32.xlu1 %v924_v57 }
 0x202   : > { %v923_v58 = vpop.xlane.xlu0 %922 }
 0x203   : > { %v930_v59 = vmul.f32 0.03125, %v923_v58 }
 0x205   : > { %v933_v60 = vsub.f32 %v6233_v52, %v930_v59 }
 0x206   : > { %v929_v61 = vpop.xlane.xlu0 %928 }
 0x207   : > { %v926_v62 = vpop.xlane.xlu1 %925  ;;  %v932_v63 = vmul.f32 0.03125, %v929_v61  ;;  %v936_v0 = vmul.f32 %v933_v60, %v933_v60 }
 0x208   : > { %v931_v1 = vmul.f32 0.03125, %v926_v62 }
 0x209   : > { %v935_v2 = vsub.f32 %v6237_v54, %v932_v63  ;;  %v939_v3 = vsel %vm833_vm0, %v936_v0, 0.0 }
 0x20a   : > { %v934_v4 = vsub.f32 %v6241_v56, %v931_v1  ;;  %940 = vadd.xlane.f32.xlu1 %v939_v3 }
 0x20b   : > { %v938_v5 = vmul.f32 %v935_v2, %v935_v2 }
 0x20c   : > { %v937_v6 = vmul.f32 %v934_v4, %v934_v4 }
 0x20d   : > { %v945_v7 = vsel %vm833_vm0, %v938_v5, 0.0 }
 0x20e   : > { %v942_v8 = vsel %vm833_vm0, %v937_v6, 0.0  ;;  %946 = vadd.xlane.f32.xlu1 %v945_v7 }
 0x20f   : > { %943 = vadd.xlane.f32.xlu0 %v942_v8 }
 0x297   : > { %v941_v11 = vpop.xlane.xlu1 %940 }
 0x298   : > { %v948_v12 = vmul.f32 0.03125, %v941_v11 }
 0x29a   : > { %v951_v13 = vadd.f32 1e-05, %v948_v12 }
 0x29b   : > { %v947_v14 = vpop.xlane.xlu1 %946 }
 0x29c   : > { %5715 = vrsqrt.f32 %v951_v13  ;;  %v950_v15 = vmul.f32 0.03125, %v947_v14  ;;  %v944_v16 = vpop.xlane.xlu0 %943 }
 0x29d   : > { %v949_v17 = vmul.f32 0.03125, %v944_v16 }
 0x29e   : > { %v953_v18 = vadd.f32 1e-05, %v950_v15 }
 0x29f   : > { %v952_v19 = vadd.f32 1e-05, %v949_v17 }
 0x2a0   : > { %5717 = vrsqrt.f32 %v953_v18 }
 0x2a1   : > { %5719 = vrsqrt.f32 %v952_v19 }
 0x2a6   : > { %v5716_v20 = vpop.eup %5715 }
 0x2a7   : > { %v957_v21 = vmul.f32 %v5716_v20, %v933_v60 }
 0x2a9   : > { %v966_v27 = vmul.f32 %v4830_v22, %v957_v21 }
 0x2aa   : > { %v5718_v23 = vpop.eup %5717 }
 0x2ab   : > { %v5720_v24 = vpop.eup %5719  ;;  %v959_v25 = vmul.f32 %v5718_v23, %v935_v2  ;;  %v975_v32 = vadd.f32 %v4831_v28, %v966_v27 }
 0x2ac   : > { %v958_v26 = vmul.f32 %v5720_v24, %v934_v4 }
 0x2ad   : > { %v968_v29 = vmul.f32 %v4830_v22, %v959_v25 }
 0x2ae   : > { %v967_v30 = vmul.f32 %v4830_v22, %v958_v26 }
 0x2af   : > { %v977_v31 = vadd.f32 %v4831_v28, %v968_v29 }
 0x2b0   : > { %v976_v33 = vadd.f32 %v4831_v28, %v967_v30 }
 0x2b1   : > { %v979_v34 = vpack.c.bf16 %v977_v31, %v977_v31 }
 0x2b2   : > { %v978_v35 = vpack.c.bf16 %v976_v33, %v975_v32 }
 0x2b4   : > { %5212 = vmatprep.mubr.msk.bf16.mxu0 %vm833_vm0, %v978_v35 }
 0x2b5   : > { %5213 = vmatmul.mubr.msk.bf16.vlgmr.msra.gmra.mrb[0].mxu0 %vm833_vm0, %v979_v34 }
 0x388   : > { %v5214_v37 = vpop.f32.mrb[0].mxu0 }
 0x389   : > { %v1052_v38 = vadd.f32 %v5214_v37, %v4832_v36  ;;  %v1043_v40 = vpop.f32.mrb[1].mxu0 }
 0x38a   : > { %v5215_v41 = vpop.f32.mrb[2].mxu0  ;;  %v1044_v44 = vadd.f32 %v4832_v36, %v1043_v40 }
 0x38b   : > { %v6268_v42 = vpack.c.bf16 %v1052_v38, %v1052_v38  ;;  %v1046_v43 = vpop.f32.mrb[3].mxu0 }
 0x38c   : > { %v1047_v45 = vadd.f32 %v4832_v36, %v1046_v43 }
 0x38d   : > { %1063 = vrot.lane.b32.xlu1 %v6268_v42, %s7189_s27 }
 0x38e   : > { %v6272_v46 = vpack.c.bf16 %v1047_v45, %v1044_v44 }
 0x390   : > { %1061 = vrot.lane.b32.xlu0 %v6272_v46, %s7189_s27  ;;  %5220 = vmatprep.mubr.msk.bf16.mxu0 %vm1065_vm1, %v6272_v46 }
 0x3ff   : > { %v1064_v51 = vpop.permute.xlu1 %1063 }
 0x400   : > { %v1076_v53 = vsel %vm1065_vm1, %v1064_v51, 0 }
 0x402   : > { %v1062_v47 = vpop.permute.xlu0 %1061 }
 0x403   : > { %5532 = vmatprep.subr.msk.bf16.mxu0 %vm1065_vm1, %v1062_v47  ;;  %v1073_v50 = vsel %vm1065_vm1, %v1062_v47, 0 }
 0x404   : > { %5217 = vmatpush3.bf16.xpose.msra.mxu0 %v1073_v50 }
 0x405   : > { %5533 = vmatprep.subr.msk.bf16.mxu0 %vm1065_vm1, %v1064_v51 }
 0x40c   : > { %5219 = vmatpush3.bf16.xpose.msra.mxu0 %v1076_v53 }
 0x413   : > { %5221 = vmatmul.mubr.msk.bf16.vlgmr.msra.gmra.mrb[4].mxu0 %vm1065_vm1, %v6268_v42 }
 0x4e6   : > { %v5222_v55 = vpop.f32.mrb[4].mxu0 }
 0x4e7   : > { %v1112_v57 = vpop.f32.mrb[5].mxu0  ;;  %v1133_v62 = vsel %vm1126_vm2, %v5222_v55, -inf }
 0x4e8   : > { %v5223_v58 = vpop.f32.mrb[6].mxu0  ;;  %v1127_v59 = vsel %vm1126_vm2, %v1112_v57, -inf }
 0x4e9   : > { %1128 = vmax.xlane.f32.xlu1 %v1127_v59  ;;  %v1115_v60 = vpop.f32.mrb[7].mxu0 }
 0x4ea   : > { %v1130_v61 = vsel %vm1126_vm2, %v1115_v60, -inf }
 0x4eb   : > { %1131 = vmax.xlane.f32.xlu0 %v1130_v61 }
 0x4ef   : > { %1134 = vmax.xlane.f32.xlu0 %v1133_v62 }
 0x576   : > { %v1129_v63 = vpop.xlane.xlu1 %1128 }
 0x577   : > { %v1136_v2 = vsub.f32 %v1112_v57, %v1129_v63 }
 0x578   : > { %v1132_v0 = vpop.xlane.xlu0 %1131 }
 0x579   : > { %v1137_v1 = vsub.f32 %v1115_v60, %v1132_v0  ;;  %v1139_v6 = vmul.f32 1.442695, %v1136_v2 }
 0x57b   : > { %v1141_v3 = vmul.f32 1.442695, %v1137_v1 }
 0x57c   : > { %v1135_v4 = vpop.xlane.xlu0 %1134 }
 0x57d   : > { %5721 = vpow2.f32 %v1141_v3  ;;  %v1138_v5 = vsub.f32 %v5222_v55, %v1135_v4 }
 0x57f   : > { %v1143_v7 = vmul.f32 1.442695, %v1138_v5 }
 0x581   : > { %5723 = vpow2.f32 %v1143_v7 }
 0x582   : > { %5725 = vpow2.f32 %v1139_v6 }
 0x587   : > { %v5722_v8 = vpop.eup %5721 }
 0x588   : > { %v1148_v9 = vsel %vm1126_vm2, %v5722_v8, 0.0 }
 0x589   : > { %1149 = vadd.xlane.f32.xlu0 %v1148_v9 }
 0x58b   : > { %v5724_v10 = vpop.eup %5723 }
 0x58c   : > { %v1151_v11 = vsel %vm1126_vm2, %v5724_v10, 0.0  ;;  %v5726_v12 = vpop.eup %5725 }
 0x58d   : > { %1152 = vadd.xlane.f32.xlu1 %v1151_v11  ;;  %v1145_v13 = vsel %vm1126_vm2, %v5726_v12, 0.0 }
 0x591   : > { %1146 = vadd.xlane.f32.xlu1 %v1145_v13 }
 0x59f   : > { %1162 = vrot.lane.b32.xlu0 %v6272_v46, %s7183_s28 }
 0x5a2   : > { %1164 = vrot.lane.b32.xlu1 %v6268_v42, %s7183_s28 }
 0x5a3   : > { %1225 = vrot.lane.b32.xlu0 %v6272_v46, %s7185_s23 }
 0x5a6   : > { %1229 = vrot.lane.b32.xlu1 %v6272_v46, %s7187_s24 }
 0x5aa   : > { %1231 = vrot.lane.b32.xlu1 %v6268_v42, %s7187_s24 }
 0x5ae   : > { %1227 = vrot.lane.b32.xlu1 %v6268_v42, %s7185_s23 }
 0x616   : > { %v1150_v14 = vpop.xlane.xlu0 %1149 }
 0x61a   : > { %v1153_v15 = vpop.xlane.xlu1 %1152  ;;  %v1163_v16 = vpop.permute.xlu0 %1162 }
 0x61b   : > { %5224 = vmatprep.subr.bf16.mxu0 %v1163_v16  ;;  %5727 = vrcp.f32 %v1153_v15 }
 0x61c   : > { %5225 = vmatpush3.bf16.msra.mxu0 %v1163_v16  ;;  %5729 = vrcp.f32 %v1150_v14 }
 0x61e   : > { %v1147_v17 = vpop.xlane.xlu1 %1146  ;;  %v1226_v29 = vpop.permute.xlu0 %1225 }
 0x61f   : > { %5731 = vrcp.f32 %v1147_v17 }
 0x622   : > { %v1165_v18 = vpop.permute.xlu1 %1164 }
 0x623   : > { %5534 = vmatprep.subr.msk.bf16.mxu0 %vm1173_vm3, %v1165_v18  ;;  %v1175_v19 = vsel %vm1173_vm3, %v1165_v18, 0 }
 0x624   : > { %5227 = vmatpush3.bf16.msra.mxu0 %v1175_v19 }
 0x625   : > { %v5728_v20 = vpop.eup %5727 }
 0x626   : > { %v1230_v21 = vpop.permute.xlu1 %1229  ;;  %v5730_v22 = vpop.eup %5729  ;;  %v1159_v24 = vmul.f32 %v5728_v20, %v5724_v10 }
 0x627   : > { %5535 = vmatprep.subr.msk.bf16.mxu0 %vm1065_vm1, %v1230_v21  ;;  %v1158_v26 = vmul.f32 %v5730_v22, %v5722_v8  ;;  %v1240_v30 = vsel %vm1065_vm1, %v1230_v21, 0 }
 0x628   : > { %v1161_v28 = vpack.c.bf16 %v1159_v24, %v1159_v24 }
 0x629   : > { %v5732_v23 = vpop.eup %5731 }
 0x62a   : > { %v1157_v25 = vmul.f32 %v5732_v23, %v5726_v12  ;;  %v1232_v31 = vpop.permute.xlu1 %1231 }
 0x62b   : > { %v1243_v32 = vsel %vm1065_vm1, %v1232_v31, 0 }
 0x62c   : > { %v1160_v27 = vpack.c.bf16 %v1158_v26, %v1157_v25 }
 0x62e   : > { %5228 = vmatprep.mubr.msk.bf16.mxu0 %vm1126_vm2, %v1160_v27  ;;  %v1228_v33 = vpop.permute.xlu1 %1227 }
 0x62f   : > { %5229 = vmatmul.mubr.msk.bf16.vlgmr.msra.gmra.mrb[8].mxu0 %vm1126_vm2, %v1161_v28 }
 0x630   : > { %5233 = vmatpush3.bf16.xpose.msra.mxu0 %v1240_v30  ;;  %5236 = vmatprep.mubr.msk.bf16.mxu0 %vm1065_vm1, %v1226_v29 }
 0x631   : > { %5536 = vmatprep.subr.msk.bf16.mxu0 %vm1065_vm1, %v1232_v31 }
 0x638   : > { %5235 = vmatpush3.bf16.xpose.msra.mxu0 %v1243_v32 }
 0x63f   : > { %5237 = vmatmul.mubr.msk.bf16.vlgmr.msra.gmra.mrb[12].mxu0 %vm1065_vm1, %v1228_v33 }
 0x702   : > { %v6312_v34 = vpop.f32.mrb[8].mxu0 }
 0x703   : > { %v6314_v35 = vpop.f32.mrb[9].mxu0 }
 0x704   : > { %v5231_v36 = vpop.f32.mrb[10].mxu0 }
 0x705   : > { %v6316_v37 = vpop.f32.mrb[11].mxu0 }
 0x712   : > { %v5238_v38 = vpop.f32.mrb[12].mxu0 }
 0x713   : > { %v1279_v40 = vpop.f32.mrb[13].mxu0  ;;  %v1299_v47 = vsel %vm1126_vm2, %v5238_v38, -inf }
 0x714   : > { %v5239_v41 = vpop.f32.mrb[14].mxu0  ;;  %v1293_v43 = vsel %vm1126_vm2, %v1279_v40, -inf }
 0x715   : > { %1294 = vmax.xlane.f32.xlu0 %v1293_v43  ;;  %v1282_v44 = vpop.f32.mrb[15].mxu0 }
 0x716   : > { %v1296_v45 = vsel %vm1126_vm2, %v1282_v44, -inf }
 0x717   : > { %1297 = vmax.xlane.f32.xlu1 %v1296_v45 }
 0x719   : > { %1300 = vmax.xlane.f32.xlu0 %v1299_v47 }
 0x7a2   : > { %v1295_v50 = vpop.xlane.xlu0 %1294 }
 0x7a3   : > { %v1302_v51 = vsub.f32 %v1279_v40, %v1295_v50 }
 0x7a4   : > { %v1298_v53 = vpop.xlane.xlu1 %1297 }
 0x7a5   : > { %v1305_v55 = vmul.f32 1.442695, %v1302_v51  ;;  %v1303_v57 = vsub.f32 %v1282_v44, %v1298_v53 }
 0x7a6   : > { %v1301_v58 = vpop.xlane.xlu0 %1300 }
 0x7a7   : > { %5733 = vpow2.f32 %v1305_v55  ;;  %v1307_v59 = vmul.f32 1.442695, %v1303_v57  ;;  %v1304_v60 = vsub.f32 %v5238_v38, %v1301_v58 }
 0x7a9   : > { %5735 = vpow2.f32 %v1307_v59  ;;  %v1309_v61 = vmul.f32 1.442695, %v1304_v60 }
 0x7ab   : > { %5737 = vpow2.f32 %v1309_v61 }
 0x7b1   : > { %v5734_v62 = vpop.eup %5733 }
 0x7b2   : > { %v1311_v63 = vsel %vm1126_vm2, %v5734_v62, 0.0 }
 0x7b3   : > { %v5736_v0 = vpop.eup %5735  ;;  %1312 = vadd.xlane.f32.xlu0 %v1311_v63 }
 0x7b4   : > { %v1314_v3 = vsel %vm1126_vm2, %v5736_v0, 0.0 }
 0x7b5   : > { %v5738_v1 = vpop.eup %5737 }
 0x7b6   : > { %v1317_v2 = vsel %vm1126_vm2, %v5738_v1, 0.0 }
 0x7b7   : > { %1318 = vadd.xlane.f32.xlu1 %v1317_v2  ;;  %1315 = vadd.xlane.f32.xlu0 %v1314_v3 }
 0x7c8   : > { %1330 = vrot.lane.b32.xlu1 %v6268_v42, %s7181_s25 }
 0x7cc   : > { %1394 = vrot.lane.b32.xlu1 %v6272_v46, %s7179_s30 }
 0x7cd   : > { %1328 = vrot.lane.b32.xlu0 %v6272_v46, %s7181_s25 }
 0x7d0   : > { %1396 = vrot.lane.b32.xlu1 %v6268_v42, %s7179_s30  ;;  %s7231_s30 = smov 80  }
 0x7d1   : > { %1390 = vrot.lane.b32.xlu0 %v6272_v46, %s7177_s4 }
 0x7d4   : > { %1392 = vrot.lane.b32.xlu1 %v6268_v42, %s7177_s4  ;;  %s7232_s4 = smov 112  }
 0x840   : > { %v1313_v4 = vpop.xlane.xlu0 %1312 }
 0x841   : > { %5739 = vrcp.f32 %v1313_v4 }
 0x844   : > { %v1316_v5 = vpop.xlane.xlu0 %1315  ;;  %v1319_v6 = vpop.xlane.xlu1 %1318 }
 0x845   : > { %5741 = vrcp.f32 %v1316_v5 }
 0x846   : > { %5743 = vrcp.f32 %v1319_v6 }
 0x848   : > { %v1329_v7 = vpop.permute.xlu0 %1328  ;;  %v1331_v8 = vpop.permute.xlu1 %1330 }
 0x849   : > { %5240 = vmatprep.subr.bf16.mxu1 %v1329_v7  ;;  %v1340_v10 = vsel %vm1173_vm3, %v1331_v8, 0 }
 0x84a   : > { %5241 = vmatpush3.bf16.msra.mxu1 %v1329_v7 }
 0x84b   : > { %5537 = vmatprep.subr.msk.bf16.mxu1 %vm1173_vm3, %v1331_v8  ;;  %v5740_v9 = vpop.eup %5739 }
 0x84c   : > { %v1395_v11 = vpop.permute.xlu1 %1394  ;;  %v1323_v14 = vmul.f32 %v5740_v9, %v5734_v62  ;;  %v1391_v19 = vpop.permute.xlu0 %1390 }
 0x84d   : > { %v1405_v20 = vsel %vm1065_vm1, %v1395_v11, 0 }
 0x84e   : > { %5243 = vmatpush3.bf16.msra.mxu1 %v1340_v10 }
 0x84f   : > { %v5742_v12 = vpop.eup %5741  ;;  %5538 = vmatprep.subr.msk.bf16.mxu1 %vm1065_vm1, %v1395_v11 }
 0x850   : > { %v5744_v13 = vpop.eup %5743  ;;  %v1324_v15 = vmul.f32 %v5742_v12, %v5736_v0  ;;  %v1397_v21 = vpop.permute.xlu1 %1396 }
 0x851   : > { %v1325_v16 = vmul.f32 %v5744_v13, %v5738_v1  ;;  %v1408_v22 = vsel %vm1065_vm1, %v1397_v21, 0 }
 0x852   : > { %v1326_v17 = vpack.c.bf16 %v1324_v15, %v1323_v14 }
 0x853   : > { %v1327_v18 = vpack.c.bf16 %v1325_v16, %v1325_v16 }
 0x854   : > { %5244 = vmatprep.mubr.msk.bf16.mxu1 %vm1126_vm2, %v1326_v17  ;;  %v1393_v23 = vpop.permute.xlu1 %1392 }
 0x855   : > { %5245 = vmatmul.mubr.msk.bf16.vlgmr.msra.gmra.mrb[0].mxu1 %vm1126_vm2, %v1327_v18 }
 0x856   : > { %5252 = vmatprep.mubr.msk.bf16.mxu1 %vm1065_vm1, %v1391_v19 }
 0x857   : > { %5249 = vmatpush3.bf16.xpose.msra.mxu1 %v1405_v20 }
 0x858   : > { %5539 = vmatprep.subr.msk.bf16.mxu1 %vm1065_vm1, %v1397_v21 }
 0x85f   : > { %5251 = vmatpush3.bf16.xpose.msra.mxu1 %v1408_v22 }
 0x866   : > { %5253 = vmatmul.mubr.msk.bf16.vlgmr.msra.gmra.mrb[4].mxu1 %vm1065_vm1, %v1393_v23 }
 0x928   : > { %v6346_v24 = vpop.f32.mrb[0].mxu1 }
 0x929   : > { %v6348_v25 = vpop.f32.mrb[1].mxu1 }
 0x92a   : > { %v5247_v26 = vpop.f32.mrb[2].mxu1 }
 0x92b   : > { %v6350_v27 = vpop.f32.mrb[3].mxu1 }
 0x92c   : > { %v5622_v28 = vpack.i.bf16 %v6350_v27, %v6348_v25 }
 0x939   : > { %v5254_v29 = vpop.f32.mrb[4].mxu1 }
 0x93a   : > { %v1444_v30 = vpop.f32.mrb[5].mxu1  ;;  %v1464_v38 = vsel %vm1126_vm2, %v5254_v29, -inf }
 0x93b   : > { %v5255_v31 = vpop.f32.mrb[6].mxu1  ;;  %v1458_v32 = vsel %vm1126_vm2, %v1444_v30, -inf }
 0x93c   : > { %1459 = vmax.xlane.f32.xlu0 %v1458_v32  ;;  %v1447_v33 = vpop.f32.mrb[7].mxu1 }
 0x93d   : > { %v1461_v36 = vsel %vm1126_vm2, %v1447_v33, -inf }
 0x93e   : > { %1462 = vmax.xlane.f32.xlu1 %v1461_v36 }
 0x940   : > { %1465 = vmax.xlane.f32.xlu0 %v1464_v38 }
 0x9c9   : > { %v1460_v40 = vpop.xlane.xlu0 %1459 }
 0x9ca   : > { %v1467_v41 = vsub.f32 %v1444_v30, %v1460_v40 }
 0x9cb   : > { %v1463_v43 = vpop.xlane.xlu1 %1462 }
 0x9cc   : > { %v1470_v44 = vmul.f32 1.442695, %v1467_v41  ;;  %v1468_v45 = vsub.f32 %v1447_v33, %v1463_v43 }
 0x9cd   : > { %v1466_v47 = vpop.xlane.xlu0 %1465 }
 0x9ce   : > { %5745 = vpow2.f32 %v1470_v44  ;;  %v1472_v50 = vmul.f32 1.442695, %v1468_v45  ;;  %v1469_v51 = vsub.f32 %v5254_v29, %v1466_v47 }
 0x9d0   : > { %5747 = vpow2.f32 %v1472_v50  ;;  %v1474_v53 = vmul.f32 1.442695, %v1469_v51 }
 0x9d2   : > { %5749 = vpow2.f32 %v1474_v53 }
 0x9d8   : > { %v5746_v55 = vpop.eup %5745 }
 0x9d9   : > { %v1476_v57 = vsel %vm1126_vm2, %v5746_v55, 0.0 }
 0x9da   : > { %v5748_v58 = vpop.eup %5747  ;;  %1477 = vadd.xlane.f32.xlu0 %v1476_v57 }
 0x9db   : > { %v1479_v61 = vsel %vm1126_vm2, %v5748_v58, 0.0 }
 0x9dc   : > { %v5750_v59 = vpop.eup %5749 }
 0x9dd   : > { %v1482_v60 = vsel %vm1126_vm2, %v5750_v59, 0.0 }
 0x9de   : > { %1483 = vadd.xlane.f32.xlu1 %v1482_v60  ;;  %1480 = vadd.xlane.f32.xlu0 %v1479_v61 }
 0x9ef   : > { %1495 = vrot.lane.b32.xlu1 %v6268_v42, %s7175_s3 }
 0x9f3   : > { %1559 = vrot.lane.b32.xlu1 %v6272_v46, %s7171_s8 }
 0x9f4   : > { %1493 = vrot.lane.b32.xlu0 %v6272_v46, %s7175_s3  ;;  %s7237_s3 = smov 8  }
 0x9f7   : > { %1561 = vrot.lane.b32.xlu1 %v6268_v42, %s7171_s8  ;;  %s7173_s8 = smov 24  }
 0x9f8   : > { %1555 = vrot.lane.b32.xlu0 %v6272_v46, %s7169_s29 }
 0x9fb   : > { %1557 = vrot.lane.b32.xlu1 %v6268_v42, %s7169_s29  ;;  %s7236_s29 = smov 40  }
 0xa67   : > { %v1478_v62 = vpop.xlane.xlu0 %1477 }
 0xa68   : > { %5751 = vrcp.f32 %v1478_v62 }
 0xa6b   : > { %v1481_v63 = vpop.xlane.xlu0 %1480  ;;  %v1484_v0 = vpop.xlane.xlu1 %1483 }
 0xa6c   : > { %5753 = vrcp.f32 %v1481_v63 }
 0xa6d   : > { %5755 = vrcp.f32 %v1484_v0 }
 0xa6f   : > { %v1494_v1 = vpop.permute.xlu0 %1493  ;;  %v1496_v2 = vpop.permute.xlu1 %1495 }
 0xa70   : > { %5256 = vmatprep.subr.bf16.mxu0 %v1494_v1  ;;  %v1505_v4 = vsel %vm1173_vm3, %v1496_v2, 0 }
 0xa71   : > { %5257 = vmatpush3.bf16.msra.mxu0 %v1494_v1 }
 0xa72   : > { %5540 = vmatprep.subr.msk.bf16.mxu0 %vm1173_vm3, %v1496_v2  ;;  %v5752_v3 = vpop.eup %5751 }
 0xa73   : > { %v1560_v5 = vpop.permute.xlu1 %1559  ;;  %v1488_v8 = vmul.f32 %v5752_v3, %v5746_v55  ;;  %v1556_v13 = vpop.permute.xlu0 %1555 }
 0xa74   : > { %v1570_v14 = vsel %vm1065_vm1, %v1560_v5, 0 }
 0xa75   : > { %5259 = vmatpush3.bf16.msra.mxu0 %v1505_v4  ;;  %v5669_v4 = vld [vmem:[%s7137_s12] sm:$0xff]  }
 0xa76   : > { %v5754_v6 = vpop.eup %5753  ;;  %5541 = vmatprep.subr.msk.bf16.mxu0 %vm1065_vm1, %v1560_v5  ;;  %v5670_v5 = vld [vmem:[%s7137_s12 + $0x8] sm:$0xff]  }
 0xa77   : > { %v5756_v7 = vpop.eup %5755  ;;  %v1489_v9 = vmul.f32 %v5754_v6, %v5748_v58  ;;  %v1562_v15 = vpop.permute.xlu1 %1561 }
 0xa78   : > { %v1490_v10 = vmul.f32 %v5756_v7, %v5750_v59  ;;  %v1573_v16 = vsel %vm1065_vm1, %v1562_v15, 0 }
 0xa79   : > { %v1491_v11 = vpack.c.bf16 %v1489_v9, %v1488_v8 }
 0xa7a   : > { %v1492_v12 = vpack.c.bf16 %v1490_v10, %v1490_v10 }
 0xa7b   : > { %5260 = vmatprep.mubr.msk.bf16.mxu0 %vm1126_vm2, %v1491_v11  ;;  %v1558_v17 = vpop.permute.xlu1 %1557 }
 0xa7c   : > { %5261 = vmatmul.mubr.msk.bf16.vlgmr.msra.gmra.mrb[16].mxu0 %vm1126_vm2, %v1492_v12 }
 0xa7d   : > { %5268 = vmatprep.mubr.msk.bf16.mxu0 %vm1065_vm1, %v1556_v13 }
 0xa7e   : > { %5265 = vmatpush3.bf16.xpose.msra.mxu0 %v1570_v14 }
 0xa7f   : > { %5542 = vmatprep.subr.msk.bf16.mxu0 %vm1065_vm1, %v1562_v15 }
 0xa86   : > { %5267 = vmatpush3.bf16.xpose.msra.mxu0 %v1573_v16 }
 0xa8d   : > { %5269 = vmatmul.mubr.msk.bf16.vlgmr.msra.gmra.mrb[20].mxu0 %vm1065_vm1, %v1558_v17 }
 0xb4f   : > { %v5262_v18 = vpop.f32.mrb[16].mxu0 }
 0xb50   : > { %v1541_v19 = vpop.f32.mrb[17].mxu0 }
 0xb51   : > { %v5263_v20 = vpop.f32.mrb[18].mxu0 }
 0xb52   : > { %v1544_v21 = vpop.f32.mrb[19].mxu0 }
 0xb53   : > { %v5627_v22 = vpack.i.bf16 %v1544_v21, %v1541_v19 }
 0xb60   : > { %v5270_v23 = vpop.f32.mrb[20].mxu0 }
 0xb61   : > { %v1609_v26 = vpop.f32.mrb[21].mxu0  ;;  %v1629_v33 = vsel %vm1126_vm2, %v5270_v23, -inf }
 0xb62   : > { %v5271_v29 = vpop.f32.mrb[22].mxu0  ;;  %v1623_v30 = vsel %vm1126_vm2, %v1609_v26, -inf }
 0xb63   : > { %1624 = vmax.xlane.f32.xlu0 %v1623_v30  ;;  %v1612_v31 = vpop.f32.mrb[23].mxu0 }
 0xb64   : > { %v1626_v32 = vsel %vm1126_vm2, %v1612_v31, -inf }
 0xb65   : > { %1627 = vmax.xlane.f32.xlu1 %v1626_v32 }
 0xb67   : > { %1630 = vmax.xlane.f32.xlu0 %v1629_v33 }
 0xbf0   : > { %v1625_v36 = vpop.xlane.xlu0 %1624 }
 0xbf1   : > { %v1632_v38 = vsub.f32 %v1609_v26, %v1625_v36 }
 0xbf2   : > { %v1628_v40 = vpop.xlane.xlu1 %1627 }
 0xbf3   : > { %v1635_v41 = vmul.f32 1.442695, %v1632_v38  ;;  %v1633_v43 = vsub.f32 %v1612_v31, %v1628_v40 }
 0xbf4   : > { %v1631_v44 = vpop.xlane.xlu0 %1630 }
 0xbf5   : > { %5757 = vpow2.f32 %v1635_v41  ;;  %v1637_v45 = vmul.f32 1.442695, %v1633_v43  ;;  %v1634_v47 = vsub.f32 %v5270_v23, %v1631_v44 }
 0xbf7   : > { %5759 = vpow2.f32 %v1637_v45  ;;  %v1639_v50 = vmul.f32 1.442695, %v1634_v47 }
 0xbf9   : > { %5761 = vpow2.f32 %v1639_v50 }
 0xbff   : > { %v5758_v51 = vpop.eup %5757 }
 0xc00   : > { %v1641_v53 = vsel %vm1126_vm2, %v5758_v51, 0.0 }
 0xc01   : > { %v5760_v55 = vpop.eup %5759  ;;  %1642 = vadd.xlane.f32.xlu0 %v1641_v53 }
 0xc02   : > { %v1644_v59 = vsel %vm1126_vm2, %v5760_v55, 0.0 }
 0xc03   : > { %v5762_v57 = vpop.eup %5761 }
 0xc04   : > { %v1647_v58 = vsel %vm1126_vm2, %v5762_v57, 0.0 }
 0xc05   : > { %1648 = vadd.xlane.f32.xlu1 %v1647_v58  ;;  %1645 = vadd.xlane.f32.xlu0 %v1644_v59 }
 0xc16   : > { %1660 = vrot.lane.b32.xlu1 %v6268_v42, %s7167_s6 }
 0xc1a   : > { %5623 = vrot.lane.b32.xlu1 %v5622_v28, %s7165_s26 }
 0xc1b   : > { %1658 = vrot.lane.b32.xlu0 %v6272_v46, %s7167_s6  ;;  %s7238_s6 = smov 16  }
 0xc1e   : > { %1727 = vrot.lane.b32.xlu1 %v6346_v24, %s7165_s26  ;;  %s7233_s26 = smov 48  }
 0xc1f   : > { %5628 = vrot.lane.b32.xlu0 %v5627_v22, %s7163_s5 }
 0xc22   : > { %1739 = vrot.lane.b32.xlu1 %v5262_v18, %s7163_s5  ;;  %s7234_s5 = smov 72  }
 0xc8e   : > { %v1643_v60 = vpop.xlane.xlu0 %1642 }
 0xc8f   : > { %5763 = vrcp.f32 %v1643_v60 }
 0xc92   : > { %v1646_v42 = vpop.xlane.xlu0 %1645  ;;  %v1649_v61 = vpop.xlane.xlu1 %1648 }
 0xc93   : > { %5765 = vrcp.f32 %v1646_v42 }
 0xc94   : > { %5767 = vrcp.f32 %v1649_v61 }
 0xc96   : > { %v1659_v62 = vpop.permute.xlu0 %1658  ;;  %v1661_v25 = vpop.permute.xlu1 %1660 }
 0xc97   : > { %5272 = vmatprep.subr.bf16.mxu1 %v1659_v62  ;;  %v1670_v24 = vsel %vm1173_vm3, %v1661_v25, 0 }
 0xc98   : > { %5273 = vmatpush3.bf16.msra.mxu1 %v1659_v62 }
 0xc99   : > { %5543 = vmatprep.subr.msk.bf16.mxu1 %vm1173_vm3, %v1661_v25  ;;  %v5764_v46 = vpop.eup %5763 }
 0xc9a   : > { %v1653_v63 = vmul.f32 %v5764_v46, %v5758_v51  ;;  %v5624_v11 = vpop.permute.xlu1 %5623  ;;  %v5629_v13 = vpop.permute.xlu0 %5628 }
 0xc9b   : > { %v5626_v14 = vunpack.i.h.bf16 %v5624_v11  ;;  %v5625_v15 = vunpack.i.l.bf16 %v5624_v11  ;;  %v5631_v17 = vunpack.i.h.bf16 %v5629_v13  ;;  %v5630_v18 = vunpack.i.l.bf16 %v5629_v13 }
 0xc9c   : > { %5275 = vmatpush3.bf16.msra.mxu1 %v1670_v24 }
 0xc9d   : > { %v5766_v27 = vpop.eup %5765  ;;  %5280 = vmatprep.subr.bf16.mxu1 %v5669_v4  ;;  %v1757_v19 = vsel %vm1065_vm1, %v6316_v37, %v5626_v14  ;;  %v1756_v20 = vsel %vm1065_vm1, %v6314_v35, %v5625_v15  ;;  %v4858_v15 = vld [vmem:[%s7139_s14] ss:$0 sm:$0xff] }
 0xc9e   : > { %v5768_v28 = vpop.eup %5767  ;;  %v1654_v0 = vmul.f32 %v5766_v27, %v5760_v55  ;;  %v1728_v12 = vpop.permute.xlu1 %1727  ;;  %v1760_v32 = vsel %vm1759_vm4, %v1756_v20, %v5630_v18  ;;  %v1761_v33 = vsel %vm1759_vm4, %v1757_v19, %v5631_v17 }
 0xc9f   : > { %v1655_v1 = vmul.f32 %v5768_v28, %v5762_v57  ;;  %v1758_v22 = vsel %vm1065_vm1, %v6312_v34, %v1728_v12  ;;  %v4853_v34 = vld [vmem:[%s7138_s13] ss:$0 sm:$0xff] }
 0xca0   : > { %v1656_v2 = vpack.c.bf16 %v1654_v0, %v1653_v63 }
 0xca1   : > { %v1657_v3 = vpack.c.bf16 %v1655_v1, %v1655_v1 }
 0xca2   : > { %5276 = vmatprep.mubr.msk.bf16.mxu1 %vm1126_vm2, %v1656_v2  ;;  %v1740_v16 = vpop.permute.xlu1 %1739  ;;  %v5671_v2 = vld [vmem:[%s7141_s16] sm:$0xff]  }
 0xca3   : > { %5277 = vmatmul.mubr.msk.bf16.vlgmr.msra.gmra.mrb[8].mxu1 %vm1126_vm2, %v1657_v3  ;;  %v1762_v26 = vsel %vm1759_vm4, %v1758_v22, %v1740_v16  ;;  %v5672_v3 = vld [vmem:[%s7141_s16 + $0x8] sm:$0xff]   ;;  %5288 = vmatprep.subr.bf16.mxu0 %v5671_v2 }
 0xca4   : > { %5281 = vmatpush3.bf16.msra.mxu1 %v5669_v4  ;;  %5289 = vmatpush3.bf16.msra.mxu0 %v5671_v2 }
 0xca5   : > { %5282 = vmatprep.subr.bf16.mxu1 %v5670_v5  ;;  %5290 = vmatprep.subr.bf16.mxu0 %v5672_v3 }
 0xca8   : > { %5283 = vmatpush3.bf16.msra.mxu1 %v5670_v5  ;;  %5291 = vmatpush3.bf16.msra.mxu0 %v5672_v3 }
 0xd76   : > { %v5278_v6 = vpop.f32.mrb[8].mxu1 }
 0xd77   : > { %1751 = vrot.lane.b32.xlu1 %v5278_v6, %s7173_s8  ;;  %v1706_v7 = vpop.f32.mrb[9].mxu1 }
 0xd78   : > { %v5279_v8 = vpop.f32.mrb[10].mxu1 }
 0xd79   : > { %v1709_v9 = vpop.f32.mrb[11].mxu1 }
 0xd7a   : > { %v5632_v10 = vpack.i.bf16 %v1709_v9, %v1706_v7 }
 0xd7c   : > { %5633 = vrot.lane.b32.xlu0 %v5632_v10, %s7173_s8  ;;  %s7235_s8 = smov 104  }
 0xde9   : > { %v1752_v21 = vpop.permute.xlu1 %1751 }
 0xdea   : > { %v1765_v31 = vsel %vm1126_vm2, %v1762_v26, %v1752_v21  ;;  %v4859_v21 = vld [vmem:[%s7140_s15] ss:$0 sm:$0xff] }
 0xdeb   : > { %v1767_v38 = vpack.c.bf16 %v1765_v31, %v1765_v31 }
 0xdee   : > { %v5634_v23 = vpop.permute.xlu0 %5633 }
 0xdef   : > { %v5636_v29 = vunpack.i.h.bf16 %v5634_v23  ;;  %v5635_v30 = vunpack.i.l.bf16 %v5634_v23 }
 0xdf1   : > { %v1763_v37 = vsel %vm1126_vm2, %v1760_v32, %v5635_v30  ;;  %v1764_v35 = vsel %vm1126_vm2, %v1761_v33, %v5636_v29  ;;  %v5673_v33 = vld [vmem:[%s7143_s18] sm:$0xff]  }
 0xdf2   : > { %v1766_v36 = vpack.c.bf16 %v1764_v35, %v1763_v37  ;;  %5296 = vmatprep.subr.bf16.mxu1 %v5673_v33  ;;  %v5674_v37 = vld [vmem:[%s7143_s18 + $0x8] sm:$0xff]   ;;  %v5675_v35 = vld [vmem:[%s7143_s18 + $0x10] sm:$0xff]  }
 0xdf4   : > { %5284 = vmatprep.mubr.msk.bf16.mxu1 %vm833_vm0, %v1766_v36  ;;  %v5676_v36 = vld [vmem:[%s7143_s18 + $0x18] sm:$0xff]  }
 0xdf5   : > { %5285 = vmatmul.mubr.msk.bf16.vlgmr.msra.gmra.mrb[12].mxu1 %vm833_vm0, %v1767_v38  ;;  %v5677_v38 = vld [vmem:[%s7143_s18 + $0x20] sm:$0xff]  }
 0xdf6   : > { %5297 = vmatpush3.bf16.msra.mxu1 %v5673_v33 }
 0xdf7   : > { %5298 = vmatprep.subr.bf16.mxu1 %v5674_v37 }
 0xdfa   : > { %5299 = vmatpush3.bf16.msra.mxu1 %v5674_v37 }
 0xdfb   : > { %5300 = vmatprep.subr.bf16.mxu1 %v5675_v35 }
 0xdfe   : > { %5301 = vmatpush3.bf16.msra.mxu1 %v5675_v35 }
 0xdff   : > { %5302 = vmatprep.subr.bf16.mxu1 %v5676_v36 }
 0xe02   : > { %5303 = vmatpush3.bf16.msra.mxu1 %v5676_v36 }
 0xe03   : > { %5304 = vmatprep.subr.bf16.mxu1 %v5677_v38 }
 0xe06   : > { %5305 = vmatpush3.bf16.msra.mxu1 %v5677_v38 }
 0xec8   : > { %v5286_v40 = vpop.f32.mrb[12].mxu1 }
 0xec9   : > { %v1831_v41 = vpop.f32.mrb[13].mxu1  ;;  %v1840_v43 = vadd.f32 %v5286_v40, %v4853_v34  ;;  %v5679_v40 = vld [vmem:[%s7143_s18 + $0x30] sm:$0xff]  }
 0xeca   : > { %v1832_v44 = vadd.f32 %v4853_v34, %v1831_v41  ;;  %v5287_v45 = vpop.f32.mrb[14].mxu1  ;;  %v5680_v41 = vld [vmem:[%s7143_s18 + $0x38] sm:$0xff]  }
 0xecb   : > { %v1834_v47 = vpop.f32.mrb[15].mxu1  ;;  %v6433_v53 = vadd.f32 %v1840_v43, %v6237_v54  ;;  %v4860_v43 = vld [vmem:[%s7142_s17] ss:$0 sm:$0xff] }
 0xecc   : > { %v6430_v50 = vadd.f32 %v1832_v44, %v6233_v52  ;;  %v1835_v51 = vadd.f32 %v4853_v34, %v1834_v47  ;;  %v5678_v34 = vld [vmem:[%s7143_s18 + $0x28] sm:$0xff]  }
 0xecd   : > { %v1856_v59 = vsel %vm833_vm0, %v6433_v53, 0.0  ;;  %5306 = vmatprep.subr.bf16.mxu1 %v5678_v34 }
 0xece   : > { %v6436_v55 = vadd.f32 %v1835_v51, %v6241_v56  ;;  %v1850_v57 = vsel %vm833_vm0, %v6430_v50, 0.0  ;;  %5307 = vmatpush3.bf16.msra.mxu1 %v5678_v34 }
 0xecf   : > { %1851 = vadd.xlane.f32.xlu0 %v1850_v57  ;;  %5308 = vmatprep.subr.bf16.mxu1 %v5679_v40 }
 0xed0   : > { %v1853_v58 = vsel %vm833_vm0, %v6436_v55, 0.0 }
 0xed1   : > { %1854 = vadd.xlane.f32.xlu1 %v1853_v58 }
 0xed2   : > { %5309 = vmatpush3.bf16.msra.mxu1 %v5679_v40 }
 0xed3   : > { %1857 = vadd.xlane.f32.xlu0 %v1856_v59  ;;  %5310 = vmatprep.subr.bf16.mxu1 %v5680_v41 }
 0xed6   : > { %5311 = vmatpush3.bf16.msra.mxu1 %v5680_v41 }
 0xf5c   : > { %v1852_v52 = vpop.xlane.xlu0 %1851 }
 0xf5d   : > { %v1859_v60 = vmul.f32 0.03125, %v1852_v52 }
 0xf5e   : > { %v1855_v42 = vpop.xlane.xlu1 %1854 }
 0xf5f   : > { %v1862_v54 = vsub.f32 %v6430_v50, %v1859_v60  ;;  %v1860_v61 = vmul.f32 0.03125, %v1855_v42 }
 0xf60   : > { %v1858_v56 = vpop.xlane.xlu0 %1857 }
 0xf61   : > { %v1863_v62 = vsub.f32 %v6436_v55, %v1860_v61  ;;  %v1861_v25 = vmul.f32 0.03125, %v1858_v56  ;;  %v1865_v46 = vmul.f32 %v1862_v54, %v1862_v54 }
 0xf63   : > { %v1864_v24 = vsub.f32 %v6433_v53, %v1861_v25  ;;  %v1868_v27 = vsel %vm833_vm0, %v1865_v46, 0.0  ;;  %v1866_v28 = vmul.f32 %v1863_v62, %v1863_v62 }
 0xf64   : > { %1869 = vadd.xlane.f32.xlu0 %v1868_v27 }
 0xf65   : > { %v1867_v63 = vmul.f32 %v1864_v24, %v1864_v24  ;;  %v1871_v0 = vsel %vm833_vm0, %v1866_v28, 0.0 }
 0xf67   : > { %v1874_v1 = vsel %vm833_vm0, %v1867_v63, 0.0 }
 0xf68   : > { %1872 = vadd.xlane.f32.xlu0 %v1871_v0  ;;  %1875 = vadd.xlane.f32.xlu1 %v1874_v1 }
 0xff1   : > { %v1870_v4 = vpop.xlane.xlu0 %1869 }
 0xff2   : > { %v1877_v5 = vmul.f32 0.03125, %v1870_v4 }
 0xff4   : > { %v1880_v6 = vadd.f32 1e-05, %v1877_v5 }
 0xff5   : > { %v1876_v7 = vpop.xlane.xlu1 %1875  ;;  %v1873_v8 = vpop.xlane.xlu0 %1872 }
 0xff6   : > { %5769 = vrsqrt.f32 %v1880_v6  ;;  %v1879_v9 = vmul.f32 0.03125, %v1876_v7  ;;  %v1878_v10 = vmul.f32 0.03125, %v1873_v8 }
 0xff8   : > { %v1882_v11 = vadd.f32 1e-05, %v1879_v9  ;;  %v1881_v12 = vadd.f32 1e-05, %v1878_v10 }
 0xffa   : > { %5771 = vrsqrt.f32 %v1882_v11 }
 0xffb   : > { %5773 = vrsqrt.f32 %v1881_v12 }
0x1000   : > { %v5770_v13 = vpop.eup %5769 }
0x1001   : > { %v1886_v14 = vmul.f32 %v5770_v13, %v1862_v54 }
0x1003   : > { %v1895_v20 = vmul.f32 %v4858_v15, %v1886_v14 }
0x1004   : > { %v5772_v16 = vpop.eup %5771 }
0x1005   : > { %v5774_v17 = vpop.eup %5773  ;;  %v1888_v18 = vmul.f32 %v5772_v16, %v1864_v24  ;;  %v1904_v29 = vadd.f32 %v4859_v21, %v1895_v20  ;;  %v4865_v16 = vld [vmem:[%s7144_s19] ss:$0 sm:$0xff] }
0x1006   : > { %v1887_v19 = vmul.f32 %v5774_v17, %v1863_v62 }
0x1007   : > { %v1897_v22 = vmul.f32 %v4858_v15, %v1888_v18 }
0x1008   : > { %v1896_v23 = vmul.f32 %v4858_v15, %v1887_v19 }
0x1009   : > { %v1906_v26 = vadd.f32 %v4859_v21, %v1897_v22 }
0x100a   : > { %v1905_v30 = vadd.f32 %v4859_v21, %v1896_v23 }
0x100b   : > { %v1908_v31 = vpack.c.bf16 %v1906_v26, %v1906_v26 }
0x100c   : > { %v1907_v32 = vpack.c.bf16 %v1905_v30, %v1904_v29 }
0x100e   : > { %5292 = vmatprep.mubr.msk.bf16.mxu0 %vm833_vm0, %v1907_v32 }
0x100f   : > { %5293 = vmatmul.mubr.msk.bf16.vlgmr.msra.gmra.mrb[24].mxu0 %vm833_vm0, %v1908_v31 }
0x10e2   : > { %v5294_v44 = vpop.f32.mrb[24].mxu0 }
0x10e3   : > { %v1981_v45 = vadd.f32 %v5294_v44, %v4860_v43  ;;  %v1972_v47 = vpop.f32.mrb[25].mxu0 }
0x10e4   : > { %v1973_v51 = vadd.f32 %v4860_v43, %v1972_v47  ;;  %v5295_v57 = vpop.f32.mrb[26].mxu0 }
0x10e5   : > { %v1991_v58 = vmul.f32 0.044715, %v1981_v45  ;;  %v1975_v59 = vpop.f32.mrb[27].mxu0  ;;  %v1988_v7 = vmul.f32 0.5, %v1981_v45  ;;  %v5681_v57 = vld [vmem:[%s7135_s10 + $0x10] sm:$0xff]  }
0x10e6   : > { %v1989_v52 = vmul.f32 0.044715, %v1973_v51  ;;  %v1976_v60 = vadd.f32 %v4860_v43, %v1975_v59  ;;  %v1986_v8 = vmul.f32 0.5, %v1973_v51  ;;  %5316 = vmatprep.subr.bf16.mxu0 %v5681_v57 }
0x10e7   : > { %v1994_v42 = vmul.f32 %v1991_v58, %v1981_v45  ;;  %v5682_v58 = vld [vmem:[%s7135_s10 + $0x18] sm:$0xff]   ;;  %5317 = vmatpush3.bf16.msra.mxu0 %v5681_v57 }
0x10e8   : > { %v1992_v54 = vmul.f32 %v1989_v52, %v1973_v51  ;;  %v1990_v61 = vmul.f32 0.044715, %v1976_v60  ;;  %v1987_v9 = vmul.f32 0.5, %v1976_v60  ;;  %5318 = vmatprep.subr.bf16.mxu0 %v5682_v58 }
0x10e9   : > { %v1997_v56 = vmul.f32 %v1994_v42, %v1981_v45 }
0x10ea   : > { %v1995_v62 = vmul.f32 %v1992_v54, %v1973_v51  ;;  %v1993_v25 = vmul.f32 %v1990_v61, %v1976_v60 }
0x10eb   : > { %v2000_v46 = vadd.f32 %v1997_v56, %v1981_v45  ;;  %5319 = vmatpush3.bf16.msra.mxu0 %v5682_v58 }
0x10ec   : > { %v1996_v24 = vmul.f32 %v1993_v25, %v1976_v60  ;;  %v1998_v27 = vadd.f32 %v1995_v62, %v1973_v51 }
0x10ed   : > { %v2003_v28 = vmul.f32 0.7978846, %v2000_v46 }
0x10ee   : > { %v1999_v63 = vadd.f32 %v1996_v24, %v1976_v60  ;;  %v2001_v0 = vmul.f32 0.7978846, %v1998_v27  ;;  %v4876_v24 = vld [vmem:[%s7228_s1 + $0x1] ss:$0 sm:$0xff] }
0x10ef   : > { %5775 = vtanh.f32 %v2003_v28 }
0x10f0   : > { %v2002_v1 = vmul.f32 0.7978846, %v1999_v63  ;;  %5777 = vtanh.f32 %v2001_v0 }
0x10f2   : > { %5779 = vtanh.f32 %v2002_v1 }
0x10f9   : > { %v5776_v2 = vpop.eup %5775 }
0x10fa   : > { %v5778_v3 = vpop.eup %5777  ;;  %v2009_v4 = vadd.f32 1.0, %v5776_v2  ;;  %v4877_v2 = vld [vmem:[%s7230_s9 + $0x1] ss:$0 sm:$0xff] }
0x10fb   : > { %v2007_v5 = vadd.f32 1.0, %v5778_v3 }
0x10fc   : > { %v5780_v6 = vpop.eup %5779  ;;  %v2012_v11 = vmul.f32 %v2009_v4, %v1988_v7 }
0x10fd   : > { %v2008_v10 = vadd.f32 1.0, %v5780_v6  ;;  %v2010_v12 = vmul.f32 %v2007_v5, %v1986_v8 }
0x10fe   : > { %v2014_v15 = vpack.c.bf16 %v2012_v11, %v2012_v11  ;;  %v4883_v11 = vld [vmem:[%s7136_s11 + $0x1] ss:$0 sm:$0xff] }
0x10ff   : > { %v2011_v13 = vmul.f32 %v2008_v10, %v1987_v9 }
0x1101   : > { %v2013_v14 = vpack.c.bf16 %v2011_v13, %v2010_v12 }
0x1103   : > { %5312 = vmatprep.mubr.bf16.mxu1 %v2013_v14 }
0x1104   : > { %5313 = vmatmul.mubr.bf16.vlgmr.msra.gmra.mrb[16].mxu1 %v2014_v15 }
0x11d7   : > { %v5314_v17 = vpop.f32.mrb[16].mxu1 }
0x11d8   : > { %v2120_v18 = vpop.f32.mrb[17].mxu1  ;;  %v2129_v19 = vadd.f32 %v5314_v17, %v4865_v16 }
0x11d9   : > { %v2121_v20 = vadd.f32 %v4865_v16, %v2120_v18  ;;  %v5315_v21 = vpop.f32.mrb[18].mxu1 }
0x11da   : > { %v2123_v22 = vpop.f32.mrb[19].mxu1  ;;  %v6498_v29 = vadd.f32 %v2129_v19, %v6433_v53 }
0x11db   : > { %v6495_v23 = vadd.f32 %v2121_v20, %v6430_v50  ;;  %v2124_v26 = vadd.f32 %v4865_v16, %v2123_v22 }
0x11dc   : > { %v2147_v33 = vsel %vm833_vm0, %v6498_v29, 0.0 }
0x11dd   : > { %v6501_v30 = vadd.f32 %v2124_v26, %v6436_v55  ;;  %v2141_v31 = vsel %vm833_vm0, %v6495_v23, 0.0 }
0x11de   : > { %2142 = vadd.xlane.f32.xlu0 %v2141_v31 }
0x11df   : > { %v2144_v32 = vsel %vm833_vm0, %v6501_v30, 0.0 }
0x11e0   : > { %2145 = vadd.xlane.f32.xlu1 %v2144_v32 }
0x11e2   : > { %2148 = vadd.xlane.f32.xlu0 %v2147_v33 }
0x126b   : > { %v2143_v50 = vpop.xlane.xlu0 %2142 }
0x126c   : > { %v2150_v37 = vmul.f32 0.03125, %v2143_v50 }
0x126d   : > { %v2146_v35 = vpop.xlane.xlu1 %2145 }
0x126e   : > { %v2153_v53 = vsub.f32 %v6495_v23, %v2150_v37  ;;  %v2151_v36 = vmul.f32 0.03125, %v2146_v35 }
0x126f   : > { %v2149_v55 = vpop.xlane.xlu0 %2148 }
0x1270   : > { %v2154_v38 = vsub.f32 %v6501_v30, %v2151_v36  ;;  %v2152_v34 = vmul.f32 0.03125, %v2149_v55  ;;  %v2156_v40 = vmul.f32 %v2153_v53, %v2153_v53 }
0x1272   : > { %v2155_v41 = vsub.f32 %v6498_v29, %v2152_v34  ;;  %v2159_v43 = vsel %vm833_vm0, %v2156_v40, 0.0  ;;  %v2157_v44 = vmul.f32 %v2154_v38, %v2154_v38 }
0x1273   : > { %2160 = vadd.xlane.f32.xlu1 %v2159_v43 }
0x1274   : > { %v2162_v45 = vsel %vm833_vm0, %v2157_v44, 0.0  ;;  %v2158_v47 = vmul.f32 %v2155_v41, %v2155_v41 }
0x1275   : > { %2163 = vadd.xlane.f32.xlu0 %v2162_v45 }
0x1276   : > { %v2165_v51 = vsel %vm833_vm0, %v2158_v47, 0.0 }
0x1277   : > { %2166 = vadd.xlane.f32.xlu1 %v2165_v51 }
0x1300   : > { %v2161_v59 = vpop.xlane.xlu1 %2160 }
0x1301   : > { %v2168_v52 = vmul.f32 0.03125, %v2161_v59 }
0x1302   : > { %v2164_v60 = vpop.xlane.xlu0 %2163 }
0x1303   : > { %v2171_v42 = vadd.f32 1e-05, %v2168_v52  ;;  %v2169_v54 = vmul.f32 0.03125, %v2164_v60 }
0x1304   : > { %v2167_v61 = vpop.xlane.xlu1 %2166 }
0x1305   : > { %5781 = vrsqrt.f32 %v2171_v42  ;;  %v2172_v56 = vadd.f32 1e-05, %v2169_v54  ;;  %v2170_v62 = vmul.f32 0.03125, %v2167_v61 }
0x1307   : > { %5783 = vrsqrt.f32 %v2172_v56  ;;  %v2173_v25 = vadd.f32 1e-05, %v2170_v62 }
0x1309   : > { %5785 = vrsqrt.f32 %v2173_v25 }
0x130f   : > { %v5782_v46 = vpop.eup %5781 }
0x1310   : > { %v2177_v27 = vmul.f32 %v5782_v46, %v2153_v53 }
0x1311   : > { %v5784_v28 = vpop.eup %5783 }
0x1312   : > { %v2178_v63 = vmul.f32 %v5784_v28, %v2154_v38  ;;  %v2186_v0 = vmul.f32 %v4876_v24, %v2177_v27 }
0x1313   : > { %v5786_v1 = vpop.eup %5785 }
0x1314   : > { %v2179_v3 = vmul.f32 %v5786_v1, %v2155_v41  ;;  %v2187_v4 = vmul.f32 %v4876_v24, %v2178_v63  ;;  %v2195_v5 = vadd.f32 %v4877_v2, %v2186_v0 }
0x1316   : > { %v2196_v6 = vadd.f32 %v4877_v2, %v2187_v4  ;;  %v2188_v7 = vmul.f32 %v4876_v24, %v2179_v3 }
0x1318   : > { %v2198_v8 = vpack.c.bf16 %v2196_v6, %v2195_v5  ;;  %v2197_v9 = vadd.f32 %v4877_v2, %v2188_v7 }
0x131a   : > { %5320 = vmatprep.mubr.msk.bf16.mxu0 %vm833_vm0, %v2198_v8  ;;  %v2199_v10 = vpack.c.bf16 %v2197_v9, %v2197_v9 }
0x131c   : > { %5321 = vmatmul.mubr.msk.bf16.vlgmr.msra.gmra.mrb[28].mxu0 %vm833_vm0, %v2199_v10 }
0x13ef   : > { %v5322_v12 = vpop.f32.mrb[28].mxu0 }
0x13f0   : > { %v2274_v13 = vadd.f32 %v5322_v12, %v4883_v11  ;;  %v2265_v14 = vpop.f32.mrb[29].mxu0 }
0x13f1   : > { %v5323_v15 = vpop.f32.mrb[30].mxu0  ;;  %v2266_v18 = vadd.f32 %v4883_v11, %v2265_v14 }
0x13f2   : > { %v6532_v16 = vpack.c.bf16 %v2274_v13, %v2274_v13  ;;  %v2268_v17 = vpop.f32.mrb[31].mxu0 }
0x13f3   : > { %v2269_v19 = vadd.f32 %v4883_v11, %v2268_v17 }
0x13f4   : > { %2285 = vrot.lane.b32.xlu1 %v6532_v16, %s7189_s27 }
0x13f5   : > { %v6536_v20 = vpack.c.bf16 %v2269_v19, %v2266_v18 }
0x13f7   : > { %2283 = vrot.lane.b32.xlu0 %v6536_v20, %s7189_s27  ;;  %5328 = vmatprep.mubr.msk.bf16.mxu0 %vm1065_vm1, %v6536_v20  ;;  %s7239_s27 = smov 24  }
0x13f8   : > { %2448 = vrot.lane.b32.xlu1 %v6536_v20, %s7187_s24 }
0x13fb   : > { %2444 = vrot.lane.b32.xlu0 %v6536_v20, %s7185_s23 }
0x13fc   : > { %2450 = vrot.lane.b32.xlu1 %v6532_v16, %s7187_s24  ;;  %s7242_s24 = smov 120  }
0x1400   : > { %2446 = vrot.lane.b32.xlu1 %v6532_v16, %s7185_s23 }
0x1466   : > { %v2286_v21 = vpop.permute.xlu1 %2285 }
0x1467   : > { %v2297_v37 = vsel %vm1065_vm1, %v2286_v21, 0 }
0x1469   : > { %v2284_v22 = vpop.permute.xlu0 %2283 }
0x146a   : > { %v2449_v26 = vpop.permute.xlu1 %2448  ;;  %5544 = vmatprep.subr.msk.bf16.mxu0 %vm1065_vm1, %v2284_v22  ;;  %v2294_v31 = vsel %vm1065_vm1, %v2284_v22, 0 }
0x146b   : > { %5325 = vmatpush3.bf16.xpose.msra.mxu0 %v2294_v31  ;;  %5547 = vmatprep.subr.msk.bf16.mxu1 %vm1065_vm1, %v2449_v26  ;;  %v2459_v32 = vsel %vm1065_vm1, %v2449_v26, 0 }
0x146c   : > { %5545 = vmatprep.subr.msk.bf16.mxu0 %vm1065_vm1, %v2286_v21  ;;  %5341 = vmatpush3.bf16.xpose.msra.mxu1 %v2459_v32 }
0x146d   : > { %v2445_v33 = vpop.permute.xlu0 %2444 }
0x146e   : > { %v2451_v50 = vpop.permute.xlu1 %2450  ;;  %5344 = vmatprep.mubr.msk.bf16.mxu1 %vm1065_vm1, %v2445_v33 }
0x146f   : > { %5548 = vmatprep.subr.msk.bf16.mxu1 %vm1065_vm1, %v2451_v50  ;;  %v2462_v35 = vsel %vm1065_vm1, %v2451_v50, 0 }
0x1472   : > { %v2447_v53 = vpop.permute.xlu1 %2446 }
0x1473   : > { %5327 = vmatpush3.bf16.xpose.msra.mxu0 %v2297_v37 }
0x1474   : > { %5343 = vmatpush3.bf16.xpose.msra.mxu1 %v2462_v35 }
0x147a   : > { %5329 = vmatmul.mubr.msk.bf16.vlgmr.msra.gmra.mrb[32].mxu0 %vm1065_vm1, %v6532_v16 }
0x147b   : > { %5345 = vmatmul.mubr.msk.bf16.vlgmr.msra.gmra.mrb[20].mxu1 %vm1065_vm1, %v2447_v53 }
0x154d   : > { %v5330_v36 = vpop.f32.mrb[32].mxu0 }
0x154e   : > { %v2333_v55 = vpop.f32.mrb[33].mxu0  ;;  %v5346_v38 = vpop.f32.mrb[20].mxu1  ;;  %v2353_v51 = vsel %vm1126_vm2, %v5330_v36, -inf }
0x154f   : > { %v5331_v34 = vpop.f32.mrb[34].mxu0  ;;  %v2498_v40 = vpop.f32.mrb[21].mxu1  ;;  %v2347_v41 = vsel %vm1126_vm2, %v2333_v55, -inf  ;;  %v2518_v57 = vsel %vm1126_vm2, %v5346_v38, -inf }
0x1550   : > { %v5347_v43 = vpop.f32.mrb[22].mxu1  ;;  %2348 = vmax.xlane.f32.xlu0 %v2347_v41  ;;  %v2336_v44 = vpop.f32.mrb[35].mxu0  ;;  %v2512_v58 = vsel %vm1126_vm2, %v2498_v40, -inf }
0x1551   : > { %v2501_v45 = vpop.f32.mrb[23].mxu1  ;;  %v2350_v47 = vsel %vm1126_vm2, %v2336_v44, -inf }
0x1552   : > { %2351 = vmax.xlane.f32.xlu1 %v2350_v47  ;;  %v2515_v59 = vsel %vm1126_vm2, %v2501_v45, -inf }
0x1554   : > { %2354 = vmax.xlane.f32.xlu0 %v2353_v51 }
0x1556   : > { %2519 = vmax.xlane.f32.xlu1 %v2518_v57 }
0x1558   : > { %2513 = vmax.xlane.f32.xlu0 %v2512_v58 }
0x155c   : > { %2516 = vmax.xlane.f32.xlu0 %v2515_v59 }
0x15dd   : > { %v2349_v52 = vpop.xlane.xlu0 %2348 }
0x15de   : > { %v2356_v60 = vsub.f32 %v2333_v55, %v2349_v52 }
0x15df   : > { %v2352_v42 = vpop.xlane.xlu1 %2351 }
0x15e0   : > { %v2359_v56 = vmul.f32 1.442695, %v2356_v60  ;;  %v2357_v8 = vsub.f32 %v2336_v44, %v2352_v42 }
0x15e1   : > { %v2355_v54 = vpop.xlane.xlu0 %2354 }
0x15e2   : > { %v2358_v61 = vsub.f32 %v5330_v36, %v2355_v54  ;;  %v2361_v10 = vmul.f32 1.442695, %v2357_v8 }
0x15e3   : > { %v2520_v62 = vpop.xlane.xlu1 %2519 }
0x15e4   : > { %v2363_v25 = vmul.f32 1.442695, %v2358_v61  ;;  %v2523_v46 = vsub.f32 %v5346_v38, %v2520_v62 }
0x15e5   : > { %v2514_v3 = vpop.xlane.xlu0 %2513 }
0x15e6   : > { %5787 = vpow2.f32 %v2363_v25  ;;  %v2528_v24 = vmul.f32 1.442695, %v2523_v46  ;;  %v2521_v6 = vsub.f32 %v2498_v40, %v2514_v3 }
0x15e7   : > { %5789 = vpow2.f32 %v2359_v56 }
0x15e8   : > { %5791 = vpow2.f32 %v2528_v24  ;;  %v2524_v9 = vmul.f32 1.442695, %v2521_v6 }
0x15e9   : > { %v2517_v4 = vpop.xlane.xlu0 %2516 }
0x15ea   : > { %v2522_v5 = vsub.f32 %v2501_v45, %v2517_v4 }
0x15ec   : > { %v2526_v7 = vmul.f32 1.442695, %v2522_v5 }
0x15ee   : > { %5793 = vpow2.f32 %v2526_v7 }
0x15ef   : > { %5795 = vpow2.f32 %v2524_v9 }
0x15f0   : > { %v6568_v27 = vpop.eup %5787  ;;  %5797 = vpow2.f32 %v2361_v10 }
0x15f1   : > { %v6570_v28 = vpop.eup %5789  ;;  %v2371_v63 = vsel %vm1126_vm2, %v6568_v27, 0.0 }
0x15f2   : > { %v6574_v0 = vpop.eup %5791  ;;  %2372 = vadd.xlane.f32.xlu0 %v2371_v63  ;;  %v2365_v2 = vsel %vm1126_vm2, %v6570_v28, 0.0 }
0x15f3   : > { %v2536_v1 = vsel %vm1126_vm2, %v6574_v0, 0.0 }
0x15f4   : > { %2537 = vadd.xlane.f32.xlu1 %v2536_v1 }
0x15f6   : > { %2366 = vadd.xlane.f32.xlu0 %v2365_v2 }
0x15f8   : > { %v5794_v11 = vpop.eup %5793 }
0x15f9   : > { %v5796_v12 = vpop.eup %5795  ;;  %v2533_v13 = vsel %vm1126_vm2, %v5794_v11, 0.0 }
0x15fa   : > { %v2530_v14 = vsel %vm1126_vm2, %v5796_v12, 0.0  ;;  %v5798_v15 = vpop.eup %5797 }
0x15fb   : > { %v2368_v17 = vsel %vm1126_vm2, %v5798_v15, 0.0 }
0x1605   : > { %2384 = vrot.lane.b32.xlu1 %v6532_v16, %s7183_s28 }
0x1609   : > { %2547 = vrot.lane.b32.xlu1 %v6536_v20, %s7181_s25 }
0x160c   : > { %2382 = vrot.lane.b32.xlu0 %v6536_v20, %s7183_s28  ;;  %s7246_s28 = sld [smem:[#allocation25_spill]] }
0x162b   : > { %2534 = vadd.xlane.f32.xlu0 %v2533_v13 }
0x162d   : > { %2531 = vadd.xlane.f32.xlu1 %v2530_v14 }
0x1631   : > { %2369 = vadd.xlane.f32.xlu1 %v2368_v17 }
0x1641   : > { %2613 = vrot.lane.b32.xlu0 %v6536_v20, %s7231_s30 }
0x1642   : > { %2549 = vrot.lane.b32.xlu1 %v6532_v16, %s7181_s25  ;;  %s7243_s25 = smov 64  }
0x1645   : > { %2609 = vrot.lane.b32.xlu0 %v6536_v20, %s7232_s4 }
0x1646   : > { %2615 = vrot.lane.b32.xlu1 %v6532_v16, %s7231_s30 }
0x164a   : > { %2611 = vrot.lane.b32.xlu1 %v6532_v16, %s7232_s4 }
0x167f   : > { %v2373_v18 = vpop.xlane.xlu0 %2372 }
0x1680   : > { %5799 = vrcp.f32 %v2373_v18 }
0x1681   : > { %v2538_v19 = vpop.xlane.xlu1 %2537 }
0x1683   : > { %v2367_v21 = vpop.xlane.xlu0 %2366 }
0x1684   : > { %5801 = vrcp.f32 %v2367_v21 }
0x1685   : > { %v2385_v22 = vpop.permute.xlu1 %2384 }
0x1686   : > { %v2394_v31 = vsel %vm1173_vm3, %v2385_v22, 0 }
0x1687   : > { %v2383_v26 = vpop.permute.xlu0 %2382 }
0x1688   : > { %5332 = vmatprep.subr.bf16.mxu0 %v2383_v26 }
0x1689   : > { %5333 = vmatpush3.bf16.msra.mxu0 %v2383_v26  ;;  %v2548_v32 = vpop.permute.xlu1 %2547 }
0x168a   : > { %5546 = vmatprep.subr.msk.bf16.mxu0 %vm1173_vm3, %v2385_v22  ;;  %v5800_v35 = vpop.eup %5799 }
0x168b   : > { %v2379_v34 = vmul.f32 %v5800_v35, %v6568_v27 }
0x168d   : > { %5335 = vmatpush3.bf16.msra.mxu0 %v2394_v31  ;;  %v2381_v47 = vpack.c.bf16 %v2379_v34, %v2379_v34 }
0x168e   : > { %5348 = vmatprep.subr.bf16.mxu0 %v2548_v32  ;;  %v5802_v53 = vpop.eup %5801 }
0x168f   : > { %v2377_v40 = vmul.f32 %v5802_v53, %v6570_v28 }
0x16b8   : > { %v2535_v50 = vpop.xlane.xlu0 %2534 }
0x16ba   : > { %v2532_v33 = vpop.xlane.xlu1 %2531 }
0x16bb   : > { %5803 = vrcp.f32 %v2532_v33 }
0x16bc   : > { %5805 = vrcp.f32 %v2535_v50  ;;  %v2614_v59 = vpop.permute.xlu0 %2613 }
0x16bd   : > { %v2624_v61 = vsel %vm1065_vm1, %v2614_v59, 0 }
0x16be   : > { %v2370_v37 = vpop.xlane.xlu1 %2369 }
0x16bf   : > { %5807 = vrcp.f32 %v2370_v37 }
0x16c0   : > { %5809 = vrcp.f32 %v2538_v19  ;;  %v2610_v54 = vpop.permute.xlu0 %2609 }
0x16c2   : > { %v2550_v58 = vpop.permute.xlu1 %2549 }
0x16c3   : > { %v2559_v60 = vsel %vm1173_vm3, %v2550_v58, 0 }
0x16c5   : > { %v5804_v36 = vpop.eup %5803 }
0x16c6   : > { %v5806_v55 = vpop.eup %5805  ;;  %v2542_v43 = vmul.f32 %v5804_v36, %v5796_v12  ;;  %v2616_v56 = vpop.permute.xlu1 %2615 }
0x16c7   : > { %v2543_v45 = vmul.f32 %v5806_v55, %v5794_v11  ;;  %v2627_v62 = vsel %vm1065_vm1, %v2616_v56, 0 }
0x16c9   : > { %v5808_v38 = vpop.eup %5807  ;;  %v2545_v57 = vpack.c.bf16 %v2543_v45, %v2542_v43 }
0x16ca   : > { %v2378_v41 = vmul.f32 %v5808_v38, %v5798_v15  ;;  %v5810_v51 = vpop.eup %5809  ;;  %v2612_v25 = vpop.permute.xlu1 %2611 }
0x16cb   : > { %v2544_v52 = vmul.f32 %v5810_v51, %v6574_v0 }
0x16cc   : > { %v2380_v44 = vpack.c.bf16 %v2378_v41, %v2377_v40 }
0x16cd   : > { %v2546_v42 = vpack.c.bf16 %v2544_v52, %v2544_v52 }
0x16ce   : > { %5336 = vmatprep.mubr.msk.bf16.mxu0 %vm1126_vm2, %v2380_v44 }
0x16cf   : > { %5337 = vmatmul.mubr.msk.bf16.vlgmr.msra.gmra.mrb[36].mxu0 %vm1126_vm2, %v2381_v47 }
0x16d0   : > { %5349 = vmatpush3.bf16.msra.mxu0 %v2548_v32  ;;  %5352 = vmatprep.mubr.msk.bf16.mxu0 %vm1126_vm2, %v2545_v57 }
0x16d1   : > { %5549 = vmatprep.subr.msk.bf16.mxu0 %vm1173_vm3, %v2550_v58 }
0x16d4   : > { %5351 = vmatpush3.bf16.msra.mxu0 %v2559_v60 }
0x16d5   : > { %5550 = vmatprep.subr.msk.bf16.mxu0 %vm1065_vm1, %v2614_v59 }
0x16d7   : > { %5353 = vmatmul.mubr.msk.bf16.vlgmr.msra.gmra.mrb[40].mxu0 %vm1126_vm2, %v2546_v42 }
0x16d8   : > { %5360 = vmatprep.mubr.msk.bf16.mxu0 %vm1065_vm1, %v2610_v54 }
0x16dd   : > { %5357 = vmatpush3.bf16.xpose.msra.mxu0 %v2624_v61 }
0x16de   : > { %5551 = vmatprep.subr.msk.bf16.mxu0 %vm1065_vm1, %v2616_v56 }
0x16e5   : > { %5359 = vmatpush3.bf16.xpose.msra.mxu0 %v2627_v62 }
0x16ec   : > { %5361 = vmatmul.mubr.msk.bf16.vlgmr.msra.gmra.mrb[44].mxu0 %vm1065_vm1, %v2612_v25 }
0x17a2   : > { %v6616_v46 = vpop.f32.mrb[36].mxu0 }
0x17a3   : > { %v6618_v24 = vpop.f32.mrb[37].mxu0 }
0x17a4   : > { %v5339_v27 = vpop.f32.mrb[38].mxu0 }
0x17a5   : > { %v6620_v28 = vpop.f32.mrb[39].mxu0 }
0x17aa   : > { %v6622_v63 = vpop.f32.mrb[40].mxu0 }
0x17ab   : > { %v6624_v0 = vpop.f32.mrb[41].mxu0 }
0x17ac   : > { %v5355_v1 = vpop.f32.mrb[42].mxu0 }
0x17ad   : > { %v6626_v2 = vpop.f32.mrb[43].mxu0 }
0x17ae   : > { %v5637_v3 = vpack.i.bf16 %v6626_v2, %v6624_v0 }
0x17bf   : > { %v5362_v4 = vpop.f32.mrb[44].mxu0 }
0x17c0   : > { %v2663_v5 = vpop.f32.mrb[45].mxu0  ;;  %v2683_v10 = vsel %vm1126_vm2, %v5362_v4, -inf }
0x17c1   : > { %v5363_v6 = vpop.f32.mrb[46].mxu0  ;;  %v2677_v7 = vsel %vm1126_vm2, %v2663_v5, -inf }
0x17c2   : > { %2678 = vmax.xlane.f32.xlu0 %v2677_v7  ;;  %v2666_v8 = vpop.f32.mrb[47].mxu0 }
0x17c3   : > { %v2680_v9 = vsel %vm1126_vm2, %v2666_v8, -inf }
0x17c4   : > { %2681 = vmax.xlane.f32.xlu1 %v2680_v9 }
0x17c6   : > { %2684 = vmax.xlane.f32.xlu0 %v2683_v10 }
0x184f   : > { %v2679_v11 = vpop.xlane.xlu0 %2678 }
0x1850   : > { %v2686_v12 = vsub.f32 %v2663_v5, %v2679_v11 }
0x1851   : > { %v2682_v13 = vpop.xlane.xlu1 %2681 }
0x1852   : > { %v2689_v14 = vmul.f32 1.442695, %v2686_v12  ;;  %v2687_v15 = vsub.f32 %v2666_v8, %v2682_v13 }
0x1853   : > { %v2685_v17 = vpop.xlane.xlu0 %2684 }
0x1854   : > { %5811 = vpow2.f32 %v2689_v14  ;;  %v2691_v18 = vmul.f32 1.442695, %v2687_v15  ;;  %v2688_v19 = vsub.f32 %v5362_v4, %v2685_v17 }
0x1856   : > { %5813 = vpow2.f32 %v2691_v18  ;;  %v2693_v21 = vmul.f32 1.442695, %v2688_v19 }
0x1858   : > { %5815 = vpow2.f32 %v2693_v21 }
0x185e   : > { %v5812_v22 = vpop.eup %5811 }
0x185f   : > { %v2695_v26 = vsel %vm1126_vm2, %v5812_v22, 0.0 }
0x1860   : > { %v5814_v31 = vpop.eup %5813  ;;  %2696 = vadd.xlane.f32.xlu0 %v2695_v26 }
0x1861   : > { %v2698_v50 = vsel %vm1126_vm2, %v5814_v31, 0.0 }
0x1862   : > { %v5816_v32 = vpop.eup %5815 }
0x1863   : > { %v2701_v33 = vsel %vm1126_vm2, %v5816_v32, 0.0 }
0x1864   : > { %2702 = vadd.xlane.f32.xlu1 %v2701_v33  ;;  %2699 = vadd.xlane.f32.xlu0 %v2698_v50 }
0x1875   : > { %2714 = vrot.lane.b32.xlu1 %v6532_v16, %s7233_s26 }
0x1879   : > { %2778 = vrot.lane.b32.xlu1 %v6536_v20, %s7234_s5 }
0x187a   : > { %2712 = vrot.lane.b32.xlu0 %v6536_v20, %s7233_s26 }
0x187d   : > { %2780 = vrot.lane.b32.xlu1 %v6532_v16, %s7234_s5 }
0x187e   : > { %2774 = vrot.lane.b32.xlu0 %v6536_v20, %s7235_s8 }
0x1881   : > { %2776 = vrot.lane.b32.xlu1 %v6532_v16, %s7235_s8 }
0x18ed   : > { %v2697_v37 = vpop.xlane.xlu0 %2696 }
0x18ee   : > { %5817 = vrcp.f32 %v2697_v37 }
0x18f1   : > { %v2700_v35 = vpop.xlane.xlu0 %2699  ;;  %v2703_v53 = vpop.xlane.xlu1 %2702 }
0x18f2   : > { %5819 = vrcp.f32 %v2700_v35 }
0x18f3   : > { %5821 = vrcp.f32 %v2703_v53 }
0x18f5   : > { %v2713_v36 = vpop.permute.xlu0 %2712  ;;  %v2715_v55 = vpop.permute.xlu1 %2714 }
0x18f6   : > { %5364 = vmatprep.subr.bf16.mxu1 %v2713_v36  ;;  %v2724_v34 = vsel %vm1173_vm3, %v2715_v55, 0 }
0x18f7   : > { %5365 = vmatpush3.bf16.msra.mxu1 %v2713_v36 }
0x18f8   : > { %5552 = vmatprep.subr.msk.bf16.mxu1 %vm1173_vm3, %v2715_v55  ;;  %v5818_v38 = vpop.eup %5817 }
0x18f9   : > { %v2779_v40 = vpop.permute.xlu1 %2778  ;;  %v2707_v44 = vmul.f32 %v5818_v38, %v5812_v22  ;;  %v2775_v58 = vpop.permute.xlu0 %2774 }
0x18fa   : > { %v2789_v59 = vsel %vm1065_vm1, %v2779_v40, 0 }
0x18fb   : > { %5367 = vmatpush3.bf16.msra.mxu1 %v2724_v34  ;;  %v5683_v34 = vld [vmem:[%s7137_s12 + $0x10] sm:$0xff]  }
0x18fc   : > { %v5820_v41 = vpop.eup %5819  ;;  %5553 = vmatprep.subr.msk.bf16.mxu1 %vm1065_vm1, %v2779_v40  ;;  %v5684_v40 = vld [vmem:[%s7137_s12 + $0x18] sm:$0xff]  }
0x18fd   : > { %v5822_v43 = vpop.eup %5821  ;;  %v2708_v45 = vmul.f32 %v5820_v41, %v5814_v31  ;;  %v2781_v52 = vpop.permute.xlu1 %2780 }
0x18fe   : > { %v2709_v47 = vmul.f32 %v5822_v43, %v5816_v32  ;;  %v2792_v60 = vsel %vm1065_vm1, %v2781_v52, 0 }
0x18ff   : > { %v2710_v51 = vpack.c.bf16 %v2708_v45, %v2707_v44 }
0x1900   : > { %v2711_v57 = vpack.c.bf16 %v2709_v47, %v2709_v47 }
0x1901   : > { %5368 = vmatprep.mubr.msk.bf16.mxu1 %vm1126_vm2, %v2710_v51  ;;  %v2777_v42 = vpop.permute.xlu1 %2776 }
0x1902   : > { %5369 = vmatmul.mubr.msk.bf16.vlgmr.msra.gmra.mrb[24].mxu1 %vm1126_vm2, %v2711_v57 }
0x1903   : > { %5376 = vmatprep.mubr.msk.bf16.mxu1 %vm1065_vm1, %v2775_v58 }
0x1904   : > { %5373 = vmatpush3.bf16.xpose.msra.mxu1 %v2789_v59 }
0x1905   : > { %5554 = vmatprep.subr.msk.bf16.mxu1 %vm1065_vm1, %v2781_v52 }
0x190c   : > { %5375 = vmatpush3.bf16.xpose.msra.mxu1 %v2792_v60 }
0x1913   : > { %5377 = vmatmul.mubr.msk.bf16.vlgmr.msra.gmra.mrb[28].mxu1 %vm1065_vm1, %v2777_v42 }
0x19d5   : > { %v5370_v54 = vpop.f32.mrb[24].mxu1 }
0x19d6   : > { %v2760_v61 = vpop.f32.mrb[25].mxu1 }
0x19d7   : > { %v5371_v56 = vpop.f32.mrb[26].mxu1 }
0x19d8   : > { %v2763_v62 = vpop.f32.mrb[27].mxu1 }
0x19d9   : > { %v5642_v25 = vpack.i.bf16 %v2763_v62, %v2760_v61 }
0x19e6   : > { %v5378_v27 = vpop.f32.mrb[28].mxu1 }
0x19e7   : > { %v2828_v1 = vpop.f32.mrb[29].mxu1  ;;  %v2848_v8 = vsel %vm1126_vm2, %v5378_v27, -inf }
0x19e8   : > { %v5379_v4 = vpop.f32.mrb[30].mxu1  ;;  %v2842_v5 = vsel %vm1126_vm2, %v2828_v1, -inf }
0x19e9   : > { %2843 = vmax.xlane.f32.xlu0 %v2842_v5  ;;  %v2831_v6 = vpop.f32.mrb[31].mxu1 }
0x19ea   : > { %v2845_v7 = vsel %vm1126_vm2, %v2831_v6, -inf }
0x19eb   : > { %2846 = vmax.xlane.f32.xlu1 %v2845_v7 }
0x19ed   : > { %2849 = vmax.xlane.f32.xlu0 %v2848_v8 }
0x1a76   : > { %v2844_v9 = vpop.xlane.xlu0 %2843 }
0x1a77   : > { %v2851_v10 = vsub.f32 %v2828_v1, %v2844_v9 }
0x1a78   : > { %v2847_v11 = vpop.xlane.xlu1 %2846 }
0x1a79   : > { %v2854_v12 = vmul.f32 1.442695, %v2851_v10  ;;  %v2852_v13 = vsub.f32 %v2831_v6, %v2847_v11 }
0x1a7a   : > { %v2850_v14 = vpop.xlane.xlu0 %2849 }
0x1a7b   : > { %5823 = vpow2.f32 %v2854_v12  ;;  %v2856_v15 = vmul.f32 1.442695, %v2852_v13  ;;  %v2853_v17 = vsub.f32 %v5378_v27, %v2850_v14 }
0x1a7d   : > { %5825 = vpow2.f32 %v2856_v15  ;;  %v2858_v18 = vmul.f32 1.442695, %v2853_v17 }
0x1a7f   : > { %5827 = vpow2.f32 %v2858_v18 }
0x1a85   : > { %v5824_v19 = vpop.eup %5823 }
0x1a86   : > { %v2860_v21 = vsel %vm1126_vm2, %v5824_v19, 0.0 }
0x1a87   : > { %v5826_v22 = vpop.eup %5825  ;;  %2861 = vadd.xlane.f32.xlu0 %v2860_v21 }
0x1a88   : > { %v2863_v32 = vsel %vm1126_vm2, %v5826_v22, 0.0 }
0x1a89   : > { %v5828_v26 = vpop.eup %5827 }
0x1a8a   : > { %v2866_v31 = vsel %vm1126_vm2, %v5828_v26, 0.0 }
0x1a8b   : > { %2867 = vadd.xlane.f32.xlu1 %v2866_v31  ;;  %2864 = vadd.xlane.f32.xlu0 %v2863_v32 }
0x1a9c   : > { %2879 = vrot.lane.b32.xlu1 %v6532_v16, %s7236_s29 }
0x1aa0   : > { %5638 = vrot.lane.b32.xlu1 %v5637_v3, %s7237_s3 }
0x1aa1   : > { %2877 = vrot.lane.b32.xlu0 %v6536_v20, %s7236_s29 }
0x1aa4   : > { %2946 = vrot.lane.b32.xlu1 %v6622_v63, %s7237_s3 }
0x1aa5   : > { %5643 = vrot.lane.b32.xlu0 %v5642_v25, %s7238_s6 }
0x1aa8   : > { %2958 = vrot.lane.b32.xlu1 %v5370_v54, %s7238_s6 }
0x1b14   : > { %v2862_v33 = vpop.xlane.xlu0 %2861 }
0x1b15   : > { %5829 = vrcp.f32 %v2862_v33 }
0x1b18   : > { %v2865_v50 = vpop.xlane.xlu0 %2864  ;;  %v2868_v37 = vpop.xlane.xlu1 %2867 }
0x1b19   : > { %5831 = vrcp.f32 %v2865_v50 }
0x1b1a   : > { %5833 = vrcp.f32 %v2868_v37 }
0x1b1c   : > { %v2878_v16 = vpop.permute.xlu0 %2877  ;;  %v2880_v0 = vpop.permute.xlu1 %2879 }
0x1b1d   : > { %5380 = vmatprep.subr.bf16.mxu0 %v2878_v16  ;;  %v2889_v2 = vsel %vm1173_vm3, %v2880_v0, 0 }
0x1b1e   : > { %5381 = vmatpush3.bf16.msra.mxu0 %v2878_v16 }
0x1b1f   : > { %5555 = vmatprep.subr.msk.bf16.mxu0 %vm1173_vm3, %v2880_v0  ;;  %v5830_v20 = vpop.eup %5829 }
0x1b20   : > { %v2872_v35 = vmul.f32 %v5830_v20, %v5824_v19  ;;  %v5639_v51 = vpop.permute.xlu1 %5638  ;;  %v5644_v58 = vpop.permute.xlu0 %5643 }
0x1b21   : > { %v5641_v59 = vunpack.i.h.bf16 %v5639_v51  ;;  %v5640_v52 = vunpack.i.l.bf16 %v5639_v51  ;;  %v5646_v42 = vunpack.i.h.bf16 %v5644_v58  ;;  %v5645_v54 = vunpack.i.l.bf16 %v5644_v58 }
0x1b22   : > { %5383 = vmatpush3.bf16.msra.mxu0 %v2889_v2 }
0x1b23   : > { %v5832_v63 = vpop.eup %5831  ;;  %5388 = vmatprep.subr.bf16.mxu0 %v5683_v34  ;;  %v2976_v61 = vsel %vm1065_vm1, %v6620_v28, %v5641_v59  ;;  %v2975_v56 = vsel %vm1065_vm1, %v6618_v24, %v5640_v52  ;;  %v4916_v52 = vld [vmem:[%s7139_s14 + $0x1] ss:$0 sm:$0xff] }
0x1b24   : > { %v5834_v3 = vpop.eup %5833  ;;  %v2873_v53 = vmul.f32 %v5832_v63, %v5826_v22  ;;  %v2947_v57 = vpop.permute.xlu1 %2946  ;;  %v2978_v7 = vsel %vm1759_vm4, %v2975_v56, %v5645_v54  ;;  %v2979_v8 = vsel %vm1759_vm4, %v2976_v61, %v5646_v42 }
0x1b25   : > { %v2874_v36 = vmul.f32 %v5834_v3, %v5828_v26  ;;  %v2977_v25 = vsel %vm1065_vm1, %v6616_v46, %v2947_v57  ;;  %v4909_v46 = vld [vmem:[%s7138_s13 + $0x1] ss:$0 sm:$0xff] }
0x1b26   : > { %v2875_v55 = vpack.c.bf16 %v2873_v53, %v2872_v35 }
0x1b27   : > { %v2876_v38 = vpack.c.bf16 %v2874_v36, %v2874_v36 }
0x1b28   : > { %5384 = vmatprep.mubr.msk.bf16.mxu0 %vm1126_vm2, %v2875_v55  ;;  %v2959_v60 = vpop.permute.xlu1 %2958  ;;  %v5685_v55 = vld [vmem:[%s7141_s16 + $0x10] sm:$0xff]  }
0x1b29   : > { %5385 = vmatmul.mubr.msk.bf16.vlgmr.msra.gmra.mrb[48].mxu0 %vm1126_vm2, %v2876_v38  ;;  %v2980_v1 = vsel %vm1759_vm4, %v2977_v25, %v2959_v60  ;;  %v5686_v38 = vld [vmem:[%s7141_s16 + $0x18] sm:$0xff]   ;;  %5396 = vmatprep.subr.bf16.mxu1 %v5685_v55 }
0x1b2a   : > { %5389 = vmatpush3.bf16.msra.mxu0 %v5683_v34  ;;  %5397 = vmatpush3.bf16.msra.mxu1 %v5685_v55 }
0x1b2b   : > { %5390 = vmatprep.subr.bf16.mxu0 %v5684_v40  ;;  %5398 = vmatprep.subr.bf16.mxu1 %v5686_v38 }
0x1b2e   : > { %5391 = vmatpush3.bf16.msra.mxu0 %v5684_v40  ;;  %5399 = vmatpush3.bf16.msra.mxu1 %v5686_v38 }
0x1bfc   : > { %v5386_v41 = vpop.f32.mrb[48].mxu0 }
0x1bfd   : > { %2970 = vrot.lane.b32.xlu1 %v5386_v41, %s7239_s27  ;;  %v2925_v43 = vpop.f32.mrb[49].mxu0 }
0x1bfe   : > { %v5387_v44 = vpop.f32.mrb[50].mxu0 }
0x1bff   : > { %v2928_v45 = vpop.f32.mrb[51].mxu0 }
0x1c00   : > { %v5647_v47 = vpack.i.bf16 %v2928_v45, %v2925_v43 }
0x1c02   : > { %5648 = vrot.lane.b32.xlu0 %v5647_v47, %s7239_s27 }
0x1c6f   : > { %v2971_v62 = vpop.permute.xlu1 %2970 }
0x1c70   : > { %v2983_v6 = vsel %vm1126_vm2, %v2980_v1, %v2971_v62  ;;  %v4917_v62 = vld [vmem:[%s7140_s15 + $0x1] ss:$0 sm:$0xff] }
0x1c71   : > { %v2985_v10 = vpack.c.bf16 %v2983_v6, %v2983_v6 }
0x1c74   : > { %v5649_v27 = vpop.permute.xlu0 %5648 }
0x1c75   : > { %v5651_v4 = vunpack.i.h.bf16 %v5649_v27  ;;  %v5650_v5 = vunpack.i.l.bf16 %v5649_v27 }
0x1c77   : > { %v2981_v28 = vsel %vm1126_vm2, %v2978_v7, %v5650_v5  ;;  %v2982_v9 = vsel %vm1126_vm2, %v2979_v8, %v5651_v4  ;;  %v5687_v8 = vld [vmem:[%s7143_s18 + $0x40] sm:$0xff]  }
0x1c78   : > { %v2984_v24 = vpack.c.bf16 %v2982_v9, %v2981_v28  ;;  %5404 = vmatprep.subr.bf16.mxu0 %v5687_v8  ;;  %v5688_v28 = vld [vmem:[%s7143_s18 + $0x48] sm:$0xff]   ;;  %v5689_v9 = vld [vmem:[%s7143_s18 + $0x50] sm:$0xff]  }
0x1c7a   : > { %5392 = vmatprep.mubr.msk.bf16.mxu0 %vm833_vm0, %v2984_v24  ;;  %v5690_v24 = vld [vmem:[%s7143_s18 + $0x58] sm:$0xff]  }
0x1c7b   : > { %5393 = vmatmul.mubr.msk.bf16.vlgmr.msra.gmra.mrb[52].mxu0 %vm833_vm0, %v2985_v10  ;;  %v5691_v10 = vld [vmem:[%s7143_s18 + $0x60] sm:$0xff]  }
0x1c7c   : > { %5405 = vmatpush3.bf16.msra.mxu0 %v5687_v8 }
0x1c7d   : > { %5406 = vmatprep.subr.bf16.mxu0 %v5688_v28 }
0x1c80   : > { %5407 = vmatpush3.bf16.msra.mxu0 %v5688_v28 }
0x1c81   : > { %5408 = vmatprep.subr.bf16.mxu0 %v5689_v9 }
0x1c84   : > { %5409 = vmatpush3.bf16.msra.mxu0 %v5689_v9 }
0x1c85   : > { %5410 = vmatprep.subr.bf16.mxu0 %v5690_v24 }
0x1c88   : > { %5411 = vmatpush3.bf16.msra.mxu0 %v5690_v24 }
0x1c89   : > { %5412 = vmatprep.subr.bf16.mxu0 %v5691_v10 }
0x1c8c   : > { %5413 = vmatpush3.bf16.msra.mxu0 %v5691_v10 }
0x1d4e   : > { %v5394_v11 = vpop.f32.mrb[52].mxu0 }
0x1d4f   : > { %v3051_v12 = vpop.f32.mrb[53].mxu0  ;;  %v3060_v13 = vadd.f32 %v5394_v11, %v4909_v46  ;;  %v5693_v11 = vld [vmem:[%s7143_s18 + $0x70] sm:$0xff]  }
0x1d50   : > { %v3052_v14 = vadd.f32 %v4909_v46, %v3051_v12  ;;  %v5395_v15 = vpop.f32.mrb[54].mxu0  ;;  %v5694_v12 = vld [vmem:[%s7143_s18 + $0x78] sm:$0xff]  }
0x1d51   : > { %v3054_v17 = vpop.f32.mrb[55].mxu0  ;;  %v6709_v21 = vadd.f32 %v3060_v13, %v6498_v29  ;;  %v4923_v13 = vld [vmem:[%s7142_s17 + $0x1] ss:$0 sm:$0xff] }
0x1d52   : > { %v6706_v18 = vadd.f32 %v3052_v14, %v6495_v23  ;;  %v3055_v19 = vadd.f32 %v4909_v46, %v3054_v17  ;;  %v5692_v46 = vld [vmem:[%s7143_s18 + $0x68] sm:$0xff]  }
0x1d53   : > { %v3078_v32 = vsel %vm833_vm0, %v6709_v21, 0.0  ;;  %5414 = vmatprep.subr.bf16.mxu0 %v5692_v46 }
0x1d54   : > { %v6712_v22 = vadd.f32 %v3055_v19, %v6501_v30  ;;  %v3072_v26 = vsel %vm833_vm0, %v6706_v18, 0.0  ;;  %5415 = vmatpush3.bf16.msra.mxu0 %v5692_v46 }
0x1d55   : > { %3073 = vadd.xlane.f32.xlu0 %v3072_v26  ;;  %5416 = vmatprep.subr.bf16.mxu0 %v5693_v11 }
0x1d56   : > { %v3075_v31 = vsel %vm833_vm0, %v6712_v22, 0.0 }
0x1d57   : > { %3076 = vadd.xlane.f32.xlu1 %v3075_v31 }
0x1d58   : > { %5417 = vmatpush3.bf16.msra.mxu0 %v5693_v11 }
0x1d59   : > { %3079 = vadd.xlane.f32.xlu0 %v3078_v32  ;;  %5418 = vmatprep.subr.bf16.mxu0 %v5694_v12 }
0x1d5c   : > { %5419 = vmatpush3.bf16.msra.mxu0 %v5694_v12 }
0x1de2   : > { %v3074_v23 = vpop.xlane.xlu0 %3073 }
0x1de3   : > { %v3081_v33 = vmul.f32 0.03125, %v3074_v23 }
0x1de4   : > { %v3077_v50 = vpop.xlane.xlu1 %3076 }
0x1de5   : > { %v3084_v29 = vsub.f32 %v6706_v18, %v3081_v33  ;;  %v3082_v37 = vmul.f32 0.03125, %v3077_v50 }
0x1de6   : > { %v3080_v30 = vpop.xlane.xlu0 %3079 }
0x1de7   : > { %v3085_v16 = vsub.f32 %v6712_v22, %v3082_v37  ;;  %v3083_v0 = vmul.f32 0.03125, %v3080_v30  ;;  %v3087_v20 = vmul.f32 %v3084_v29, %v3084_v29 }
0x1de9   : > { %v3086_v2 = vsub.f32 %v6709_v21, %v3083_v0  ;;  %v3090_v63 = vsel %vm833_vm0, %v3087_v20, 0.0  ;;  %v3088_v3 = vmul.f32 %v3085_v16, %v3085_v16 }
0x1dea   : > { %3091 = vadd.xlane.f32.xlu0 %v3090_v63 }
0x1deb   : > { %v3089_v35 = vmul.f32 %v3086_v2, %v3086_v2  ;;  %v3093_v53 = vsel %vm833_vm0, %v3088_v3, 0.0 }
0x1ded   : > { %v3096_v36 = vsel %vm833_vm0, %v3089_v35, 0.0 }
0x1dee   : > { %3094 = vadd.xlane.f32.xlu0 %v3093_v53  ;;  %3097 = vadd.xlane.f32.xlu1 %v3096_v36 }
0x1e77   : > { %v3092_v34 = vpop.xlane.xlu0 %3091 }
0x1e78   : > { %v3099_v40 = vmul.f32 0.03125, %v3092_v34 }
0x1e7a   : > { %v3102_v41 = vadd.f32 1e-05, %v3099_v40 }
0x1e7b   : > { %v3098_v43 = vpop.xlane.xlu1 %3097  ;;  %v3095_v44 = vpop.xlane.xlu0 %3094 }
0x1e7c   : > { %5835 = vrsqrt.f32 %v3102_v41  ;;  %v3101_v45 = vmul.f32 0.03125, %v3098_v43  ;;  %v3100_v47 = vmul.f32 0.03125, %v3095_v44 }
0x1e7e   : > { %v3104_v51 = vadd.f32 1e-05, %v3101_v45  ;;  %v3103_v57 = vadd.f32 1e-05, %v3100_v47 }
0x1e80   : > { %5837 = vrsqrt.f32 %v3104_v51 }
0x1e81   : > { %5839 = vrsqrt.f32 %v3103_v57 }
0x1e86   : > { %v5836_v58 = vpop.eup %5835 }
0x1e87   : > { %v3108_v59 = vmul.f32 %v5836_v58, %v3084_v29 }
0x1e89   : > { %v3117_v56 = vmul.f32 %v4916_v52, %v3108_v59 }
0x1e8a   : > { %v5838_v60 = vpop.eup %5837 }
0x1e8b   : > { %v5840_v42 = vpop.eup %5839  ;;  %v3110_v54 = vmul.f32 %v5838_v60, %v3086_v2  ;;  %v3126_v4 = vadd.f32 %v4917_v62, %v3117_v56  ;;  %v4945_v60 = vld [vmem:[%s7144_s19 + $0x1] ss:$0 sm:$0xff] }
0x1e8c   : > { %v3109_v61 = vmul.f32 %v5840_v42, %v3085_v16 }
0x1e8d   : > { %v3119_v25 = vmul.f32 %v4916_v52, %v3110_v54 }
0x1e8e   : > { %v3118_v27 = vmul.f32 %v4916_v52, %v3109_v61 }
0x1e8f   : > { %v3128_v1 = vadd.f32 %v4917_v62, %v3119_v25 }
0x1e90   : > { %v3127_v5 = vadd.f32 %v4917_v62, %v3118_v27 }
0x1e91   : > { %v3130_v6 = vpack.c.bf16 %v3128_v1, %v3128_v1 }
0x1e92   : > { %v3129_v7 = vpack.c.bf16 %v3127_v5, %v3126_v4 }
0x1e94   : > { %5400 = vmatprep.mubr.msk.bf16.mxu1 %vm833_vm0, %v3129_v7 }
0x1e95   : > { %5401 = vmatmul.mubr.msk.bf16.vlgmr.msra.gmra.mrb[32].mxu1 %vm833_vm0, %v3130_v6 }
0x1f68   : > { %v5402_v14 = vpop.f32.mrb[32].mxu1 }
0x1f69   : > { %v3205_v15 = vadd.f32 %v5402_v14, %v4923_v13  ;;  %v3196_v17 = vpop.f32.mrb[33].mxu1 }
0x1f6a   : > { %v3197_v19 = vadd.f32 %v4923_v13, %v3196_v17  ;;  %v5403_v26 = vpop.f32.mrb[34].mxu1 }
0x1f6b   : > { %v3215_v31 = vmul.f32 0.044715, %v3205_v15  ;;  %v3199_v32 = vpop.f32.mrb[35].mxu1  ;;  %v3212_v43 = vmul.f32 0.5, %v3205_v15  ;;  %v5695_v26 = vld [vmem:[%s7135_s10 + $0x20] sm:$0xff]  }
0x1f6c   : > { %v3213_v23 = vmul.f32 0.044715, %v3197_v19  ;;  %v3200_v33 = vadd.f32 %v4923_v13, %v3199_v32  ;;  %v3210_v44 = vmul.f32 0.5, %v3197_v19  ;;  %5424 = vmatprep.subr.bf16.mxu1 %v5695_v26 }
0x1f6d   : > { %v3218_v50 = vmul.f32 %v3215_v31, %v3205_v15  ;;  %v5696_v31 = vld [vmem:[%s7135_s10 + $0x28] sm:$0xff]   ;;  %5425 = vmatpush3.bf16.msra.mxu1 %v5695_v26 }
0x1f6e   : > { %v3216_v29 = vmul.f32 %v3213_v23, %v3197_v19  ;;  %v3214_v37 = vmul.f32 0.044715, %v3200_v33  ;;  %v3211_v45 = vmul.f32 0.5, %v3200_v33  ;;  %5426 = vmatprep.subr.bf16.mxu1 %v5696_v31 }
0x1f6f   : > { %v3221_v30 = vmul.f32 %v3218_v50, %v3205_v15 }
0x1f70   : > { %v3219_v16 = vmul.f32 %v3216_v29, %v3197_v19  ;;  %v3217_v0 = vmul.f32 %v3214_v37, %v3200_v33 }
0x1f71   : > { %v3224_v20 = vadd.f32 %v3221_v30, %v3205_v15  ;;  %5427 = vmatpush3.bf16.msra.mxu1 %v5696_v31 }
0x1f72   : > { %v3220_v2 = vmul.f32 %v3217_v0, %v3200_v33  ;;  %v3222_v63 = vadd.f32 %v3219_v16, %v3197_v19 }
0x1f73   : > { %v3227_v3 = vmul.f32 0.7978846, %v3224_v20 }
0x1f74   : > { %v3223_v35 = vadd.f32 %v3220_v2, %v3200_v33  ;;  %v3225_v53 = vmul.f32 0.7978846, %v3222_v63  ;;  %v4956_v2 = vld [vmem:[%s7228_s1 + $0x2] ss:$0 sm:$0xff] }
0x1f75   : > { %5841 = vtanh.f32 %v3227_v3 }
0x1f76   : > { %v3226_v36 = vmul.f32 0.7978846, %v3223_v35  ;;  %5843 = vtanh.f32 %v3225_v53 }
0x1f78   : > { %5845 = vtanh.f32 %v3226_v36 }
0x1f7f   : > { %v5842_v55 = vpop.eup %5841 }
0x1f80   : > { %v5844_v38 = vpop.eup %5843  ;;  %v3233_v34 = vadd.f32 1.0, %v5842_v55  ;;  %v4957_v55 = vld [vmem:[%s7230_s9 + $0x2] ss:$0 sm:$0xff] }
0x1f81   : > { %v3231_v40 = vadd.f32 1.0, %v5844_v38 }
0x1f82   : > { %v5846_v41 = vpop.eup %5845  ;;  %v3236_v51 = vmul.f32 %v3233_v34, %v3212_v43 }
0x1f83   : > { %v3232_v47 = vadd.f32 1.0, %v5846_v41  ;;  %v3234_v57 = vmul.f32 %v3231_v40, %v3210_v44 }
0x1f84   : > { %v3238_v52 = vpack.c.bf16 %v3236_v51, %v3236_v51  ;;  %v4963_v51 = vld [vmem:[%s7136_s11 + $0x2] ss:$0 sm:$0xff] }
0x1f85   : > { %v3235_v58 = vmul.f32 %v3232_v47, %v3211_v45 }
0x1f87   : > { %v3237_v59 = vpack.c.bf16 %v3235_v58, %v3234_v57 }
0x1f89   : > { %5420 = vmatprep.mubr.bf16.mxu0 %v3237_v59 }
0x1f8a   : > { %5421 = vmatmul.mubr.bf16.vlgmr.msra.gmra.mrb[56].mxu0 %v3238_v52 }
0x205d   : > { %v5422_v42 = vpop.f32.mrb[56].mxu0 }
0x205e   : > { %v3346_v54 = vpop.f32.mrb[57].mxu0  ;;  %v3355_v61 = vadd.f32 %v5422_v42, %v4945_v60 }
0x205f   : > { %v3347_v56 = vadd.f32 %v4945_v60, %v3346_v54  ;;  %v5423_v62 = vpop.f32.mrb[58].mxu0 }
0x2060   : > { %v3349_v25 = vpop.f32.mrb[59].mxu0  ;;  %v6774_v4 = vadd.f32 %v3355_v61, %v6709_v21 }
0x2061   : > { %v6771_v27 = vadd.f32 %v3347_v56, %v6706_v18  ;;  %v3350_v1 = vadd.f32 %v4945_v60, %v3349_v25 }
0x2062   : > { %v3373_v8 = vsel %vm833_vm0, %v6774_v4, 0.0 }
0x2063   : > { %v6777_v5 = vadd.f32 %v3350_v1, %v6712_v22  ;;  %v3367_v6 = vsel %vm833_vm0, %v6771_v27, 0.0 }
0x2064   : > { %3368 = vadd.xlane.f32.xlu0 %v3367_v6 }
0x2065   : > { %v3370_v7 = vsel %vm833_vm0, %v6777_v5, 0.0 }
0x2066   : > { %3371 = vadd.xlane.f32.xlu1 %v3370_v7 }
0x2068   : > { %3374 = vadd.xlane.f32.xlu0 %v3373_v8 }
0x20f1   : > { %v3369_v18 = vpop.xlane.xlu0 %3368 }
0x20f2   : > { %v3376_v28 = vmul.f32 0.03125, %v3369_v18 }
0x20f3   : > { %v3372_v9 = vpop.xlane.xlu1 %3371 }
0x20f4   : > { %v3379_v21 = vsub.f32 %v6771_v27, %v3376_v28  ;;  %v3377_v24 = vmul.f32 0.03125, %v3372_v9 }
0x20f5   : > { %v3375_v22 = vpop.xlane.xlu0 %3374 }
0x20f6   : > { %v3380_v10 = vsub.f32 %v6777_v5, %v3377_v24  ;;  %v3378_v46 = vmul.f32 0.03125, %v3375_v22  ;;  %v3382_v11 = vmul.f32 %v3379_v21, %v3379_v21 }
0x20f8   : > { %v3381_v12 = vsub.f32 %v6774_v4, %v3378_v46  ;;  %v3385_v13 = vsel %vm833_vm0, %v3382_v11, 0.0  ;;  %v3383_v14 = vmul.f32 %v3380_v10, %v3380_v10 }
0x20f9   : > { %3386 = vadd.xlane.f32.xlu1 %v3385_v13 }
0x20fa   : > { %v3388_v15 = vsel %vm833_vm0, %v3383_v14, 0.0  ;;  %v3384_v17 = vmul.f32 %v3381_v12, %v3381_v12 }
0x20fb   : > { %3389 = vadd.xlane.f32.xlu0 %v3388_v15 }
0x20fc   : > { %v3391_v19 = vsel %vm833_vm0, %v3384_v17, 0.0 }
0x20fd   : > { %3392 = vadd.xlane.f32.xlu1 %v3391_v19 }
0x2186   : > { %v3387_v32 = vpop.xlane.xlu1 %3386 }
0x2187   : > { %v3394_v23 = vmul.f32 0.03125, %v3387_v32 }
0x2188   : > { %v3390_v33 = vpop.xlane.xlu0 %3389 }
0x2189   : > { %v3397_v50 = vadd.f32 1e-05, %v3394_v23  ;;  %v3395_v29 = vmul.f32 0.03125, %v3390_v33 }
0x218a   : > { %v3393_v37 = vpop.xlane.xlu1 %3392 }
0x218b   : > { %5847 = vrsqrt.f32 %v3397_v50  ;;  %v3398_v30 = vadd.f32 1e-05, %v3395_v29  ;;  %v3396_v16 = vmul.f32 0.03125, %v3393_v37 }
0x218d   : > { %5849 = vrsqrt.f32 %v3398_v30  ;;  %v3399_v0 = vadd.f32 1e-05, %v3396_v16 }
0x218f   : > { %5851 = vrsqrt.f32 %v3399_v0 }
0x2195   : > { %v5848_v20 = vpop.eup %5847 }
0x2196   : > { %v3403_v63 = vmul.f32 %v5848_v20, %v3379_v21 }
0x2197   : > { %v5850_v3 = vpop.eup %5849 }
0x2198   : > { %v3404_v35 = vmul.f32 %v5850_v3, %v3380_v10  ;;  %v3412_v53 = vmul.f32 %v4956_v2, %v3403_v63 }
0x2199   : > { %v5852_v36 = vpop.eup %5851 }
0x219a   : > { %v3405_v38 = vmul.f32 %v5852_v36, %v3381_v12  ;;  %v3413_v34 = vmul.f32 %v4956_v2, %v3404_v35  ;;  %v3421_v40 = vadd.f32 %v4957_v55, %v3412_v53 }
0x219c   : > { %v3422_v41 = vadd.f32 %v4957_v55, %v3413_v34  ;;  %v3414_v43 = vmul.f32 %v4956_v2, %v3405_v38 }
0x219e   : > { %v3424_v44 = vpack.c.bf16 %v3422_v41, %v3421_v40  ;;  %v3423_v45 = vadd.f32 %v4957_v55, %v3414_v43 }
0x21a0   : > { %5428 = vmatprep.mubr.msk.bf16.mxu1 %vm833_vm0, %v3424_v44  ;;  %v3425_v47 = vpack.c.bf16 %v3423_v45, %v3423_v45 }
0x21a2   : > { %5429 = vmatmul.mubr.msk.bf16.vlgmr.msra.gmra.mrb[36].mxu1 %vm833_vm0, %v3425_v47 }
0x2275   : > { %v5430_v57 = vpop.f32.mrb[36].mxu1 }
0x2276   : > { %v3500_v58 = vadd.f32 %v5430_v57, %v4963_v51  ;;  %v3491_v59 = vpop.f32.mrb[37].mxu1 }
0x2277   : > { %v5431_v52 = vpop.f32.mrb[38].mxu1  ;;  %v3492_v54 = vadd.f32 %v4963_v51, %v3491_v59 }
0x2278   : > { %v6808_v60 = vpack.c.bf16 %v3500_v58, %v3500_v58  ;;  %v3494_v42 = vpop.f32.mrb[39].mxu1 }
0x2279   : > { %v3495_v61 = vadd.f32 %v4963_v51, %v3494_v42 }
0x227a   : > { %3511 = vrot.lane.b32.xlu1 %v6808_v60, %s7240_s21 }
0x227b   : > { %v6812_v56 = vpack.c.bf16 %v3495_v61, %v3492_v54 }
0x227d   : > { %3509 = vrot.lane.b32.xlu0 %v6812_v56, %s7240_s21  ;;  %5436 = vmatprep.mubr.msk.bf16.mxu1 %vm1065_vm1, %v6812_v56  ;;  %s7247_s21 = sld [smem:[#allocation26_spill]] }
0x227e   : > { %3674 = vrot.lane.b32.xlu1 %v6812_v56, %s7241_s7 }
0x2281   : > { %3670 = vrot.lane.b32.xlu0 %v6812_v56, %s7242_s24 }
0x2282   : > { %3676 = vrot.lane.b32.xlu1 %v6808_v60, %s7241_s7 }
0x2286   : > { %3672 = vrot.lane.b32.xlu1 %v6808_v60, %s7242_s24  ;;  %s7248_s24 = sld [smem:[#allocation14_spill]] }
0x22ec   : > { %v3512_v62 = vpop.permute.xlu1 %3511 }
0x22ed   : > { %v3523_v28 = vsel %vm1065_vm1, %v3512_v62, 0 }
0x22ef   : > { %v3510_v25 = vpop.permute.xlu0 %3509 }
0x22f0   : > { %v3520_v1 = vsel %vm1065_vm1, %v3510_v25, 0  ;;  %v3675_v6 = vpop.permute.xlu1 %3674  ;;  %5556 = vmatprep.subr.msk.bf16.mxu1 %vm1065_vm1, %v3510_v25 }
0x22f1   : > { %v3685_v7 = vsel %vm1065_vm1, %v3675_v6, 0  ;;  %5433 = vmatpush3.bf16.xpose.msra.mxu1 %v3520_v1  ;;  %5559 = vmatprep.subr.msk.bf16.mxu0 %vm1065_vm1, %v3675_v6 }
0x22f2   : > { %5557 = vmatprep.subr.msk.bf16.mxu1 %vm1065_vm1, %v3512_v62  ;;  %5449 = vmatpush3.bf16.xpose.msra.mxu0 %v3685_v7 }
0x22f3   : > { %v3671_v8 = vpop.permute.xlu0 %3670 }
0x22f4   : > { %v3677_v18 = vpop.permute.xlu1 %3676  ;;  %5452 = vmatprep.mubr.msk.bf16.mxu0 %vm1065_vm1, %v3671_v8 }
0x22f5   : > { %5560 = vmatprep.subr.msk.bf16.mxu0 %vm1065_vm1, %v3677_v18  ;;  %v3688_v9 = vsel %vm1065_vm1, %v3677_v18, 0 }
0x22f8   : > { %v3673_v21 = vpop.permute.xlu1 %3672 }
0x22f9   : > { %5435 = vmatpush3.bf16.xpose.msra.mxu1 %v3523_v28 }
0x22fa   : > { %5451 = vmatpush3.bf16.xpose.msra.mxu0 %v3688_v9 }
0x2300   : > { %5437 = vmatmul.mubr.msk.bf16.vlgmr.msra.gmra.mrb[40].mxu1 %vm1065_vm1, %v6808_v60 }
0x2301   : > { %5453 = vmatmul.mubr.msk.bf16.vlgmr.msra.gmra.mrb[60].mxu0 %vm1065_vm1, %v3673_v21 }
0x23d3   : > { %v5438_v24 = vpop.f32.mrb[40].mxu1 }
0x23d4   : > { %v3559_v22 = vpop.f32.mrb[41].mxu1  ;;  %v5454_v10 = vpop.f32.mrb[60].mxu0  ;;  %v3579_v19 = vsel %vm1126_vm2, %v5438_v24, -inf }
0x23d5   : > { %v5439_v46 = vpop.f32.mrb[42].mxu1  ;;  %v3724_v11 = vpop.f32.mrb[61].mxu0  ;;  %v3573_v12 = vsel %vm1126_vm2, %v3559_v22, -inf  ;;  %v3744_v26 = vsel %vm1126_vm2, %v5454_v10, -inf }
0x23d6   : > { %v5455_v13 = vpop.f32.mrb[62].mxu0  ;;  %3574 = vmax.xlane.f32.xlu0 %v3573_v12  ;;  %v3562_v14 = vpop.f32.mrb[43].mxu1  ;;  %v3738_v31 = vsel %vm1126_vm2, %v3724_v11, -inf }
0x23d7   : > { %v3727_v15 = vpop.f32.mrb[63].mxu0  ;;  %v3576_v17 = vsel %vm1126_vm2, %v3562_v14, -inf }
0x23d8   : > { %3577 = vmax.xlane.f32.xlu1 %v3576_v17  ;;  %v3741_v32 = vsel %vm1126_vm2, %v3727_v15, -inf }
0x23da   : > { %3580 = vmax.xlane.f32.xlu0 %v3579_v19 }
0x23dc   : > { %3745 = vmax.xlane.f32.xlu1 %v3744_v26 }
0x23de   : > { %3739 = vmax.xlane.f32.xlu0 %v3738_v31 }
0x23e2   : > { %3742 = vmax.xlane.f32.xlu0 %v3741_v32 }
0x2463   : > { %v3575_v23 = vpop.xlane.xlu0 %3574 }
0x2464   : > { %v3582_v33 = vsub.f32 %v3559_v22, %v3575_v23 }
0x2465   : > { %v3578_v50 = vpop.xlane.xlu1 %3577 }
0x2466   : > { %v3583_v29 = vsub.f32 %v3562_v14, %v3578_v50  ;;  %v3585_v16 = vmul.f32 1.442695, %v3582_v33 }
0x2467   : > { %v3581_v37 = vpop.xlane.xlu0 %3580 }
0x2468   : > { %v3584_v30 = vsub.f32 %v5438_v24, %v3581_v37  ;;  %v3587_v47 = vmul.f32 1.442695, %v3583_v29 }
0x2469   : > { %v3746_v0 = vpop.xlane.xlu1 %3745 }
0x246a   : > { %v3589_v20 = vmul.f32 1.442695, %v3584_v30  ;;  %v3749_v2 = vsub.f32 %v5454_v10, %v3746_v0 }
0x246b   : > { %v3740_v34 = vpop.xlane.xlu0 %3739 }
0x246c   : > { %5853 = vpow2.f32 %v3589_v20  ;;  %v3754_v63 = vmul.f32 1.442695, %v3749_v2  ;;  %v3747_v43 = vsub.f32 %v3724_v11, %v3740_v34 }
0x246d   : > { %5855 = vpow2.f32 %v3585_v16 }
0x246e   : > { %5857 = vpow2.f32 %v3754_v63  ;;  %v3750_v45 = vmul.f32 1.442695, %v3747_v43 }
0x246f   : > { %v3743_v40 = vpop.xlane.xlu0 %3742 }
0x2470   : > { %v3748_v41 = vsub.f32 %v3727_v15, %v3743_v40 }
0x2472   : > { %v3752_v44 = vmul.f32 1.442695, %v3748_v41 }
0x2474   : > { %5859 = vpow2.f32 %v3752_v44 }
0x2475   : > { %5861 = vpow2.f32 %v3750_v45 }
0x2476   : > { %v5854_v3 = vpop.eup %5853  ;;  %5863 = vpow2.f32 %v3587_v47 }
0x2477   : > { %v5856_v35 = vpop.eup %5855  ;;  %v3597_v53 = vsel %vm1126_vm2, %v5854_v3, 0.0 }
0x2478   : > { %v6845_v36 = vpop.eup %5857  ;;  %3598 = vadd.xlane.f32.xlu0 %v3597_v53  ;;  %v3591_v38 = vsel %vm1126_vm2, %v5856_v35, 0.0 }
0x2479   : > { %v3762_v55 = vsel %vm1126_vm2, %v6845_v36, 0.0 }
0x247a   : > { %3763 = vadd.xlane.f32.xlu1 %v3762_v55 }
0x247c   : > { %3592 = vadd.xlane.f32.xlu0 %v3591_v38 }
0x247e   : > { %v5860_v51 = vpop.eup %5859 }
0x247f   : > { %v5862_v57 = vpop.eup %5861  ;;  %v3759_v58 = vsel %vm1126_vm2, %v5860_v51, 0.0 }
0x2480   : > { %v3756_v59 = vsel %vm1126_vm2, %v5862_v57, 0.0  ;;  %v5864_v52 = vpop.eup %5863 }
0x2481   : > { %v3594_v42 = vsel %vm1126_vm2, %v5864_v52, 0.0 }
0x248b   : > { %3610 = vrot.lane.b32.xlu1 %v6808_v60, %s7243_s25 }
0x248f   : > { %3773 = vrot.lane.b32.xlu1 %v6812_v56, %s7244_s0 }
0x2492   : > { %3608 = vrot.lane.b32.xlu0 %v6812_v56, %s7243_s25 }
0x24b1   : > { %3760 = vadd.xlane.f32.xlu0 %v3759_v58 }
0x24b3   : > { %3757 = vadd.xlane.f32.xlu1 %v3756_v59 }
0x24b7   : > { %3595 = vadd.xlane.f32.xlu1 %v3594_v42 }
0x24c7   : > { %3839 = vrot.lane.b32.xlu0 %v6812_v56, %s7231_s30 }
0x24c8   : > { %3775 = vrot.lane.b32.xlu1 %v6808_v60, %s7244_s0 }
0x24cb   : > { %3835 = vrot.lane.b32.xlu0 %v6812_v56, %s7232_s4 }
0x24cc   : > { %3841 = vrot.lane.b32.xlu1 %v6808_v60, %s7231_s30 }
0x24d0   : > { %3837 = vrot.lane.b32.xlu1 %v6808_v60, %s7232_s4  ;;  %s7249_s4 = sld [smem:[#allocation27_spill]] }
0x2505   : > { %v3599_v54 = vpop.xlane.xlu0 %3598 }
0x2506   : > { %5865 = vrcp.f32 %v3599_v54 }
0x2507   : > { %v3764_v61 = vpop.xlane.xlu1 %3763 }
0x2509   : > { %v3593_v62 = vpop.xlane.xlu0 %3592 }
0x250a   : > { %5867 = vrcp.f32 %v3593_v62 }
0x250b   : > { %v3611_v25 = vpop.permute.xlu1 %3610 }
0x250c   : > { %v3620_v6 = vsel %vm1173_vm3, %v3611_v25, 0 }
0x250d   : > { %v3609_v1 = vpop.permute.xlu0 %3608 }
0x250e   : > { %5440 = vmatprep.subr.bf16.mxu1 %v3609_v1 }
0x250f   : > { %5441 = vmatpush3.bf16.msra.mxu1 %v3609_v1  ;;  %v3774_v7 = vpop.permute.xlu1 %3773 }
0x2510   : > { %5558 = vmatprep.subr.msk.bf16.mxu1 %vm1173_vm3, %v3611_v25  ;;  %v5866_v9 = vpop.eup %5865 }
0x2511   : > { %v3605_v46 = vmul.f32 %v5866_v9, %v5854_v3 }
0x2513   : > { %5443 = vmatpush3.bf16.msra.mxu1 %v3620_v6  ;;  %v3607_v17 = vpack.c.bf16 %v3605_v46, %v3605_v46 }
0x2514   : > { %5456 = vmatprep.subr.bf16.mxu1 %v3774_v7  ;;  %v5868_v21 = vpop.eup %5867 }
0x2515   : > { %v3603_v11 = vmul.f32 %v5868_v21, %v5856_v35 }
0x253e   : > { %v3761_v18 = vpop.xlane.xlu0 %3760 }
0x2540   : > { %v3758_v8 = vpop.xlane.xlu1 %3757 }
0x2541   : > { %5869 = vrcp.f32 %v3758_v8 }
0x2542   : > { %5871 = vrcp.f32 %v3761_v18  ;;  %v3840_v23 = vpop.permute.xlu0 %3839 }
0x2543   : > { %v3850_v37 = vsel %vm1065_vm1, %v3840_v23, 0 }
0x2544   : > { %v3596_v28 = vpop.xlane.xlu1 %3595 }
0x2545   : > { %5873 = vrcp.f32 %v3596_v28 }
0x2546   : > { %5875 = vrcp.f32 %v3764_v61  ;;  %v3836_v29 = vpop.permute.xlu0 %3835 }
0x2548   : > { %v3776_v31 = vpop.permute.xlu1 %3775 }
0x2549   : > { %v3785_v33 = vsel %vm1173_vm3, %v3776_v31, 0 }
0x254b   : > { %v5870_v24 = vpop.eup %5869 }
0x254c   : > { %v5872_v22 = vpop.eup %5871  ;;  %v3768_v13 = vmul.f32 %v5870_v24, %v5862_v57  ;;  %v3842_v30 = vpop.permute.xlu1 %3841 }
0x254d   : > { %v3769_v15 = vmul.f32 %v5872_v22, %v5860_v51  ;;  %v3853_v16 = vsel %vm1065_vm1, %v3842_v30, 0 }
0x254f   : > { %v5874_v10 = vpop.eup %5873  ;;  %v3771_v26 = vpack.c.bf16 %v3769_v15, %v3768_v13 }
0x2550   : > { %v3604_v12 = vmul.f32 %v5874_v10, %v5864_v52  ;;  %v5876_v19 = vpop.eup %5875  ;;  %v3838_v0 = vpop.permute.xlu1 %3837 }
0x2551   : > { %v3770_v32 = vmul.f32 %v5876_v19, %v6845_v36 }
0x2552   : > { %v3606_v14 = vpack.c.bf16 %v3604_v12, %v3603_v11 }
0x2553   : > { %v3772_v50 = vpack.c.bf16 %v3770_v32, %v3770_v32 }
0x2554   : > { %5444 = vmatprep.mubr.msk.bf16.mxu1 %vm1126_vm2, %v3606_v14 }
0x2555   : > { %5445 = vmatmul.mubr.msk.bf16.vlgmr.msra.gmra.mrb[44].mxu1 %vm1126_vm2, %v3607_v17 }
0x2556   : > { %5457 = vmatpush3.bf16.msra.mxu1 %v3774_v7  ;;  %5460 = vmatprep.mubr.msk.bf16.mxu1 %vm1126_vm2, %v3771_v26 }
0x2557   : > { %5561 = vmatprep.subr.msk.bf16.mxu1 %vm1173_vm3, %v3776_v31 }
0x255a   : > { %5459 = vmatpush3.bf16.msra.mxu1 %v3785_v33 }
0x255b   : > { %5562 = vmatprep.subr.msk.bf16.mxu1 %vm1065_vm1, %v3840_v23 }
0x255d   : > { %5461 = vmatmul.mubr.msk.bf16.vlgmr.msra.gmra.mrb[48].mxu1 %vm1126_vm2, %v3772_v50 }
0x255e   : > { %5468 = vmatprep.mubr.msk.bf16.mxu1 %vm1065_vm1, %v3836_v29 }
0x2563   : > { %5465 = vmatpush3.bf16.xpose.msra.mxu1 %v3850_v37 }
0x2564   : > { %5563 = vmatprep.subr.msk.bf16.mxu1 %vm1065_vm1, %v3842_v30 }
0x256b   : > { %5467 = vmatpush3.bf16.xpose.msra.mxu1 %v3853_v16 }
0x2572   : > { %5469 = vmatmul.mubr.msk.bf16.vlgmr.msra.gmra.mrb[52].mxu1 %vm1065_vm1, %v3838_v0 }
0x2628   : > { %v6884_v20 = vpop.f32.mrb[44].mxu1 }
0x2629   : > { %v6886_v2 = vpop.f32.mrb[45].mxu1 }
0x262a   : > { %v5447_v63 = vpop.f32.mrb[46].mxu1 }
0x262b   : > { %v6888_v3 = vpop.f32.mrb[47].mxu1 }
0x2630   : > { %v6890_v35 = vpop.f32.mrb[48].mxu1 }
0x2631   : > { %v6892_v53 = vpop.f32.mrb[49].mxu1 }
0x2632   : > { %v5463_v36 = vpop.f32.mrb[50].mxu1 }
0x2633   : > { %v6894_v55 = vpop.f32.mrb[51].mxu1 }
0x2634   : > { %v5652_v38 = vpack.i.bf16 %v6894_v55, %v6892_v53 }
0x2645   : > { %v5470_v34 = vpop.f32.mrb[52].mxu1 }
0x2646   : > { %v3889_v40 = vpop.f32.mrb[53].mxu1  ;;  %v3909_v47 = vsel %vm1126_vm2, %v5470_v34, -inf }
0x2647   : > { %v5471_v41 = vpop.f32.mrb[54].mxu1  ;;  %v3903_v43 = vsel %vm1126_vm2, %v3889_v40, -inf }
0x2648   : > { %3904 = vmax.xlane.f32.xlu0 %v3903_v43  ;;  %v3892_v44 = vpop.f32.mrb[55].mxu1 }
0x2649   : > { %v3906_v45 = vsel %vm1126_vm2, %v3892_v44, -inf }
0x264a   : > { %3907 = vmax.xlane.f32.xlu1 %v3906_v45 }
0x264c   : > { %3910 = vmax.xlane.f32.xlu0 %v3909_v47 }
0x26d5   : > { %v3905_v51 = vpop.xlane.xlu0 %3904 }
0x26d6   : > { %v3912_v57 = vsub.f32 %v3889_v40, %v3905_v51 }
0x26d7   : > { %v3908_v58 = vpop.xlane.xlu1 %3907 }
0x26d8   : > { %v3915_v59 = vmul.f32 1.442695, %v3912_v57  ;;  %v3913_v52 = vsub.f32 %v3892_v44, %v3908_v58 }
0x26d9   : > { %v3911_v42 = vpop.xlane.xlu0 %3910 }
0x26da   : > { %5877 = vpow2.f32 %v3915_v59  ;;  %v3917_v54 = vmul.f32 1.442695, %v3913_v52  ;;  %v3914_v61 = vsub.f32 %v5470_v34, %v3911_v42 }
0x26dc   : > { %5879 = vpow2.f32 %v3917_v54  ;;  %v3919_v62 = vmul.f32 1.442695, %v3914_v61 }
0x26de   : > { %5881 = vpow2.f32 %v3919_v62 }
0x26e4   : > { %v5878_v25 = vpop.eup %5877 }
0x26e5   : > { %v3921_v1 = vsel %vm1126_vm2, %v5878_v25, 0.0 }
0x26e6   : > { %v5880_v6 = vpop.eup %5879  ;;  %3922 = vadd.xlane.f32.xlu0 %v3921_v1 }
0x26e7   : > { %v3924_v18 = vsel %vm1126_vm2, %v5880_v6, 0.0 }
0x26e8   : > { %v5882_v7 = vpop.eup %5881 }
0x26e9   : > { %v3927_v8 = vsel %vm1126_vm2, %v5882_v7, 0.0 }
0x26ea   : > { %3928 = vadd.xlane.f32.xlu1 %v3927_v8  ;;  %3925 = vadd.xlane.f32.xlu0 %v3924_v18 }
0x26fb   : > { %3940 = vrot.lane.b32.xlu1 %v6808_v60, %s7233_s26 }
0x26ff   : > { %4004 = vrot.lane.b32.xlu1 %v6812_v56, %s7234_s5 }
0x2700   : > { %3938 = vrot.lane.b32.xlu0 %v6812_v56, %s7233_s26 }
0x2703   : > { %4006 = vrot.lane.b32.xlu1 %v6808_v60, %s7234_s5 }
0x2704   : > { %4000 = vrot.lane.b32.xlu0 %v6812_v56, %s7235_s8 }
0x2707   : > { %4002 = vrot.lane.b32.xlu1 %v6808_v60, %s7235_s8  ;;  %s797_s8 = sand.u32 1, %s5973_s2  }
0x2708   : > { %s4818_s7 = sshll.u32 %s797_s8, 4 }
0x2709   : > { %s799_s26 = scalar_lea.vmem [#allocation3], %s4818_s7  ;;  %s7252_s7 = sld [smem:[#allocation29_spill]] }
0x270f   : > { %s827_s0 = scalar_lea.vmem %s7252_s7, %s7248_s24 }
0x2773   : > { %v3923_v28 = vpop.xlane.xlu0 %3922 }
0x2774   : > { %5883 = vrcp.f32 %v3923_v28 }
0x2777   : > { %v3926_v9 = vpop.xlane.xlu0 %3925  ;;  %v3929_v21 = vpop.xlane.xlu1 %3928 }
0x2778   : > { %5885 = vrcp.f32 %v3926_v9 }
0x2779   : > { %5887 = vrcp.f32 %v3929_v21 }
0x277b   : > { %v3939_v24 = vpop.permute.xlu0 %3938  ;;  %v3941_v22 = vpop.permute.xlu1 %3940 }
0x277c   : > { %5472 = vmatprep.subr.bf16.mxu0 %v3939_v24  ;;  %v3950_v46 = vsel %vm1173_vm3, %v3941_v22, 0 }
0x277d   : > { %5473 = vmatpush3.bf16.msra.mxu0 %v3939_v24 }
0x277e   : > { %5564 = vmatprep.subr.msk.bf16.mxu0 %vm1173_vm3, %v3941_v22  ;;  %v5884_v10 = vpop.eup %5883 }
0x277f   : > { %v4005_v11 = vpop.permute.xlu1 %4004  ;;  %v3933_v14 = vmul.f32 %v5884_v10, %v5878_v25  ;;  %v4001_v31 = vpop.permute.xlu0 %4000 }
0x2780   : > { %v4015_v32 = vsel %vm1065_vm1, %v4005_v11, 0 }
0x2781   : > { %5475 = vmatpush3.bf16.msra.mxu0 %v3950_v46  ;;  %v5697_v46 = vld [vmem:[%s7137_s12 + $0x20] sm:$0xff]  }
0x2782   : > { %v5886_v12 = vpop.eup %5885  ;;  %5565 = vmatprep.subr.msk.bf16.mxu0 %vm1065_vm1, %v4005_v11  ;;  %v5698_v11 = vld [vmem:[%s7137_s12 + $0x28] sm:$0xff]  }
0x2783   : > { %v5888_v13 = vpop.eup %5887  ;;  %v3934_v15 = vmul.f32 %v5886_v12, %v5880_v6  ;;  %v4007_v23 = vpop.permute.xlu1 %4006 }
0x2784   : > { %v3935_v17 = vmul.f32 %v5888_v13, %v5882_v7  ;;  %v4018_v33 = vsel %vm1065_vm1, %v4007_v23, 0 }
0x2785   : > { %v3936_v19 = vpack.c.bf16 %v3934_v15, %v3933_v14 }
0x2786   : > { %v3937_v26 = vpack.c.bf16 %v3935_v17, %v3935_v17 }
0x2787   : > { %5476 = vmatprep.mubr.msk.bf16.mxu0 %vm1126_vm2, %v3936_v19  ;;  %v4003_v50 = vpop.permute.xlu1 %4002 }
0x2788   : > { %5477 = vmatmul.mubr.msk.bf16.vlgmr.msra.gmra.mrb[64].mxu0 %vm1126_vm2, %v3937_v26 }
0x2789   : > { %5484 = vmatprep.mubr.msk.bf16.mxu0 %vm1065_vm1, %v4001_v31 }
0x278a   : > { %5481 = vmatpush3.bf16.xpose.msra.mxu0 %v4015_v32 }
0x278b   : > { %5566 = vmatprep.subr.msk.bf16.mxu0 %vm1065_vm1, %v4007_v23 }
0x2792   : > { %5483 = vmatpush3.bf16.xpose.msra.mxu0 %v4018_v33 }
0x2799   : > { %5485 = vmatmul.mubr.msk.bf16.vlgmr.msra.gmra.mrb[68].mxu0 %vm1065_vm1, %v4003_v50 }
0x285b   : > { %v5478_v29 = vpop.f32.mrb[64].mxu0 }
0x285c   : > { %v3986_v37 = vpop.f32.mrb[65].mxu0 }
0x285d   : > { %v5479_v30 = vpop.f32.mrb[66].mxu0 }
0x285e   : > { %v3989_v16 = vpop.f32.mrb[67].mxu0 }
0x285f   : > { %v5657_v0 = vpack.i.bf16 %v3989_v16, %v3986_v37 }
0x286c   : > { %v5486_v63 = vpop.f32.mrb[68].mxu0 }
0x286d   : > { %v4054_v36 = vpop.f32.mrb[69].mxu0  ;;  %v4074_v44 = vsel %vm1126_vm2, %v5486_v63, -inf }
0x286e   : > { %v5487_v34 = vpop.f32.mrb[70].mxu0  ;;  %v4068_v40 = vsel %vm1126_vm2, %v4054_v36, -inf }
0x286f   : > { %4069 = vmax.xlane.f32.xlu0 %v4068_v40  ;;  %v4057_v41 = vpop.f32.mrb[71].mxu0 }
0x2870   : > { %v4071_v43 = vsel %vm1126_vm2, %v4057_v41, -inf }
0x2871   : > { %4072 = vmax.xlane.f32.xlu1 %v4071_v43 }
0x2873   : > { %4075 = vmax.xlane.f32.xlu0 %v4074_v44 }
0x28fc   : > { %v4070_v45 = vpop.xlane.xlu0 %4069 }
0x28fd   : > { %v4077_v47 = vsub.f32 %v4054_v36, %v4070_v45 }
0x28fe   : > { %v4073_v51 = vpop.xlane.xlu1 %4072 }
0x28ff   : > { %v4080_v57 = vmul.f32 1.442695, %v4077_v47  ;;  %v4078_v58 = vsub.f32 %v4057_v41, %v4073_v51 }
0x2900   : > { %v4076_v59 = vpop.xlane.xlu0 %4075 }
0x2901   : > { %5889 = vpow2.f32 %v4080_v57  ;;  %v4082_v52 = vmul.f32 1.442695, %v4078_v58  ;;  %v4079_v42 = vsub.f32 %v5486_v63, %v4076_v59 }
0x2903   : > { %5891 = vpow2.f32 %v4082_v52  ;;  %v4084_v54 = vmul.f32 1.442695, %v4079_v42 }
0x2905   : > { %5893 = vpow2.f32 %v4084_v54 }
0x290b   : > { %v5890_v61 = vpop.eup %5889 }
0x290c   : > { %v4086_v62 = vsel %vm1126_vm2, %v5890_v61, 0.0 }
0x290d   : > { %v5892_v25 = vpop.eup %5891  ;;  %4087 = vadd.xlane.f32.xlu0 %v4086_v62 }
0x290e   : > { %v4089_v7 = vsel %vm1126_vm2, %v5892_v25, 0.0 }
0x290f   : > { %v5894_v1 = vpop.eup %5893 }
0x2910   : > { %v4092_v6 = vsel %vm1126_vm2, %v5894_v1, 0.0 }
0x2911   : > { %4093 = vadd.xlane.f32.xlu1 %v4092_v6  ;;  %4090 = vadd.xlane.f32.xlu0 %v4089_v7 }
0x2922   : > { %4105 = vrot.lane.b32.xlu1 %v6808_v60, %s7236_s29 }
0x2926   : > { %5653 = vrot.lane.b32.xlu1 %v5652_v38, %s7237_s3 }
0x2927   : > { %4103 = vrot.lane.b32.xlu0 %v6812_v56, %s7236_s29  ;;  %s4689_s29 = sshll.u32 %s799_s26, 4  ;;  %s7069_s29 = int_to_ptr.vmem [resolvable:$true] %s4689_s29 }
0x2928   : > { %s5919_s30 = scalar_lea.vmem %s7069_s29, 256 }
0x2929   : > { %p5920_p11 = scmp.ne.s32.totalorder %s7069_s29, %s5919_s30 }
0x292a   : > { %4172 = vrot.lane.b32.xlu1 %v6890_v35, %s7237_s3 }
0x292b   : > { %5658 = vrot.lane.b32.xlu0 %v5657_v0, %s7238_s6  ;;  %p5921_p12 = pnand %p5920_p11, %p6167_p5 }
0x292d   : > { %p5922_p13 = pneg %p5921_p12 }
0x292e   : > { %4184 = vrot.lane.b32.xlu1 %v5478_v29, %s7238_s6 }
0x299a   : > { %v4088_v8 = vpop.xlane.xlu0 %4087 }
0x299b   : > { %5895 = vrcp.f32 %v4088_v8 }
0x299e   : > { %v4091_v18 = vpop.xlane.xlu0 %4090  ;;  %v4094_v28 = vpop.xlane.xlu1 %4093 }
0x299f   : > { %5897 = vrcp.f32 %v4091_v18 }
0x29a0   : > { %5899 = vrcp.f32 %v4094_v28 }
0x29a2   : > { %v4104_v60 = vpop.permute.xlu0 %4103  ;;  %v4106_v53 = vpop.permute.xlu1 %4105 }
0x29a3   : > { %5488 = vmatprep.subr.bf16.mxu1 %v4104_v60  ;;  %v4115_v55 = vsel %vm1173_vm3, %v4106_v53, 0 }
0x29a4   : > { %5489 = vmatpush3.bf16.msra.mxu1 %v4104_v60 }
0x29a5   : > { %5567 = vmatprep.subr.msk.bf16.mxu1 %vm1173_vm3, %v4106_v53  ;;  %v5896_v56 = vpop.eup %5895 }
0x29a6   : > { %v4098_v9 = vmul.f32 %v5896_v56, %v5890_v61  ;;  %v5654_v19 = vpop.permute.xlu1 %5653  ;;  %v5659_v31 = vpop.permute.xlu0 %5658 }
0x29a7   : > { %v5656_v32 = vunpack.i.h.bf16 %v5654_v19  ;;  %v5655_v23 = vunpack.i.l.bf16 %v5654_v19  ;;  %v5661_v50 = vunpack.i.h.bf16 %v5659_v31  ;;  %v5660_v29 = vunpack.i.l.bf16 %v5659_v31 }
0x29a8   : > { %5491 = vmatpush3.bf16.msra.mxu1 %v4115_v55 }
0x29a9   : > { %v5898_v35 = vpop.eup %5897  ;;  %5496 = vmatprep.subr.bf16.mxu1 %v5697_v46  ;;  %v4202_v37 = vsel %vm1065_vm1, %v6888_v3, %v5656_v32  ;;  %v4201_v30 = vsel %vm1065_vm1, %v6886_v2, %v5655_v23  ;;  %v4996_v23 = vld [vmem:[%s7139_s14 + $0x2] ss:$0 sm:$0xff] }
0x29aa   : > { %v5900_v38 = vpop.eup %5899  ;;  %v4099_v21 = vmul.f32 %v5898_v35, %v5892_v25  ;;  %v4173_v26 = vpop.permute.xlu1 %4172  ;;  %v4204_v43 = vsel %vm1759_vm4, %v4201_v30, %v5660_v29  ;;  %v4205_v44 = vsel %vm1759_vm4, %v4202_v37, %v5661_v50 }
0x29ab   : > { %v4100_v24 = vmul.f32 %v5900_v38, %v5894_v1  ;;  %v4203_v0 = vsel %vm1065_vm1, %v6884_v20, %v4173_v26  ;;  %v4989_v20 = vld [vmem:[%s7138_s13 + $0x2] ss:$0 sm:$0xff] }
0x29ac   : > { %v4101_v22 = vpack.c.bf16 %v4099_v21, %v4098_v9 }
0x29ad   : > { %v4102_v10 = vpack.c.bf16 %v4100_v24, %v4100_v24 }
0x29ae   : > { %5492 = vmatprep.mubr.msk.bf16.mxu1 %vm1126_vm2, %v4101_v22  ;;  %v4185_v33 = vpop.permute.xlu1 %4184  ;;  %v5699_v22 = vld [vmem:[%s7141_s16 + $0x20] sm:$0xff]  }
0x29af   : > { %5493 = vmatmul.mubr.msk.bf16.vlgmr.msra.gmra.mrb[56].mxu1 %vm1126_vm2, %v4102_v10  ;;  %v4206_v36 = vsel %vm1759_vm4, %v4203_v0, %v4185_v33  ;;  %v5700_v10 = vld [vmem:[%s7141_s16 + $0x28] sm:$0xff]   ;;  %5504 = vmatprep.subr.bf16.mxu0 %v5699_v22 }
0x29b0   : > { %5497 = vmatpush3.bf16.msra.mxu1 %v5697_v46  ;;  %5505 = vmatpush3.bf16.msra.mxu0 %v5699_v22 }
0x29b1   : > { %5498 = vmatprep.subr.bf16.mxu1 %v5698_v11  ;;  %5506 = vmatprep.subr.bf16.mxu0 %v5700_v10 }
0x29b4   : > { %5499 = vmatpush3.bf16.msra.mxu1 %v5698_v11  ;;  %5507 = vmatpush3.bf16.msra.mxu0 %v5700_v10 }
0x2a82   : > { %v5494_v12 = vpop.f32.mrb[56].mxu1 }
0x2a83   : > { %4196 = vrot.lane.b32.xlu1 %v5494_v12, %s7239_s27  ;;  %v4151_v13 = vpop.f32.mrb[57].mxu1 }
0x2a84   : > { %v5495_v14 = vpop.f32.mrb[58].mxu1 }
0x2a85   : > { %v4154_v15 = vpop.f32.mrb[59].mxu1 }
0x2a86   : > { %v5662_v17 = vpack.i.bf16 %v4154_v15, %v4151_v13 }
0x2a88   : > { %5663 = vrot.lane.b32.xlu0 %v5662_v17, %s7239_s27  ;;  %s7245_s27 = sld [smem:[#allocation9_spill]] }
0x2a8e   : > { %s5045_s25 = sshll.u32 %s7245_s27, 8 }
0x2a8f   : > { %s7065_s23 = scalar_lea.hbm %s7251_s22, %s5045_s25  ;;  %s7077_s25 = scalar_lea.sflag [#allocation4], %s797_s8 }
0x2af5   : > { %v4197_v16 = vpop.permute.xlu1 %4196 }
0x2af6   : > { %v4209_v41 = vsel %vm1126_vm2, %v4206_v36, %v4197_v16  ;;  %v4997_v16 = vld [vmem:[%s7140_s15 + $0x2] ss:$0 sm:$0xff] }
0x2af7   : > { %v4211_v47 = vpack.c.bf16 %v4209_v41, %v4209_v41 }
0x2afa   : > { %v5664_v63 = vpop.permute.xlu0 %5663 }
0x2afb   : > { %v5666_v34 = vunpack.i.h.bf16 %v5664_v63  ;;  %v5665_v40 = vunpack.i.l.bf16 %v5664_v63 }
0x2afd   : > { %v4207_v3 = vsel %vm1126_vm2, %v4204_v43, %v5665_v40  ;;  %v4208_v45 = vsel %vm1126_vm2, %v4205_v44, %v5666_v34  ;;  %v5701_v44 = vld [vmem:[%s7143_s18 + $0x80] sm:$0xff]  }
0x2afe   : > { %v4210_v2 = vpack.c.bf16 %v4208_v45, %v4207_v3  ;;  %5512 = vmatprep.subr.bf16.mxu1 %v5701_v44  ;;  %v5702_v3 = vld [vmem:[%s7143_s18 + $0x88] sm:$0xff]   ;;  %v5703_v45 = vld [vmem:[%s7143_s18 + $0x90] sm:$0xff]  }
0x2b00   : > { %5500 = vmatprep.mubr.msk.bf16.mxu1 %vm833_vm0, %v4210_v2  ;;  %v5704_v2 = vld [vmem:[%s7143_s18 + $0x98] sm:$0xff]  }
0x2b01   : > { %5501 = vmatmul.mubr.msk.bf16.vlgmr.msra.gmra.mrb[60].mxu1 %vm833_vm0, %v4211_v47  ;;  %v5705_v47 = vld [vmem:[%s7143_s18 + $0xa0] sm:$0xff]  }
0x2b02   : > { %5513 = vmatpush3.bf16.msra.mxu1 %v5701_v44 }
0x2b03   : > { %5514 = vmatprep.subr.bf16.mxu1 %v5702_v3 }
0x2b06   : > { %5515 = vmatpush3.bf16.msra.mxu1 %v5702_v3 }
0x2b07   : > { %5516 = vmatprep.subr.bf16.mxu1 %v5703_v45 }
0x2b0a   : > { %5517 = vmatpush3.bf16.msra.mxu1 %v5703_v45 }
0x2b0b   : > { %5518 = vmatprep.subr.bf16.mxu1 %v5704_v2 }
0x2b0e   : > { %5519 = vmatpush3.bf16.msra.mxu1 %v5704_v2 }
0x2b0f   : > { %5520 = vmatprep.subr.bf16.mxu1 %v5705_v47 }
0x2b12   : > { %5521 = vmatpush3.bf16.msra.mxu1 %v5705_v47 }
0x2bd4   : > { %v5502_v51 = vpop.f32.mrb[60].mxu1 }
0x2bd5   : > { %v4277_v57 = vpop.f32.mrb[61].mxu1  ;;  %v4286_v58 = vadd.f32 %v5502_v51, %v4989_v20  ;;  %v5707_v51 = vld [vmem:[%s7143_s18 + $0xb0] sm:$0xff]  }
0x2bd6   : > { %v4278_v59 = vadd.f32 %v4989_v20, %v4277_v57  ;;  %v5503_v52 = vpop.f32.mrb[62].mxu1  ;;  %v5708_v57 = vld [vmem:[%s7143_s18 + $0xb8] sm:$0xff]  }
0x2bd7   : > { %v4280_v42 = vpop.f32.mrb[63].mxu1  ;;  %v6977_v62 = vadd.f32 %v4286_v58, %v6774_v4  ;;  %v5003_v58 = vld [vmem:[%s7142_s17 + $0x2] ss:$0 sm:$0xff] }
0x2bd8   : > { %v6974_v54 = vadd.f32 %v4278_v59, %v6771_v27  ;;  %v4281_v61 = vadd.f32 %v4989_v20, %v4280_v42  ;;  %v5706_v20 = vld [vmem:[%s7143_s18 + $0xa8] sm:$0xff]  }
0x2bd9   : > { %v4304_v7 = vsel %vm833_vm0, %v6977_v62, 0.0  ;;  %5522 = vmatprep.subr.bf16.mxu1 %v5706_v20 }
0x2bda   : > { %v6980_v25 = vadd.f32 %v4281_v61, %v6777_v5  ;;  %v4298_v1 = vsel %vm833_vm0, %v6974_v54, 0.0  ;;  %5523 = vmatpush3.bf16.msra.mxu1 %v5706_v20 }
0x2bdb   : > { %4299 = vadd.xlane.f32.xlu0 %v4298_v1  ;;  %5524 = vmatprep.subr.bf16.mxu1 %v5707_v51 }
0x2bdc   : > { %v4301_v6 = vsel %vm833_vm0, %v6980_v25, 0.0 }
0x2bdd   : > { %4302 = vadd.xlane.f32.xlu1 %v4301_v6 }
0x2bde   : > { %5525 = vmatpush3.bf16.msra.mxu1 %v5707_v51 }
0x2bdf   : > { %4305 = vadd.xlane.f32.xlu0 %v4304_v7  ;;  %5526 = vmatprep.subr.bf16.mxu1 %v5708_v57 }
0x2be2   : > { %5527 = vmatpush3.bf16.msra.mxu1 %v5708_v57 }
0x2c68   : > { %v4300_v27 = vpop.xlane.xlu0 %4299 }
0x2c69   : > { %v4307_v8 = vmul.f32 0.03125, %v4300_v27 }
0x2c6a   : > { %v4303_v18 = vpop.xlane.xlu1 %4302 }
0x2c6b   : > { %v4310_v4 = vsub.f32 %v6974_v54, %v4307_v8  ;;  %v4308_v28 = vmul.f32 0.03125, %v4303_v18 }
0x2c6c   : > { %v4306_v5 = vpop.xlane.xlu0 %4305 }
0x2c6d   : > { %v4311_v60 = vsub.f32 %v6980_v25, %v4308_v28  ;;  %v4309_v53 = vmul.f32 0.03125, %v4306_v5  ;;  %v4313_v56 = vmul.f32 %v4310_v4, %v4310_v4 }
0x2c6f   : > { %v4312_v55 = vsub.f32 %v6977_v62, %v4309_v53  ;;  %v4316_v35 = vsel %vm833_vm0, %v4313_v56, 0.0  ;;  %v4314_v38 = vmul.f32 %v4311_v60, %v4311_v60 }
0x2c70   : > { %4317 = vadd.xlane.f32.xlu0 %v4316_v35 }
0x2c71   : > { %v4315_v9 = vmul.f32 %v4312_v55, %v4312_v55  ;;  %v4319_v21 = vsel %vm833_vm0, %v4314_v38, 0.0 }
0x2c73   : > { %v4322_v24 = vsel %vm833_vm0, %v4315_v9, 0.0 }
0x2c74   : > { %4320 = vadd.xlane.f32.xlu0 %v4319_v21  ;;  %4323 = vadd.xlane.f32.xlu1 %v4322_v24 }
0x2cfd   : > { %v4318_v46 = vpop.xlane.xlu0 %4317 }
0x2cfe   : > { %v4325_v11 = vmul.f32 0.03125, %v4318_v46 }
0x2d00   : > { %v4328_v12 = vadd.f32 1e-05, %v4325_v11 }
0x2d01   : > { %v4324_v13 = vpop.xlane.xlu1 %4323  ;;  %v4321_v14 = vpop.xlane.xlu0 %4320 }
0x2d02   : > { %5901 = vrsqrt.f32 %v4328_v12  ;;  %v4327_v15 = vmul.f32 0.03125, %v4324_v13  ;;  %v4326_v17 = vmul.f32 0.03125, %v4321_v14 }
0x2d04   : > { %v4330_v19 = vadd.f32 1e-05, %v4327_v15  ;;  %v4329_v26 = vadd.f32 1e-05, %v4326_v17 }
0x2d06   : > { %5903 = vrsqrt.f32 %v4330_v19 }
0x2d07   : > { %5905 = vrsqrt.f32 %v4329_v26 }
0x2d0c   : > { %v5902_v31 = vpop.eup %5901 }
0x2d0d   : > { %v4334_v32 = vmul.f32 %v5902_v31, %v4310_v4 }
0x2d0f   : > { %v4343_v30 = vmul.f32 %v4996_v23, %v4334_v32 }
0x2d10   : > { %v5904_v33 = vpop.eup %5903 }
0x2d11   : > { %v5906_v50 = vpop.eup %5905  ;;  %v4336_v29 = vmul.f32 %v5904_v33, %v4312_v55  ;;  %v4352_v34 = vadd.f32 %v4997_v16, %v4343_v30  ;;  %v5025_v33 = vld [vmem:[%s7144_s19 + $0x2] ss:$0 sm:$0xff] }
0x2d12   : > { %v4335_v37 = vmul.f32 %v5906_v50, %v4311_v60 }
0x2d13   : > { %v4345_v0 = vmul.f32 %v4996_v23, %v4336_v29 }
0x2d14   : > { %v4344_v63 = vmul.f32 %v4996_v23, %v4335_v37 }
0x2d15   : > { %v4354_v36 = vadd.f32 %v4997_v16, %v4345_v0 }
0x2d16   : > { %v4353_v40 = vadd.f32 %v4997_v16, %v4344_v63 }
0x2d17   : > { %v4356_v41 = vpack.c.bf16 %v4354_v36, %v4354_v36 }
0x2d18   : > { %v4355_v43 = vpack.c.bf16 %v4353_v40, %v4352_v34 }
0x2d1a   : > { %5508 = vmatprep.mubr.msk.bf16.mxu0 %vm833_vm0, %v4355_v43 }
0x2d1b   : > { %5509 = vmatmul.mubr.msk.bf16.vlgmr.msra.gmra.mrb[72].mxu0 %vm833_vm0, %v4356_v41 }
0x2dee   : > { %v5510_v59 = vpop.f32.mrb[72].mxu0 }
0x2def   : > { %v4431_v52 = vadd.f32 %v5510_v59, %v5003_v58  ;;  %v4422_v42 = vpop.f32.mrb[73].mxu0 }
0x2df0   : > { %v4423_v61 = vadd.f32 %v5003_v58, %v4422_v42  ;;  %v5511_v1 = vpop.f32.mrb[74].mxu0 }
0x2df1   : > { %v4441_v6 = vmul.f32 0.044715, %v4431_v52  ;;  %v4425_v7 = vpop.f32.mrb[75].mxu0  ;;  %v4438_v13 = vmul.f32 0.5, %v4431_v52 }
0x2df2   : > { %v4439_v27 = vmul.f32 0.044715, %v4423_v61  ;;  %v4426_v8 = vadd.f32 %v5003_v58, %v4425_v7  ;;  %v4436_v14 = vmul.f32 0.5, %v4423_v61 }
0x2df3   : > { %v4444_v18 = vmul.f32 %v4441_v6, %v4431_v52 }
0x2df4   : > { %v4442_v4 = vmul.f32 %v4439_v27, %v4423_v61  ;;  %v4440_v28 = vmul.f32 0.044715, %v4426_v8  ;;  %v4437_v15 = vmul.f32 0.5, %v4426_v8 }
0x2df5   : > { %v4447_v5 = vmul.f32 %v4444_v18, %v4431_v52 }
0x2df6   : > { %v4445_v60 = vmul.f32 %v4442_v4, %v4423_v61  ;;  %v4443_v53 = vmul.f32 %v4440_v28, %v4426_v8 }
0x2df7   : > { %v4450_v56 = vadd.f32 %v4447_v5, %v4431_v52 }
0x2df8   : > { %v4446_v55 = vmul.f32 %v4443_v53, %v4426_v8  ;;  %v4448_v35 = vadd.f32 %v4445_v60, %v4423_v61  ;;  %v5034_v53 = vld [vmem:[%s7145_s20] ss:$0 sm:$0xff] }
0x2df9   : > { %v4453_v38 = vmul.f32 0.7978846, %v4450_v56 }
0x2dfa   : > { %v4449_v9 = vadd.f32 %v4446_v55, %v4426_v8  ;;  %v4451_v21 = vmul.f32 0.7978846, %v4448_v35  ;;  %v5035_v35 = vld [vmem:[%s7246_s28] ss:$0 sm:$0xff] }
0x2dfb   : > { %5907 = vtanh.f32 %v4453_v38 }
0x2dfc   : > { %v4452_v24 = vmul.f32 0.7978846, %v4449_v9  ;;  %5909 = vtanh.f32 %v4451_v21 }
0x2dfe   : > { %5911 = vtanh.f32 %v4452_v24  ;;  %v5036_v24 = vld [vmem:[%s7247_s21] ss:$0 sm:$0xff] }
0x2e05   : > { %v5908_v22 = vpop.eup %5907 }
0x2e06   : > { %v5910_v10 = vpop.eup %5909  ;;  %v4459_v46 = vadd.f32 1.0, %v5908_v22 }
0x2e07   : > { %v4457_v11 = vadd.f32 1.0, %v5910_v10 }
0x2e08   : > { %v5912_v12 = vpop.eup %5911  ;;  %v4462_v19 = vmul.f32 %v4459_v46, %v4438_v13 }
0x2e09   : > { %v4458_v17 = vadd.f32 1.0, %v5912_v12  ;;  %v4460_v26 = vmul.f32 %v4457_v11, %v4436_v14  ;;  %v5037_v14 = vld [vmem:[%s7249_s4] ss:$0 sm:$0xff]  ;;  %s5997_s4 = smov [#allocation3]  }
0x2e0a   : > { %v4464_v23 = vpack.c.bf16 %v4462_v19, %v4462_v19  ;;  %s5923_s6 = sshll.u32 %s5997_s4, 4  ;;  %s5924_s6 = int_to_ptr.vmem [resolvable:$false] %s5923_s6 }
0x2e0b   : > { %v4461_v31 = vmul.f32 %v4458_v17, %v4437_v15  ;;  %s5925_s28 = scalar_lea.vmem %s5924_s6, 512  ;;  %p5926_p0 = scmp.lt.s32.totalorder %s7069_s29, %s5924_s6 }
0x2e0c   : > { %p5927_p1 = scmp.lt.s32.totalorder %s5925_s28, %s5919_s30 }
0x2e0d   : > { %v4463_v32 = vpack.c.bf16 %v4461_v31, %v4460_v26 }
0x2e0e   : > { %p5928_p2 = por %p5927_p1, %p5926_p0 }
0x2e0f   : > { %5528 = vmatprep.mubr.bf16.mxu1 %v4463_v32 }
0x2e10   : > { %5529 = vmatmul.mubr.bf16.vlgmr.msra.gmra.mrb[64].mxu1 %v4464_v23  ;;  %p5929_p3 = pnand %p5928_p2, %p5922_p13 }
0x2ee3   : > { %v5530_v50 = vpop.f32.mrb[64].mxu1 }
0x2ee4   : > { %v4572_v29 = vpop.f32.mrb[65].mxu1  ;;  %v4581_v37 = vadd.f32 %v5530_v50, %v5025_v33 }
0x2ee5   : > { %v4573_v30 = vadd.f32 %v5025_v33, %v4572_v29  ;;  %v5531_v16 = vpop.f32.mrb[66].mxu1 }
0x2ee6   : > { %v4575_v0 = vpop.f32.mrb[67].mxu1  ;;  %v4588_v34 = vadd.f32 %v4581_v37, %v6977_v62 }
0x2ee7   : > { %v4586_v63 = vadd.f32 %v4573_v30, %v6974_v54  ;;  %v4576_v36 = vadd.f32 %v5025_v33, %v4575_v0 }
0x2ee8   : > { %v4597_v44 = vsel %vm833_vm0, %v4588_v34, 0.0 }
0x2ee9   : > { %v4587_v40 = vadd.f32 %v4576_v36, %v6980_v25  ;;  %v4591_v41 = vsel %vm833_vm0, %v4586_v63, 0.0 }
0x2eea   : > { %4592 = vadd.xlane.f32.xlu0 %v4591_v41 }
0x2eeb   : > { %v4594_v43 = vsel %vm833_vm0, %v4587_v40, 0.0 }
0x2eec   : > { %4595 = vadd.xlane.f32.xlu1 %v4594_v43 }
0x2eee   : > { %4598 = vadd.xlane.f32.xlu0 %v4597_v44 }
0x2f77   : > { %v4593_v3 = vpop.xlane.xlu0 %4592 }
0x2f78   : > { %v4600_v45 = vmul.f32 0.03125, %v4593_v3 }
0x2f79   : > { %v4596_v2 = vpop.xlane.xlu1 %4595 }
0x2f7a   : > { %v4603_v47 = vsub.f32 %v4586_v63, %v4600_v45  ;;  %v4601_v20 = vmul.f32 0.03125, %v4596_v2 }
0x2f7b   : > { %v4599_v54 = vpop.xlane.xlu0 %4598 }
0x2f7c   : > { %v4604_v51 = vsub.f32 %v4587_v40, %v4601_v20  ;;  %v4602_v57 = vmul.f32 0.03125, %v4599_v54  ;;  %v4606_v62 = vmul.f32 %v4603_v47, %v4603_v47 }
0x2f7e   : > { %v4605_v58 = vsub.f32 %v4588_v34, %v4602_v57  ;;  %v4609_v25 = vsel %vm833_vm0, %v4606_v62, 0.0  ;;  %v4607_v59 = vmul.f32 %v4604_v51, %v4604_v51 }
0x2f7f   : > { %4610 = vadd.xlane.f32.xlu1 %v4609_v25 }
0x2f80   : > { %v4612_v52 = vsel %vm833_vm0, %v4607_v59, 0.0  ;;  %v4608_v42 = vmul.f32 %v4605_v58, %v4605_v58 }
0x2f81   : > { %4613 = vadd.xlane.f32.xlu0 %v4612_v52 }
0x2f82   : > { %v4615_v61 = vsel %vm833_vm0, %v4608_v42, 0.0 }
0x2f83   : > { %4616 = vadd.xlane.f32.xlu1 %v4615_v61 }
0x300c   : > { %v4611_v1 = vpop.xlane.xlu1 %4610 }
0x300d   : > { %v4618_v6 = vmul.f32 0.03125, %v4611_v1 }
0x300e   : > { %v4614_v7 = vpop.xlane.xlu0 %4613 }
0x300f   : > { %v4621_v27 = vadd.f32 1e-05, %v4618_v6  ;;  %v4619_v8 = vmul.f32 0.03125, %v4614_v7 }
0x3010   : > { %v4617_v18 = vpop.xlane.xlu1 %4616 }
0x3011   : > { %5913 = vrsqrt.f32 %v4621_v27  ;;  %v4622_v4 = vadd.f32 1e-05, %v4619_v8  ;;  %v4620_v28 = vmul.f32 0.03125, %v4617_v18 }
0x3013   : > { %5915 = vrsqrt.f32 %v4622_v4  ;;  %v4623_v5 = vadd.f32 1e-05, %v4620_v28 }
0x3015   : > { %5917 = vrsqrt.f32 %v4623_v5 }
0x301b   : > { %v5914_v60 = vpop.eup %5913 }
0x301c   : > { %v4627_v56 = vmul.f32 %v5914_v60, %v4603_v47 }
0x301d   : > { %v5916_v55 = vpop.eup %5915 }
0x301e   : > { %v4636_v38 = vmul.f32 %v5034_v53, %v4627_v56  ;;  %v4628_v9 = vmul.f32 %v5916_v55, %v4604_v51 }
0x301f   : > { %v5918_v21 = vpop.eup %5917 }
0x3020   : > { %v4645_v22 = vadd.f32 %v5035_v35, %v4636_v38  ;;  %v4637_v10 = vmul.f32 %v5034_v53, %v4628_v9  ;;  %v4629_v46 = vmul.f32 %v5918_v21, %v4605_v58 }
0x3022   : > { %v4646_v11 = vadd.f32 %v5035_v35, %v4637_v10  ;;  %v4638_v12 = vmul.f32 %v5034_v53, %v4629_v46  ;;  %v4655_v13 = vmul.f32 %v5036_v24, %v4645_v22 }
0x3024   : > { %v4656_v15 = vmul.f32 %v5036_v24, %v4646_v11  ;;  %v4647_v17 = vadd.f32 %v5035_v35, %v4638_v12  ;;  %v4657_v19 = vadd.f32 %v4655_v13, %v6218_v39 }
0x3026   : > { %v4668_v26 = vmul.f32 %v5037_v14, %v4647_v17  ;;  %v4658_v31 = vadd.f32 %v4656_v15, %v6227_v49  ;;  %4659 = vst.msk [vmem:[%s799_s26] sm:$0xff] %vm833_vm0, %v4657_v19 }
0x3028   : > { %v4669_v39 = vadd.f32 %v4668_v26, %v6225_v48  ;;  %4660 = vst.msk [vmem:[%s799_s26 + $0x8] sm:$0xff] %vm833_vm0, %v4658_v31 }
0x3029   : > { %5932 = shalt.err (!%p5929_p3)
}
0x302a   : > { %s5933_s8 = scalar_lea.hbm %s7065_s23, 256  ;;  %s5937_s21 = scalar_lea.hbm %s7251_s22, 512 }
0x302b   : > { %p5934_p4 = scmp.ne.s32.totalorder %s7065_s23, %s5933_s8  ;;  %p5938_p9 = scmp.lt.u32.totalorder %s7065_s23, %s7251_s22 }
0x302c   : > { %p5939_p10 = scmp.lt.u32.totalorder %s5937_s21, %s5933_s8  ;;  %p5941_p12 = scmp.lt.u32.totalorder %s5933_s8, %s7065_s23 }
0x302d   : > { %p5935_p7 = pnand %p5934_p4, %p6167_p5 }
0x302e   : > { %p5940_p11 = por %p5939_p10, %p5938_p9 }
0x302f   : > { %p5936_p8 = pneg %p5935_p7 }
0x3030   : > { %p5942_p13 = por %p5941_p12, %p5940_p11 }
0x3032   : > { %p5943_p0 = pnand %p5942_p13, %p5936_p8 }
0x3034   : > { %5946 = shalt.err (!%p5943_p0)
}
0x3035   : > { %s5998_s30 = smov 128   ;;  %4670 = vst.msk [vmem:[%s827_s0] sm:$0xff] %vm833_vm0, %v4669_v39 }
0x3036   : > { %5568 = dma.vmem_to_hbm [thread:$0]  (%p6167_p5), %s7069_s29, 256, %s7065_s23, %s7077_s25, %s5998_s30, %s5998_s30, %s7237_s3  }
0x3037 PF: > { %s7253_s8 = sld [smem:[#allocation8_spill]]  ;;  %s7254_s27 = sld [smem:[#allocation6_spill]] }
0x303d   : > { %p5574_p1 = scmp.ge.s32.totalorder %s7253_s8, 2  ;;  %s4707_s4 = sand.u32 1, %s7254_s27  }
0x303e   : > { %s4708_s5 = scalar_lea.sflag [#allocation4], %s4707_s4 }
0x303f   : > { %p5571_p2 = pnand %p5574_p1, %p6171_p6 }
0x3041   : > { %5964 = dma.done.wait (!%p5571_p2), %s4708_s5, 256  }
0x3042   : > { %5966 = vsyncadd (!%p5571_p2), %s4708_s5, 4294967040  ;;  %s7256_s30 = sld [smem:[#allocation10_spill]]  ;;  %s7257_s3 = sld [smem:[#allocation7_spill]] }
0x3043   : > { %s7258_s6 = sld [smem:[#allocation11_spill]]  ;;  %s7259_s29 = smov %s5973_s2 }
0x3048   : > { %p36_p5 = scmp.ge.s32.totalorder %s7256_s30, 4   ;;  %s7260_s2 = smov %s7257_s3 }
0x304a   :  { %38 = sbr.rel (!%p36_p5) target bundleno = 19 (0x13), region = 196 }
0x3051   :  { %4720 = vsyncpa [#allocation4], 1 }
0x3052   :  { %4722 = vsyncpa [#allocation4 + $0x1], 1 }

// kernel: one_stream_attention_block_forward.2
= control target key start
LH: loop header
LB: loop body
LE: loop exit
PB: predicated region body
PF: predicated region fallthrough
CT: control target
= control target key end

     0   :  { %s7323_s0 = inlined_call_operand.vmem [shape: f32[2,16,32], index: 0, kind: input, shape index: {}]   ;;  %s7324_s1 = inlined_call_operand.vmem [shape: f32[2,8,32], index: 1, kind: input, shape index: {}]   ;;  %s7325_s2 = inlined_call_operand.vmem [shape: f32[2,16,32], index: 2, kind: input, shape index: {}]   ;;  %s7326_s3 = inlined_call_operand.vmem [shape: f32[2,8,32], index: 3, kind: input, shape index: {}]   ;;  %s7327_s4 = inlined_call_operand.vmem [shape: f32[1,32], index: 4, kind: input, shape index: {}]   ;;  %s7328_s5 = inlined_call_operand.vmem [shape: f32[1,32], index: 5, kind: input, shape index: {}]   ;;  %s7329_s6 = inlined_call_operand.vmem [shape: f32[1,32], index: 6, kind: input, shape index: {}]   ;;  %s7330_s7 = inlined_call_operand.vmem [shape: f32[1,32], index: 7, kind: input, shape index: {}]   ;;  %s7331_s8 = inlined_call_operand.vmem [shape: f32[3,1,32], index: 8, kind: input, shape index: {}]   ;;  %s7332_s9 = inlined_call_operand.vmem [shape: f32[3,1,32], index: 9, kind: input, shape index: {}]   ;;  %s7333_s10 = inlined_call_operand.vmem [shape: bf16[3,32,96], index: 10, kind: input, shape index: {}]   ;;  %s7334_s11 = inlined_call_operand.vmem [shape: f32[3,1,96], index: 11, kind: input, shape index: {}]   ;;  %s7335_s12 = inlined_call_operand.vmem [shape: bf16[3,32,32], index: 12, kind: input, shape index: {}]   ;;  %s7336_s13 = inlined_call_operand.vmem [shape: f32[3,1,32], index: 13, kind: input, shape index: {}]   ;;  %s7337_s14 = inlined_call_operand.vmem [shape: f32[3,1,32], index: 14, kind: input, shape index: {}]   ;;  %s7338_s15 = inlined_call_operand.vmem [shape: f32[3,1,32], index: 15, kind: input, shape index: {}]   ;;  %s7339_s16 = inlined_call_operand.vmem [shape: bf16[3,32,128], index: 16, kind: input, shape index: {}]   ;;  %s7340_s17 = inlined_call_operand.hbm [shape: f32[3,1,128], index: 17, kind: input, shape index: {}]   ;;  %s7341_s18 = inlined_call_operand.vmem [shape: bf16[3,128,32], index: 18, kind: input, shape index: {}]   ;;  %s7342_s19 = inlined_call_operand.hbm [shape: f32[3,1,32], index: 19, kind: input, shape index: {}]   ;;  %s7343_s20 = inlined_call_operand.vmem [shape: f32[1,32], index: 20, kind: input, shape index: {}]   ;;  %s7344_s21 = inlined_call_operand.vmem [shape: f32[1,32], index: 21, kind: input, shape index: {}]   ;;  %s7345_s22 = inlined_call_operand.vmem [shape: f32[1,32], index: 22, kind: input, shape index: {}]   ;;  %s7346_s23 = inlined_call_operand.vmem [shape: f32[1,32], index: 23, kind: input, shape index: {}]   ;;  %s7347_s24 = inlined_call_operand.hbm [shape: f32[2,16,32], index: 24, kind: output, shape index: {0}]   ;;  %s7348_s25 = inlined_call_operand.vmem [shape: f32[2,8,32], index: 25, kind: output, shape index: {1}]  }
   0x1   :  { %7394 = sst [smem:[#allocation20_spill]] %s7323_s0 }
   0x2   :  { %7395 = sst [smem:[#allocation21_spill]] %s7324_s1 }
   0x3   :  { %7396 = sst [smem:[#allocation22_spill]] %s7325_s2 }
   0x4   :  { %7397 = sst [smem:[#allocation23_spill]] %s7326_s3 }
   0x5   :  { %7398 = sst [smem:[#allocation24_spill]] %s7327_s4 }
   0x6   :  { %7399 = sst [smem:[#allocation25_spill]] %s7328_s5 }
   0x7   :  { %7400 = sst [smem:[#allocation26_spill]] %s7329_s6 }
   0x8   :  { %7401 = sst [smem:[#allocation27_spill]] %s7330_s7 }
   0x9   :  { %7402 = sst [smem:[#allocation28_spill]] %s7331_s8 }
   0xa   :  { %7403 = sst [smem:[#allocation29_spill]] %s7332_s9 }
   0xb   :  { %7404 = sst [smem:[#allocation30_spill]] %s7340_s17 }
   0xc   :  { %7405 = sst [smem:[#allocation31_spill]] %s7342_s19 }
   0xd   :  { %7406 = sst [smem:[#allocation32_spill]] %s7345_s22 }
   0xe   :  { %7407 = sst [smem:[#allocation33_spill]] %s7346_s23 }
   0xf   :  { %7408 = sst [smem:[#allocation34_spill]] %s7347_s24 }
  0x10   :  { %7409 = sst [smem:[#allocation35_spill]] %s7348_s25 }
  0x11   :  { %31 = vsyncpa [#allocation4], 0 }
  0x12   :  { %32 = vsyncpa [#allocation7], 0 }
  0x13   :  { %33 = vsyncpa [#allocation5], 0 }
  0x14   :  { %35 = vsyncpa [#allocation5 + $0x1], 0  ;;  %s6272_s29 = smov 0   ;;  %s6274_s2 = smov 0  }
  0x15   :  { %s6276_s6 = smov 0   ;;  %s6278_s30 = smov 0  }
  0x16 LB: > { %7410 = sst [smem:[#allocation12_spill]] %s6108_s29  ;;  %s6293_s7 = sadd.s32 4294967295, %s6120_s30   ;;  %s6120_s30 = sphi %s6278_s30, %s7465_s30   ;;  %s6116_s6 = sphi %s6276_s6, %s7467_s6   ;;  %s6112_s2 = sphi %s6274_s2, %s7469_s2   ;;  %s6108_s29 = sphi %s6272_s29, %s7468_s29  }
  0x17   : > { %7411 = sst [smem:[#allocation13_spill]] %s6116_s6  ;;  %s4866_s3 = sadd.s32 4294967294, %s6120_s30  }
  0x18   : > { %7412 = sst [smem:[#allocation14_spill]] %s6120_s30  ;;  %s6297_s26 = sadd.s32 1, %s6120_s30  }
  0x19   : > { %7413 = sst [smem:[#allocation15_spill]] %s6297_s26  ;;  %s572_s1 = sadd.s32 1, %s6116_s6 }
  0x1a   : > { %s569_s8 = ssub.s32 %s6120_s30, %s6297_s26  ;;  %p582_p0 = scmp.ne.s32.totalorder %s6116_s6, %s6112_s2 }
  0x1b   : > { %p570_p1 = scmp.eq.s32.totalorder %s569_s8, 0  ;;  %p583_p2 = scmp.eq.s32.totalorder %s6293_s7, 1 }
  0x1c   : > { %p588_p3 = scmp.ne.s32.totalorder %s6112_s2, %s6108_s29  ;;  %p589_p4 = scmp.eq.s32.totalorder %s4866_s3, 1 }
  0x1d   : > { %s6308_s27 = scalar_select %p570_p1, %s6116_s6, %s572_s1  }
  0x1e   : > { %p6310_p5 = por %p583_p2, %p582_p0  ;;  %p6314_p6 = por %p589_p4, %p588_p3 }
  0x1f   : > { %7414 = sst [smem:[#allocation16_spill]] %s6308_s27  ;;  %p4867_p7 = scmp.ge.s32.totalorder %s6120_s30, 1 }
  0x20   : > { %s7415_s4 = scalar_select %p6310_p5, 1, 0 }
  0x21   : > { %s7417_s28 = scalar_select %p6314_p6, 1, 0 }
  0x22   : > { %7416 = sst [smem:[#allocation17_spill]] %s7415_s4  ;;  %p622_p8 = scmp.lt.s32.totalorder %s6120_s30, 3 }
  0x23   : > { %7418 = sst [smem:[#allocation18_spill]] %s7417_s28  ;;  %p7357_p9 = scmp.eq.s32.totalorder %s6293_s7, 0 }
  0x24   : > { %p6321_p10 = pnand %p4867_p7, %p622_p8  ;;  %s6122_s5 = smov [#allocation3]  }
  0x25   : > { %s673_s0 = sshll.u32 %s6122_s5, 4  ;;  %s6123_s1 = smov [#allocation6]   ;;  %s674_s0 = int_to_ptr.vmem [resolvable:$true] %s673_s0 }
  0x26   : > { %s7419_s9 = scalar_select %p6321_p10, 1, 0 }
  0x27   : > { %p5630_p11 = pneg %p6321_p10  ;;  %s689_s8 = sshll.u32 %s6123_s1, 4  ;;  %s6333_s8 = int_to_ptr.vmem [resolvable:$true] %s689_s8 }
  0x28   : > { %s7421_s17 = sld [smem:[#allocation30_spill]] }
  0x29   : > { %p6329_p12 = pnand %p7357_p9, %p5630_p11 }
  0x2b   : > { %p5996_p0 = pneg %p6329_p12 }
  0x2e   : > { %s5994_s26 = scalar_lea.hbm %s7421_s17, 48 }
  0x2f   : > { %p5995_p13 = scmp.ne.s32.totalorder %s7421_s17, %s5994_s26  ;;  %p6001_p3 = scmp.lt.u32.totalorder %s5994_s26, %s7421_s17 }
  0x31   : > { %p5997_p1 = pnand %p5996_p0, %p5995_p13 }
  0x33   : > { %p5998_p2 = pneg %p5997_p1 }
  0x35   : > { %p6003_p4 = pnand %p6001_p3, %p5998_p2 }
  0x37   : > { %6006 = shalt.err (!%p6003_p4)
}
  0x38   : > { %s6007_s1 = scalar_lea.vmem %s674_s0, 48  ;;  %s6014_s6 = scalar_lea.vmem %s674_s0, 64 }
  0x39   : > { %p6008_p7 = scmp.ne.s32.totalorder %s674_s0, %s6007_s1  ;;  %p6015_p9 = scmp.lt.s32.totalorder %s674_s0, %s674_s0 }
  0x3a   : > { %p6016_p6 = scmp.lt.s32.totalorder %s6014_s6, %s6007_s1 }
  0x3b   : > { %p6010_p8 = pnand %p6008_p7, %p5996_p0 }
  0x3c   : > { %p6017_p5 = por %p6016_p6, %p6015_p9 }
  0x3d   : > { %p6011_p11 = pneg %p6010_p8 }
  0x3f   : > { %p6018_p10 = pnand %p6017_p5, %p6011_p11 }
  0x41   : > { %6021 = shalt.err (!%p6018_p10)
}
  0x42   : > { %s6124_s27 = smov 16   ;;  %s6125_s29 = smov 1  }
  0x43   : > { %5633 = dma.hbm_to_vmem [thread:$0]  (!%p6329_p12), %s7421_s17, 48, %s674_s0, [#allocation4], %s6124_s27, %s6124_s27, %s6125_s29  }
  0x44   : > { %s7422_s19 = sld [smem:[#allocation31_spill]] }
  0x4a   : > { %s6022_s25 = scalar_lea.hbm %s7422_s19, 48 }
  0x4b   : > { %p6023_p13 = scmp.ne.s32.totalorder %s7422_s19, %s6022_s25  ;;  %p6029_p9 = scmp.lt.u32.totalorder %s6022_s25, %s7422_s19 }
  0x4d   : > { %p6025_p5 = pnand %p6023_p13, %p5996_p0 }
  0x4f   : > { %p6026_p6 = pneg %p6025_p5 }
  0x51   : > { %p6031_p10 = pnand %p6029_p9, %p6026_p6 }
  0x53   : > { %6034 = shalt.err (!%p6031_p10)
}
  0x54   : > { %s6035_s0 = scalar_lea.vmem %s6333_s8, 48  ;;  %s6042_s24 = scalar_lea.vmem %s6333_s8, 64 }
  0x55   : > { %p6036_p1 = scmp.ne.s32.totalorder %s6333_s8, %s6035_s0  ;;  %p6043_p4 = scmp.lt.s32.totalorder %s6333_s8, %s6333_s8 }
  0x56   : > { %p6044_p7 = scmp.lt.s32.totalorder %s6042_s24, %s6035_s0 }
  0x57   : > { %p6038_p2 = pnand %p6036_p1, %p5996_p0 }
  0x58   : > { %p6045_p8 = por %p6044_p7, %p6043_p4 }
  0x59   : > { %p6039_p3 = pneg %p6038_p2 }
  0x5b   : > { %p6046_p11 = pnand %p6045_p8, %p6039_p3 }
  0x5d   : > { %6049 = shalt.err (!%p6046_p11)
}
  0x5e   : > { %5636 = dma.hbm_to_vmem [thread:$0]  (!%p6329_p12), %s7422_s19, 48, %s6333_s8, [#allocation7], %s6124_s27, %s6124_s27, %s6125_s29  }
  0x5f   : > { %p7423_p13 = scmp.ne.s32.totalorder %s7419_s9, 0 }
  0x61   : > { %747 = sbr.rel (%p7423_p13) target bundleno = 12412 (0x307c), region = 116 }
  0x68   : > { %p7424_p0 = scmp.eq.s32.totalorder %s6293_s7, 0 }
  0x6a   : > { %6095 = dma.done.wait (%p7424_p0), [#allocation4], 48   ;;  %p7425_p5 = pmov %p7424_p0 }
  0x6b   : > { %p7426_p6 = pmov %p7424_p0 }
  0x6c   : > { %6097 = vsyncadd (%p7425_p5), [#allocation4], 4294967248 }
  0x6d   : > { %6099 = dma.done.wait (%p7426_p6), [#allocation7], 48   ;;  %p7427_p9 = pmov %p7424_p0 }
  0x6e   : > { %p836_p10 = scmp.lt.s32.totalorder %s6293_s7, 1  ;;  %s7429_s30 = sld [smem:[#allocation20_spill]]  ;;  %vm863_vm0 = vcmask 261120   ;;  %vm1095_vm1 = vcmask 64512   ;;  %vm1156_vm2 = vcmask 195584   ;;  %vm1203_vm3 = vcmask 1043456  }
  0x6f   : > { %6101 = vsyncadd (%p7427_p9), [#allocation7], 4294967248  ;;  %s7430_s1 = sld [smem:[#allocation21_spill]]  ;;  %s7431_s25 = sld [smem:[#allocation24_spill]]  ;;  %vm1789_vm4 = vcmask 130048  }
  0x70   : > { %s6395_s3 = scalar_select %p836_p10, %s6293_s7, 1 }
  0x71   : > { %s7432_s29 = sld [smem:[#allocation22_spill]]  ;;  %s7433_s5 = sld [smem:[#allocation25_spill]] }
  0x72   : > { %s5095_s9 = sshll.u32 %s6395_s3, 4  ;;  %s6399_s8 = sshll.u32 %s6395_s3, 3 }
  0x73   : > { %7428 = sst [smem:[#allocation19_spill]] %s6399_s8  ;;  %s7434_s17 = sld [smem:[#allocation26_spill]] }
  0x74   : > { %s840_s26 = scalar_lea.vmem %s7429_s30, %s5095_s9  ;;  %s7435_s3 = sld [smem:[#allocation23_spill]] }
  0x75   : > { %s844_s6 = scalar_lea.vmem %s7430_s1, %s6399_s8  ;;  %v859_v0 = vld [vmem:[%s840_s26] sm:$0xff]  ;;  %v860_v3 = vld [vmem:[%s840_s26 + $0x8] sm:$0xff]  ;;  %s7436_s27 = sld [smem:[#allocation27_spill]] }
  0x76   : > { %v864_v1 = vsel %vm863_vm0, %v859_v0, 0.0  ;;  %v907_v2 = vld [vmem:[%s844_s6] sm:$0xff]  ;;  %v867_v5 = vsel %vm863_vm0, %v860_v3, 0.0  ;;  %s7437_s1 = sld [smem:[#allocation28_spill]]  ;;  %s7438_s24 = sld [smem:[#allocation29_spill]] }
  0x77   : > { %865 = vadd.xlane.f32.xlu0 %v864_v1  ;;  %v910_v4 = vsel %vm863_vm0, %v907_v2, 0.0  ;;  %v4882_v31 = vld [vmem:[%s7431_s25] ss:$0 sm:$0xff]  ;;  %s849_s30 = scalar_lea.vmem %s7432_s29, %s5095_s9  ;;  %s7390_s9 = smov 96  }
  0x78   : > { %911 = vadd.xlane.f32.xlu1 %v910_v4  ;;  %v4883_v33 = vld [vmem:[%s7433_s5] ss:$0 sm:$0xff]  ;;  %v938_v47 = vld [vmem:[%s849_s30 + $0x8] sm:$0xff]  ;;  %s7384_s4 = smov 64   ;;  %s7382_s29 = smov 56  }
  0x79   : > { %v937_v36 = vld [vmem:[%s849_s30] sm:$0xff]  ;;  %s7380_s30 = smov 80   ;;  %s7378_s26 = smov 112  }
  0x7a   : > { %v4884_v37 = vld [vmem:[%s7434_s17] ss:$0 sm:$0xff]  ;;  %s853_s25 = scalar_lea.vmem %s7435_s3, %s6399_s8  ;;  %s7388_s17 = smov 88  }
  0x7b   : > { %868 = vadd.xlane.f32.xlu0 %v867_v5  ;;  %v4885_v41 = vld [vmem:[%s7436_s27] ss:$0 sm:$0xff]  ;;  %s7386_s27 = smov 120   ;;  %s7376_s28 = smov 48  }
  0x7c   : > { %v943_v45 = vld [vmem:[%s853_s25] sm:$0xff]  ;;  %s7372_s5 = smov 72   ;;  %s7370_s6 = smov 104  }
  0x7d   : > { %s7368_s0 = smov 40   ;;  %s7366_s3 = smov 8  }
  0x7e   : > { %s7364_s25 = smov 16   ;;  %s7448_s19 = smov 96  }
  0x7f   : > { %s7450_s23 = smov 120   ;;  %s7452_s22 = smov 56  }
  0x80   : > { %s5097_s8 = sshll.u32 %s6293_s7, 8 }
 0x104   : > { %v866_v6 = vpop.xlane.xlu0 %865 }
 0x105   : > { %v871_v7 = vmul.f32 0.03125, %v866_v6  ;;  %v912_v8 = vpop.xlane.xlu1 %911 }
 0x106   : > { %v913_v9 = vmul.f32 0.03125, %v912_v8 }
 0x107   : > { %v873_v10 = vsub.f32 %v859_v0, %v871_v7 }
 0x108   : > { %v914_v11 = vsub.f32 %v907_v2, %v913_v9  ;;  %v869_v12 = vpop.xlane.xlu0 %868  ;;  %v5742_v9 = vld [vmem:[%s7333_s10] sm:$0xff]  }
 0x109   : > { %v872_v13 = vmul.f32 0.03125, %v869_v12  ;;  %v875_v14 = vmul.f32 %v873_v10, %v873_v10  ;;  %5260 = vmatprep.subr.bf16.mxu0 %v5742_v9 }
 0x10a   : > { %v915_v15 = vmul.f32 %v914_v11, %v914_v11  ;;  %5261 = vmatpush3.bf16.msra.mxu0 %v5742_v9 }
 0x10b   : > { %v874_v16 = vsub.f32 %v860_v3, %v872_v13  ;;  %v877_v17 = vsel %vm863_vm0, %v875_v14, 0.0 }
 0x10c   : > { %878 = vadd.xlane.f32.xlu1 %v877_v17  ;;  %v916_v18 = vsel %vm863_vm0, %v915_v15, 0.0 }
 0x10d   : > { %v876_v19 = vmul.f32 %v874_v16, %v874_v16 }
 0x10f   : > { %v880_v20 = vsel %vm863_vm0, %v876_v19, 0.0 }
 0x110   : > { %917 = vadd.xlane.f32.xlu1 %v916_v18  ;;  %881 = vadd.xlane.f32.xlu0 %v880_v20 }
 0x199   : > { %v879_v21 = vpop.xlane.xlu1 %878 }
 0x19a   : > { %v883_v22 = vmul.f32 0.03125, %v879_v21 }
 0x19c   : > { %v885_v23 = vadd.f32 1e-05, %v883_v22  ;;  %v4886_v22 = vld [vmem:[%s7437_s1] ss:$0 sm:$0xff] }
 0x19d   : > { %v918_v24 = vpop.xlane.xlu1 %917  ;;  %v882_v25 = vpop.xlane.xlu0 %881 }
 0x19e   : > { %5784 = vrsqrt.f32 %v885_v23  ;;  %v919_v26 = vmul.f32 0.03125, %v918_v24  ;;  %v884_v27 = vmul.f32 0.03125, %v882_v25 }
 0x1a0   : > { %v920_v28 = vadd.f32 1e-05, %v919_v26  ;;  %v886_v29 = vadd.f32 1e-05, %v884_v27 }
 0x1a2   : > { %5786 = vrsqrt.f32 %v920_v28  ;;  %v4887_v28 = vld [vmem:[%s7438_s24] ss:$0 sm:$0xff] }
 0x1a3   : > { %5788 = vrsqrt.f32 %v886_v29 }
 0x1a8   : > { %v5785_v30 = vpop.eup %5784 }
 0x1a9   : > { %v889_v32 = vmul.f32 %v5785_v30, %v873_v10  ;;  %v5743_v10 = vld [vmem:[%s7333_s10 + $0x8] sm:$0xff]  }
 0x1aa   : > { %5262 = vmatprep.subr.bf16.mxu0 %v5743_v10 }
 0x1ab   : > { %v897_v34 = vmul.f32 %v4882_v31, %v889_v32  ;;  %5263 = vmatpush3.bf16.msra.mxu0 %v5743_v10 }
 0x1ac   : > { %v5787_v35 = vpop.eup %5786 }
 0x1ad   : > { %v5789_v38 = vpop.eup %5788  ;;  %v6434_v39 = vadd.f32 %v4883_v33, %v897_v34  ;;  %v922_v40 = vmul.f32 %v5787_v35, %v914_v11 }
 0x1ae   : > { %v890_v42 = vmul.f32 %v5789_v38, %v874_v16 }
 0x1af   : > { %v939_v43 = vadd.f32 %v937_v36, %v6434_v39  ;;  %v929_v44 = vmul.f32 %v4884_v37, %v922_v40  ;;  %v4888_v36 = vld [vmem:[%s7334_s11] ss:$0 sm:$0xff] }
 0x1b0   : > { %v898_v46 = vmul.f32 %v4882_v31, %v890_v42 }
 0x1b1   : > { %941 = vst.msk [vmem:[#allocation2] sm:$0xff] %vm863_vm0, %v939_v43  ;;  %v6441_v48 = vadd.f32 %v4885_v41, %v929_v44 }
 0x1b2   : > { %v6443_v49 = vadd.f32 %v4883_v33, %v898_v46 }
 0x1b3   : > { %v944_v50 = vadd.f32 %v943_v45, %v6441_v48 }
 0x1b4   : > { %v940_v51 = vadd.f32 %v938_v47, %v6443_v49 }
 0x1b5   : > { %945 = vst.msk [vmem:[#allocation2 + $0x10] sm:$0xff] %vm863_vm0, %v944_v50 }
 0x1b6   : > { %942 = vst.msk [vmem:[#allocation2 + $0x8] sm:$0xff] %vm863_vm0, %v940_v51 }
 0x1b8   : > { %v6449_v52 = vld [vmem:[#allocation2] sm:$0xff] }
 0x1b9   : > { %v951_v53 = vsel %vm863_vm0, %v6449_v52, 0.0 }
 0x1ba   : > { %952 = vadd.xlane.f32.xlu0 %v951_v53 }
 0x1bc   : > { %v6453_v54 = vld [vmem:[#allocation2 + $0x10] sm:$0xff] }
 0x1bd   : > { %v957_v55 = vsel %vm863_vm0, %v6453_v54, 0.0  ;;  %v6457_v56 = vld [vmem:[#allocation2 + $0x8] sm:$0xff] }
 0x1be   : > { %958 = vadd.xlane.f32.xlu0 %v957_v55  ;;  %v954_v57 = vsel %vm863_vm0, %v6457_v56, 0.0 }
 0x1bf   : > { %955 = vadd.xlane.f32.xlu1 %v954_v57 }
 0x247   : > { %v953_v58 = vpop.xlane.xlu0 %952 }
 0x248   : > { %v960_v59 = vmul.f32 0.03125, %v953_v58 }
 0x24a   : > { %v963_v60 = vsub.f32 %v6449_v52, %v960_v59 }
 0x24b   : > { %v959_v61 = vpop.xlane.xlu0 %958 }
 0x24c   : > { %v956_v62 = vpop.xlane.xlu1 %955  ;;  %v962_v63 = vmul.f32 0.03125, %v959_v61  ;;  %v966_v0 = vmul.f32 %v963_v60, %v963_v60 }
 0x24d   : > { %v961_v1 = vmul.f32 0.03125, %v956_v62 }
 0x24e   : > { %v965_v2 = vsub.f32 %v6453_v54, %v962_v63  ;;  %v969_v3 = vsel %vm863_vm0, %v966_v0, 0.0 }
 0x24f   : > { %v964_v4 = vsub.f32 %v6457_v56, %v961_v1  ;;  %970 = vadd.xlane.f32.xlu1 %v969_v3 }
 0x250   : > { %v968_v5 = vmul.f32 %v965_v2, %v965_v2 }
 0x251   : > { %v967_v6 = vmul.f32 %v964_v4, %v964_v4 }
 0x252   : > { %v975_v7 = vsel %vm863_vm0, %v968_v5, 0.0 }
 0x253   : > { %v972_v8 = vsel %vm863_vm0, %v967_v6, 0.0  ;;  %976 = vadd.xlane.f32.xlu1 %v975_v7 }
 0x254   : > { %973 = vadd.xlane.f32.xlu0 %v972_v8 }
 0x2dc   : > { %v971_v11 = vpop.xlane.xlu1 %970 }
 0x2dd   : > { %v978_v12 = vmul.f32 0.03125, %v971_v11 }
 0x2df   : > { %v981_v13 = vadd.f32 1e-05, %v978_v12 }
 0x2e0   : > { %v977_v14 = vpop.xlane.xlu1 %976 }
 0x2e1   : > { %5790 = vrsqrt.f32 %v981_v13  ;;  %v980_v15 = vmul.f32 0.03125, %v977_v14  ;;  %v974_v16 = vpop.xlane.xlu0 %973 }
 0x2e2   : > { %v979_v17 = vmul.f32 0.03125, %v974_v16 }
 0x2e3   : > { %v983_v18 = vadd.f32 1e-05, %v980_v15 }
 0x2e4   : > { %v982_v19 = vadd.f32 1e-05, %v979_v17 }
 0x2e5   : > { %5792 = vrsqrt.f32 %v983_v18 }
 0x2e6   : > { %5794 = vrsqrt.f32 %v982_v19 }
 0x2eb   : > { %v5791_v20 = vpop.eup %5790 }
 0x2ec   : > { %v987_v21 = vmul.f32 %v5791_v20, %v963_v60 }
 0x2ee   : > { %v996_v27 = vmul.f32 %v4886_v22, %v987_v21 }
 0x2ef   : > { %v5793_v23 = vpop.eup %5792 }
 0x2f0   : > { %v5795_v24 = vpop.eup %5794  ;;  %v989_v25 = vmul.f32 %v5793_v23, %v965_v2  ;;  %v1005_v32 = vadd.f32 %v4887_v28, %v996_v27 }
 0x2f1   : > { %v988_v26 = vmul.f32 %v5795_v24, %v964_v4 }
 0x2f2   : > { %v998_v29 = vmul.f32 %v4886_v22, %v989_v25 }
 0x2f3   : > { %v997_v30 = vmul.f32 %v4886_v22, %v988_v26 }
 0x2f4   : > { %v1007_v31 = vadd.f32 %v4887_v28, %v998_v29 }
 0x2f5   : > { %v1006_v33 = vadd.f32 %v4887_v28, %v997_v30 }
 0x2f6   : > { %v1009_v34 = vpack.c.bf16 %v1007_v31, %v1007_v31 }
 0x2f7   : > { %v1008_v35 = vpack.c.bf16 %v1006_v33, %v1005_v32 }
 0x2f9   : > { %5264 = vmatprep.mubr.msk.bf16.mxu0 %vm863_vm0, %v1008_v35 }
 0x2fa   : > { %5265 = vmatmul.mubr.msk.bf16.vlgmr.msra.gmra.mrb[0].mxu0 %vm863_vm0, %v1009_v34 }
 0x3cd   : > { %v5266_v37 = vpop.f32.mrb[0].mxu0 }
 0x3ce   : > { %v1082_v38 = vadd.f32 %v5266_v37, %v4888_v36  ;;  %v1073_v40 = vpop.f32.mrb[1].mxu0 }
 0x3cf   : > { %v5267_v41 = vpop.f32.mrb[2].mxu0  ;;  %v1074_v44 = vadd.f32 %v4888_v36, %v1073_v40 }
 0x3d0   : > { %v6484_v42 = vpack.c.bf16 %v1082_v38, %v1082_v38  ;;  %v1076_v43 = vpop.f32.mrb[3].mxu0 }
 0x3d1   : > { %v1077_v45 = vadd.f32 %v4888_v36, %v1076_v43 }
 0x3d2   : > { %1093 = vrot.lane.b32.xlu1 %v6484_v42, %s7390_s9 }
 0x3d3   : > { %v6488_v46 = vpack.c.bf16 %v1077_v45, %v1074_v44 }
 0x3d5   : > { %1091 = vrot.lane.b32.xlu0 %v6488_v46, %s7390_s9  ;;  %5272 = vmatprep.mubr.msk.bf16.mxu0 %vm1095_vm1, %v6488_v46 }
 0x444   : > { %v1094_v51 = vpop.permute.xlu1 %1093 }
 0x445   : > { %v1106_v53 = vsel %vm1095_vm1, %v1094_v51, 0 }
 0x447   : > { %v1092_v47 = vpop.permute.xlu0 %1091 }
 0x448   : > { %5584 = vmatprep.subr.msk.bf16.mxu0 %vm1095_vm1, %v1092_v47  ;;  %v1103_v50 = vsel %vm1095_vm1, %v1092_v47, 0 }
 0x449   : > { %5269 = vmatpush3.bf16.xpose.msra.mxu0 %v1103_v50 }
 0x44a   : > { %5585 = vmatprep.subr.msk.bf16.mxu0 %vm1095_vm1, %v1094_v51 }
 0x451   : > { %5271 = vmatpush3.bf16.xpose.msra.mxu0 %v1106_v53 }
 0x458   : > { %5273 = vmatmul.mubr.msk.bf16.vlgmr.msra.gmra.mrb[4].mxu0 %vm1095_vm1, %v6484_v42 }
 0x52b   : > { %v5274_v55 = vpop.f32.mrb[4].mxu0 }
 0x52c   : > { %v1142_v57 = vpop.f32.mrb[5].mxu0  ;;  %v1163_v62 = vsel %vm1156_vm2, %v5274_v55, -inf }
 0x52d   : > { %v5275_v58 = vpop.f32.mrb[6].mxu0  ;;  %v1157_v59 = vsel %vm1156_vm2, %v1142_v57, -inf }
 0x52e   : > { %1158 = vmax.xlane.f32.xlu1 %v1157_v59  ;;  %v1145_v60 = vpop.f32.mrb[7].mxu0 }
 0x52f   : > { %v1160_v61 = vsel %vm1156_vm2, %v1145_v60, -inf }
 0x530   : > { %1161 = vmax.xlane.f32.xlu0 %v1160_v61 }
 0x534   : > { %1164 = vmax.xlane.f32.xlu0 %v1163_v62 }
 0x5bb   : > { %v1159_v63 = vpop.xlane.xlu1 %1158 }
 0x5bc   : > { %v1166_v2 = vsub.f32 %v1142_v57, %v1159_v63 }
 0x5bd   : > { %v1162_v0 = vpop.xlane.xlu0 %1161 }
 0x5be   : > { %v1167_v1 = vsub.f32 %v1145_v60, %v1162_v0  ;;  %v1169_v6 = vmul.f32 1.442695, %v1166_v2 }
 0x5c0   : > { %v1171_v3 = vmul.f32 1.442695, %v1167_v1 }
 0x5c1   : > { %v1165_v4 = vpop.xlane.xlu0 %1164 }
 0x5c2   : > { %5796 = vpow2.f32 %v1171_v3  ;;  %v1168_v5 = vsub.f32 %v5274_v55, %v1165_v4 }
 0x5c4   : > { %v1173_v7 = vmul.f32 1.442695, %v1168_v5 }
 0x5c6   : > { %5798 = vpow2.f32 %v1173_v7 }
 0x5c7   : > { %5800 = vpow2.f32 %v1169_v6 }
 0x5cc   : > { %v5797_v8 = vpop.eup %5796 }
 0x5cd   : > { %v1178_v9 = vsel %vm1156_vm2, %v5797_v8, 0.0 }
 0x5ce   : > { %1179 = vadd.xlane.f32.xlu0 %v1178_v9 }
 0x5d0   : > { %v5799_v10 = vpop.eup %5798 }
 0x5d1   : > { %v1181_v11 = vsel %vm1156_vm2, %v5799_v10, 0.0  ;;  %v5801_v12 = vpop.eup %5800 }
 0x5d2   : > { %1182 = vadd.xlane.f32.xlu1 %v1181_v11  ;;  %v1175_v13 = vsel %vm1156_vm2, %v5801_v12, 0.0 }
 0x5d6   : > { %1176 = vadd.xlane.f32.xlu1 %v1175_v13 }
 0x5e4   : > { %1192 = vrot.lane.b32.xlu0 %v6488_v46, %s7384_s4 }
 0x5e7   : > { %1194 = vrot.lane.b32.xlu1 %v6484_v42, %s7384_s4 }
 0x5e8   : > { %1255 = vrot.lane.b32.xlu0 %v6488_v46, %s7386_s27 }
 0x5eb   : > { %1259 = vrot.lane.b32.xlu1 %v6488_v46, %s7388_s17 }
 0x5ef   : > { %1261 = vrot.lane.b32.xlu1 %v6484_v42, %s7388_s17 }
 0x5f3   : > { %1257 = vrot.lane.b32.xlu1 %v6484_v42, %s7386_s27 }
 0x65b   : > { %v1180_v14 = vpop.xlane.xlu0 %1179 }
 0x65f   : > { %v1183_v15 = vpop.xlane.xlu1 %1182  ;;  %v1193_v16 = vpop.permute.xlu0 %1192 }
 0x660   : > { %5276 = vmatprep.subr.bf16.mxu0 %v1193_v16  ;;  %5802 = vrcp.f32 %v1183_v15 }
 0x661   : > { %5277 = vmatpush3.bf16.msra.mxu0 %v1193_v16  ;;  %5804 = vrcp.f32 %v1180_v14 }
 0x663   : > { %v1177_v17 = vpop.xlane.xlu1 %1176  ;;  %v1256_v29 = vpop.permute.xlu0 %1255 }
 0x664   : > { %5806 = vrcp.f32 %v1177_v17 }
 0x667   : > { %v1195_v18 = vpop.permute.xlu1 %1194 }
 0x668   : > { %5586 = vmatprep.subr.msk.bf16.mxu0 %vm1203_vm3, %v1195_v18  ;;  %v1205_v19 = vsel %vm1203_vm3, %v1195_v18, 0 }
 0x669   : > { %5279 = vmatpush3.bf16.msra.mxu0 %v1205_v19 }
 0x66a   : > { %v5803_v20 = vpop.eup %5802 }
 0x66b   : > { %v1260_v21 = vpop.permute.xlu1 %1259  ;;  %v5805_v22 = vpop.eup %5804  ;;  %v1189_v24 = vmul.f32 %v5803_v20, %v5799_v10 }
 0x66c   : > { %5587 = vmatprep.subr.msk.bf16.mxu0 %vm1095_vm1, %v1260_v21  ;;  %v1188_v26 = vmul.f32 %v5805_v22, %v5797_v8  ;;  %v1270_v30 = vsel %vm1095_vm1, %v1260_v21, 0 }
 0x66d   : > { %v1191_v28 = vpack.c.bf16 %v1189_v24, %v1189_v24 }
 0x66e   : > { %v5807_v23 = vpop.eup %5806 }
 0x66f   : > { %v1187_v25 = vmul.f32 %v5807_v23, %v5801_v12  ;;  %v1262_v31 = vpop.permute.xlu1 %1261 }
 0x670   : > { %v1273_v32 = vsel %vm1095_vm1, %v1262_v31, 0 }
 0x671   : > { %v1190_v27 = vpack.c.bf16 %v1188_v26, %v1187_v25 }
 0x673   : > { %5280 = vmatprep.mubr.msk.bf16.mxu0 %vm1156_vm2, %v1190_v27  ;;  %v1258_v33 = vpop.permute.xlu1 %1257 }
 0x674   : > { %5281 = vmatmul.mubr.msk.bf16.vlgmr.msra.gmra.mrb[8].mxu0 %vm1156_vm2, %v1191_v28 }
 0x675   : > { %5285 = vmatpush3.bf16.xpose.msra.mxu0 %v1270_v30  ;;  %5288 = vmatprep.mubr.msk.bf16.mxu0 %vm1095_vm1, %v1256_v29 }
 0x676   : > { %5588 = vmatprep.subr.msk.bf16.mxu0 %vm1095_vm1, %v1262_v31 }
 0x67d   : > { %5287 = vmatpush3.bf16.xpose.msra.mxu0 %v1273_v32 }
 0x684   : > { %5289 = vmatmul.mubr.msk.bf16.vlgmr.msra.gmra.mrb[12].mxu0 %vm1095_vm1, %v1258_v33 }
 0x747   : > { %v6528_v34 = vpop.f32.mrb[8].mxu0 }
 0x748   : > { %v6530_v35 = vpop.f32.mrb[9].mxu0 }
 0x749   : > { %v5283_v36 = vpop.f32.mrb[10].mxu0 }
 0x74a   : > { %v6532_v37 = vpop.f32.mrb[11].mxu0 }
 0x757   : > { %v5290_v38 = vpop.f32.mrb[12].mxu0 }
 0x758   : > { %v1309_v40 = vpop.f32.mrb[13].mxu0  ;;  %v1329_v47 = vsel %vm1156_vm2, %v5290_v38, -inf }
 0x759   : > { %v5291_v41 = vpop.f32.mrb[14].mxu0  ;;  %v1323_v43 = vsel %vm1156_vm2, %v1309_v40, -inf }
 0x75a   : > { %1324 = vmax.xlane.f32.xlu0 %v1323_v43  ;;  %v1312_v44 = vpop.f32.mrb[15].mxu0 }
 0x75b   : > { %v1326_v45 = vsel %vm1156_vm2, %v1312_v44, -inf }
 0x75c   : > { %1327 = vmax.xlane.f32.xlu1 %v1326_v45 }
 0x75e   : > { %1330 = vmax.xlane.f32.xlu0 %v1329_v47 }
 0x7e7   : > { %v1325_v50 = vpop.xlane.xlu0 %1324 }
 0x7e8   : > { %v1332_v51 = vsub.f32 %v1309_v40, %v1325_v50 }
 0x7e9   : > { %v1328_v53 = vpop.xlane.xlu1 %1327 }
 0x7ea   : > { %v1335_v55 = vmul.f32 1.442695, %v1332_v51  ;;  %v1333_v57 = vsub.f32 %v1312_v44, %v1328_v53 }
 0x7eb   : > { %v1331_v58 = vpop.xlane.xlu0 %1330 }
 0x7ec   : > { %5808 = vpow2.f32 %v1335_v55  ;;  %v1337_v59 = vmul.f32 1.442695, %v1333_v57  ;;  %v1334_v60 = vsub.f32 %v5290_v38, %v1331_v58 }
 0x7ee   : > { %5810 = vpow2.f32 %v1337_v59  ;;  %v1339_v61 = vmul.f32 1.442695, %v1334_v60 }
 0x7f0   : > { %5812 = vpow2.f32 %v1339_v61 }
 0x7f6   : > { %v5809_v62 = vpop.eup %5808 }
 0x7f7   : > { %v1341_v63 = vsel %vm1156_vm2, %v5809_v62, 0.0 }
 0x7f8   : > { %v5811_v0 = vpop.eup %5810  ;;  %1342 = vadd.xlane.f32.xlu0 %v1341_v63 }
 0x7f9   : > { %v1344_v3 = vsel %vm1156_vm2, %v5811_v0, 0.0 }
 0x7fa   : > { %v5813_v1 = vpop.eup %5812 }
 0x7fb   : > { %v1347_v2 = vsel %vm1156_vm2, %v5813_v1, 0.0 }
 0x7fc   : > { %1348 = vadd.xlane.f32.xlu1 %v1347_v2  ;;  %1345 = vadd.xlane.f32.xlu0 %v1344_v3 }
 0x80d   : > { %1360 = vrot.lane.b32.xlu1 %v6484_v42, %s7382_s29 }
 0x811   : > { %1424 = vrot.lane.b32.xlu1 %v6488_v46, %s7380_s30 }
 0x812   : > { %1358 = vrot.lane.b32.xlu0 %v6488_v46, %s7382_s29 }
 0x815   : > { %1426 = vrot.lane.b32.xlu1 %v6484_v42, %s7380_s30  ;;  %s7443_s30 = smov 104  }
 0x816   : > { %1420 = vrot.lane.b32.xlu0 %v6488_v46, %s7378_s26 }
 0x819   : > { %1422 = vrot.lane.b32.xlu1 %v6484_v42, %s7378_s26  ;;  %s7444_s26 = smov 40  }
 0x885   : > { %v1343_v4 = vpop.xlane.xlu0 %1342 }
 0x886   : > { %5814 = vrcp.f32 %v1343_v4 }
 0x889   : > { %v1346_v5 = vpop.xlane.xlu0 %1345  ;;  %v1349_v6 = vpop.xlane.xlu1 %1348 }
 0x88a   : > { %5816 = vrcp.f32 %v1346_v5 }
 0x88b   : > { %5818 = vrcp.f32 %v1349_v6 }
 0x88d   : > { %v1359_v7 = vpop.permute.xlu0 %1358  ;;  %v1361_v8 = vpop.permute.xlu1 %1360 }
 0x88e   : > { %5292 = vmatprep.subr.bf16.mxu1 %v1359_v7  ;;  %v1370_v10 = vsel %vm1203_vm3, %v1361_v8, 0 }
 0x88f   : > { %5293 = vmatpush3.bf16.msra.mxu1 %v1359_v7 }
 0x890   : > { %5589 = vmatprep.subr.msk.bf16.mxu1 %vm1203_vm3, %v1361_v8  ;;  %v5815_v9 = vpop.eup %5814 }
 0x891   : > { %v1425_v11 = vpop.permute.xlu1 %1424  ;;  %v1353_v14 = vmul.f32 %v5815_v9, %v5809_v62  ;;  %v1421_v19 = vpop.permute.xlu0 %1420 }
 0x892   : > { %v1435_v20 = vsel %vm1095_vm1, %v1425_v11, 0 }
 0x893   : > { %5295 = vmatpush3.bf16.msra.mxu1 %v1370_v10 }
 0x894   : > { %v5817_v12 = vpop.eup %5816  ;;  %5590 = vmatprep.subr.msk.bf16.mxu1 %vm1095_vm1, %v1425_v11 }
 0x895   : > { %v5819_v13 = vpop.eup %5818  ;;  %v1354_v15 = vmul.f32 %v5817_v12, %v5811_v0  ;;  %v1427_v21 = vpop.permute.xlu1 %1426 }
 0x896   : > { %v1355_v16 = vmul.f32 %v5819_v13, %v5813_v1  ;;  %v1438_v22 = vsel %vm1095_vm1, %v1427_v21, 0 }
 0x897   : > { %v1356_v17 = vpack.c.bf16 %v1354_v15, %v1353_v14 }
 0x898   : > { %v1357_v18 = vpack.c.bf16 %v1355_v16, %v1355_v16 }
 0x899   : > { %5296 = vmatprep.mubr.msk.bf16.mxu1 %vm1156_vm2, %v1356_v17  ;;  %v1423_v23 = vpop.permute.xlu1 %1422 }
 0x89a   : > { %5297 = vmatmul.mubr.msk.bf16.vlgmr.msra.gmra.mrb[0].mxu1 %vm1156_vm2, %v1357_v18 }
 0x89b   : > { %5304 = vmatprep.mubr.msk.bf16.mxu1 %vm1095_vm1, %v1421_v19 }
 0x89c   : > { %5301 = vmatpush3.bf16.xpose.msra.mxu1 %v1435_v20 }
 0x89d   : > { %5591 = vmatprep.subr.msk.bf16.mxu1 %vm1095_vm1, %v1427_v21 }
 0x8a4   : > { %5303 = vmatpush3.bf16.xpose.msra.mxu1 %v1438_v22 }
 0x8ab   : > { %5305 = vmatmul.mubr.msk.bf16.vlgmr.msra.gmra.mrb[4].mxu1 %vm1095_vm1, %v1423_v23 }
 0x96d   : > { %v6562_v24 = vpop.f32.mrb[0].mxu1 }
 0x96e   : > { %v6564_v25 = vpop.f32.mrb[1].mxu1 }
 0x96f   : > { %v5299_v26 = vpop.f32.mrb[2].mxu1 }
 0x970   : > { %v6566_v27 = vpop.f32.mrb[3].mxu1 }
 0x971   : > { %v5697_v28 = vpack.i.bf16 %v6566_v27, %v6564_v25 }
 0x97e   : > { %v5306_v29 = vpop.f32.mrb[4].mxu1 }
 0x97f   : > { %v1474_v30 = vpop.f32.mrb[5].mxu1  ;;  %v1494_v38 = vsel %vm1156_vm2, %v5306_v29, -inf }
 0x980   : > { %v5307_v31 = vpop.f32.mrb[6].mxu1  ;;  %v1488_v32 = vsel %vm1156_vm2, %v1474_v30, -inf }
 0x981   : > { %1489 = vmax.xlane.f32.xlu0 %v1488_v32  ;;  %v1477_v33 = vpop.f32.mrb[7].mxu1 }
 0x982   : > { %v1491_v36 = vsel %vm1156_vm2, %v1477_v33, -inf }
 0x983   : > { %1492 = vmax.xlane.f32.xlu1 %v1491_v36 }
 0x985   : > { %1495 = vmax.xlane.f32.xlu0 %v1494_v38 }
 0xa0e   : > { %v1490_v40 = vpop.xlane.xlu0 %1489 }
 0xa0f   : > { %v1497_v41 = vsub.f32 %v1474_v30, %v1490_v40 }
 0xa10   : > { %v1493_v43 = vpop.xlane.xlu1 %1492 }
 0xa11   : > { %v1500_v44 = vmul.f32 1.442695, %v1497_v41  ;;  %v1498_v45 = vsub.f32 %v1477_v33, %v1493_v43 }
 0xa12   : > { %v1496_v47 = vpop.xlane.xlu0 %1495 }
 0xa13   : > { %5820 = vpow2.f32 %v1500_v44  ;;  %v1502_v50 = vmul.f32 1.442695, %v1498_v45  ;;  %v1499_v51 = vsub.f32 %v5306_v29, %v1496_v47 }
 0xa15   : > { %5822 = vpow2.f32 %v1502_v50  ;;  %v1504_v53 = vmul.f32 1.442695, %v1499_v51 }
 0xa17   : > { %5824 = vpow2.f32 %v1504_v53 }
 0xa1d   : > { %v5821_v55 = vpop.eup %5820 }
 0xa1e   : > { %v1506_v57 = vsel %vm1156_vm2, %v5821_v55, 0.0 }
 0xa1f   : > { %v5823_v58 = vpop.eup %5822  ;;  %1507 = vadd.xlane.f32.xlu0 %v1506_v57 }
 0xa20   : > { %v1509_v61 = vsel %vm1156_vm2, %v5823_v58, 0.0 }
 0xa21   : > { %v5825_v59 = vpop.eup %5824 }
 0xa22   : > { %v1512_v60 = vsel %vm1156_vm2, %v5825_v59, 0.0 }
 0xa23   : > { %1513 = vadd.xlane.f32.xlu1 %v1512_v60  ;;  %1510 = vadd.xlane.f32.xlu0 %v1509_v61 }
 0xa34   : > { %1525 = vrot.lane.b32.xlu1 %v6484_v42, %s7376_s28 }
 0xa38   : > { %1589 = vrot.lane.b32.xlu1 %v6488_v46, %s7372_s5 }
 0xa39   : > { %1523 = vrot.lane.b32.xlu0 %v6488_v46, %s7376_s28  ;;  %s7441_s28 = smov 48  }
 0xa3c   : > { %1591 = vrot.lane.b32.xlu1 %v6484_v42, %s7372_s5  ;;  %s7374_s5 = smov 24  }
 0xa3d   : > { %1585 = vrot.lane.b32.xlu0 %v6488_v46, %s7370_s6 }
 0xa40   : > { %1587 = vrot.lane.b32.xlu1 %v6484_v42, %s7370_s6  ;;  %s7440_s6 = smov 112  }
 0xaac   : > { %v1508_v62 = vpop.xlane.xlu0 %1507 }
 0xaad   : > { %5826 = vrcp.f32 %v1508_v62 }
 0xab0   : > { %v1511_v63 = vpop.xlane.xlu0 %1510  ;;  %v1514_v0 = vpop.xlane.xlu1 %1513 }
 0xab1   : > { %5828 = vrcp.f32 %v1511_v63 }
 0xab2   : > { %5830 = vrcp.f32 %v1514_v0 }
 0xab4   : > { %v1524_v1 = vpop.permute.xlu0 %1523  ;;  %v1526_v2 = vpop.permute.xlu1 %1525 }
 0xab5   : > { %5308 = vmatprep.subr.bf16.mxu0 %v1524_v1  ;;  %v1535_v4 = vsel %vm1203_vm3, %v1526_v2, 0 }
 0xab6   : > { %5309 = vmatpush3.bf16.msra.mxu0 %v1524_v1 }
 0xab7   : > { %5592 = vmatprep.subr.msk.bf16.mxu0 %vm1203_vm3, %v1526_v2  ;;  %v5827_v3 = vpop.eup %5826 }
 0xab8   : > { %v1590_v5 = vpop.permute.xlu1 %1589  ;;  %v1518_v8 = vmul.f32 %v5827_v3, %v5821_v55  ;;  %v1586_v13 = vpop.permute.xlu0 %1585 }
 0xab9   : > { %v1600_v14 = vsel %vm1095_vm1, %v1590_v5, 0 }
 0xaba   : > { %5311 = vmatpush3.bf16.msra.mxu0 %v1535_v4  ;;  %v5744_v4 = vld [vmem:[%s7335_s12] sm:$0xff]  }
 0xabb   : > { %v5829_v6 = vpop.eup %5828  ;;  %5593 = vmatprep.subr.msk.bf16.mxu0 %vm1095_vm1, %v1590_v5  ;;  %v5745_v5 = vld [vmem:[%s7335_s12 + $0x8] sm:$0xff]  }
 0xabc   : > { %v5831_v7 = vpop.eup %5830  ;;  %v1519_v9 = vmul.f32 %v5829_v6, %v5823_v58  ;;  %v1592_v15 = vpop.permute.xlu1 %1591 }
 0xabd   : > { %v1520_v10 = vmul.f32 %v5831_v7, %v5825_v59  ;;  %v1603_v16 = vsel %vm1095_vm1, %v1592_v15, 0 }
 0xabe   : > { %v1521_v11 = vpack.c.bf16 %v1519_v9, %v1518_v8 }
 0xabf   : > { %v1522_v12 = vpack.c.bf16 %v1520_v10, %v1520_v10 }
 0xac0   : > { %5312 = vmatprep.mubr.msk.bf16.mxu0 %vm1156_vm2, %v1521_v11  ;;  %v1588_v17 = vpop.permute.xlu1 %1587 }
 0xac1   : > { %5313 = vmatmul.mubr.msk.bf16.vlgmr.msra.gmra.mrb[16].mxu0 %vm1156_vm2, %v1522_v12 }
 0xac2   : > { %5320 = vmatprep.mubr.msk.bf16.mxu0 %vm1095_vm1, %v1586_v13 }
 0xac3   : > { %5317 = vmatpush3.bf16.xpose.msra.mxu0 %v1600_v14 }
 0xac4   : > { %5594 = vmatprep.subr.msk.bf16.mxu0 %vm1095_vm1, %v1592_v15 }
 0xacb   : > { %5319 = vmatpush3.bf16.xpose.msra.mxu0 %v1603_v16 }
 0xad2   : > { %5321 = vmatmul.mubr.msk.bf16.vlgmr.msra.gmra.mrb[20].mxu0 %vm1095_vm1, %v1588_v17 }
 0xb94   : > { %v5314_v18 = vpop.f32.mrb[16].mxu0 }
 0xb95   : > { %v1571_v19 = vpop.f32.mrb[17].mxu0 }
 0xb96   : > { %v5315_v20 = vpop.f32.mrb[18].mxu0 }
 0xb97   : > { %v1574_v21 = vpop.f32.mrb[19].mxu0 }
 0xb98   : > { %v5702_v22 = vpack.i.bf16 %v1574_v21, %v1571_v19 }
 0xba5   : > { %v5322_v23 = vpop.f32.mrb[20].mxu0 }
 0xba6   : > { %v1639_v26 = vpop.f32.mrb[21].mxu0  ;;  %v1659_v33 = vsel %vm1156_vm2, %v5322_v23, -inf }
 0xba7   : > { %v5323_v29 = vpop.f32.mrb[22].mxu0  ;;  %v1653_v30 = vsel %vm1156_vm2, %v1639_v26, -inf }
 0xba8   : > { %1654 = vmax.xlane.f32.xlu0 %v1653_v30  ;;  %v1642_v31 = vpop.f32.mrb[23].mxu0 }
 0xba9   : > { %v1656_v32 = vsel %vm1156_vm2, %v1642_v31, -inf }
 0xbaa   : > { %1657 = vmax.xlane.f32.xlu1 %v1656_v32 }
 0xbac   : > { %1660 = vmax.xlane.f32.xlu0 %v1659_v33 }
 0xc35   : > { %v1655_v36 = vpop.xlane.xlu0 %1654 }
 0xc36   : > { %v1662_v38 = vsub.f32 %v1639_v26, %v1655_v36 }
 0xc37   : > { %v1658_v40 = vpop.xlane.xlu1 %1657 }
 0xc38   : > { %v1665_v41 = vmul.f32 1.442695, %v1662_v38  ;;  %v1663_v43 = vsub.f32 %v1642_v31, %v1658_v40 }
 0xc39   : > { %v1661_v44 = vpop.xlane.xlu0 %1660 }
 0xc3a   : > { %5832 = vpow2.f32 %v1665_v41  ;;  %v1667_v45 = vmul.f32 1.442695, %v1663_v43  ;;  %v1664_v47 = vsub.f32 %v5322_v23, %v1661_v44 }
 0xc3c   : > { %5834 = vpow2.f32 %v1667_v45  ;;  %v1669_v50 = vmul.f32 1.442695, %v1664_v47 }
 0xc3e   : > { %5836 = vpow2.f32 %v1669_v50 }
 0xc44   : > { %v5833_v51 = vpop.eup %5832 }
 0xc45   : > { %v1671_v53 = vsel %vm1156_vm2, %v5833_v51, 0.0 }
 0xc46   : > { %v5835_v55 = vpop.eup %5834  ;;  %1672 = vadd.xlane.f32.xlu0 %v1671_v53 }
 0xc47   : > { %v1674_v59 = vsel %vm1156_vm2, %v5835_v55, 0.0 }
 0xc48   : > { %v5837_v57 = vpop.eup %5836 }
 0xc49   : > { %v1677_v58 = vsel %vm1156_vm2, %v5837_v57, 0.0 }
 0xc4a   : > { %1678 = vadd.xlane.f32.xlu1 %v1677_v58  ;;  %1675 = vadd.xlane.f32.xlu0 %v1674_v59 }
 0xc5b   : > { %1690 = vrot.lane.b32.xlu1 %v6484_v42, %s7368_s0 }
 0xc5f   : > { %5698 = vrot.lane.b32.xlu1 %v5697_v28, %s7366_s3 }
 0xc60   : > { %1688 = vrot.lane.b32.xlu0 %v6488_v46, %s7368_s0  ;;  %s7442_s0 = smov 72  }
 0xc63   : > { %1757 = vrot.lane.b32.xlu1 %v6562_v24, %s7366_s3  ;;  %s7445_s3 = smov 8  }
 0xc64   : > { %5703 = vrot.lane.b32.xlu0 %v5702_v22, %s7364_s25 }
 0xc67   : > { %1769 = vrot.lane.b32.xlu1 %v5314_v18, %s7364_s25  ;;  %s7446_s25 = smov 16  }
 0xcd3   : > { %v1673_v60 = vpop.xlane.xlu0 %1672 }
 0xcd4   : > { %5838 = vrcp.f32 %v1673_v60 }
 0xcd7   : > { %v1676_v42 = vpop.xlane.xlu0 %1675  ;;  %v1679_v61 = vpop.xlane.xlu1 %1678 }
 0xcd8   : > { %5840 = vrcp.f32 %v1676_v42 }
 0xcd9   : > { %5842 = vrcp.f32 %v1679_v61 }
 0xcdb   : > { %v1689_v62 = vpop.permute.xlu0 %1688  ;;  %v1691_v25 = vpop.permute.xlu1 %1690 }
 0xcdc   : > { %5324 = vmatprep.subr.bf16.mxu1 %v1689_v62  ;;  %v1700_v24 = vsel %vm1203_vm3, %v1691_v25, 0 }
 0xcdd   : > { %5325 = vmatpush3.bf16.msra.mxu1 %v1689_v62 }
 0xcde   : > { %5595 = vmatprep.subr.msk.bf16.mxu1 %vm1203_vm3, %v1691_v25  ;;  %v5839_v46 = vpop.eup %5838 }
 0xcdf   : > { %v1683_v63 = vmul.f32 %v5839_v46, %v5833_v51  ;;  %v5699_v11 = vpop.permute.xlu1 %5698  ;;  %v5704_v13 = vpop.permute.xlu0 %5703 }
 0xce0   : > { %v5701_v14 = vunpack.i.h.bf16 %v5699_v11  ;;  %v5700_v15 = vunpack.i.l.bf16 %v5699_v11  ;;  %v5706_v17 = vunpack.i.h.bf16 %v5704_v13  ;;  %v5705_v18 = vunpack.i.l.bf16 %v5704_v13 }
 0xce1   : > { %5327 = vmatpush3.bf16.msra.mxu1 %v1700_v24 }
 0xce2   : > { %v5841_v27 = vpop.eup %5840  ;;  %5332 = vmatprep.subr.bf16.mxu1 %v5744_v4  ;;  %v1787_v19 = vsel %vm1095_vm1, %v6532_v37, %v5701_v14  ;;  %v1786_v20 = vsel %vm1095_vm1, %v6530_v35, %v5700_v15  ;;  %v4914_v15 = vld [vmem:[%s7337_s14] ss:$0 sm:$0xff] }
 0xce3   : > { %v5843_v28 = vpop.eup %5842  ;;  %v1684_v0 = vmul.f32 %v5841_v27, %v5835_v55  ;;  %v1758_v12 = vpop.permute.xlu1 %1757  ;;  %v1790_v32 = vsel %vm1789_vm4, %v1786_v20, %v5705_v18  ;;  %v1791_v33 = vsel %vm1789_vm4, %v1787_v19, %v5706_v17 }
 0xce4   : > { %v1685_v1 = vmul.f32 %v5843_v28, %v5837_v57  ;;  %v1788_v22 = vsel %vm1095_vm1, %v6528_v34, %v1758_v12  ;;  %v4909_v34 = vld [vmem:[%s7336_s13] ss:$0 sm:$0xff] }
 0xce5   : > { %v1686_v2 = vpack.c.bf16 %v1684_v0, %v1683_v63 }
 0xce6   : > { %v1687_v3 = vpack.c.bf16 %v1685_v1, %v1685_v1 }
 0xce7   : > { %5328 = vmatprep.mubr.msk.bf16.mxu1 %vm1156_vm2, %v1686_v2  ;;  %v1770_v16 = vpop.permute.xlu1 %1769  ;;  %v5746_v2 = vld [vmem:[%s7339_s16] sm:$0xff]  }
 0xce8   : > { %5329 = vmatmul.mubr.msk.bf16.vlgmr.msra.gmra.mrb[8].mxu1 %vm1156_vm2, %v1687_v3  ;;  %v1792_v26 = vsel %vm1789_vm4, %v1788_v22, %v1770_v16  ;;  %v5747_v3 = vld [vmem:[%s7339_s16 + $0x8] sm:$0xff]   ;;  %5340 = vmatprep.subr.bf16.mxu0 %v5746_v2 }
 0xce9   : > { %5333 = vmatpush3.bf16.msra.mxu1 %v5744_v4  ;;  %5341 = vmatpush3.bf16.msra.mxu0 %v5746_v2 }
 0xcea   : > { %5334 = vmatprep.subr.bf16.mxu1 %v5745_v5  ;;  %5342 = vmatprep.subr.bf16.mxu0 %v5747_v3 }
 0xced   : > { %5335 = vmatpush3.bf16.msra.mxu1 %v5745_v5  ;;  %5343 = vmatpush3.bf16.msra.mxu0 %v5747_v3 }
 0xdbb   : > { %v5330_v6 = vpop.f32.mrb[8].mxu1 }
 0xdbc   : > { %1781 = vrot.lane.b32.xlu1 %v5330_v6, %s7374_s5  ;;  %v1736_v7 = vpop.f32.mrb[9].mxu1 }
 0xdbd   : > { %v5331_v8 = vpop.f32.mrb[10].mxu1 }
 0xdbe   : > { %v1739_v9 = vpop.f32.mrb[11].mxu1 }
 0xdbf   : > { %v5707_v10 = vpack.i.bf16 %v1739_v9, %v1736_v7 }
 0xdc1   : > { %5708 = vrot.lane.b32.xlu0 %v5707_v10, %s7374_s5  ;;  %s7439_s5 = smov 80  }
 0xe2e   : > { %v1782_v21 = vpop.permute.xlu1 %1781 }
 0xe2f   : > { %v1795_v31 = vsel %vm1156_vm2, %v1792_v26, %v1782_v21  ;;  %v4915_v21 = vld [vmem:[%s7338_s15] ss:$0 sm:$0xff] }
 0xe30   : > { %v1797_v38 = vpack.c.bf16 %v1795_v31, %v1795_v31 }
 0xe33   : > { %v5709_v23 = vpop.permute.xlu0 %5708 }
 0xe34   : > { %v5711_v29 = vunpack.i.h.bf16 %v5709_v23  ;;  %v5710_v30 = vunpack.i.l.bf16 %v5709_v23 }
 0xe36   : > { %v1793_v37 = vsel %vm1156_vm2, %v1790_v32, %v5710_v30  ;;  %v1794_v35 = vsel %vm1156_vm2, %v1791_v33, %v5711_v29  ;;  %v5748_v33 = vld [vmem:[%s7341_s18] sm:$0xff]  }
 0xe37   : > { %v1796_v36 = vpack.c.bf16 %v1794_v35, %v1793_v37  ;;  %5348 = vmatprep.subr.bf16.mxu1 %v5748_v33  ;;  %v5749_v37 = vld [vmem:[%s7341_s18 + $0x8] sm:$0xff]   ;;  %v5750_v35 = vld [vmem:[%s7341_s18 + $0x10] sm:$0xff]  }
 0xe39   : > { %5336 = vmatprep.mubr.msk.bf16.mxu1 %vm863_vm0, %v1796_v36  ;;  %v5751_v36 = vld [vmem:[%s7341_s18 + $0x18] sm:$0xff]  }
 0xe3a   : > { %5337 = vmatmul.mubr.msk.bf16.vlgmr.msra.gmra.mrb[12].mxu1 %vm863_vm0, %v1797_v38  ;;  %v5752_v38 = vld [vmem:[%s7341_s18 + $0x20] sm:$0xff]  }
 0xe3b   : > { %5349 = vmatpush3.bf16.msra.mxu1 %v5748_v33 }
 0xe3c   : > { %5350 = vmatprep.subr.bf16.mxu1 %v5749_v37 }
 0xe3f   : > { %5351 = vmatpush3.bf16.msra.mxu1 %v5749_v37 }
 0xe40   : > { %5352 = vmatprep.subr.bf16.mxu1 %v5750_v35 }
 0xe43   : > { %5353 = vmatpush3.bf16.msra.mxu1 %v5750_v35 }
 0xe44   : > { %5354 = vmatprep.subr.bf16.mxu1 %v5751_v36 }
 0xe47   : > { %5355 = vmatpush3.bf16.msra.mxu1 %v5751_v36 }
 0xe48   : > { %5356 = vmatprep.subr.bf16.mxu1 %v5752_v38 }
 0xe4b   : > { %5357 = vmatpush3.bf16.msra.mxu1 %v5752_v38 }
 0xf0d   : > { %v5338_v40 = vpop.f32.mrb[12].mxu1 }
 0xf0e   : > { %v1861_v41 = vpop.f32.mrb[13].mxu1  ;;  %v1870_v43 = vadd.f32 %v5338_v40, %v4909_v34  ;;  %v5754_v40 = vld [vmem:[%s7341_s18 + $0x30] sm:$0xff]  }
 0xf0f   : > { %v1862_v44 = vadd.f32 %v4909_v34, %v1861_v41  ;;  %v5339_v45 = vpop.f32.mrb[14].mxu1  ;;  %v5755_v41 = vld [vmem:[%s7341_s18 + $0x38] sm:$0xff]  }
 0xf10   : > { %v1864_v47 = vpop.f32.mrb[15].mxu1  ;;  %v6649_v53 = vadd.f32 %v1870_v43, %v6453_v54  ;;  %v4916_v43 = vld [vmem:[#allocation3] ss:$0 sm:$0xff] }
 0xf11   : > { %v6646_v50 = vadd.f32 %v1862_v44, %v6449_v52  ;;  %v1865_v51 = vadd.f32 %v4909_v34, %v1864_v47  ;;  %v5753_v34 = vld [vmem:[%s7341_s18 + $0x28] sm:$0xff]  }
 0xf12   : > { %v1886_v59 = vsel %vm863_vm0, %v6649_v53, 0.0  ;;  %5358 = vmatprep.subr.bf16.mxu1 %v5753_v34 }
 0xf13   : > { %v6652_v55 = vadd.f32 %v1865_v51, %v6457_v56  ;;  %v1880_v57 = vsel %vm863_vm0, %v6646_v50, 0.0  ;;  %5359 = vmatpush3.bf16.msra.mxu1 %v5753_v34 }
 0xf14   : > { %1881 = vadd.xlane.f32.xlu0 %v1880_v57  ;;  %5360 = vmatprep.subr.bf16.mxu1 %v5754_v40 }
 0xf15   : > { %v1883_v58 = vsel %vm863_vm0, %v6652_v55, 0.0 }
 0xf16   : > { %1884 = vadd.xlane.f32.xlu1 %v1883_v58 }
 0xf17   : > { %5361 = vmatpush3.bf16.msra.mxu1 %v5754_v40 }
 0xf18   : > { %1887 = vadd.xlane.f32.xlu0 %v1886_v59  ;;  %5362 = vmatprep.subr.bf16.mxu1 %v5755_v41 }
 0xf1b   : > { %5363 = vmatpush3.bf16.msra.mxu1 %v5755_v41 }
 0xfa1   : > { %v1882_v52 = vpop.xlane.xlu0 %1881 }
 0xfa2   : > { %v1889_v60 = vmul.f32 0.03125, %v1882_v52 }
 0xfa3   : > { %v1885_v42 = vpop.xlane.xlu1 %1884 }
 0xfa4   : > { %v1892_v54 = vsub.f32 %v6646_v50, %v1889_v60  ;;  %v1890_v61 = vmul.f32 0.03125, %v1885_v42 }
 0xfa5   : > { %v1888_v56 = vpop.xlane.xlu0 %1887 }
 0xfa6   : > { %v1893_v62 = vsub.f32 %v6652_v55, %v1890_v61  ;;  %v1891_v25 = vmul.f32 0.03125, %v1888_v56  ;;  %v1895_v46 = vmul.f32 %v1892_v54, %v1892_v54 }
 0xfa8   : > { %v1894_v24 = vsub.f32 %v6649_v53, %v1891_v25  ;;  %v1898_v27 = vsel %vm863_vm0, %v1895_v46, 0.0  ;;  %v1896_v28 = vmul.f32 %v1893_v62, %v1893_v62 }
 0xfa9   : > { %1899 = vadd.xlane.f32.xlu0 %v1898_v27 }
 0xfaa   : > { %v1897_v63 = vmul.f32 %v1894_v24, %v1894_v24  ;;  %v1901_v0 = vsel %vm863_vm0, %v1896_v28, 0.0 }
 0xfac   : > { %v1904_v1 = vsel %vm863_vm0, %v1897_v63, 0.0 }
 0xfad   : > { %1902 = vadd.xlane.f32.xlu0 %v1901_v0  ;;  %1905 = vadd.xlane.f32.xlu1 %v1904_v1 }
0x1036   : > { %v1900_v4 = vpop.xlane.xlu0 %1899 }
0x1037   : > { %v1907_v5 = vmul.f32 0.03125, %v1900_v4 }
0x1039   : > { %v1910_v6 = vadd.f32 1e-05, %v1907_v5 }
0x103a   : > { %v1906_v7 = vpop.xlane.xlu1 %1905  ;;  %v1903_v8 = vpop.xlane.xlu0 %1902 }
0x103b   : > { %5844 = vrsqrt.f32 %v1910_v6  ;;  %v1909_v9 = vmul.f32 0.03125, %v1906_v7  ;;  %v1908_v10 = vmul.f32 0.03125, %v1903_v8 }
0x103d   : > { %v1912_v11 = vadd.f32 1e-05, %v1909_v9  ;;  %v1911_v12 = vadd.f32 1e-05, %v1908_v10 }
0x103f   : > { %5846 = vrsqrt.f32 %v1912_v11 }
0x1040   : > { %5848 = vrsqrt.f32 %v1911_v12 }
0x1045   : > { %v5845_v13 = vpop.eup %5844 }
0x1046   : > { %v1916_v14 = vmul.f32 %v5845_v13, %v1892_v54 }
0x1048   : > { %v1925_v20 = vmul.f32 %v4914_v15, %v1916_v14 }
0x1049   : > { %v5847_v16 = vpop.eup %5846 }
0x104a   : > { %v5849_v17 = vpop.eup %5848  ;;  %v1918_v18 = vmul.f32 %v5847_v16, %v1894_v24  ;;  %v1934_v29 = vadd.f32 %v4915_v21, %v1925_v20  ;;  %v4921_v16 = vld [vmem:[#allocation6] ss:$0 sm:$0xff] }
0x104b   : > { %v1917_v19 = vmul.f32 %v5849_v17, %v1893_v62 }
0x104c   : > { %v1927_v22 = vmul.f32 %v4914_v15, %v1918_v18 }
0x104d   : > { %v1926_v23 = vmul.f32 %v4914_v15, %v1917_v19 }
0x104e   : > { %v1936_v26 = vadd.f32 %v4915_v21, %v1927_v22 }
0x104f   : > { %v1935_v30 = vadd.f32 %v4915_v21, %v1926_v23 }
0x1050   : > { %v1938_v31 = vpack.c.bf16 %v1936_v26, %v1936_v26 }
0x1051   : > { %v1937_v32 = vpack.c.bf16 %v1935_v30, %v1934_v29 }
0x1053   : > { %5344 = vmatprep.mubr.msk.bf16.mxu0 %vm863_vm0, %v1937_v32 }
0x1054   : > { %5345 = vmatmul.mubr.msk.bf16.vlgmr.msra.gmra.mrb[24].mxu0 %vm863_vm0, %v1938_v31 }
0x1127   : > { %v5346_v44 = vpop.f32.mrb[24].mxu0 }
0x1128   : > { %v2011_v45 = vadd.f32 %v5346_v44, %v4916_v43  ;;  %v2002_v47 = vpop.f32.mrb[25].mxu0 }
0x1129   : > { %v2003_v51 = vadd.f32 %v4916_v43, %v2002_v47  ;;  %v5347_v57 = vpop.f32.mrb[26].mxu0 }
0x112a   : > { %v2021_v58 = vmul.f32 0.044715, %v2011_v45  ;;  %v2005_v59 = vpop.f32.mrb[27].mxu0  ;;  %v2018_v7 = vmul.f32 0.5, %v2011_v45  ;;  %v5756_v57 = vld [vmem:[%s7333_s10 + $0x10] sm:$0xff]  }
0x112b   : > { %v2019_v52 = vmul.f32 0.044715, %v2003_v51  ;;  %v2006_v60 = vadd.f32 %v4916_v43, %v2005_v59  ;;  %v2016_v8 = vmul.f32 0.5, %v2003_v51  ;;  %5368 = vmatprep.subr.bf16.mxu0 %v5756_v57 }
0x112c   : > { %v2024_v42 = vmul.f32 %v2021_v58, %v2011_v45  ;;  %v5757_v58 = vld [vmem:[%s7333_s10 + $0x18] sm:$0xff]   ;;  %5369 = vmatpush3.bf16.msra.mxu0 %v5756_v57 }
0x112d   : > { %v2022_v54 = vmul.f32 %v2019_v52, %v2003_v51  ;;  %v2020_v61 = vmul.f32 0.044715, %v2006_v60  ;;  %v2017_v9 = vmul.f32 0.5, %v2006_v60  ;;  %5370 = vmatprep.subr.bf16.mxu0 %v5757_v58 }
0x112e   : > { %v2027_v56 = vmul.f32 %v2024_v42, %v2011_v45 }
0x112f   : > { %v2025_v62 = vmul.f32 %v2022_v54, %v2003_v51  ;;  %v2023_v25 = vmul.f32 %v2020_v61, %v2006_v60 }
0x1130   : > { %v2030_v46 = vadd.f32 %v2027_v56, %v2011_v45  ;;  %5371 = vmatpush3.bf16.msra.mxu0 %v5757_v58 }
0x1131   : > { %v2026_v24 = vmul.f32 %v2023_v25, %v2006_v60  ;;  %v2028_v27 = vadd.f32 %v2025_v62, %v2003_v51 }
0x1132   : > { %v2033_v28 = vmul.f32 0.7978846, %v2030_v46 }
0x1133   : > { %v2029_v63 = vadd.f32 %v2026_v24, %v2006_v60  ;;  %v2031_v0 = vmul.f32 0.7978846, %v2028_v27  ;;  %v4932_v24 = vld [vmem:[%s7437_s1 + $0x1] ss:$0 sm:$0xff] }
0x1134   : > { %5850 = vtanh.f32 %v2033_v28 }
0x1135   : > { %v2032_v1 = vmul.f32 0.7978846, %v2029_v63  ;;  %5852 = vtanh.f32 %v2031_v0 }
0x1137   : > { %5854 = vtanh.f32 %v2032_v1 }
0x113e   : > { %v5851_v2 = vpop.eup %5850 }
0x113f   : > { %v5853_v3 = vpop.eup %5852  ;;  %v2039_v4 = vadd.f32 1.0, %v5851_v2  ;;  %v4933_v2 = vld [vmem:[%s7438_s24 + $0x1] ss:$0 sm:$0xff] }
0x1140   : > { %v2037_v5 = vadd.f32 1.0, %v5853_v3 }
0x1141   : > { %v5855_v6 = vpop.eup %5854  ;;  %v2042_v11 = vmul.f32 %v2039_v4, %v2018_v7 }
0x1142   : > { %v2038_v10 = vadd.f32 1.0, %v5855_v6  ;;  %v2040_v12 = vmul.f32 %v2037_v5, %v2016_v8 }
0x1143   : > { %v2044_v15 = vpack.c.bf16 %v2042_v11, %v2042_v11  ;;  %v4939_v11 = vld [vmem:[%s7334_s11 + $0x1] ss:$0 sm:$0xff] }
0x1144   : > { %v2041_v13 = vmul.f32 %v2038_v10, %v2017_v9 }
0x1146   : > { %v2043_v14 = vpack.c.bf16 %v2041_v13, %v2040_v12 }
0x1148   : > { %5364 = vmatprep.mubr.bf16.mxu1 %v2043_v14 }
0x1149   : > { %5365 = vmatmul.mubr.bf16.vlgmr.msra.gmra.mrb[16].mxu1 %v2044_v15 }
0x121c   : > { %v5366_v17 = vpop.f32.mrb[16].mxu1 }
0x121d   : > { %v2150_v18 = vpop.f32.mrb[17].mxu1  ;;  %v2159_v19 = vadd.f32 %v5366_v17, %v4921_v16 }
0x121e   : > { %v2151_v20 = vadd.f32 %v4921_v16, %v2150_v18  ;;  %v5367_v21 = vpop.f32.mrb[18].mxu1 }
0x121f   : > { %v2153_v22 = vpop.f32.mrb[19].mxu1  ;;  %v6708_v29 = vadd.f32 %v2159_v19, %v6649_v53 }
0x1220   : > { %v6705_v23 = vadd.f32 %v2151_v20, %v6646_v50  ;;  %v2154_v26 = vadd.f32 %v4921_v16, %v2153_v22 }
0x1221   : > { %v2177_v33 = vsel %vm863_vm0, %v6708_v29, 0.0 }
0x1222   : > { %v6711_v30 = vadd.f32 %v2154_v26, %v6652_v55  ;;  %v2171_v31 = vsel %vm863_vm0, %v6705_v23, 0.0 }
0x1223   : > { %2172 = vadd.xlane.f32.xlu0 %v2171_v31 }
0x1224   : > { %v2174_v32 = vsel %vm863_vm0, %v6711_v30, 0.0 }
0x1225   : > { %2175 = vadd.xlane.f32.xlu1 %v2174_v32 }
0x1227   : > { %2178 = vadd.xlane.f32.xlu0 %v2177_v33 }
0x12b0   : > { %v2173_v50 = vpop.xlane.xlu0 %2172 }
0x12b1   : > { %v2180_v37 = vmul.f32 0.03125, %v2173_v50 }
0x12b2   : > { %v2176_v35 = vpop.xlane.xlu1 %2175 }
0x12b3   : > { %v2183_v53 = vsub.f32 %v6705_v23, %v2180_v37  ;;  %v2181_v36 = vmul.f32 0.03125, %v2176_v35 }
0x12b4   : > { %v2179_v55 = vpop.xlane.xlu0 %2178 }
0x12b5   : > { %v2184_v38 = vsub.f32 %v6711_v30, %v2181_v36  ;;  %v2182_v34 = vmul.f32 0.03125, %v2179_v55  ;;  %v2186_v40 = vmul.f32 %v2183_v53, %v2183_v53 }
0x12b7   : > { %v2185_v41 = vsub.f32 %v6708_v29, %v2182_v34  ;;  %v2189_v43 = vsel %vm863_vm0, %v2186_v40, 0.0  ;;  %v2187_v44 = vmul.f32 %v2184_v38, %v2184_v38 }
0x12b8   : > { %2190 = vadd.xlane.f32.xlu1 %v2189_v43 }
0x12b9   : > { %v2192_v45 = vsel %vm863_vm0, %v2187_v44, 0.0  ;;  %v2188_v47 = vmul.f32 %v2185_v41, %v2185_v41 }
0x12ba   : > { %2193 = vadd.xlane.f32.xlu0 %v2192_v45 }
0x12bb   : > { %v2195_v51 = vsel %vm863_vm0, %v2188_v47, 0.0 }
0x12bc   : > { %2196 = vadd.xlane.f32.xlu1 %v2195_v51 }
0x1345   : > { %v2191_v59 = vpop.xlane.xlu1 %2190 }
0x1346   : > { %v2198_v52 = vmul.f32 0.03125, %v2191_v59 }
0x1347   : > { %v2194_v60 = vpop.xlane.xlu0 %2193 }
0x1348   : > { %v2201_v42 = vadd.f32 1e-05, %v2198_v52  ;;  %v2199_v54 = vmul.f32 0.03125, %v2194_v60 }
0x1349   : > { %v2197_v61 = vpop.xlane.xlu1 %2196 }
0x134a   : > { %5856 = vrsqrt.f32 %v2201_v42  ;;  %v2202_v56 = vadd.f32 1e-05, %v2199_v54  ;;  %v2200_v62 = vmul.f32 0.03125, %v2197_v61 }
0x134c   : > { %5858 = vrsqrt.f32 %v2202_v56  ;;  %v2203_v25 = vadd.f32 1e-05, %v2200_v62 }
0x134e   : > { %5860 = vrsqrt.f32 %v2203_v25 }
0x1354   : > { %v5857_v46 = vpop.eup %5856 }
0x1355   : > { %v2207_v27 = vmul.f32 %v5857_v46, %v2183_v53 }
0x1356   : > { %v5859_v28 = vpop.eup %5858 }
0x1357   : > { %v2208_v63 = vmul.f32 %v5859_v28, %v2184_v38  ;;  %v2216_v0 = vmul.f32 %v4932_v24, %v2207_v27 }
0x1358   : > { %v5861_v1 = vpop.eup %5860 }
0x1359   : > { %v2209_v3 = vmul.f32 %v5861_v1, %v2185_v41  ;;  %v2217_v4 = vmul.f32 %v4932_v24, %v2208_v63  ;;  %v2225_v5 = vadd.f32 %v4933_v2, %v2216_v0 }
0x135b   : > { %v2226_v6 = vadd.f32 %v4933_v2, %v2217_v4  ;;  %v2218_v7 = vmul.f32 %v4932_v24, %v2209_v3 }
0x135d   : > { %v2228_v8 = vpack.c.bf16 %v2226_v6, %v2225_v5  ;;  %v2227_v9 = vadd.f32 %v4933_v2, %v2218_v7 }
0x135f   : > { %5372 = vmatprep.mubr.msk.bf16.mxu0 %vm863_vm0, %v2228_v8  ;;  %v2229_v10 = vpack.c.bf16 %v2227_v9, %v2227_v9 }
0x1361   : > { %5373 = vmatmul.mubr.msk.bf16.vlgmr.msra.gmra.mrb[28].mxu0 %vm863_vm0, %v2229_v10 }
0x1434   : > { %v5374_v12 = vpop.f32.mrb[28].mxu0 }
0x1435   : > { %v2304_v13 = vadd.f32 %v5374_v12, %v4939_v11  ;;  %v2295_v14 = vpop.f32.mrb[29].mxu0 }
0x1436   : > { %v5375_v15 = vpop.f32.mrb[30].mxu0  ;;  %v2296_v18 = vadd.f32 %v4939_v11, %v2295_v14 }
0x1437   : > { %v6742_v16 = vpack.c.bf16 %v2304_v13, %v2304_v13  ;;  %v2298_v17 = vpop.f32.mrb[31].mxu0 }
0x1438   : > { %v2299_v19 = vadd.f32 %v4939_v11, %v2298_v17 }
0x1439   : > { %2315 = vrot.lane.b32.xlu1 %v6742_v16, %s7390_s9 }
0x143a   : > { %v6746_v20 = vpack.c.bf16 %v2299_v19, %v2296_v18 }
0x143c   : > { %2313 = vrot.lane.b32.xlu0 %v6746_v20, %s7390_s9  ;;  %5380 = vmatprep.mubr.msk.bf16.mxu0 %vm1095_vm1, %v6746_v20  ;;  %s7447_s9 = smov 24  }
0x143d   : > { %2478 = vrot.lane.b32.xlu1 %v6746_v20, %s7388_s17 }
0x1440   : > { %2474 = vrot.lane.b32.xlu0 %v6746_v20, %s7386_s27 }
0x1441   : > { %2480 = vrot.lane.b32.xlu1 %v6742_v16, %s7388_s17 }
0x1445   : > { %2476 = vrot.lane.b32.xlu1 %v6742_v16, %s7386_s27  ;;  %s7451_s27 = smov 64  }
0x14ab   : > { %v2316_v21 = vpop.permute.xlu1 %2315 }
0x14ac   : > { %v2327_v37 = vsel %vm1095_vm1, %v2316_v21, 0 }
0x14ae   : > { %v2314_v22 = vpop.permute.xlu0 %2313 }
0x14af   : > { %v2479_v26 = vpop.permute.xlu1 %2478  ;;  %5596 = vmatprep.subr.msk.bf16.mxu0 %vm1095_vm1, %v2314_v22  ;;  %v2324_v31 = vsel %vm1095_vm1, %v2314_v22, 0 }
0x14b0   : > { %5377 = vmatpush3.bf16.xpose.msra.mxu0 %v2324_v31  ;;  %5599 = vmatprep.subr.msk.bf16.mxu1 %vm1095_vm1, %v2479_v26  ;;  %v2489_v32 = vsel %vm1095_vm1, %v2479_v26, 0 }
0x14b1   : > { %5597 = vmatprep.subr.msk.bf16.mxu0 %vm1095_vm1, %v2316_v21  ;;  %5393 = vmatpush3.bf16.xpose.msra.mxu1 %v2489_v32 }
0x14b2   : > { %v2475_v33 = vpop.permute.xlu0 %2474 }
0x14b3   : > { %v2481_v50 = vpop.permute.xlu1 %2480  ;;  %5396 = vmatprep.mubr.msk.bf16.mxu1 %vm1095_vm1, %v2475_v33 }
0x14b4   : > { %5600 = vmatprep.subr.msk.bf16.mxu1 %vm1095_vm1, %v2481_v50  ;;  %v2492_v35 = vsel %vm1095_vm1, %v2481_v50, 0 }
0x14b7   : > { %v2477_v53 = vpop.permute.xlu1 %2476 }
0x14b8   : > { %5379 = vmatpush3.bf16.xpose.msra.mxu0 %v2327_v37 }
0x14b9   : > { %5395 = vmatpush3.bf16.xpose.msra.mxu1 %v2492_v35 }
0x14bf   : > { %5381 = vmatmul.mubr.msk.bf16.vlgmr.msra.gmra.mrb[32].mxu0 %vm1095_vm1, %v6742_v16 }
0x14c0   : > { %5397 = vmatmul.mubr.msk.bf16.vlgmr.msra.gmra.mrb[20].mxu1 %vm1095_vm1, %v2477_v53 }
0x1592   : > { %v5382_v36 = vpop.f32.mrb[32].mxu0 }
0x1593   : > { %v2363_v55 = vpop.f32.mrb[33].mxu0  ;;  %v5398_v38 = vpop.f32.mrb[20].mxu1  ;;  %v2383_v51 = vsel %vm1156_vm2, %v5382_v36, -inf }
0x1594   : > { %v5383_v34 = vpop.f32.mrb[34].mxu0  ;;  %v2528_v40 = vpop.f32.mrb[21].mxu1  ;;  %v2377_v41 = vsel %vm1156_vm2, %v2363_v55, -inf  ;;  %v2548_v57 = vsel %vm1156_vm2, %v5398_v38, -inf }
0x1595   : > { %v5399_v43 = vpop.f32.mrb[22].mxu1  ;;  %2378 = vmax.xlane.f32.xlu0 %v2377_v41  ;;  %v2366_v44 = vpop.f32.mrb[35].mxu0  ;;  %v2542_v58 = vsel %vm1156_vm2, %v2528_v40, -inf }
0x1596   : > { %v2531_v45 = vpop.f32.mrb[23].mxu1  ;;  %v2380_v47 = vsel %vm1156_vm2, %v2366_v44, -inf }
0x1597   : > { %2381 = vmax.xlane.f32.xlu1 %v2380_v47  ;;  %v2545_v59 = vsel %vm1156_vm2, %v2531_v45, -inf }
0x1599   : > { %2384 = vmax.xlane.f32.xlu0 %v2383_v51 }
0x159b   : > { %2549 = vmax.xlane.f32.xlu1 %v2548_v57 }
0x159d   : > { %2543 = vmax.xlane.f32.xlu0 %v2542_v58 }
0x15a1   : > { %2546 = vmax.xlane.f32.xlu0 %v2545_v59 }
0x1622   : > { %v2379_v52 = vpop.xlane.xlu0 %2378 }
0x1623   : > { %v2386_v60 = vsub.f32 %v2363_v55, %v2379_v52 }
0x1624   : > { %v2382_v42 = vpop.xlane.xlu1 %2381 }
0x1625   : > { %v2389_v56 = vmul.f32 1.442695, %v2386_v60  ;;  %v2387_v8 = vsub.f32 %v2366_v44, %v2382_v42 }
0x1626   : > { %v2385_v54 = vpop.xlane.xlu0 %2384 }
0x1627   : > { %v2388_v61 = vsub.f32 %v5382_v36, %v2385_v54  ;;  %v2391_v10 = vmul.f32 1.442695, %v2387_v8 }
0x1628   : > { %v2550_v62 = vpop.xlane.xlu1 %2549 }
0x1629   : > { %v2393_v25 = vmul.f32 1.442695, %v2388_v61  ;;  %v2553_v46 = vsub.f32 %v5398_v38, %v2550_v62 }
0x162a   : > { %v2544_v3 = vpop.xlane.xlu0 %2543 }
0x162b   : > { %5862 = vpow2.f32 %v2393_v25  ;;  %v2558_v24 = vmul.f32 1.442695, %v2553_v46  ;;  %v2551_v6 = vsub.f32 %v2528_v40, %v2544_v3 }
0x162c   : > { %5864 = vpow2.f32 %v2389_v56 }
0x162d   : > { %5866 = vpow2.f32 %v2558_v24  ;;  %v2554_v9 = vmul.f32 1.442695, %v2551_v6 }
0x162e   : > { %v2547_v4 = vpop.xlane.xlu0 %2546 }
0x162f   : > { %v2552_v5 = vsub.f32 %v2531_v45, %v2547_v4 }
0x1631   : > { %v2556_v7 = vmul.f32 1.442695, %v2552_v5 }
0x1633   : > { %5868 = vpow2.f32 %v2556_v7 }
0x1634   : > { %5870 = vpow2.f32 %v2554_v9 }
0x1635   : > { %v6778_v27 = vpop.eup %5862  ;;  %5872 = vpow2.f32 %v2391_v10 }
0x1636   : > { %v6780_v28 = vpop.eup %5864  ;;  %v2401_v63 = vsel %vm1156_vm2, %v6778_v27, 0.0 }
0x1637   : > { %v6784_v0 = vpop.eup %5866  ;;  %2402 = vadd.xlane.f32.xlu0 %v2401_v63  ;;  %v2395_v2 = vsel %vm1156_vm2, %v6780_v28, 0.0 }
0x1638   : > { %v2566_v1 = vsel %vm1156_vm2, %v6784_v0, 0.0 }
0x1639   : > { %2567 = vadd.xlane.f32.xlu1 %v2566_v1 }
0x163b   : > { %2396 = vadd.xlane.f32.xlu0 %v2395_v2 }
0x163d   : > { %v5869_v11 = vpop.eup %5868 }
0x163e   : > { %v5871_v12 = vpop.eup %5870  ;;  %v2563_v13 = vsel %vm1156_vm2, %v5869_v11, 0.0 }
0x163f   : > { %v2560_v14 = vsel %vm1156_vm2, %v5871_v12, 0.0  ;;  %v5873_v15 = vpop.eup %5872 }
0x1640   : > { %v2398_v17 = vsel %vm1156_vm2, %v5873_v15, 0.0 }
0x164a   : > { %2414 = vrot.lane.b32.xlu1 %v6742_v16, %s7384_s4 }
0x164e   : > { %2577 = vrot.lane.b32.xlu1 %v6746_v20, %s7382_s29 }
0x1651   : > { %2412 = vrot.lane.b32.xlu0 %v6746_v20, %s7384_s4  ;;  %s7449_s4 = smov 88  }
0x1670   : > { %2564 = vadd.xlane.f32.xlu0 %v2563_v13 }
0x1672   : > { %2561 = vadd.xlane.f32.xlu1 %v2560_v14 }
0x1676   : > { %2399 = vadd.xlane.f32.xlu1 %v2398_v17 }
0x1686   : > { %2643 = vrot.lane.b32.xlu0 %v6746_v20, %s7439_s5 }
0x1687   : > { %2579 = vrot.lane.b32.xlu1 %v6742_v16, %s7382_s29 }
0x168a   : > { %2639 = vrot.lane.b32.xlu0 %v6746_v20, %s7440_s6 }
0x168b   : > { %2645 = vrot.lane.b32.xlu1 %v6742_v16, %s7439_s5 }
0x168f   : > { %2641 = vrot.lane.b32.xlu1 %v6742_v16, %s7440_s6 }
0x16c4   : > { %v2403_v18 = vpop.xlane.xlu0 %2402 }
0x16c5   : > { %5874 = vrcp.f32 %v2403_v18 }
0x16c6   : > { %v2568_v19 = vpop.xlane.xlu1 %2567 }
0x16c8   : > { %v2397_v21 = vpop.xlane.xlu0 %2396 }
0x16c9   : > { %5876 = vrcp.f32 %v2397_v21 }
0x16ca   : > { %v2415_v22 = vpop.permute.xlu1 %2414 }
0x16cb   : > { %v2424_v31 = vsel %vm1203_vm3, %v2415_v22, 0 }
0x16cc   : > { %v2413_v26 = vpop.permute.xlu0 %2412 }
0x16cd   : > { %5384 = vmatprep.subr.bf16.mxu0 %v2413_v26 }
0x16ce   : > { %5385 = vmatpush3.bf16.msra.mxu0 %v2413_v26  ;;  %v2578_v32 = vpop.permute.xlu1 %2577 }
0x16cf   : > { %5598 = vmatprep.subr.msk.bf16.mxu0 %vm1203_vm3, %v2415_v22  ;;  %v5875_v35 = vpop.eup %5874 }
0x16d0   : > { %v2409_v34 = vmul.f32 %v5875_v35, %v6778_v27 }
0x16d2   : > { %5387 = vmatpush3.bf16.msra.mxu0 %v2424_v31  ;;  %v2411_v47 = vpack.c.bf16 %v2409_v34, %v2409_v34 }
0x16d3   : > { %5400 = vmatprep.subr.bf16.mxu0 %v2578_v32  ;;  %v5877_v53 = vpop.eup %5876 }
0x16d4   : > { %v2407_v40 = vmul.f32 %v5877_v53, %v6780_v28 }
0x16fd   : > { %v2565_v50 = vpop.xlane.xlu0 %2564 }
0x16ff   : > { %v2562_v33 = vpop.xlane.xlu1 %2561 }
0x1700   : > { %5878 = vrcp.f32 %v2562_v33 }
0x1701   : > { %5880 = vrcp.f32 %v2565_v50  ;;  %v2644_v59 = vpop.permute.xlu0 %2643 }
0x1702   : > { %v2654_v61 = vsel %vm1095_vm1, %v2644_v59, 0 }
0x1703   : > { %v2400_v37 = vpop.xlane.xlu1 %2399 }
0x1704   : > { %5882 = vrcp.f32 %v2400_v37 }
0x1705   : > { %5884 = vrcp.f32 %v2568_v19  ;;  %v2640_v54 = vpop.permute.xlu0 %2639 }
0x1707   : > { %v2580_v58 = vpop.permute.xlu1 %2579 }
0x1708   : > { %v2589_v60 = vsel %vm1203_vm3, %v2580_v58, 0 }
0x170a   : > { %v5879_v36 = vpop.eup %5878 }
0x170b   : > { %v5881_v55 = vpop.eup %5880  ;;  %v2572_v43 = vmul.f32 %v5879_v36, %v5871_v12  ;;  %v2646_v56 = vpop.permute.xlu1 %2645 }
0x170c   : > { %v2573_v45 = vmul.f32 %v5881_v55, %v5869_v11  ;;  %v2657_v62 = vsel %vm1095_vm1, %v2646_v56, 0 }
0x170e   : > { %v5883_v38 = vpop.eup %5882  ;;  %v2575_v57 = vpack.c.bf16 %v2573_v45, %v2572_v43 }
0x170f   : > { %v2408_v41 = vmul.f32 %v5883_v38, %v5873_v15  ;;  %v5885_v51 = vpop.eup %5884  ;;  %v2642_v25 = vpop.permute.xlu1 %2641 }
0x1710   : > { %v2574_v52 = vmul.f32 %v5885_v51, %v6784_v0 }
0x1711   : > { %v2410_v44 = vpack.c.bf16 %v2408_v41, %v2407_v40 }
0x1712   : > { %v2576_v42 = vpack.c.bf16 %v2574_v52, %v2574_v52 }
0x1713   : > { %5388 = vmatprep.mubr.msk.bf16.mxu0 %vm1156_vm2, %v2410_v44 }
0x1714   : > { %5389 = vmatmul.mubr.msk.bf16.vlgmr.msra.gmra.mrb[36].mxu0 %vm1156_vm2, %v2411_v47 }
0x1715   : > { %5401 = vmatpush3.bf16.msra.mxu0 %v2578_v32  ;;  %5404 = vmatprep.mubr.msk.bf16.mxu0 %vm1156_vm2, %v2575_v57 }
0x1716   : > { %5601 = vmatprep.subr.msk.bf16.mxu0 %vm1203_vm3, %v2580_v58 }
0x1719   : > { %5403 = vmatpush3.bf16.msra.mxu0 %v2589_v60 }
0x171a   : > { %5602 = vmatprep.subr.msk.bf16.mxu0 %vm1095_vm1, %v2644_v59 }
0x171c   : > { %5405 = vmatmul.mubr.msk.bf16.vlgmr.msra.gmra.mrb[40].mxu0 %vm1156_vm2, %v2576_v42 }
0x171d   : > { %5412 = vmatprep.mubr.msk.bf16.mxu0 %vm1095_vm1, %v2640_v54 }
0x1722   : > { %5409 = vmatpush3.bf16.xpose.msra.mxu0 %v2654_v61 }
0x1723   : > { %5603 = vmatprep.subr.msk.bf16.mxu0 %vm1095_vm1, %v2646_v56 }
0x172a   : > { %5411 = vmatpush3.bf16.xpose.msra.mxu0 %v2657_v62 }
0x1731   : > { %5413 = vmatmul.mubr.msk.bf16.vlgmr.msra.gmra.mrb[44].mxu0 %vm1095_vm1, %v2642_v25 }
0x17e7   : > { %v6826_v46 = vpop.f32.mrb[36].mxu0 }
0x17e8   : > { %v6828_v24 = vpop.f32.mrb[37].mxu0 }
0x17e9   : > { %v5391_v27 = vpop.f32.mrb[38].mxu0 }
0x17ea   : > { %v6830_v28 = vpop.f32.mrb[39].mxu0 }
0x17ef   : > { %v6832_v63 = vpop.f32.mrb[40].mxu0 }
0x17f0   : > { %v6834_v0 = vpop.f32.mrb[41].mxu0 }
0x17f1   : > { %v5407_v1 = vpop.f32.mrb[42].mxu0 }
0x17f2   : > { %v6836_v2 = vpop.f32.mrb[43].mxu0 }
0x17f3   : > { %v5712_v3 = vpack.i.bf16 %v6836_v2, %v6834_v0 }
0x1804   : > { %v5414_v4 = vpop.f32.mrb[44].mxu0 }
0x1805   : > { %v2693_v5 = vpop.f32.mrb[45].mxu0  ;;  %v2713_v10 = vsel %vm1156_vm2, %v5414_v4, -inf }
0x1806   : > { %v5415_v6 = vpop.f32.mrb[46].mxu0  ;;  %v2707_v7 = vsel %vm1156_vm2, %v2693_v5, -inf }
0x1807   : > { %2708 = vmax.xlane.f32.xlu0 %v2707_v7  ;;  %v2696_v8 = vpop.f32.mrb[47].mxu0 }
0x1808   : > { %v2710_v9 = vsel %vm1156_vm2, %v2696_v8, -inf }
0x1809   : > { %2711 = vmax.xlane.f32.xlu1 %v2710_v9 }
0x180b   : > { %2714 = vmax.xlane.f32.xlu0 %v2713_v10 }
0x1894   : > { %v2709_v11 = vpop.xlane.xlu0 %2708 }
0x1895   : > { %v2716_v12 = vsub.f32 %v2693_v5, %v2709_v11 }
0x1896   : > { %v2712_v13 = vpop.xlane.xlu1 %2711 }
0x1897   : > { %v2719_v14 = vmul.f32 1.442695, %v2716_v12  ;;  %v2717_v15 = vsub.f32 %v2696_v8, %v2712_v13 }
0x1898   : > { %v2715_v17 = vpop.xlane.xlu0 %2714 }
0x1899   : > { %5886 = vpow2.f32 %v2719_v14  ;;  %v2721_v18 = vmul.f32 1.442695, %v2717_v15  ;;  %v2718_v19 = vsub.f32 %v5414_v4, %v2715_v17 }
0x189b   : > { %5888 = vpow2.f32 %v2721_v18  ;;  %v2723_v21 = vmul.f32 1.442695, %v2718_v19 }
0x189d   : > { %5890 = vpow2.f32 %v2723_v21 }
0x18a3   : > { %v5887_v22 = vpop.eup %5886 }
0x18a4   : > { %v2725_v26 = vsel %vm1156_vm2, %v5887_v22, 0.0 }
0x18a5   : > { %v5889_v31 = vpop.eup %5888  ;;  %2726 = vadd.xlane.f32.xlu0 %v2725_v26 }
0x18a6   : > { %v2728_v50 = vsel %vm1156_vm2, %v5889_v31, 0.0 }
0x18a7   : > { %v5891_v32 = vpop.eup %5890 }
0x18a8   : > { %v2731_v33 = vsel %vm1156_vm2, %v5891_v32, 0.0 }
0x18a9   : > { %2732 = vadd.xlane.f32.xlu1 %v2731_v33  ;;  %2729 = vadd.xlane.f32.xlu0 %v2728_v50 }
0x18ba   : > { %2744 = vrot.lane.b32.xlu1 %v6742_v16, %s7441_s28 }
0x18be   : > { %2808 = vrot.lane.b32.xlu1 %v6746_v20, %s7442_s0 }
0x18bf   : > { %2742 = vrot.lane.b32.xlu0 %v6746_v20, %s7441_s28 }
0x18c2   : > { %2810 = vrot.lane.b32.xlu1 %v6742_v16, %s7442_s0 }
0x18c3   : > { %2804 = vrot.lane.b32.xlu0 %v6746_v20, %s7443_s30 }
0x18c6   : > { %2806 = vrot.lane.b32.xlu1 %v6742_v16, %s7443_s30 }
0x1932   : > { %v2727_v37 = vpop.xlane.xlu0 %2726 }
0x1933   : > { %5892 = vrcp.f32 %v2727_v37 }
0x1936   : > { %v2730_v35 = vpop.xlane.xlu0 %2729  ;;  %v2733_v53 = vpop.xlane.xlu1 %2732 }
0x1937   : > { %5894 = vrcp.f32 %v2730_v35 }
0x1938   : > { %5896 = vrcp.f32 %v2733_v53 }
0x193a   : > { %v2743_v36 = vpop.permute.xlu0 %2742  ;;  %v2745_v55 = vpop.permute.xlu1 %2744 }
0x193b   : > { %5416 = vmatprep.subr.bf16.mxu1 %v2743_v36  ;;  %v2754_v34 = vsel %vm1203_vm3, %v2745_v55, 0 }
0x193c   : > { %5417 = vmatpush3.bf16.msra.mxu1 %v2743_v36 }
0x193d   : > { %5604 = vmatprep.subr.msk.bf16.mxu1 %vm1203_vm3, %v2745_v55  ;;  %v5893_v38 = vpop.eup %5892 }
0x193e   : > { %v2809_v40 = vpop.permute.xlu1 %2808  ;;  %v2737_v44 = vmul.f32 %v5893_v38, %v5887_v22  ;;  %v2805_v58 = vpop.permute.xlu0 %2804 }
0x193f   : > { %v2819_v59 = vsel %vm1095_vm1, %v2809_v40, 0 }
0x1940   : > { %5419 = vmatpush3.bf16.msra.mxu1 %v2754_v34  ;;  %v5758_v34 = vld [vmem:[%s7335_s12 + $0x10] sm:$0xff]  }
0x1941   : > { %v5895_v41 = vpop.eup %5894  ;;  %5605 = vmatprep.subr.msk.bf16.mxu1 %vm1095_vm1, %v2809_v40  ;;  %v5759_v40 = vld [vmem:[%s7335_s12 + $0x18] sm:$0xff]  }
0x1942   : > { %v5897_v43 = vpop.eup %5896  ;;  %v2738_v45 = vmul.f32 %v5895_v41, %v5889_v31  ;;  %v2811_v52 = vpop.permute.xlu1 %2810 }
0x1943   : > { %v2739_v47 = vmul.f32 %v5897_v43, %v5891_v32  ;;  %v2822_v60 = vsel %vm1095_vm1, %v2811_v52, 0 }
0x1944   : > { %v2740_v51 = vpack.c.bf16 %v2738_v45, %v2737_v44 }
0x1945   : > { %v2741_v57 = vpack.c.bf16 %v2739_v47, %v2739_v47 }
0x1946   : > { %5420 = vmatprep.mubr.msk.bf16.mxu1 %vm1156_vm2, %v2740_v51  ;;  %v2807_v42 = vpop.permute.xlu1 %2806 }
0x1947   : > { %5421 = vmatmul.mubr.msk.bf16.vlgmr.msra.gmra.mrb[24].mxu1 %vm1156_vm2, %v2741_v57 }
0x1948   : > { %5428 = vmatprep.mubr.msk.bf16.mxu1 %vm1095_vm1, %v2805_v58 }
0x1949   : > { %5425 = vmatpush3.bf16.xpose.msra.mxu1 %v2819_v59 }
0x194a   : > { %5606 = vmatprep.subr.msk.bf16.mxu1 %vm1095_vm1, %v2811_v52 }
0x1951   : > { %5427 = vmatpush3.bf16.xpose.msra.mxu1 %v2822_v60 }
0x1958   : > { %5429 = vmatmul.mubr.msk.bf16.vlgmr.msra.gmra.mrb[28].mxu1 %vm1095_vm1, %v2807_v42 }
0x1a1a   : > { %v5422_v54 = vpop.f32.mrb[24].mxu1 }
0x1a1b   : > { %v2790_v61 = vpop.f32.mrb[25].mxu1 }
0x1a1c   : > { %v5423_v56 = vpop.f32.mrb[26].mxu1 }
0x1a1d   : > { %v2793_v62 = vpop.f32.mrb[27].mxu1 }
0x1a1e   : > { %v5717_v25 = vpack.i.bf16 %v2793_v62, %v2790_v61 }
0x1a2b   : > { %v5430_v27 = vpop.f32.mrb[28].mxu1 }
0x1a2c   : > { %v2858_v1 = vpop.f32.mrb[29].mxu1  ;;  %v2878_v8 = vsel %vm1156_vm2, %v5430_v27, -inf }
0x1a2d   : > { %v5431_v4 = vpop.f32.mrb[30].mxu1  ;;  %v2872_v5 = vsel %vm1156_vm2, %v2858_v1, -inf }
0x1a2e   : > { %2873 = vmax.xlane.f32.xlu0 %v2872_v5  ;;  %v2861_v6 = vpop.f32.mrb[31].mxu1 }
0x1a2f   : > { %v2875_v7 = vsel %vm1156_vm2, %v2861_v6, -inf }
0x1a30   : > { %2876 = vmax.xlane.f32.xlu1 %v2875_v7 }
0x1a32   : > { %2879 = vmax.xlane.f32.xlu0 %v2878_v8 }
0x1abb   : > { %v2874_v9 = vpop.xlane.xlu0 %2873 }
0x1abc   : > { %v2881_v10 = vsub.f32 %v2858_v1, %v2874_v9 }
0x1abd   : > { %v2877_v11 = vpop.xlane.xlu1 %2876 }
0x1abe   : > { %v2884_v12 = vmul.f32 1.442695, %v2881_v10  ;;  %v2882_v13 = vsub.f32 %v2861_v6, %v2877_v11 }
0x1abf   : > { %v2880_v14 = vpop.xlane.xlu0 %2879 }
0x1ac0   : > { %5898 = vpow2.f32 %v2884_v12  ;;  %v2886_v15 = vmul.f32 1.442695, %v2882_v13  ;;  %v2883_v17 = vsub.f32 %v5430_v27, %v2880_v14 }
0x1ac2   : > { %5900 = vpow2.f32 %v2886_v15  ;;  %v2888_v18 = vmul.f32 1.442695, %v2883_v17 }
0x1ac4   : > { %5902 = vpow2.f32 %v2888_v18 }
0x1aca   : > { %v5899_v19 = vpop.eup %5898 }
0x1acb   : > { %v2890_v21 = vsel %vm1156_vm2, %v5899_v19, 0.0 }
0x1acc   : > { %v5901_v22 = vpop.eup %5900  ;;  %2891 = vadd.xlane.f32.xlu0 %v2890_v21 }
0x1acd   : > { %v2893_v32 = vsel %vm1156_vm2, %v5901_v22, 0.0 }
0x1ace   : > { %v5903_v26 = vpop.eup %5902 }
0x1acf   : > { %v2896_v31 = vsel %vm1156_vm2, %v5903_v26, 0.0 }
0x1ad0   : > { %2897 = vadd.xlane.f32.xlu1 %v2896_v31  ;;  %2894 = vadd.xlane.f32.xlu0 %v2893_v32 }
0x1ae1   : > { %2909 = vrot.lane.b32.xlu1 %v6742_v16, %s7444_s26 }
0x1ae5   : > { %5713 = vrot.lane.b32.xlu1 %v5712_v3, %s7445_s3 }
0x1ae6   : > { %2907 = vrot.lane.b32.xlu0 %v6746_v20, %s7444_s26 }
0x1ae9   : > { %2976 = vrot.lane.b32.xlu1 %v6832_v63, %s7445_s3 }
0x1aea   : > { %5718 = vrot.lane.b32.xlu0 %v5717_v25, %s7446_s25 }
0x1aed   : > { %2988 = vrot.lane.b32.xlu1 %v5422_v54, %s7446_s25 }
0x1b59   : > { %v2892_v33 = vpop.xlane.xlu0 %2891 }
0x1b5a   : > { %5904 = vrcp.f32 %v2892_v33 }
0x1b5d   : > { %v2895_v50 = vpop.xlane.xlu0 %2894  ;;  %v2898_v37 = vpop.xlane.xlu1 %2897 }
0x1b5e   : > { %5906 = vrcp.f32 %v2895_v50 }
0x1b5f   : > { %5908 = vrcp.f32 %v2898_v37 }
0x1b61   : > { %v2908_v16 = vpop.permute.xlu0 %2907  ;;  %v2910_v0 = vpop.permute.xlu1 %2909 }
0x1b62   : > { %5432 = vmatprep.subr.bf16.mxu0 %v2908_v16  ;;  %v2919_v2 = vsel %vm1203_vm3, %v2910_v0, 0 }
0x1b63   : > { %5433 = vmatpush3.bf16.msra.mxu0 %v2908_v16 }
0x1b64   : > { %5607 = vmatprep.subr.msk.bf16.mxu0 %vm1203_vm3, %v2910_v0  ;;  %v5905_v20 = vpop.eup %5904 }
0x1b65   : > { %v2902_v35 = vmul.f32 %v5905_v20, %v5899_v19  ;;  %v5714_v51 = vpop.permute.xlu1 %5713  ;;  %v5719_v58 = vpop.permute.xlu0 %5718 }
0x1b66   : > { %v5716_v59 = vunpack.i.h.bf16 %v5714_v51  ;;  %v5715_v52 = vunpack.i.l.bf16 %v5714_v51  ;;  %v5721_v42 = vunpack.i.h.bf16 %v5719_v58  ;;  %v5720_v54 = vunpack.i.l.bf16 %v5719_v58 }
0x1b67   : > { %5435 = vmatpush3.bf16.msra.mxu0 %v2919_v2 }
0x1b68   : > { %v5907_v63 = vpop.eup %5906  ;;  %5440 = vmatprep.subr.bf16.mxu0 %v5758_v34  ;;  %v3006_v61 = vsel %vm1095_vm1, %v6830_v28, %v5716_v59  ;;  %v3005_v56 = vsel %vm1095_vm1, %v6828_v24, %v5715_v52  ;;  %v4972_v52 = vld [vmem:[%s7337_s14 + $0x1] ss:$0 sm:$0xff] }
0x1b69   : > { %v5909_v3 = vpop.eup %5908  ;;  %v2903_v53 = vmul.f32 %v5907_v63, %v5901_v22  ;;  %v2977_v57 = vpop.permute.xlu1 %2976  ;;  %v3008_v7 = vsel %vm1789_vm4, %v3005_v56, %v5720_v54  ;;  %v3009_v8 = vsel %vm1789_vm4, %v3006_v61, %v5721_v42 }
0x1b6a   : > { %v2904_v36 = vmul.f32 %v5909_v3, %v5903_v26  ;;  %v3007_v25 = vsel %vm1095_vm1, %v6826_v46, %v2977_v57  ;;  %v4965_v46 = vld [vmem:[%s7336_s13 + $0x1] ss:$0 sm:$0xff] }
0x1b6b   : > { %v2905_v55 = vpack.c.bf16 %v2903_v53, %v2902_v35 }
0x1b6c   : > { %v2906_v38 = vpack.c.bf16 %v2904_v36, %v2904_v36 }
0x1b6d   : > { %5436 = vmatprep.mubr.msk.bf16.mxu0 %vm1156_vm2, %v2905_v55  ;;  %v2989_v60 = vpop.permute.xlu1 %2988  ;;  %v5760_v55 = vld [vmem:[%s7339_s16 + $0x10] sm:$0xff]  }
0x1b6e   : > { %5437 = vmatmul.mubr.msk.bf16.vlgmr.msra.gmra.mrb[48].mxu0 %vm1156_vm2, %v2906_v38  ;;  %v3010_v1 = vsel %vm1789_vm4, %v3007_v25, %v2989_v60  ;;  %v5761_v38 = vld [vmem:[%s7339_s16 + $0x18] sm:$0xff]   ;;  %5448 = vmatprep.subr.bf16.mxu1 %v5760_v55 }
0x1b6f   : > { %5441 = vmatpush3.bf16.msra.mxu0 %v5758_v34  ;;  %5449 = vmatpush3.bf16.msra.mxu1 %v5760_v55 }
0x1b70   : > { %5442 = vmatprep.subr.bf16.mxu0 %v5759_v40  ;;  %5450 = vmatprep.subr.bf16.mxu1 %v5761_v38 }
0x1b73   : > { %5443 = vmatpush3.bf16.msra.mxu0 %v5759_v40  ;;  %5451 = vmatpush3.bf16.msra.mxu1 %v5761_v38 }
0x1c41   : > { %v5438_v41 = vpop.f32.mrb[48].mxu0 }
0x1c42   : > { %3000 = vrot.lane.b32.xlu1 %v5438_v41, %s7447_s9  ;;  %v2955_v43 = vpop.f32.mrb[49].mxu0 }
0x1c43   : > { %v5439_v44 = vpop.f32.mrb[50].mxu0 }
0x1c44   : > { %v2958_v45 = vpop.f32.mrb[51].mxu0 }
0x1c45   : > { %v5722_v47 = vpack.i.bf16 %v2958_v45, %v2955_v43 }
0x1c47   : > { %5723 = vrot.lane.b32.xlu0 %v5722_v47, %s7447_s9 }
0x1cb4   : > { %v3001_v62 = vpop.permute.xlu1 %3000 }
0x1cb5   : > { %v3013_v6 = vsel %vm1156_vm2, %v3010_v1, %v3001_v62  ;;  %v4973_v62 = vld [vmem:[%s7338_s15 + $0x1] ss:$0 sm:$0xff] }
0x1cb6   : > { %v3015_v10 = vpack.c.bf16 %v3013_v6, %v3013_v6 }
0x1cb9   : > { %v5724_v27 = vpop.permute.xlu0 %5723 }
0x1cba   : > { %v5726_v4 = vunpack.i.h.bf16 %v5724_v27  ;;  %v5725_v5 = vunpack.i.l.bf16 %v5724_v27 }
0x1cbc   : > { %v3011_v28 = vsel %vm1156_vm2, %v3008_v7, %v5725_v5  ;;  %v3012_v9 = vsel %vm1156_vm2, %v3009_v8, %v5726_v4  ;;  %v5762_v8 = vld [vmem:[%s7341_s18 + $0x40] sm:$0xff]  }
0x1cbd   : > { %v3014_v24 = vpack.c.bf16 %v3012_v9, %v3011_v28  ;;  %5456 = vmatprep.subr.bf16.mxu0 %v5762_v8  ;;  %v5763_v28 = vld [vmem:[%s7341_s18 + $0x48] sm:$0xff]   ;;  %v5764_v9 = vld [vmem:[%s7341_s18 + $0x50] sm:$0xff]  }
0x1cbf   : > { %5444 = vmatprep.mubr.msk.bf16.mxu0 %vm863_vm0, %v3014_v24  ;;  %v5765_v24 = vld [vmem:[%s7341_s18 + $0x58] sm:$0xff]  }
0x1cc0   : > { %5445 = vmatmul.mubr.msk.bf16.vlgmr.msra.gmra.mrb[52].mxu0 %vm863_vm0, %v3015_v10  ;;  %v5766_v10 = vld [vmem:[%s7341_s18 + $0x60] sm:$0xff]  }
0x1cc1   : > { %5457 = vmatpush3.bf16.msra.mxu0 %v5762_v8 }
0x1cc2   : > { %5458 = vmatprep.subr.bf16.mxu0 %v5763_v28 }
0x1cc5   : > { %5459 = vmatpush3.bf16.msra.mxu0 %v5763_v28 }
0x1cc6   : > { %5460 = vmatprep.subr.bf16.mxu0 %v5764_v9 }
0x1cc9   : > { %5461 = vmatpush3.bf16.msra.mxu0 %v5764_v9 }
0x1cca   : > { %5462 = vmatprep.subr.bf16.mxu0 %v5765_v24 }
0x1ccd   : > { %5463 = vmatpush3.bf16.msra.mxu0 %v5765_v24 }
0x1cce   : > { %5464 = vmatprep.subr.bf16.mxu0 %v5766_v10 }
0x1cd1   : > { %5465 = vmatpush3.bf16.msra.mxu0 %v5766_v10 }
0x1d93   : > { %v5446_v11 = vpop.f32.mrb[52].mxu0 }
0x1d94   : > { %v3081_v12 = vpop.f32.mrb[53].mxu0  ;;  %v3090_v13 = vadd.f32 %v5446_v11, %v4965_v46  ;;  %v5768_v11 = vld [vmem:[%s7341_s18 + $0x70] sm:$0xff]  }
0x1d95   : > { %v3082_v14 = vadd.f32 %v4965_v46, %v3081_v12  ;;  %v5447_v15 = vpop.f32.mrb[54].mxu0  ;;  %v5769_v12 = vld [vmem:[%s7341_s18 + $0x78] sm:$0xff]  }
0x1d96   : > { %v3084_v17 = vpop.f32.mrb[55].mxu0  ;;  %v6919_v21 = vadd.f32 %v3090_v13, %v6708_v29  ;;  %v4978_v13 = vld [vmem:[#allocation3 + $0x1] ss:$0 sm:$0xff] }
0x1d97   : > { %v6916_v18 = vadd.f32 %v3082_v14, %v6705_v23  ;;  %v3085_v19 = vadd.f32 %v4965_v46, %v3084_v17  ;;  %v5767_v46 = vld [vmem:[%s7341_s18 + $0x68] sm:$0xff]  }
0x1d98   : > { %v3108_v32 = vsel %vm863_vm0, %v6919_v21, 0.0  ;;  %5466 = vmatprep.subr.bf16.mxu0 %v5767_v46 }
0x1d99   : > { %v6922_v22 = vadd.f32 %v3085_v19, %v6711_v30  ;;  %v3102_v26 = vsel %vm863_vm0, %v6916_v18, 0.0  ;;  %5467 = vmatpush3.bf16.msra.mxu0 %v5767_v46 }
0x1d9a   : > { %3103 = vadd.xlane.f32.xlu0 %v3102_v26  ;;  %5468 = vmatprep.subr.bf16.mxu0 %v5768_v11 }
0x1d9b   : > { %v3105_v31 = vsel %vm863_vm0, %v6922_v22, 0.0 }
0x1d9c   : > { %3106 = vadd.xlane.f32.xlu1 %v3105_v31 }
0x1d9d   : > { %5469 = vmatpush3.bf16.msra.mxu0 %v5768_v11 }
0x1d9e   : > { %3109 = vadd.xlane.f32.xlu0 %v3108_v32  ;;  %5470 = vmatprep.subr.bf16.mxu0 %v5769_v12 }
0x1da1   : > { %5471 = vmatpush3.bf16.msra.mxu0 %v5769_v12 }
0x1e27   : > { %v3104_v23 = vpop.xlane.xlu0 %3103 }
0x1e28   : > { %v3111_v33 = vmul.f32 0.03125, %v3104_v23 }
0x1e29   : > { %v3107_v50 = vpop.xlane.xlu1 %3106 }
0x1e2a   : > { %v3114_v29 = vsub.f32 %v6916_v18, %v3111_v33  ;;  %v3112_v37 = vmul.f32 0.03125, %v3107_v50 }
0x1e2b   : > { %v3110_v30 = vpop.xlane.xlu0 %3109 }
0x1e2c   : > { %v3115_v16 = vsub.f32 %v6922_v22, %v3112_v37  ;;  %v3113_v0 = vmul.f32 0.03125, %v3110_v30  ;;  %v3117_v20 = vmul.f32 %v3114_v29, %v3114_v29 }
0x1e2e   : > { %v3116_v2 = vsub.f32 %v6919_v21, %v3113_v0  ;;  %v3120_v63 = vsel %vm863_vm0, %v3117_v20, 0.0  ;;  %v3118_v3 = vmul.f32 %v3115_v16, %v3115_v16 }
0x1e2f   : > { %3121 = vadd.xlane.f32.xlu0 %v3120_v63 }
0x1e30   : > { %v3119_v35 = vmul.f32 %v3116_v2, %v3116_v2  ;;  %v3123_v53 = vsel %vm863_vm0, %v3118_v3, 0.0 }
0x1e32   : > { %v3126_v36 = vsel %vm863_vm0, %v3119_v35, 0.0 }
0x1e33   : > { %3124 = vadd.xlane.f32.xlu0 %v3123_v53  ;;  %3127 = vadd.xlane.f32.xlu1 %v3126_v36 }
0x1ebc   : > { %v3122_v34 = vpop.xlane.xlu0 %3121 }
0x1ebd   : > { %v3129_v40 = vmul.f32 0.03125, %v3122_v34 }
0x1ebf   : > { %v3132_v41 = vadd.f32 1e-05, %v3129_v40 }
0x1ec0   : > { %v3128_v43 = vpop.xlane.xlu1 %3127  ;;  %v3125_v44 = vpop.xlane.xlu0 %3124 }
0x1ec1   : > { %5910 = vrsqrt.f32 %v3132_v41  ;;  %v3131_v45 = vmul.f32 0.03125, %v3128_v43  ;;  %v3130_v47 = vmul.f32 0.03125, %v3125_v44 }
0x1ec3   : > { %v3134_v51 = vadd.f32 1e-05, %v3131_v45  ;;  %v3133_v57 = vadd.f32 1e-05, %v3130_v47 }
0x1ec5   : > { %5912 = vrsqrt.f32 %v3134_v51 }
0x1ec6   : > { %5914 = vrsqrt.f32 %v3133_v57 }
0x1ecb   : > { %v5911_v58 = vpop.eup %5910 }
0x1ecc   : > { %v3138_v59 = vmul.f32 %v5911_v58, %v3114_v29 }
0x1ece   : > { %v3147_v56 = vmul.f32 %v4972_v52, %v3138_v59 }
0x1ecf   : > { %v5913_v60 = vpop.eup %5912 }
0x1ed0   : > { %v5915_v42 = vpop.eup %5914  ;;  %v3140_v54 = vmul.f32 %v5913_v60, %v3116_v2  ;;  %v3156_v4 = vadd.f32 %v4973_v62, %v3147_v56  ;;  %v4999_v60 = vld [vmem:[#allocation6 + $0x1] ss:$0 sm:$0xff] }
0x1ed1   : > { %v3139_v61 = vmul.f32 %v5915_v42, %v3115_v16 }
0x1ed2   : > { %v3149_v25 = vmul.f32 %v4972_v52, %v3140_v54 }
0x1ed3   : > { %v3148_v27 = vmul.f32 %v4972_v52, %v3139_v61 }
0x1ed4   : > { %v3158_v1 = vadd.f32 %v4973_v62, %v3149_v25 }
0x1ed5   : > { %v3157_v5 = vadd.f32 %v4973_v62, %v3148_v27 }
0x1ed6   : > { %v3160_v6 = vpack.c.bf16 %v3158_v1, %v3158_v1 }
0x1ed7   : > { %v3159_v7 = vpack.c.bf16 %v3157_v5, %v3156_v4 }
0x1ed9   : > { %5452 = vmatprep.mubr.msk.bf16.mxu1 %vm863_vm0, %v3159_v7 }
0x1eda   : > { %5453 = vmatmul.mubr.msk.bf16.vlgmr.msra.gmra.mrb[32].mxu1 %vm863_vm0, %v3160_v6 }
0x1fad   : > { %v5454_v14 = vpop.f32.mrb[32].mxu1 }
0x1fae   : > { %v3235_v15 = vadd.f32 %v5454_v14, %v4978_v13  ;;  %v3226_v17 = vpop.f32.mrb[33].mxu1 }
0x1faf   : > { %v3227_v19 = vadd.f32 %v4978_v13, %v3226_v17  ;;  %v5455_v26 = vpop.f32.mrb[34].mxu1 }
0x1fb0   : > { %v3245_v31 = vmul.f32 0.044715, %v3235_v15  ;;  %v3229_v32 = vpop.f32.mrb[35].mxu1  ;;  %v3242_v43 = vmul.f32 0.5, %v3235_v15  ;;  %v5770_v26 = vld [vmem:[%s7333_s10 + $0x20] sm:$0xff]  }
0x1fb1   : > { %v3243_v23 = vmul.f32 0.044715, %v3227_v19  ;;  %v3230_v33 = vadd.f32 %v4978_v13, %v3229_v32  ;;  %v3240_v44 = vmul.f32 0.5, %v3227_v19  ;;  %5476 = vmatprep.subr.bf16.mxu1 %v5770_v26 }
0x1fb2   : > { %v3248_v50 = vmul.f32 %v3245_v31, %v3235_v15  ;;  %v5771_v31 = vld [vmem:[%s7333_s10 + $0x28] sm:$0xff]   ;;  %5477 = vmatpush3.bf16.msra.mxu1 %v5770_v26 }
0x1fb3   : > { %v3246_v29 = vmul.f32 %v3243_v23, %v3227_v19  ;;  %v3244_v37 = vmul.f32 0.044715, %v3230_v33  ;;  %v3241_v45 = vmul.f32 0.5, %v3230_v33  ;;  %5478 = vmatprep.subr.bf16.mxu1 %v5771_v31 }
0x1fb4   : > { %v3251_v30 = vmul.f32 %v3248_v50, %v3235_v15 }
0x1fb5   : > { %v3249_v16 = vmul.f32 %v3246_v29, %v3227_v19  ;;  %v3247_v0 = vmul.f32 %v3244_v37, %v3230_v33 }
0x1fb6   : > { %v3254_v20 = vadd.f32 %v3251_v30, %v3235_v15  ;;  %5479 = vmatpush3.bf16.msra.mxu1 %v5771_v31 }
0x1fb7   : > { %v3250_v2 = vmul.f32 %v3247_v0, %v3230_v33  ;;  %v3252_v63 = vadd.f32 %v3249_v16, %v3227_v19 }
0x1fb8   : > { %v3257_v3 = vmul.f32 0.7978846, %v3254_v20 }
0x1fb9   : > { %v3253_v35 = vadd.f32 %v3250_v2, %v3230_v33  ;;  %v3255_v53 = vmul.f32 0.7978846, %v3252_v63  ;;  %v5010_v2 = vld [vmem:[%s7437_s1 + $0x2] ss:$0 sm:$0xff] }
0x1fba   : > { %5916 = vtanh.f32 %v3257_v3 }
0x1fbb   : > { %v3256_v36 = vmul.f32 0.7978846, %v3253_v35  ;;  %5918 = vtanh.f32 %v3255_v53 }
0x1fbd   : > { %5920 = vtanh.f32 %v3256_v36 }
0x1fc4   : > { %v5917_v55 = vpop.eup %5916 }
0x1fc5   : > { %v5919_v38 = vpop.eup %5918  ;;  %v3263_v34 = vadd.f32 1.0, %v5917_v55  ;;  %v5011_v55 = vld [vmem:[%s7438_s24 + $0x2] ss:$0 sm:$0xff] }
0x1fc6   : > { %v3261_v40 = vadd.f32 1.0, %v5919_v38 }
0x1fc7   : > { %v5921_v41 = vpop.eup %5920  ;;  %v3266_v51 = vmul.f32 %v3263_v34, %v3242_v43 }
0x1fc8   : > { %v3262_v47 = vadd.f32 1.0, %v5921_v41  ;;  %v3264_v57 = vmul.f32 %v3261_v40, %v3240_v44 }
0x1fc9   : > { %v3268_v52 = vpack.c.bf16 %v3266_v51, %v3266_v51  ;;  %v5017_v51 = vld [vmem:[%s7334_s11 + $0x2] ss:$0 sm:$0xff] }
0x1fca   : > { %v3265_v58 = vmul.f32 %v3262_v47, %v3241_v45 }
0x1fcc   : > { %v3267_v59 = vpack.c.bf16 %v3265_v58, %v3264_v57 }
0x1fce   : > { %5472 = vmatprep.mubr.bf16.mxu0 %v3267_v59 }
0x1fcf   : > { %5473 = vmatmul.mubr.bf16.vlgmr.msra.gmra.mrb[56].mxu0 %v3268_v52 }
0x20a2   : > { %v5474_v42 = vpop.f32.mrb[56].mxu0 }
0x20a3   : > { %v3376_v54 = vpop.f32.mrb[57].mxu0  ;;  %v3385_v61 = vadd.f32 %v5474_v42, %v4999_v60 }
0x20a4   : > { %v3377_v56 = vadd.f32 %v4999_v60, %v3376_v54  ;;  %v5475_v62 = vpop.f32.mrb[58].mxu0 }
0x20a5   : > { %v3379_v25 = vpop.f32.mrb[59].mxu0  ;;  %v6978_v4 = vadd.f32 %v3385_v61, %v6919_v21 }
0x20a6   : > { %v6975_v27 = vadd.f32 %v3377_v56, %v6916_v18  ;;  %v3380_v1 = vadd.f32 %v4999_v60, %v3379_v25 }
0x20a7   : > { %v3403_v8 = vsel %vm863_vm0, %v6978_v4, 0.0 }
0x20a8   : > { %v6981_v5 = vadd.f32 %v3380_v1, %v6922_v22  ;;  %v3397_v6 = vsel %vm863_vm0, %v6975_v27, 0.0 }
0x20a9   : > { %3398 = vadd.xlane.f32.xlu0 %v3397_v6 }
0x20aa   : > { %v3400_v7 = vsel %vm863_vm0, %v6981_v5, 0.0 }
0x20ab   : > { %3401 = vadd.xlane.f32.xlu1 %v3400_v7 }
0x20ad   : > { %3404 = vadd.xlane.f32.xlu0 %v3403_v8 }
0x2136   : > { %v3399_v18 = vpop.xlane.xlu0 %3398 }
0x2137   : > { %v3406_v28 = vmul.f32 0.03125, %v3399_v18 }
0x2138   : > { %v3402_v9 = vpop.xlane.xlu1 %3401 }
0x2139   : > { %v3409_v21 = vsub.f32 %v6975_v27, %v3406_v28  ;;  %v3407_v24 = vmul.f32 0.03125, %v3402_v9 }
0x213a   : > { %v3405_v22 = vpop.xlane.xlu0 %3404 }
0x213b   : > { %v3410_v10 = vsub.f32 %v6981_v5, %v3407_v24  ;;  %v3408_v46 = vmul.f32 0.03125, %v3405_v22  ;;  %v3412_v11 = vmul.f32 %v3409_v21, %v3409_v21 }
0x213d   : > { %v3411_v12 = vsub.f32 %v6978_v4, %v3408_v46  ;;  %v3415_v13 = vsel %vm863_vm0, %v3412_v11, 0.0  ;;  %v3413_v14 = vmul.f32 %v3410_v10, %v3410_v10 }
0x213e   : > { %3416 = vadd.xlane.f32.xlu1 %v3415_v13 }
0x213f   : > { %v3418_v15 = vsel %vm863_vm0, %v3413_v14, 0.0  ;;  %v3414_v17 = vmul.f32 %v3411_v12, %v3411_v12 }
0x2140   : > { %3419 = vadd.xlane.f32.xlu0 %v3418_v15 }
0x2141   : > { %v3421_v19 = vsel %vm863_vm0, %v3414_v17, 0.0 }
0x2142   : > { %3422 = vadd.xlane.f32.xlu1 %v3421_v19 }
0x21cb   : > { %v3417_v32 = vpop.xlane.xlu1 %3416 }
0x21cc   : > { %v3424_v23 = vmul.f32 0.03125, %v3417_v32 }
0x21cd   : > { %v3420_v33 = vpop.xlane.xlu0 %3419 }
0x21ce   : > { %v3427_v50 = vadd.f32 1e-05, %v3424_v23  ;;  %v3425_v29 = vmul.f32 0.03125, %v3420_v33 }
0x21cf   : > { %v3423_v37 = vpop.xlane.xlu1 %3422 }
0x21d0   : > { %5922 = vrsqrt.f32 %v3427_v50  ;;  %v3428_v30 = vadd.f32 1e-05, %v3425_v29  ;;  %v3426_v16 = vmul.f32 0.03125, %v3423_v37 }
0x21d2   : > { %5924 = vrsqrt.f32 %v3428_v30  ;;  %v3429_v0 = vadd.f32 1e-05, %v3426_v16 }
0x21d4   : > { %5926 = vrsqrt.f32 %v3429_v0 }
0x21da   : > { %v5923_v20 = vpop.eup %5922 }
0x21db   : > { %v3433_v63 = vmul.f32 %v5923_v20, %v3409_v21 }
0x21dc   : > { %v5925_v3 = vpop.eup %5924 }
0x21dd   : > { %v3434_v35 = vmul.f32 %v5925_v3, %v3410_v10  ;;  %v3442_v53 = vmul.f32 %v5010_v2, %v3433_v63 }
0x21de   : > { %v5927_v36 = vpop.eup %5926 }
0x21df   : > { %v3435_v38 = vmul.f32 %v5927_v36, %v3411_v12  ;;  %v3443_v34 = vmul.f32 %v5010_v2, %v3434_v35  ;;  %v3451_v40 = vadd.f32 %v5011_v55, %v3442_v53 }
0x21e1   : > { %v3452_v41 = vadd.f32 %v5011_v55, %v3443_v34  ;;  %v3444_v43 = vmul.f32 %v5010_v2, %v3435_v38 }
0x21e3   : > { %v3454_v44 = vpack.c.bf16 %v3452_v41, %v3451_v40  ;;  %v3453_v45 = vadd.f32 %v5011_v55, %v3444_v43 }
0x21e5   : > { %5480 = vmatprep.mubr.msk.bf16.mxu1 %vm863_vm0, %v3454_v44  ;;  %v3455_v47 = vpack.c.bf16 %v3453_v45, %v3453_v45 }
0x21e7   : > { %5481 = vmatmul.mubr.msk.bf16.vlgmr.msra.gmra.mrb[36].mxu1 %vm863_vm0, %v3455_v47 }
0x22ba   : > { %v5482_v57 = vpop.f32.mrb[36].mxu1 }
0x22bb   : > { %v3530_v58 = vadd.f32 %v5482_v57, %v5017_v51  ;;  %v3521_v59 = vpop.f32.mrb[37].mxu1 }
0x22bc   : > { %v5483_v52 = vpop.f32.mrb[38].mxu1  ;;  %v3522_v54 = vadd.f32 %v5017_v51, %v3521_v59 }
0x22bd   : > { %v7012_v60 = vpack.c.bf16 %v3530_v58, %v3530_v58  ;;  %v3524_v42 = vpop.f32.mrb[39].mxu1 }
0x22be   : > { %v3525_v61 = vadd.f32 %v5017_v51, %v3524_v42 }
0x22bf   : > { %3541 = vrot.lane.b32.xlu1 %v7012_v60, %s7448_s19 }
0x22c0   : > { %v7016_v56 = vpack.c.bf16 %v3525_v61, %v3522_v54 }
0x22c2   : > { %3539 = vrot.lane.b32.xlu0 %v7016_v56, %s7448_s19  ;;  %5488 = vmatprep.mubr.msk.bf16.mxu1 %vm1095_vm1, %v7016_v56  ;;  %s7455_s19 = sld [smem:[#allocation33_spill]] }
0x22c3   : > { %3704 = vrot.lane.b32.xlu1 %v7016_v56, %s7449_s4 }
0x22c6   : > { %3700 = vrot.lane.b32.xlu0 %v7016_v56, %s7450_s23 }
0x22c7   : > { %3706 = vrot.lane.b32.xlu1 %v7012_v60, %s7449_s4 }
0x22cb   : > { %3702 = vrot.lane.b32.xlu1 %v7012_v60, %s7450_s23  ;;  %s7456_s23 = sld [smem:[#allocation17_spill]] }
0x22d1   : > { %p7460_p1 = scmp.ne.s32.totalorder %s7456_s23, 0 }
0x2331   : > { %v3542_v62 = vpop.permute.xlu1 %3541 }
0x2332   : > { %v3553_v28 = vsel %vm1095_vm1, %v3542_v62, 0 }
0x2334   : > { %v3540_v25 = vpop.permute.xlu0 %3539 }
0x2335   : > { %v3550_v1 = vsel %vm1095_vm1, %v3540_v25, 0  ;;  %v3705_v6 = vpop.permute.xlu1 %3704  ;;  %5608 = vmatprep.subr.msk.bf16.mxu1 %vm1095_vm1, %v3540_v25 }
0x2336   : > { %v3715_v7 = vsel %vm1095_vm1, %v3705_v6, 0  ;;  %5485 = vmatpush3.bf16.xpose.msra.mxu1 %v3550_v1  ;;  %5611 = vmatprep.subr.msk.bf16.mxu0 %vm1095_vm1, %v3705_v6 }
0x2337   : > { %5609 = vmatprep.subr.msk.bf16.mxu1 %vm1095_vm1, %v3542_v62  ;;  %5501 = vmatpush3.bf16.xpose.msra.mxu0 %v3715_v7 }
0x2338   : > { %v3701_v8 = vpop.permute.xlu0 %3700 }
0x2339   : > { %v3707_v18 = vpop.permute.xlu1 %3706  ;;  %5504 = vmatprep.mubr.msk.bf16.mxu0 %vm1095_vm1, %v3701_v8 }
0x233a   : > { %5612 = vmatprep.subr.msk.bf16.mxu0 %vm1095_vm1, %v3707_v18  ;;  %v3718_v9 = vsel %vm1095_vm1, %v3707_v18, 0 }
0x233d   : > { %v3703_v21 = vpop.permute.xlu1 %3702 }
0x233e   : > { %5487 = vmatpush3.bf16.xpose.msra.mxu1 %v3553_v28 }
0x233f   : > { %5503 = vmatpush3.bf16.xpose.msra.mxu0 %v3718_v9 }
0x2345   : > { %5489 = vmatmul.mubr.msk.bf16.vlgmr.msra.gmra.mrb[40].mxu1 %vm1095_vm1, %v7012_v60 }
0x2346   : > { %5505 = vmatmul.mubr.msk.bf16.vlgmr.msra.gmra.mrb[60].mxu0 %vm1095_vm1, %v3703_v21 }
0x2418   : > { %v5490_v24 = vpop.f32.mrb[40].mxu1 }
0x2419   : > { %v3589_v22 = vpop.f32.mrb[41].mxu1  ;;  %v5506_v10 = vpop.f32.mrb[60].mxu0  ;;  %v3609_v19 = vsel %vm1156_vm2, %v5490_v24, -inf }
0x241a   : > { %v5491_v46 = vpop.f32.mrb[42].mxu1  ;;  %v3754_v11 = vpop.f32.mrb[61].mxu0  ;;  %v3603_v12 = vsel %vm1156_vm2, %v3589_v22, -inf  ;;  %v3774_v26 = vsel %vm1156_vm2, %v5506_v10, -inf }
0x241b   : > { %v5507_v13 = vpop.f32.mrb[62].mxu0  ;;  %3604 = vmax.xlane.f32.xlu0 %v3603_v12  ;;  %v3592_v14 = vpop.f32.mrb[43].mxu1  ;;  %v3768_v31 = vsel %vm1156_vm2, %v3754_v11, -inf }
0x241c   : > { %v3757_v15 = vpop.f32.mrb[63].mxu0  ;;  %v3606_v17 = vsel %vm1156_vm2, %v3592_v14, -inf }
0x241d   : > { %3607 = vmax.xlane.f32.xlu1 %v3606_v17  ;;  %v3771_v32 = vsel %vm1156_vm2, %v3757_v15, -inf }
0x241f   : > { %3610 = vmax.xlane.f32.xlu0 %v3609_v19 }
0x2421   : > { %3775 = vmax.xlane.f32.xlu1 %v3774_v26 }
0x2423   : > { %3769 = vmax.xlane.f32.xlu0 %v3768_v31 }
0x2427   : > { %3772 = vmax.xlane.f32.xlu0 %v3771_v32 }
0x24a8   : > { %v3605_v23 = vpop.xlane.xlu0 %3604 }
0x24a9   : > { %v3612_v33 = vsub.f32 %v3589_v22, %v3605_v23 }
0x24aa   : > { %v3608_v50 = vpop.xlane.xlu1 %3607 }
0x24ab   : > { %v3613_v29 = vsub.f32 %v3592_v14, %v3608_v50  ;;  %v3615_v16 = vmul.f32 1.442695, %v3612_v33 }
0x24ac   : > { %v3611_v37 = vpop.xlane.xlu0 %3610 }
0x24ad   : > { %v3614_v30 = vsub.f32 %v5490_v24, %v3611_v37  ;;  %v3617_v47 = vmul.f32 1.442695, %v3613_v29 }
0x24ae   : > { %v3776_v0 = vpop.xlane.xlu1 %3775 }
0x24af   : > { %v3619_v20 = vmul.f32 1.442695, %v3614_v30  ;;  %v3779_v2 = vsub.f32 %v5506_v10, %v3776_v0 }
0x24b0   : > { %v3770_v34 = vpop.xlane.xlu0 %3769 }
0x24b1   : > { %5928 = vpow2.f32 %v3619_v20  ;;  %v3784_v63 = vmul.f32 1.442695, %v3779_v2  ;;  %v3777_v43 = vsub.f32 %v3754_v11, %v3770_v34 }
0x24b2   : > { %5930 = vpow2.f32 %v3615_v16 }
0x24b3   : > { %5932 = vpow2.f32 %v3784_v63  ;;  %v3780_v45 = vmul.f32 1.442695, %v3777_v43 }
0x24b4   : > { %v3773_v40 = vpop.xlane.xlu0 %3772 }
0x24b5   : > { %v3778_v41 = vsub.f32 %v3757_v15, %v3773_v40 }
0x24b7   : > { %v3782_v44 = vmul.f32 1.442695, %v3778_v41 }
0x24b9   : > { %5934 = vpow2.f32 %v3782_v44 }
0x24ba   : > { %5936 = vpow2.f32 %v3780_v45 }
0x24bb   : > { %v5929_v3 = vpop.eup %5928  ;;  %5938 = vpow2.f32 %v3617_v47 }
0x24bc   : > { %v5931_v35 = vpop.eup %5930  ;;  %v3627_v53 = vsel %vm1156_vm2, %v5929_v3, 0.0 }
0x24bd   : > { %v7049_v36 = vpop.eup %5932  ;;  %3628 = vadd.xlane.f32.xlu0 %v3627_v53  ;;  %v3621_v38 = vsel %vm1156_vm2, %v5931_v35, 0.0 }
0x24be   : > { %v3792_v55 = vsel %vm1156_vm2, %v7049_v36, 0.0 }
0x24bf   : > { %3793 = vadd.xlane.f32.xlu1 %v3792_v55 }
0x24c1   : > { %3622 = vadd.xlane.f32.xlu0 %v3621_v38 }
0x24c3   : > { %v5935_v51 = vpop.eup %5934 }
0x24c4   : > { %v5937_v57 = vpop.eup %5936  ;;  %v3789_v58 = vsel %vm1156_vm2, %v5935_v51, 0.0 }
0x24c5   : > { %v3786_v59 = vsel %vm1156_vm2, %v5937_v57, 0.0  ;;  %v5939_v52 = vpop.eup %5938 }
0x24c6   : > { %v3624_v42 = vsel %vm1156_vm2, %v5939_v52, 0.0 }
0x24d0   : > { %3640 = vrot.lane.b32.xlu1 %v7012_v60, %s7451_s27 }
0x24d4   : > { %3803 = vrot.lane.b32.xlu1 %v7016_v56, %s7452_s22 }
0x24d7   : > { %3638 = vrot.lane.b32.xlu0 %v7016_v56, %s7451_s27 }
0x24f6   : > { %3790 = vadd.xlane.f32.xlu0 %v3789_v58 }
0x24f8   : > { %3787 = vadd.xlane.f32.xlu1 %v3786_v59 }
0x24fc   : > { %3625 = vadd.xlane.f32.xlu1 %v3624_v42 }
0x250c   : > { %3869 = vrot.lane.b32.xlu0 %v7016_v56, %s7439_s5 }
0x250d   : > { %3805 = vrot.lane.b32.xlu1 %v7012_v60, %s7452_s22 }
0x2510   : > { %3865 = vrot.lane.b32.xlu0 %v7016_v56, %s7440_s6 }
0x2511   : > { %3871 = vrot.lane.b32.xlu1 %v7012_v60, %s7439_s5  ;;  %s827_s5 = sand.u32 1, %s6112_s2  }
0x2515   : > { %3867 = vrot.lane.b32.xlu1 %v7012_v60, %s7440_s6 }
0x254a   : > { %v3629_v54 = vpop.xlane.xlu0 %3628 }
0x254b   : > { %5940 = vrcp.f32 %v3629_v54 }
0x254c   : > { %v3794_v61 = vpop.xlane.xlu1 %3793 }
0x254e   : > { %v3623_v62 = vpop.xlane.xlu0 %3622 }
0x254f   : > { %5942 = vrcp.f32 %v3623_v62 }
0x2550   : > { %v3641_v25 = vpop.permute.xlu1 %3640 }
0x2551   : > { %v3650_v6 = vsel %vm1203_vm3, %v3641_v25, 0 }
0x2552   : > { %v3639_v1 = vpop.permute.xlu0 %3638 }
0x2553   : > { %5492 = vmatprep.subr.bf16.mxu1 %v3639_v1 }
0x2554   : > { %5493 = vmatpush3.bf16.msra.mxu1 %v3639_v1  ;;  %v3804_v7 = vpop.permute.xlu1 %3803 }
0x2555   : > { %5610 = vmatprep.subr.msk.bf16.mxu1 %vm1203_vm3, %v3641_v25  ;;  %v5941_v9 = vpop.eup %5940 }
0x2556   : > { %v3635_v46 = vmul.f32 %v5941_v9, %v5929_v3 }
0x2558   : > { %5495 = vmatpush3.bf16.msra.mxu1 %v3650_v6  ;;  %v3637_v17 = vpack.c.bf16 %v3635_v46, %v3635_v46 }
0x2559   : > { %5508 = vmatprep.subr.bf16.mxu1 %v3804_v7  ;;  %v5943_v21 = vpop.eup %5942 }
0x255a   : > { %v3633_v11 = vmul.f32 %v5943_v21, %v5931_v35 }
0x2583   : > { %v3791_v18 = vpop.xlane.xlu0 %3790 }
0x2585   : > { %v3788_v8 = vpop.xlane.xlu1 %3787 }
0x2586   : > { %5944 = vrcp.f32 %v3788_v8 }
0x2587   : > { %5946 = vrcp.f32 %v3791_v18  ;;  %v3870_v23 = vpop.permute.xlu0 %3869 }
0x2588   : > { %v3880_v37 = vsel %vm1095_vm1, %v3870_v23, 0 }
0x2589   : > { %v3626_v28 = vpop.xlane.xlu1 %3625 }
0x258a   : > { %5948 = vrcp.f32 %v3626_v28 }
0x258b   : > { %5950 = vrcp.f32 %v3794_v61  ;;  %v3866_v29 = vpop.permute.xlu0 %3865 }
0x258d   : > { %v3806_v31 = vpop.permute.xlu1 %3805 }
0x258e   : > { %v3815_v33 = vsel %vm1203_vm3, %v3806_v31, 0 }
0x2590   : > { %v5945_v24 = vpop.eup %5944 }
0x2591   : > { %v5947_v22 = vpop.eup %5946  ;;  %v3798_v13 = vmul.f32 %v5945_v24, %v5937_v57  ;;  %v3872_v30 = vpop.permute.xlu1 %3871 }
0x2592   : > { %v3799_v15 = vmul.f32 %v5947_v22, %v5935_v51  ;;  %v3883_v16 = vsel %vm1095_vm1, %v3872_v30, 0 }
0x2594   : > { %v5949_v10 = vpop.eup %5948  ;;  %v3801_v26 = vpack.c.bf16 %v3799_v15, %v3798_v13 }
0x2595   : > { %v3634_v12 = vmul.f32 %v5949_v10, %v5939_v52  ;;  %v5951_v19 = vpop.eup %5950  ;;  %v3868_v0 = vpop.permute.xlu1 %3867 }
0x2596   : > { %v3800_v32 = vmul.f32 %v5951_v19, %v7049_v36 }
0x2597   : > { %v3636_v14 = vpack.c.bf16 %v3634_v12, %v3633_v11 }
0x2598   : > { %v3802_v50 = vpack.c.bf16 %v3800_v32, %v3800_v32 }
0x2599   : > { %5496 = vmatprep.mubr.msk.bf16.mxu1 %vm1156_vm2, %v3636_v14 }
0x259a   : > { %5497 = vmatmul.mubr.msk.bf16.vlgmr.msra.gmra.mrb[44].mxu1 %vm1156_vm2, %v3637_v17 }
0x259b   : > { %5509 = vmatpush3.bf16.msra.mxu1 %v3804_v7  ;;  %5512 = vmatprep.mubr.msk.bf16.mxu1 %vm1156_vm2, %v3801_v26 }
0x259c   : > { %5613 = vmatprep.subr.msk.bf16.mxu1 %vm1203_vm3, %v3806_v31 }
0x259f   : > { %5511 = vmatpush3.bf16.msra.mxu1 %v3815_v33 }
0x25a0   : > { %5614 = vmatprep.subr.msk.bf16.mxu1 %vm1095_vm1, %v3870_v23 }
0x25a2   : > { %5513 = vmatmul.mubr.msk.bf16.vlgmr.msra.gmra.mrb[48].mxu1 %vm1156_vm2, %v3802_v50 }
0x25a3   : > { %5520 = vmatprep.mubr.msk.bf16.mxu1 %vm1095_vm1, %v3866_v29 }
0x25a8   : > { %5517 = vmatpush3.bf16.xpose.msra.mxu1 %v3880_v37 }
0x25a9   : > { %5615 = vmatprep.subr.msk.bf16.mxu1 %vm1095_vm1, %v3872_v30 }
0x25b0   : > { %5519 = vmatpush3.bf16.xpose.msra.mxu1 %v3883_v16 }
0x25b7   : > { %5521 = vmatmul.mubr.msk.bf16.vlgmr.msra.gmra.mrb[52].mxu1 %vm1095_vm1, %v3868_v0 }
0x266d   : > { %v7088_v20 = vpop.f32.mrb[44].mxu1 }
0x266e   : > { %v7090_v2 = vpop.f32.mrb[45].mxu1 }
0x266f   : > { %v5499_v63 = vpop.f32.mrb[46].mxu1 }
0x2670   : > { %v7092_v3 = vpop.f32.mrb[47].mxu1 }
0x2675   : > { %v7094_v35 = vpop.f32.mrb[48].mxu1 }
0x2676   : > { %v7096_v53 = vpop.f32.mrb[49].mxu1 }
0x2677   : > { %v5515_v36 = vpop.f32.mrb[50].mxu1 }
0x2678   : > { %v7098_v55 = vpop.f32.mrb[51].mxu1 }
0x2679   : > { %v5727_v38 = vpack.i.bf16 %v7098_v55, %v7096_v53 }
0x268a   : > { %v5522_v34 = vpop.f32.mrb[52].mxu1 }
0x268b   : > { %v3919_v40 = vpop.f32.mrb[53].mxu1  ;;  %v3939_v47 = vsel %vm1156_vm2, %v5522_v34, -inf }
0x268c   : > { %v5523_v41 = vpop.f32.mrb[54].mxu1  ;;  %v3933_v43 = vsel %vm1156_vm2, %v3919_v40, -inf }
0x268d   : > { %3934 = vmax.xlane.f32.xlu0 %v3933_v43  ;;  %v3922_v44 = vpop.f32.mrb[55].mxu1 }
0x268e   : > { %v3936_v45 = vsel %vm1156_vm2, %v3922_v44, -inf }
0x268f   : > { %3937 = vmax.xlane.f32.xlu1 %v3936_v45 }
0x2691   : > { %3940 = vmax.xlane.f32.xlu0 %v3939_v47 }
0x271a   : > { %v3935_v51 = vpop.xlane.xlu0 %3934 }
0x271b   : > { %v3942_v57 = vsub.f32 %v3919_v40, %v3935_v51 }
0x271c   : > { %v3938_v58 = vpop.xlane.xlu1 %3937 }
0x271d   : > { %v3945_v59 = vmul.f32 1.442695, %v3942_v57  ;;  %v3943_v52 = vsub.f32 %v3922_v44, %v3938_v58 }
0x271e   : > { %v3941_v42 = vpop.xlane.xlu0 %3940 }
0x271f   : > { %5952 = vpow2.f32 %v3945_v59  ;;  %v3947_v54 = vmul.f32 1.442695, %v3943_v52  ;;  %v3944_v61 = vsub.f32 %v5522_v34, %v3941_v42 }
0x2721   : > { %5954 = vpow2.f32 %v3947_v54  ;;  %v3949_v62 = vmul.f32 1.442695, %v3944_v61 }
0x2723   : > { %5956 = vpow2.f32 %v3949_v62 }
0x2729   : > { %v5953_v25 = vpop.eup %5952 }
0x272a   : > { %v3951_v1 = vsel %vm1156_vm2, %v5953_v25, 0.0 }
0x272b   : > { %v5955_v6 = vpop.eup %5954  ;;  %3952 = vadd.xlane.f32.xlu0 %v3951_v1 }
0x272c   : > { %v3954_v18 = vsel %vm1156_vm2, %v5955_v6, 0.0 }
0x272d   : > { %v5957_v7 = vpop.eup %5956 }
0x272e   : > { %v3957_v8 = vsel %vm1156_vm2, %v5957_v7, 0.0 }
0x272f   : > { %3958 = vadd.xlane.f32.xlu1 %v3957_v8  ;;  %3955 = vadd.xlane.f32.xlu0 %v3954_v18 }
0x2740   : > { %3970 = vrot.lane.b32.xlu1 %v7012_v60, %s7441_s28 }
0x2744   : > { %4034 = vrot.lane.b32.xlu1 %v7016_v56, %s7442_s0 }
0x2745   : > { %3968 = vrot.lane.b32.xlu0 %v7016_v56, %s7441_s28  ;;  %s7457_s28 = sld [smem:[#allocation34_spill]] }
0x2748   : > { %4036 = vrot.lane.b32.xlu1 %v7012_v60, %s7442_s0 }
0x2749   : > { %4030 = vrot.lane.b32.xlu0 %v7016_v56, %s7443_s30 }
0x274b   : > { %s7263_s0 = scalar_lea.hbm %s7457_s28, %s5097_s8  ;;  %s7275_s8 = scalar_lea.sflag [#allocation5], %s827_s5 }
0x274c   : > { %4032 = vrot.lane.b32.xlu1 %v7012_v60, %s7443_s30  ;;  %s7453_s30 = sld [smem:[#allocation32_spill]] }
0x27b8   : > { %v3953_v28 = vpop.xlane.xlu0 %3952 }
0x27b9   : > { %5958 = vrcp.f32 %v3953_v28 }
0x27bc   : > { %v3956_v9 = vpop.xlane.xlu0 %3955  ;;  %v3959_v21 = vpop.xlane.xlu1 %3958 }
0x27bd   : > { %5960 = vrcp.f32 %v3956_v9 }
0x27be   : > { %5962 = vrcp.f32 %v3959_v21 }
0x27c0   : > { %v3969_v24 = vpop.permute.xlu0 %3968  ;;  %v3971_v22 = vpop.permute.xlu1 %3970 }
0x27c1   : > { %5524 = vmatprep.subr.bf16.mxu0 %v3969_v24  ;;  %v3980_v46 = vsel %vm1203_vm3, %v3971_v22, 0 }
0x27c2   : > { %5525 = vmatpush3.bf16.msra.mxu0 %v3969_v24 }
0x27c3   : > { %5616 = vmatprep.subr.msk.bf16.mxu0 %vm1203_vm3, %v3971_v22  ;;  %v5959_v10 = vpop.eup %5958 }
0x27c4   : > { %v4035_v11 = vpop.permute.xlu1 %4034  ;;  %v3963_v14 = vmul.f32 %v5959_v10, %v5953_v25  ;;  %v4031_v31 = vpop.permute.xlu0 %4030 }
0x27c5   : > { %v4045_v32 = vsel %vm1095_vm1, %v4035_v11, 0 }
0x27c6   : > { %5527 = vmatpush3.bf16.msra.mxu0 %v3980_v46  ;;  %v5772_v46 = vld [vmem:[%s7335_s12 + $0x20] sm:$0xff]  }
0x27c7   : > { %v5961_v12 = vpop.eup %5960  ;;  %5617 = vmatprep.subr.msk.bf16.mxu0 %vm1095_vm1, %v4035_v11  ;;  %v5773_v11 = vld [vmem:[%s7335_s12 + $0x28] sm:$0xff]  }
0x27c8   : > { %v5963_v13 = vpop.eup %5962  ;;  %v3964_v15 = vmul.f32 %v5961_v12, %v5955_v6  ;;  %v4037_v23 = vpop.permute.xlu1 %4036 }
0x27c9   : > { %v3965_v17 = vmul.f32 %v5963_v13, %v5957_v7  ;;  %v4048_v33 = vsel %vm1095_vm1, %v4037_v23, 0 }
0x27ca   : > { %v3966_v19 = vpack.c.bf16 %v3964_v15, %v3963_v14 }
0x27cb   : > { %v3967_v26 = vpack.c.bf16 %v3965_v17, %v3965_v17 }
0x27cc   : > { %5528 = vmatprep.mubr.msk.bf16.mxu0 %vm1156_vm2, %v3966_v19  ;;  %v4033_v50 = vpop.permute.xlu1 %4032 }
0x27cd   : > { %5529 = vmatmul.mubr.msk.bf16.vlgmr.msra.gmra.mrb[64].mxu0 %vm1156_vm2, %v3967_v26 }
0x27ce   : > { %5536 = vmatprep.mubr.msk.bf16.mxu0 %vm1095_vm1, %v4031_v31 }
0x27cf   : > { %5533 = vmatpush3.bf16.xpose.msra.mxu0 %v4045_v32 }
0x27d0   : > { %5618 = vmatprep.subr.msk.bf16.mxu0 %vm1095_vm1, %v4037_v23 }
0x27d7   : > { %5535 = vmatpush3.bf16.xpose.msra.mxu0 %v4048_v33 }
0x27de   : > { %5537 = vmatmul.mubr.msk.bf16.vlgmr.msra.gmra.mrb[68].mxu0 %vm1095_vm1, %v4033_v50 }
0x28a0   : > { %v5530_v29 = vpop.f32.mrb[64].mxu0 }
0x28a1   : > { %v4016_v37 = vpop.f32.mrb[65].mxu0 }
0x28a2   : > { %v5531_v30 = vpop.f32.mrb[66].mxu0 }
0x28a3   : > { %v4019_v16 = vpop.f32.mrb[67].mxu0 }
0x28a4   : > { %v5732_v0 = vpack.i.bf16 %v4019_v16, %v4016_v37 }
0x28b1   : > { %v5538_v63 = vpop.f32.mrb[68].mxu0 }
0x28b2   : > { %v4084_v36 = vpop.f32.mrb[69].mxu0  ;;  %v4104_v44 = vsel %vm1156_vm2, %v5538_v63, -inf }
0x28b3   : > { %v5539_v34 = vpop.f32.mrb[70].mxu0  ;;  %v4098_v40 = vsel %vm1156_vm2, %v4084_v36, -inf }
0x28b4   : > { %4099 = vmax.xlane.f32.xlu0 %v4098_v40  ;;  %v4087_v41 = vpop.f32.mrb[71].mxu0 }
0x28b5   : > { %v4101_v43 = vsel %vm1156_vm2, %v4087_v41, -inf }
0x28b6   : > { %4102 = vmax.xlane.f32.xlu1 %v4101_v43 }
0x28b8   : > { %4105 = vmax.xlane.f32.xlu0 %v4104_v44 }
0x2941   : > { %v4100_v45 = vpop.xlane.xlu0 %4099 }
0x2942   : > { %v4107_v47 = vsub.f32 %v4084_v36, %v4100_v45 }
0x2943   : > { %v4103_v51 = vpop.xlane.xlu1 %4102 }
0x2944   : > { %v4110_v57 = vmul.f32 1.442695, %v4107_v47  ;;  %v4108_v58 = vsub.f32 %v4087_v41, %v4103_v51 }
0x2945   : > { %v4106_v59 = vpop.xlane.xlu0 %4105 }
0x2946   : > { %5964 = vpow2.f32 %v4110_v57  ;;  %v4112_v52 = vmul.f32 1.442695, %v4108_v58  ;;  %v4109_v42 = vsub.f32 %v5538_v63, %v4106_v59 }
0x2948   : > { %5966 = vpow2.f32 %v4112_v52  ;;  %v4114_v54 = vmul.f32 1.442695, %v4109_v42 }
0x294a   : > { %5968 = vpow2.f32 %v4114_v54 }
0x2950   : > { %v5965_v61 = vpop.eup %5964 }
0x2951   : > { %v4116_v62 = vsel %vm1156_vm2, %v5965_v61, 0.0 }
0x2952   : > { %v5967_v25 = vpop.eup %5966  ;;  %4117 = vadd.xlane.f32.xlu0 %v4116_v62 }
0x2953   : > { %v4119_v7 = vsel %vm1156_vm2, %v5967_v25, 0.0 }
0x2954   : > { %v5969_v1 = vpop.eup %5968 }
0x2955   : > { %v4122_v6 = vsel %vm1156_vm2, %v5969_v1, 0.0 }
0x2956   : > { %4123 = vadd.xlane.f32.xlu1 %v4122_v6  ;;  %4120 = vadd.xlane.f32.xlu0 %v4119_v7 }
0x2967   : > { %4135 = vrot.lane.b32.xlu1 %v7012_v60, %s7444_s26 }
0x296b   : > { %5728 = vrot.lane.b32.xlu1 %v5727_v38, %s7445_s3 }
0x296c   : > { %4133 = vrot.lane.b32.xlu0 %v7016_v56, %s7444_s26  ;;  %s4874_s26 = sshll.u32 %s827_s5, 4 }
0x296d   : > { %s829_s4 = scalar_lea.vmem [#allocation8], %s4874_s26 }
0x296e   : > { %s4719_s27 = sshll.u32 %s829_s4, 4  ;;  %s7267_s27 = int_to_ptr.vmem [resolvable:$true] %s4719_s27 }
0x296f   : > { %4202 = vrot.lane.b32.xlu1 %v7094_v35, %s7445_s3  ;;  %s6050_s29 = scalar_lea.vmem %s7267_s27, 256 }
0x2970   : > { %5733 = vrot.lane.b32.xlu0 %v5732_v0, %s7446_s25  ;;  %p6051_p12 = scmp.ne.s32.totalorder %s7267_s27, %s6050_s29 }
0x2972   : > { %p6052_p2 = pnand %p6051_p12, %p7460_p1 }
0x2973   : > { %4214 = vrot.lane.b32.xlu1 %v5530_v29, %s7446_s25  ;;  %s7454_s25 = sld [smem:[#allocation19_spill]] }
0x2974   : > { %p6053_p3 = pneg %p6052_p2 }
0x29df   : > { %v4118_v8 = vpop.xlane.xlu0 %4117 }
0x29e0   : > { %5970 = vrcp.f32 %v4118_v8 }
0x29e3   : > { %v4121_v18 = vpop.xlane.xlu0 %4120  ;;  %v4124_v28 = vpop.xlane.xlu1 %4123 }
0x29e4   : > { %5972 = vrcp.f32 %v4121_v18 }
0x29e5   : > { %5974 = vrcp.f32 %v4124_v28 }
0x29e7   : > { %v4134_v60 = vpop.permute.xlu0 %4133  ;;  %v4136_v53 = vpop.permute.xlu1 %4135 }
0x29e8   : > { %5540 = vmatprep.subr.bf16.mxu1 %v4134_v60  ;;  %v4145_v55 = vsel %vm1203_vm3, %v4136_v53, 0 }
0x29e9   : > { %5541 = vmatpush3.bf16.msra.mxu1 %v4134_v60 }
0x29ea   : > { %5619 = vmatprep.subr.msk.bf16.mxu1 %vm1203_vm3, %v4136_v53  ;;  %v5971_v56 = vpop.eup %5970 }
0x29eb   : > { %v4128_v9 = vmul.f32 %v5971_v56, %v5965_v61  ;;  %v5729_v19 = vpop.permute.xlu1 %5728  ;;  %v5734_v31 = vpop.permute.xlu0 %5733 }
0x29ec   : > { %v5731_v32 = vunpack.i.h.bf16 %v5729_v19  ;;  %v5730_v23 = vunpack.i.l.bf16 %v5729_v19  ;;  %v5736_v50 = vunpack.i.h.bf16 %v5734_v31  ;;  %v5735_v29 = vunpack.i.l.bf16 %v5734_v31 }
0x29ed   : > { %5543 = vmatpush3.bf16.msra.mxu1 %v4145_v55 }
0x29ee   : > { %v5973_v35 = vpop.eup %5972  ;;  %5548 = vmatprep.subr.bf16.mxu1 %v5772_v46  ;;  %v4232_v37 = vsel %vm1095_vm1, %v7092_v3, %v5731_v32  ;;  %v4231_v30 = vsel %vm1095_vm1, %v7090_v2, %v5730_v23  ;;  %v5050_v23 = vld [vmem:[%s7337_s14 + $0x2] ss:$0 sm:$0xff] }
0x29ef   : > { %v5975_v38 = vpop.eup %5974  ;;  %v4129_v21 = vmul.f32 %v5973_v35, %v5967_v25  ;;  %v4203_v26 = vpop.permute.xlu1 %4202  ;;  %v4234_v43 = vsel %vm1789_vm4, %v4231_v30, %v5735_v29  ;;  %v4235_v44 = vsel %vm1789_vm4, %v4232_v37, %v5736_v50 }
0x29f0   : > { %v4130_v24 = vmul.f32 %v5975_v38, %v5969_v1  ;;  %v4233_v0 = vsel %vm1095_vm1, %v7088_v20, %v4203_v26  ;;  %v5043_v20 = vld [vmem:[%s7336_s13 + $0x2] ss:$0 sm:$0xff] }
0x29f1   : > { %v4131_v22 = vpack.c.bf16 %v4129_v21, %v4128_v9 }
0x29f2   : > { %v4132_v10 = vpack.c.bf16 %v4130_v24, %v4130_v24 }
0x29f3   : > { %5544 = vmatprep.mubr.msk.bf16.mxu1 %vm1156_vm2, %v4131_v22  ;;  %v4215_v33 = vpop.permute.xlu1 %4214  ;;  %v5774_v22 = vld [vmem:[%s7339_s16 + $0x20] sm:$0xff]  }
0x29f4   : > { %5545 = vmatmul.mubr.msk.bf16.vlgmr.msra.gmra.mrb[56].mxu1 %vm1156_vm2, %v4132_v10  ;;  %v4236_v36 = vsel %vm1789_vm4, %v4233_v0, %v4215_v33  ;;  %v5775_v10 = vld [vmem:[%s7339_s16 + $0x28] sm:$0xff]   ;;  %5556 = vmatprep.subr.bf16.mxu0 %v5774_v22 }
0x29f5   : > { %5549 = vmatpush3.bf16.msra.mxu1 %v5772_v46  ;;  %5557 = vmatpush3.bf16.msra.mxu0 %v5774_v22 }
0x29f6   : > { %5550 = vmatprep.subr.bf16.mxu1 %v5773_v11  ;;  %5558 = vmatprep.subr.bf16.mxu0 %v5775_v10 }
0x29f9   : > { %5551 = vmatpush3.bf16.msra.mxu1 %v5773_v11  ;;  %5559 = vmatpush3.bf16.msra.mxu0 %v5775_v10 }
0x2ac7   : > { %v5546_v12 = vpop.f32.mrb[56].mxu1 }
0x2ac8   : > { %4226 = vrot.lane.b32.xlu1 %v5546_v12, %s7447_s9  ;;  %v4181_v13 = vpop.f32.mrb[57].mxu1 }
0x2ac9   : > { %v5547_v14 = vpop.f32.mrb[58].mxu1 }
0x2aca   : > { %v4184_v15 = vpop.f32.mrb[59].mxu1 }
0x2acb   : > { %v5737_v17 = vpack.i.bf16 %v4184_v15, %v4181_v13 }
0x2acd   : > { %5738 = vrot.lane.b32.xlu0 %v5737_v17, %s7447_s9 }
0x2b3a   : > { %v4227_v16 = vpop.permute.xlu1 %4226 }
0x2b3b   : > { %v4239_v41 = vsel %vm1156_vm2, %v4236_v36, %v4227_v16  ;;  %v5051_v16 = vld [vmem:[%s7338_s15 + $0x2] ss:$0 sm:$0xff] }
0x2b3c   : > { %v4241_v47 = vpack.c.bf16 %v4239_v41, %v4239_v41 }
0x2b3f   : > { %v5739_v63 = vpop.permute.xlu0 %5738 }
0x2b40   : > { %v5741_v34 = vunpack.i.h.bf16 %v5739_v63  ;;  %v5740_v40 = vunpack.i.l.bf16 %v5739_v63 }
0x2b42   : > { %v4237_v3 = vsel %vm1156_vm2, %v4234_v43, %v5740_v40  ;;  %v4238_v45 = vsel %vm1156_vm2, %v4235_v44, %v5741_v34  ;;  %v5776_v44 = vld [vmem:[%s7341_s18 + $0x80] sm:$0xff]  }
0x2b43   : > { %v4240_v2 = vpack.c.bf16 %v4238_v45, %v4237_v3  ;;  %5564 = vmatprep.subr.bf16.mxu1 %v5776_v44  ;;  %v5777_v3 = vld [vmem:[%s7341_s18 + $0x88] sm:$0xff]   ;;  %v5778_v45 = vld [vmem:[%s7341_s18 + $0x90] sm:$0xff]  }
0x2b45   : > { %5552 = vmatprep.mubr.msk.bf16.mxu1 %vm863_vm0, %v4240_v2  ;;  %v5779_v2 = vld [vmem:[%s7341_s18 + $0x98] sm:$0xff]  }
0x2b46   : > { %5553 = vmatmul.mubr.msk.bf16.vlgmr.msra.gmra.mrb[60].mxu1 %vm863_vm0, %v4241_v47  ;;  %v5780_v47 = vld [vmem:[%s7341_s18 + $0xa0] sm:$0xff]  }
0x2b47   : > { %5565 = vmatpush3.bf16.msra.mxu1 %v5776_v44 }
0x2b48   : > { %5566 = vmatprep.subr.bf16.mxu1 %v5777_v3 }
0x2b4b   : > { %5567 = vmatpush3.bf16.msra.mxu1 %v5777_v3 }
0x2b4c   : > { %5568 = vmatprep.subr.bf16.mxu1 %v5778_v45 }
0x2b4f   : > { %5569 = vmatpush3.bf16.msra.mxu1 %v5778_v45 }
0x2b50   : > { %5570 = vmatprep.subr.bf16.mxu1 %v5779_v2 }
0x2b53   : > { %5571 = vmatpush3.bf16.msra.mxu1 %v5779_v2 }
0x2b54   : > { %5572 = vmatprep.subr.bf16.mxu1 %v5780_v47 }
0x2b57   : > { %5573 = vmatpush3.bf16.msra.mxu1 %v5780_v47 }
0x2c19   : > { %v5554_v51 = vpop.f32.mrb[60].mxu1 }
0x2c1a   : > { %v4307_v57 = vpop.f32.mrb[61].mxu1  ;;  %v4316_v58 = vadd.f32 %v5554_v51, %v5043_v20  ;;  %v5782_v51 = vld [vmem:[%s7341_s18 + $0xb0] sm:$0xff]  }
0x2c1b   : > { %v4308_v59 = vadd.f32 %v5043_v20, %v4307_v57  ;;  %v5555_v52 = vpop.f32.mrb[62].mxu1  ;;  %v5783_v57 = vld [vmem:[%s7341_s18 + $0xb8] sm:$0xff]  }
0x2c1c   : > { %v4310_v42 = vpop.f32.mrb[63].mxu1  ;;  %v7181_v62 = vadd.f32 %v4316_v58, %v6978_v4  ;;  %v5056_v58 = vld [vmem:[#allocation3 + $0x2] ss:$0 sm:$0xff] }
0x2c1d   : > { %v7178_v54 = vadd.f32 %v4308_v59, %v6975_v27  ;;  %v4311_v61 = vadd.f32 %v5043_v20, %v4310_v42  ;;  %v5781_v20 = vld [vmem:[%s7341_s18 + $0xa8] sm:$0xff]  }
0x2c1e   : > { %v4334_v7 = vsel %vm863_vm0, %v7181_v62, 0.0  ;;  %5574 = vmatprep.subr.bf16.mxu1 %v5781_v20 }
0x2c1f   : > { %v7184_v25 = vadd.f32 %v4311_v61, %v6981_v5  ;;  %v4328_v1 = vsel %vm863_vm0, %v7178_v54, 0.0  ;;  %5575 = vmatpush3.bf16.msra.mxu1 %v5781_v20 }
0x2c20   : > { %4329 = vadd.xlane.f32.xlu0 %v4328_v1  ;;  %5576 = vmatprep.subr.bf16.mxu1 %v5782_v51 }
0x2c21   : > { %v4331_v6 = vsel %vm863_vm0, %v7184_v25, 0.0 }
0x2c22   : > { %4332 = vadd.xlane.f32.xlu1 %v4331_v6 }
0x2c23   : > { %5577 = vmatpush3.bf16.msra.mxu1 %v5782_v51 }
0x2c24   : > { %4335 = vadd.xlane.f32.xlu0 %v4334_v7  ;;  %5578 = vmatprep.subr.bf16.mxu1 %v5783_v57 }
0x2c27   : > { %5579 = vmatpush3.bf16.msra.mxu1 %v5783_v57 }
0x2cad   : > { %v4330_v27 = vpop.xlane.xlu0 %4329 }
0x2cae   : > { %v4337_v8 = vmul.f32 0.03125, %v4330_v27 }
0x2caf   : > { %v4333_v18 = vpop.xlane.xlu1 %4332 }
0x2cb0   : > { %v4340_v4 = vsub.f32 %v7178_v54, %v4337_v8  ;;  %v4338_v28 = vmul.f32 0.03125, %v4333_v18 }
0x2cb1   : > { %v4336_v5 = vpop.xlane.xlu0 %4335 }
0x2cb2   : > { %v4341_v60 = vsub.f32 %v7184_v25, %v4338_v28  ;;  %v4339_v53 = vmul.f32 0.03125, %v4336_v5  ;;  %v4343_v56 = vmul.f32 %v4340_v4, %v4340_v4 }
0x2cb4   : > { %v4342_v55 = vsub.f32 %v7181_v62, %v4339_v53  ;;  %v4346_v35 = vsel %vm863_vm0, %v4343_v56, 0.0  ;;  %v4344_v38 = vmul.f32 %v4341_v60, %v4341_v60 }
0x2cb5   : > { %4347 = vadd.xlane.f32.xlu0 %v4346_v35 }
0x2cb6   : > { %v4345_v9 = vmul.f32 %v4342_v55, %v4342_v55  ;;  %v4349_v21 = vsel %vm863_vm0, %v4344_v38, 0.0 }
0x2cb8   : > { %v4352_v24 = vsel %vm863_vm0, %v4345_v9, 0.0 }
0x2cb9   : > { %4350 = vadd.xlane.f32.xlu0 %v4349_v21  ;;  %4353 = vadd.xlane.f32.xlu1 %v4352_v24 }
0x2d42   : > { %v4348_v46 = vpop.xlane.xlu0 %4347 }
0x2d43   : > { %v4355_v11 = vmul.f32 0.03125, %v4348_v46 }
0x2d45   : > { %v4358_v12 = vadd.f32 1e-05, %v4355_v11 }
0x2d46   : > { %v4354_v13 = vpop.xlane.xlu1 %4353  ;;  %v4351_v14 = vpop.xlane.xlu0 %4350 }
0x2d47   : > { %5976 = vrsqrt.f32 %v4358_v12  ;;  %v4357_v15 = vmul.f32 0.03125, %v4354_v13  ;;  %v4356_v17 = vmul.f32 0.03125, %v4351_v14 }
0x2d49   : > { %v4360_v19 = vadd.f32 1e-05, %v4357_v15  ;;  %v4359_v26 = vadd.f32 1e-05, %v4356_v17 }
0x2d4b   : > { %5978 = vrsqrt.f32 %v4360_v19 }
0x2d4c   : > { %5980 = vrsqrt.f32 %v4359_v26 }
0x2d51   : > { %v5977_v31 = vpop.eup %5976 }
0x2d52   : > { %v4364_v32 = vmul.f32 %v5977_v31, %v4340_v4 }
0x2d54   : > { %v4373_v30 = vmul.f32 %v5050_v23, %v4364_v32 }
0x2d55   : > { %v5979_v33 = vpop.eup %5978 }
0x2d56   : > { %v5981_v50 = vpop.eup %5980  ;;  %v4366_v29 = vmul.f32 %v5979_v33, %v4342_v55  ;;  %v4382_v34 = vadd.f32 %v5051_v16, %v4373_v30  ;;  %v5077_v33 = vld [vmem:[#allocation6 + $0x2] ss:$0 sm:$0xff] }
0x2d57   : > { %v4365_v37 = vmul.f32 %v5981_v50, %v4341_v60 }
0x2d58   : > { %v4375_v0 = vmul.f32 %v5050_v23, %v4366_v29 }
0x2d59   : > { %v4374_v63 = vmul.f32 %v5050_v23, %v4365_v37 }
0x2d5a   : > { %v4384_v36 = vadd.f32 %v5051_v16, %v4375_v0 }
0x2d5b   : > { %v4383_v40 = vadd.f32 %v5051_v16, %v4374_v63 }
0x2d5c   : > { %v4386_v41 = vpack.c.bf16 %v4384_v36, %v4384_v36 }
0x2d5d   : > { %v4385_v43 = vpack.c.bf16 %v4383_v40, %v4382_v34 }
0x2d5f   : > { %5560 = vmatprep.mubr.msk.bf16.mxu0 %vm863_vm0, %v4385_v43 }
0x2d60   : > { %5561 = vmatmul.mubr.msk.bf16.vlgmr.msra.gmra.mrb[72].mxu0 %vm863_vm0, %v4386_v41 }
0x2e33   : > { %v5562_v59 = vpop.f32.mrb[72].mxu0 }
0x2e34   : > { %v4461_v52 = vadd.f32 %v5562_v59, %v5056_v58  ;;  %v4452_v42 = vpop.f32.mrb[73].mxu0 }
0x2e35   : > { %v4453_v61 = vadd.f32 %v5056_v58, %v4452_v42  ;;  %v5563_v1 = vpop.f32.mrb[74].mxu0 }
0x2e36   : > { %v4471_v6 = vmul.f32 0.044715, %v4461_v52  ;;  %v4455_v7 = vpop.f32.mrb[75].mxu0  ;;  %v4468_v13 = vmul.f32 0.5, %v4461_v52 }
0x2e37   : > { %v4469_v27 = vmul.f32 0.044715, %v4453_v61  ;;  %v4456_v8 = vadd.f32 %v5056_v58, %v4455_v7  ;;  %v4466_v14 = vmul.f32 0.5, %v4453_v61 }
0x2e38   : > { %v4474_v18 = vmul.f32 %v4471_v6, %v4461_v52 }
0x2e39   : > { %v4472_v4 = vmul.f32 %v4469_v27, %v4453_v61  ;;  %v4470_v28 = vmul.f32 0.044715, %v4456_v8  ;;  %v4467_v15 = vmul.f32 0.5, %v4456_v8 }
0x2e3a   : > { %v4477_v5 = vmul.f32 %v4474_v18, %v4461_v52 }
0x2e3b   : > { %v4475_v60 = vmul.f32 %v4472_v4, %v4453_v61  ;;  %v4473_v53 = vmul.f32 %v4470_v28, %v4456_v8 }
0x2e3c   : > { %v4480_v56 = vadd.f32 %v4477_v5, %v4461_v52 }
0x2e3d   : > { %v4476_v55 = vmul.f32 %v4473_v53, %v4456_v8  ;;  %v4478_v35 = vadd.f32 %v4475_v60, %v4453_v61  ;;  %v5086_v53 = vld [vmem:[%s7343_s20] ss:$0 sm:$0xff] }
0x2e3e   : > { %v4483_v38 = vmul.f32 0.7978846, %v4480_v56 }
0x2e3f   : > { %v4479_v9 = vadd.f32 %v4476_v55, %v4456_v8  ;;  %v4481_v21 = vmul.f32 0.7978846, %v4478_v35  ;;  %v5087_v35 = vld [vmem:[%s7344_s21] ss:$0 sm:$0xff] }
0x2e40   : > { %5982 = vtanh.f32 %v4483_v38 }
0x2e41   : > { %v4482_v24 = vmul.f32 0.7978846, %v4479_v9  ;;  %5984 = vtanh.f32 %v4481_v21 }
0x2e43   : > { %5986 = vtanh.f32 %v4482_v24  ;;  %v5088_v24 = vld [vmem:[%s7453_s30] ss:$0 sm:$0xff]  ;;  %s7458_s30 = sld [smem:[#allocation35_spill]] }
0x2e49   : > { %s857_s17 = scalar_lea.vmem %s7458_s30, %s7454_s25 }
0x2e4a   : > { %v5983_v22 = vpop.eup %5982 }
0x2e4b   : > { %v5985_v10 = vpop.eup %5984  ;;  %v4489_v46 = vadd.f32 1.0, %v5983_v22 }
0x2e4c   : > { %v4487_v11 = vadd.f32 1.0, %v5985_v10 }
0x2e4d   : > { %v5987_v12 = vpop.eup %5986  ;;  %v4492_v19 = vmul.f32 %v4489_v46, %v4468_v13 }
0x2e4e   : > { %v4488_v17 = vadd.f32 1.0, %v5987_v12  ;;  %v4490_v26 = vmul.f32 %v4487_v11, %v4466_v14  ;;  %v5089_v14 = vld [vmem:[%s7455_s19] ss:$0 sm:$0xff]  ;;  %s6140_s19 = smov [#allocation8]  }
0x2e4f   : > { %v4494_v23 = vpack.c.bf16 %v4492_v19, %v4492_v19  ;;  %s6054_s22 = sshll.u32 %s6140_s19, 4  ;;  %s6055_s22 = int_to_ptr.vmem [resolvable:$false] %s6054_s22 }
0x2e50   : > { %v4491_v31 = vmul.f32 %v4488_v17, %v4467_v15  ;;  %s6056_s6 = scalar_lea.vmem %s6055_s22, 512  ;;  %p6057_p4 = scmp.lt.s32.totalorder %s7267_s27, %s6055_s22 }
0x2e51   : > { %p6058_p7 = scmp.lt.s32.totalorder %s6056_s6, %s6050_s29 }
0x2e52   : > { %v4493_v32 = vpack.c.bf16 %v4491_v31, %v4490_v26 }
0x2e53   : > { %p6059_p8 = por %p6058_p7, %p6057_p4 }
0x2e54   : > { %5580 = vmatprep.mubr.bf16.mxu1 %v4493_v32 }
0x2e55   : > { %5581 = vmatmul.mubr.bf16.vlgmr.msra.gmra.mrb[64].mxu1 %v4494_v23  ;;  %p6060_p11 = pnand %p6059_p8, %p6053_p3 }
0x2f28   : > { %v5582_v50 = vpop.f32.mrb[64].mxu1 }
0x2f29   : > { %v4602_v29 = vpop.f32.mrb[65].mxu1  ;;  %v4611_v37 = vadd.f32 %v5582_v50, %v5077_v33 }
0x2f2a   : > { %v4603_v30 = vadd.f32 %v5077_v33, %v4602_v29  ;;  %v5583_v16 = vpop.f32.mrb[66].mxu1 }
0x2f2b   : > { %v4605_v0 = vpop.f32.mrb[67].mxu1  ;;  %v4618_v34 = vadd.f32 %v4611_v37, %v7181_v62 }
0x2f2c   : > { %v4616_v63 = vadd.f32 %v4603_v30, %v7178_v54  ;;  %v4606_v36 = vadd.f32 %v5077_v33, %v4605_v0 }
0x2f2d   : > { %v4627_v44 = vsel %vm863_vm0, %v4618_v34, 0.0 }
0x2f2e   : > { %v4617_v40 = vadd.f32 %v4606_v36, %v7184_v25  ;;  %v4621_v41 = vsel %vm863_vm0, %v4616_v63, 0.0 }
0x2f2f   : > { %4622 = vadd.xlane.f32.xlu0 %v4621_v41 }
0x2f30   : > { %v4624_v43 = vsel %vm863_vm0, %v4617_v40, 0.0 }
0x2f31   : > { %4625 = vadd.xlane.f32.xlu1 %v4624_v43 }
0x2f33   : > { %4628 = vadd.xlane.f32.xlu0 %v4627_v44 }
0x2fbc   : > { %v4623_v3 = vpop.xlane.xlu0 %4622 }
0x2fbd   : > { %v4630_v45 = vmul.f32 0.03125, %v4623_v3 }
0x2fbe   : > { %v4626_v2 = vpop.xlane.xlu1 %4625 }
0x2fbf   : > { %v4633_v47 = vsub.f32 %v4616_v63, %v4630_v45  ;;  %v4631_v20 = vmul.f32 0.03125, %v4626_v2 }
0x2fc0   : > { %v4629_v54 = vpop.xlane.xlu0 %4628 }
0x2fc1   : > { %v4634_v51 = vsub.f32 %v4617_v40, %v4631_v20  ;;  %v4632_v57 = vmul.f32 0.03125, %v4629_v54  ;;  %v4636_v62 = vmul.f32 %v4633_v47, %v4633_v47 }
0x2fc3   : > { %v4635_v58 = vsub.f32 %v4618_v34, %v4632_v57  ;;  %v4639_v25 = vsel %vm863_vm0, %v4636_v62, 0.0  ;;  %v4637_v59 = vmul.f32 %v4634_v51, %v4634_v51 }
0x2fc4   : > { %4640 = vadd.xlane.f32.xlu1 %v4639_v25 }
0x2fc5   : > { %v4642_v52 = vsel %vm863_vm0, %v4637_v59, 0.0  ;;  %v4638_v42 = vmul.f32 %v4635_v58, %v4635_v58 }
0x2fc6   : > { %4643 = vadd.xlane.f32.xlu0 %v4642_v52 }
0x2fc7   : > { %v4645_v61 = vsel %vm863_vm0, %v4638_v42, 0.0 }
0x2fc8   : > { %4646 = vadd.xlane.f32.xlu1 %v4645_v61 }
0x3051   : > { %v4641_v1 = vpop.xlane.xlu1 %4640 }
0x3052   : > { %v4648_v6 = vmul.f32 0.03125, %v4641_v1 }
0x3053   : > { %v4644_v7 = vpop.xlane.xlu0 %4643 }
0x3054   : > { %v4651_v27 = vadd.f32 1e-05, %v4648_v6  ;;  %v4649_v8 = vmul.f32 0.03125, %v4644_v7 }
0x3055   : > { %v4647_v18 = vpop.xlane.xlu1 %4646 }
0x3056   : > { %5988 = vrsqrt.f32 %v4651_v27  ;;  %v4652_v4 = vadd.f32 1e-05, %v4649_v8  ;;  %v4650_v28 = vmul.f32 0.03125, %v4647_v18 }
0x3058   : > { %5990 = vrsqrt.f32 %v4652_v4  ;;  %v4653_v5 = vadd.f32 1e-05, %v4650_v28 }
0x305a   : > { %5992 = vrsqrt.f32 %v4653_v5 }
0x3060   : > { %v5989_v60 = vpop.eup %5988 }
0x3061   : > { %v4657_v56 = vmul.f32 %v5989_v60, %v4633_v47 }
0x3062   : > { %v5991_v55 = vpop.eup %5990 }
0x3063   : > { %v4666_v38 = vmul.f32 %v5086_v53, %v4657_v56  ;;  %v4658_v9 = vmul.f32 %v5991_v55, %v4634_v51 }
0x3064   : > { %v5993_v21 = vpop.eup %5992 }
0x3065   : > { %v4675_v22 = vadd.f32 %v5087_v35, %v4666_v38  ;;  %v4667_v10 = vmul.f32 %v5086_v53, %v4658_v9  ;;  %v4659_v46 = vmul.f32 %v5993_v21, %v4635_v58 }
0x3067   : > { %v4685_v11 = vmul.f32 %v5088_v24, %v4675_v22  ;;  %v4676_v12 = vadd.f32 %v5087_v35, %v4667_v10  ;;  %v4668_v13 = vmul.f32 %v5086_v53, %v4659_v46 }
0x3069   : > { %v4687_v15 = vadd.f32 %v4685_v11, %v6434_v39  ;;  %v4686_v17 = vmul.f32 %v5088_v24, %v4676_v12  ;;  %v4677_v19 = vadd.f32 %v5087_v35, %v4668_v13 }
0x306b   : > { %v4688_v26 = vadd.f32 %v4686_v17, %v6443_v49  ;;  %v4698_v31 = vmul.f32 %v5089_v14, %v4677_v19  ;;  %4689 = vst.msk [vmem:[%s829_s4] sm:$0xff] %vm863_vm0, %v4687_v15 }
0x306d   : > { %v4699_v39 = vadd.f32 %v4698_v31, %v6441_v48  ;;  %4690 = vst.msk [vmem:[%s829_s4 + $0x8] sm:$0xff] %vm863_vm0, %v4688_v26 }
0x306e   : > { %6063 = shalt.err (!%p6060_p11)
}
0x306f   : > { %s6064_s5 = scalar_lea.hbm %s7263_s0, 256  ;;  %s6068_s9 = scalar_lea.hbm %s7457_s28, 512 }
0x3070   : > { %p6065_p13 = scmp.ne.s32.totalorder %s7263_s0, %s6064_s5  ;;  %p6069_p6 = scmp.lt.u32.totalorder %s7263_s0, %s7457_s28 }
0x3071   : > { %p6070_p9 = scmp.lt.u32.totalorder %s6068_s9, %s6064_s5  ;;  %p6072_p12 = scmp.lt.u32.totalorder %s6064_s5, %s7263_s0 }
0x3072   : > { %p6066_p0 = pnand %p6065_p13, %p7460_p1 }
0x3073   : > { %p6071_p10 = por %p6070_p9, %p6069_p6 }
0x3074   : > { %p6067_p5 = pneg %p6066_p0 }
0x3075   : > { %p6073_p2 = por %p6072_p12, %p6071_p10 }
0x3077   : > { %p6074_p3 = pnand %p6073_p2, %p6067_p5 }
0x3079   : > { %6077 = shalt.err (!%p6074_p3)
}
0x307a   : > { %s6141_s29 = smov 128   ;;  %4700 = vst.msk [vmem:[%s857_s17] sm:$0xff] %vm863_vm0, %v4699_v39 }
0x307b   : > { %5628 = dma.vmem_to_hbm [thread:$0]  (%p7460_p1), %s7267_s27, 256, %s7263_s0, %s7275_s8, %s6141_s29, %s6141_s29, %s7445_s3  }
0x307c PF: > { %s7461_s5 = sld [smem:[#allocation14_spill]]  ;;  %s7462_s4 = sld [smem:[#allocation12_spill]] }
0x307d   : > { %s7463_s7 = sld [smem:[#allocation18_spill]] }
0x3082   : > { %p5645_p4 = scmp.ge.s32.totalorder %s7461_s5, 2  ;;  %s4737_s9 = sand.u32 1, %s7462_s4  }
0x3083   : > { %p7464_p7 = scmp.ne.s32.totalorder %s7463_s7, 0  ;;  %s4738_s23 = scalar_lea.sflag [#allocation5], %s4737_s9 }
0x3085   : > { %p5638_p8 = pnand %p5645_p4, %p7464_p7 }
0x3087   : > { %6103 = dma.done.wait (!%p5638_p8), %s4738_s23, 256  }
0x3088   : > { %6105 = vsyncadd (!%p5638_p8), %s4738_s23, 4294967040  ;;  %s7465_s30 = sld [smem:[#allocation15_spill]]  ;;  %s7466_s3 = sld [smem:[#allocation13_spill]] }
0x3089   : > { %s7467_s6 = sld [smem:[#allocation16_spill]]  ;;  %s7468_s29 = smov %s6112_s2 }
0x308e   : > { %p38_p1 = scmp.ge.s32.totalorder %s7465_s30, 4   ;;  %s7469_s2 = smov %s7466_s3 }
0x3090   :  { %40 = sbr.rel (!%p38_p1) target bundleno = 22 (0x16), region = 205 }
0x3097   :  { %4750 = vsyncpa [#allocation4], 1 }
0x3098   :  { %4752 = vsyncpa [#allocation4 + $0x1], 1 }
0x3099   :  { %4753 = vsyncpa [#allocation7], 1 }
0x309a   :  { %4754 = vsyncpa [#allocation5], 1 }
0x309b   :  { %4756 = vsyncpa [#allocation5 + $0x1], 1 }

</bundles_post_ra>
